<compile_context>
chip_gen: v6e
topology: v6e:2x2x1
jax: 0.10.0
libtpu: 0.0.40
codegen_flags: <defaults>
</compile_context>

<pallas_src>
import numpy as np
import jax
import jax.numpy as jnp
from jax.experimental import pallas as pl
from jax.experimental.pallas import tpu as pltpu

D = 28 * 28        # 784 features, fixed by get_mask() in the reference module
H = 1024           # default n_hidden of Coupling
N_FLOWS = 4        # default n_flows of Flow
L = 2 * N_FLOWS    # 8 coupling layers (mask, 1-mask alternating)
N_ACT = D // 2     # 392 active features per checkerboard parity
C = 512            # padded compact width (392 -> 512, lane aligned)


# ----------------------------------------------------------------------------
# Checkerboard mask / selection matrices (host-side, built once)
# ----------------------------------------------------------------------------
def checkerboard_indices():
    m = np.zeros((28, 28), dtype=np.float32)
    for i in range(28):
        for j in range(28):
            if (i + j) % 2 == 0:
                m[i, j] = 1.0
    flat = m.reshape(-1)
    act0 = np.nonzero(flat == 1.0)[0]   # active positions for mask   (even layers)
    act1 = np.nonzero(flat == 0.0)[0]   # active positions for 1-mask (odd layers)
    return flat, act0, act1


def build_selectors(act0, act1):
    """sel[p]  : (D, C) bf16 gather matrix  (z -> compact active features)
       selT[p] : (C, D) f32  scatter matrix (compact -> full width, exact)."""
    sel = np.zeros((2, D, C), np.float32)
    for p, idx in enumerate((act0, act1)):
        sel[p, idx, np.arange(N_ACT)] = 1.0
    selT = np.transpose(sel, (0, 2, 1)).copy()
    return jnp.asarray(sel, jnp.bfloat16), jnp.asarray(selT, jnp.float32)


# ----------------------------------------------------------------------------
# Pallas kernel: whole Flow forward (reverse=False), grid over the 8 layers
# ----------------------------------------------------------------------------
def flow_kernel(z_in_ref, ldj_in_ref, sel_ref, selT_ref,
                w1_ref, w2_ref, w3_ref, bias_ref,
                z_out_ref, ldj_out_ref):
    l = pl.program_id(0)
    parity = l % 2

    # Initialize the output-resident carries on the first layer.
    @pl.when(l == 0)
    def _():
        z_out_ref[...] = z_in_ref[...]
        ldj_out_ref[...] = ldj_in_ref[...]

    z = z_out_ref[...]                                   # (B, D) f32 carry
    zb = z.astype(jnp.bfloat16)

    # Gather the 392 mask-active features (== z*mask, compacted) via a 0/1
    # selection matmul; padded compact columns are exactly zero.
    x_c = jnp.dot(zb, sel_ref[parity],
                  preferred_element_type=jnp.float32).astype(jnp.bfloat16)

    bias = bias_ref[...]                                 # (3, H) f32
    # Coupling net: Linear -> ReLU -> Linear -> ReLU -> Linear (s,t fused).
    h1 = jnp.maximum(
        jnp.dot(x_c, w1_ref[...], preferred_element_type=jnp.float32)
        + bias[0:1, :], 0.0)                             # (B, H) f32
    h2 = jnp.maximum(
        jnp.dot(h1.astype(jnp.bfloat16), w2_ref[...],
                preferred_element_type=jnp.float32) + bias[1:2, :], 0.0)
    st = jnp.dot(h2.astype(jnp.bfloat16), w3_ref[...],
                 preferred_element_type=jnp.float32) + bias[2:3, :]   # (B, 2C)
    log_scale = jnp.tanh(st[:, :C])                      # (B, C) compacted
    translation = st[:, C:]                              # (B, C) compacted

    # Scatter compacted log_scale / translation back to 784 lanes with an
    # exact f32 0/1 matmul; mask-active positions (and padding) stay 0.
    sT = selT_ref[1 - parity]                            # (C, D) f32
    ls_full = jnp.dot(log_scale, sT, preferred_element_type=jnp.float32)
    t_full = jnp.dot(translation, sT, preferred_element_type=jnp.float32)

    # Coupling update: active positions get ls=0, t=0  ->  z unchanged there.
    z_out_ref[...] = z * jnp.exp(ls_full) + t_full
    ldj_out_ref[...] = ldj_out_ref[...] + jnp.sum(log_scale, axis=1,
                                                  keepdims=True)


def flow_forward(z, logdet, kernel_params, selectors):
    """Flow.forward with reverse=False.  z: (B, D) f32, logdet: (B,) f32."""
    B = z.shape[0]
    ldj = logdet.reshape(B, 1)
    sel, selT = selectors
    W1, W2, W3, BIAS = kernel_params

    layer_spec = lambda shape: pl.BlockSpec((None,) + shape,
                                            lambda l: (l, 0, 0))

    fn = pl.pallas_call(
        flow_kernel,
        grid_spec=pltpu.PrefetchScalarGridSpec(
            num_scalar_prefetch=0,
            grid=(L,),
            in_specs=[
                pl.BlockSpec((B, D), lambda l: (0, 0)),        # z_in
                pl.BlockSpec((B, 1), lambda l: (0, 0)),        # ldj_in
                pl.BlockSpec((2, D, C), lambda l: (0, 0, 0)),  # sel  (resident)
                pl.BlockSpec((2, C, D), lambda l: (0, 0, 0)),  # selT (resident)
                layer_spec((C, H)),                            # W1 compact bf16
                layer_spec((H, H)),                            # W2 bf16
                layer_spec((H, 2 * C)),                        # W3 fused s|t bf16
                layer_spec((3, H)),                            # packed biases f32
            ],
            out_specs=[
                pl.BlockSpec((B, D), lambda l: (0, 0)),        # z carry/out
                pl.BlockSpec((B, 1), lambda l: (0, 0)),        # ldj carry/out
            ],
        ),
        out_shape=(jax.ShapeDtypeStruct((B, D), jnp.float32),
                   jax.ShapeDtypeStruct((B, 1), jnp.float32)),
        compiler_params=pltpu.CompilerParams(
            dimension_semantics=("arbitrary",),      # sequential layer carry
            vmem_limit_bytes=32 * 1024 * 1024),      # ~21 MB actual need
    )
    z_out, ldj_out = fn(z, ldj, sel, selT, W1, W2, W3, BIAS)
    return z_out, ldj_out.reshape(-1)


# ----------------------------------------------------------------------------
# Parameter construction: f32 "PyTorch-faithful" masters + packed kernel params
# ----------------------------------------------------------------------------
def init_master_params(key, zero_last=True, scale=0.02):
    """Per-layer f32 params, Linear weights stored transposed as (in, out)."""
    params = []
    for k in jax.random.split(key, L):
        k1, k2, k3, k4, k5, k6 = jax.random.split(k, 6)
        w1 = scale * jax.random.normal(k1, (D, H), jnp.float32)
        b1 = scale * jax.random.normal(k2, (H,), jnp.float32)
        w2 = scale * jax.random.normal(k3, (H, H), jnp.float32)
        b2 = scale * jax.random.normal(k4, (H,), jnp.float32)
        if zero_last:
            # Faithful to the reference: nn[-1].weight / bias are zero-init.
            w3 = jnp.zeros((H, 2 * D), jnp.float32)
            b3 = jnp.zeros((2 * D,), jnp.float32)
        else:
            w3 = scale * jax.random.normal(k5, (H, 2 * D), jnp.float32)
            b3 = scale * jax.random.normal(k6, (2 * D,), jnp.float32)
        params.append((w1, b1, w2, b2, w3, b3))
    return params


def pack_kernel_params(master, act0, act1):
    """Checkerboard-compact + bf16-cast + fuse for the Pallas kernel."""
    acts = (act0, act1)
    W1 = np.zeros((L, C, H), np.float32)
    W2 = np.zeros((L, H, H), np.float32)
    W3 = np.zeros((L, H, 2 * C), np.float32)
    BIAS = np.zeros((L, 3, H), np.float32)
    for l, (w1, b1, w2, b2, w3, b3) in enumerate(master):
        p = l % 2
        act = acts[p]            # mask-active rows feeding W1
        inact = acts[1 - p]      # mask-inactive output positions (s/t used)
        w1, b1, w2, b2, w3, b3 = map(np.asarray, (w1, b1, w2, b2, w3, b3))
        W1[l, :N_ACT, :] = w1[act, :]
        W2[l] = w2
        W3[l, :, :N_ACT] = w3[:, :D][:, inact]            # log-scale columns
        W3[l, :, C:C + N_ACT] = w3[:, D:][:, inact]       # translation columns
        BIAS[l, 0, :] = b1
        BIAS[l, 1, :] = b2
        BIAS[l, 2, :N_ACT] = b3[:D][inact]
        BIAS[l, 2, C:C + N_ACT] = b3[D:][inact]
    return (jnp.asarray(W1, jnp.bfloat16), jnp.asarray(W2, jnp.bfloat16),
            jnp.asarray(W3, jnp.bfloat16), jnp.asarray(BIAS, jnp.float32))


# ----------------------------------------------------------------------------
# References: (a) exact mirror of the kernel dataflow, (b) faithful f32 module
# ----------------------------------------------------------------------------
def flow_reference_bf16(z, logdet, kernel_params, selectors):
    sel, selT = selectors
    W1, W2, W3, BIAS = kernel_params
    ldj = logdet.reshape(-1, 1)
    for l in range(L):
        p = l % 2
        zb = z.astype(jnp.bfloat16)
        x_c = jnp.dot(zb, sel[p],
                      preferred_element_type=jnp.float32).astype(jnp.bfloat16)
        h1 = jnp.maximum(jnp.dot(x_c, W1[l], preferred_element_type=jnp.float32)
                         + BIAS[l, 0:1, :], 0.0)
        h2 = jnp.maximum(jnp.dot(h1.astype(jnp.bfloat16), W2[l],
                                 preferred_element_type=jnp.float32)
                         + BIAS[l, 1:2, :], 0.0)
        st = jnp.dot(h2.astype(jnp.bfloat16), W3[l],
                     preferred_element_type=jnp.float32) + BIAS[l, 2:3, :]
        ls_c = jnp.tanh(st[:, :C])
        t_c = st[:, C:]
        ls = jnp.dot(ls_c, selT[1 - p], preferred_element_type=jnp.float32)
        t = jnp.dot(t_c, selT[1 - p], preferred_element_type=jnp.float32)
        z = z * jnp.exp(ls) + t
        ldj = ldj + jnp.sum(ls_c, axis=1, keepdims=True)
    return z, ldj.reshape(-1)


def flow_reference_f32(z, logdet, master, mask_flat):
    m0 = jnp.asarray(mask_flat).reshape(1, D)
    hi = jax.lax.Precision.HIGHEST
    ldj = logdet
    for l, (w1, b1, w2, b2, w3, b3) in enumerate(master):
        m = m0 if l % 2 == 0 else 1.0 - m0
        h = jnp.maximum(jnp.dot(z * m, w1, precision=hi) + b1, 0.0)
        h = jnp.maximum(jnp.dot(h, w2, precision=hi) + b2, 0.0)
        out = jnp.dot(h, w3, precision=hi) + b3
        ls = jnp.tanh(out[:, :D])
        t = out[:, D:]
        z = m * z + (1.0 - m) * (z * jnp.exp(ls) + t)
        ldj = ldj + jnp.sum(ls * (1.0 - m), axis=1)
    return z, ldj


if __name__ == "__main__":
    key = jax.random.PRNGKey(0)
    k_params, k_data, k_check = jax.random.split(key, 3)

    mask_flat, act0, act1 = checkerboard_indices()
    selectors = build_selectors(act0, act1)

    B = 8
    z = jax.random.normal(k_data, (B, D), dtype=jnp.float32)
    logdet = jnp.zeros((B,), dtype=jnp.float32)

    # 1) Faithful zero-init last layers (as in the PyTorch module): the flow
    #    is the identity at init, so the kernel must return z / logdet exactly.
    master0 = init_master_params(k_params, zero_last=True)
    kp0 = pack_kernel_params(master0, act0, act1)
    z0, l0 = flow_forward(z, logdet, kp0, selectors)
    jax.block_until_ready((z0, l0))
    assert z0.shape == (B, D) and l0.shape == (B,)
    np.testing.assert_allclose(np.asarray(z0), np.asarray(z), rtol=0, atol=1e-6)
    np.testing.assert_allclose(np.asarray(l0), np.asarray(logdet), rtol=0,
                               atol=1e-6)

    # 2) Non-zero last layers: tight check against a pure-JAX mirror of the
    #    exact kernel dataflow (same compaction / bf16 casts).
    masterc = init_master_params(k_check, zero_last=False)
    kpc = pack_kernel_params(masterc, act0, act1)
    zk, lk = flow_forward(z, logdet, kpc, selectors)
    zr, lr = flow_reference_bf16(z, logdet, kpc, selectors)
    np.testing.assert_allclose(np.asarray(zk), np.asarray(zr), rtol=2e-3,
                               atol=2e-3)
    np.testing.assert_allclose(np.asarray(lk), np.asarray(lr), rtol=2e-3,
                               atol=2e-3)

    # 3) Fidelity vs the f32 PyTorch-faithful reference: differences here are
    #    the intrinsic bf16-weight-streaming error across 8 coupling layers.
    zf, lf = flow_reference_f32(z, logdet, masterc, mask_flat)
    np.testing.assert_allclose(np.asarray(zk), np.asarray(zf), rtol=1e-1,
                               atol=1e-1)
    np.testing.assert_allclose(np.asarray(lk), np.asarray(lf), rtol=1e-1,
                               atol=1e-1)

    print("KERNEL_OK")
</pallas_src>

<mosaic_0001>
module attributes {stable_mosaic.version = 11 : i64} {
  func.func @flow_kernel(%arg0: i32, %arg1: memref<8x784xf32, #tpu.memory_space<vmem>>, %arg2: memref<8x1xf32, #tpu.memory_space<vmem>>, %arg3: memref<2x784x512xbf16, #tpu.memory_space<vmem>>, %arg4: memref<2x512x784xf32, #tpu.memory_space<vmem>>, %arg5: memref<1x512x1024xbf16, #tpu.memory_space<vmem>>, %arg6: memref<1x1024x1024xbf16, #tpu.memory_space<vmem>>, %arg7: memref<1x1024x1024xbf16, #tpu.memory_space<vmem>>, %arg8: memref<1x3x1024xf32, #tpu.memory_space<vmem>>, %arg9: memref<8x784xf32, #tpu.memory_space<vmem>>, %arg10: memref<8x1xf32, #tpu.memory_space<vmem>>) attributes {dimension_semantics = [#tpu.dimension_semantics<arbitrary>], iteration_bounds = array<i64: 8>, scalar_prefetch = 0 : i64, scratch_operands = 0 : i64, tpu.core_type = #tpu.core_type<tc>, window_params = [{pipeline_mode = #tpu.pipeline_mode<synchronous>, transform_indices = @transform_0, window_bounds = array<i64: 8, 784>}, {pipeline_mode = #tpu.pipeline_mode<synchronous>, transform_indices = @transform_1, window_bounds = array<i64: 8, 1>}, {pipeline_mode = #tpu.pipeline_mode<synchronous>, transform_indices = @transform_2, window_bounds = array<i64: 2, 784, 512>}, {pipeline_mode = #tpu.pipeline_mode<synchronous>, transform_indices = @transform_3, window_bounds = array<i64: 2, 512, 784>}, {transform_indices = @transform_4, window_bounds = array<i64: 1, 512, 1024>}, {transform_indices = @transform_5, window_bounds = array<i64: 1, 1024, 1024>}, {transform_indices = @transform_6, window_bounds = array<i64: 1, 1024, 1024>}, {transform_indices = @transform_7, window_bounds = array<i64: 1, 3, 1024>}, {pipeline_mode = #tpu.pipeline_mode<synchronous>, transform_indices = @transform_8, window_bounds = array<i64: 8, 784>}, {pipeline_mode = #tpu.pipeline_mode<synchronous>, transform_indices = @transform_9, window_bounds = array<i64: 8, 1>}]} {
    %c2_i32 = arith.constant 2 : i32
    %c0_i32 = arith.constant 0 : i32
    %0 = arith.cmpi eq, %c2_i32, %c0_i32 : i32
    %c1_i32 = arith.constant 1 : i32
    %1 = arith.select %0, %c1_i32, %c2_i32 : i32
    %2 = arith.remsi %arg0, %1 : i32
    %c0_i32_0 = arith.constant 0 : i32
    %3 = arith.cmpi ne, %2, %c0_i32_0 : i32
    %c0_i32_1 = arith.constant 0 : i32
    %4 = arith.cmpi slt, %2, %c0_i32_1 : i32
    %c0_i32_2 = arith.constant 0 : i32
    %5 = arith.cmpi slt, %1, %c0_i32_2 : i32
    %6 = arith.xori %4, %5 : i1
    %7 = arith.andi %6, %3 : i1
    %8 = arith.addi %2, %1 : i32
    %9 = arith.select %7, %8, %2 : i32
    %c0_i32_3 = arith.constant 0 : i32
    %10 = arith.cmpi eq, %arg0, %c0_i32_3 : i32
    %11 = arith.extui %10 : i1 to i32
    %c0_i32_4 = arith.constant 0 : i32
    %12 = arith.cmpi ne, %11, %c0_i32_4 : i32
    scf.if %12 {
      %c0_37 = arith.constant 0 : index
      %c0_38 = arith.constant 0 : index
      %64 = vector.load %arg1[%c0_37, %c0_38] : memref<8x784xf32, #tpu.memory_space<vmem>>, vector<8x784xf32>
      %c0_39 = arith.constant 0 : index
      %c0_40 = arith.constant 0 : index
      %65 = vector.load %arg9[%c0_39, %c0_40] : memref<8x784xf32, #tpu.memory_space<vmem>>, vector<8x784xf32>
      tpu.vector_store %arg9[%c0_39, %c0_40], %64 {strides = array<i32>} : memref<8x784xf32, #tpu.memory_space<vmem>>, vector<8x784xf32>,
      %c0_41 = arith.constant 0 : index
      %c0_42 = arith.constant 0 : index
      %66 = vector.load %arg2[%c0_41, %c0_42] : memref<8x1xf32, #tpu.memory_space<vmem>>, vector<8x1xf32>
      %c0_43 = arith.constant 0 : index
      %c0_44 = arith.constant 0 : index
      %67 = vector.load %arg10[%c0_43, %c0_44] : memref<8x1xf32, #tpu.memory_space<vmem>>, vector<8x1xf32>
      tpu.vector_store %arg10[%c0_43, %c0_44], %66 {strides = array<i32>} : memref<8x1xf32, #tpu.memory_space<vmem>>, vector<8x1xf32>,
    } else {
    }
    %c0 = arith.constant 0 : index
    %c0_5 = arith.constant 0 : index
    %13 = vector.load %arg9[%c0, %c0_5] : memref<8x784xf32, #tpu.memory_space<vmem>>, vector<8x784xf32>
    %14 = arith.truncf %13 : vector<8x784xf32> to vector<8x784xbf16>
    %15 = arith.index_cast %9 : i32 to index
    %c0_6 = arith.constant 0 : index
    %c0_7 = arith.constant 0 : index
    %16 = vector.load %arg3[%15, %c0_6, %c0_7] : memref<2x784x512xbf16, #tpu.memory_space<vmem>>, vector<1x784x512xbf16>
    %17 = vector.shape_cast %16 : vector<1x784x512xbf16> to vector<784x512xbf16>
    %cst = arith.constant dense<0.000000e+00> : vector<8x512xf32>
    %18 = tpu.matmul %14, %17, %cst {dimension_numbers = #tpu.dot_dimension_numbers<[1], [0], [0], [1], [0, 0, 1, 1], [], []>} : vector<8x784xbf16>, vector<784x512xbf16>, vector<8x512xf32> -> vector<8x512xf32>
    %19 = arith.truncf %18 : vector<8x512xf32> to vector<8x512xbf16>
    %c0_8 = arith.constant 0 : index
    %c0_9 = arith.constant 0 : index
    %c0_10 = arith.constant 0 : index
    %20 = vector.load %arg8[%c0_8, %c0_9, %c0_10] : memref<1x3x1024xf32, #tpu.memory_space<vmem>>, vector<1x3x1024xf32>
    %21 = vector.shape_cast %20 : vector<1x3x1024xf32> to vector<3x1024xf32>
    %c0_11 = arith.constant 0 : index
    %c0_12 = arith.constant 0 : index
    %c0_13 = arith.constant 0 : index
    %22 = vector.load %arg5[%c0_11, %c0_12, %c0_13] : memref<1x512x1024xbf16, #tpu.memory_space<vmem>>, vector<1x512x1024xbf16>
    %23 = vector.shape_cast %22 : vector<1x512x1024xbf16> to vector<512x1024xbf16>
    %cst_14 = arith.constant dense<0.000000e+00> : vector<8x1024xf32>
    %24 = tpu.matmul %19, %23, %cst_14 {dimension_numbers = #tpu.dot_dimension_numbers<[1], [0], [0], [1], [0, 0, 1, 1], [], []>} : vector<8x512xbf16>, vector<512x1024xbf16>, vector<8x1024xf32> -> vector<8x1024xf32>
    %25 = vector.extract_strided_slice %21 {offsets = [0, 0], sizes = [1, 1024], strides = [1, 1]} : vector<3x1024xf32> to vector<1x1024xf32>
    %26 = vector.broadcast %25 : vector<1x1024xf32> to vector<8x1024xf32>
    %27 = arith.addf %24, %26 : vector<8x1024xf32>
    %cst_15 = arith.constant 0.000000e+00 : f32
    %28 = vector.broadcast %cst_15 : f32 to vector<8x1024xf32>
    %29 = arith.maximumf %27, %28 : vector<8x1024xf32>
    %30 = arith.truncf %29 : vector<8x1024xf32> to vector<8x1024xbf16>
    %c0_16 = arith.constant 0 : index
    %c0_17 = arith.constant 0 : index
    %c0_18 = arith.constant 0 : index
    %31 = vector.load %arg6[%c0_16, %c0_17, %c0_18] : memref<1x1024x1024xbf16, #tpu.memory_space<vmem>>, vector<1x1024x1024xbf16>
    %32 = vector.shape_cast %31 : vector<1x1024x1024xbf16> to vector<1024x1024xbf16>
    %cst_19 = arith.constant dense<0.000000e+00> : vector<8x1024xf32>
    %33 = tpu.matmul %30, %32, %cst_19 {dimension_numbers = #tpu.dot_dimension_numbers<[1], [0], [0], [1], [0, 0, 1, 1], [], []>} : vector<8x1024xbf16>, vector<1024x1024xbf16>, vector<8x1024xf32> -> vector<8x1024xf32>
    %34 = vector.extract_strided_slice %21 {offsets = [1, 0], sizes = [1, 1024], strides = [1, 1]} : vector<3x1024xf32> to vector<1x1024xf32>
    %35 = vector.broadcast %34 : vector<1x1024xf32> to vector<8x1024xf32>
    %36 = arith.addf %33, %35 : vector<8x1024xf32>
    %cst_20 = arith.constant 0.000000e+00 : f32
    %37 = vector.broadcast %cst_20 : f32 to vector<8x1024xf32>
    %38 = arith.maximumf %36, %37 : vector<8x1024xf32>
    %39 = arith.truncf %38 : vector<8x1024xf32> to vector<8x1024xbf16>
    %c0_21 = arith.constant 0 : index
    %c0_22 = arith.constant 0 : index
    %c0_23 = arith.constant 0 : index
    %40 = vector.load %arg7[%c0_21, %c0_22, %c0_23] : memref<1x1024x1024xbf16, #tpu.memory_space<vmem>>, vector<1x1024x1024xbf16>
    %41 = vector.shape_cast %40 : vector<1x1024x1024xbf16> to vector<1024x1024xbf16>
    %cst_24 = arith.constant dense<0.000000e+00> : vector<8x1024xf32>
    %42 = tpu.matmul %39, %41, %cst_24 {dimension_numbers = #tpu.dot_dimension_numbers<[1], [0], [0], [1], [0, 0, 1, 1], [], []>} : vector<8x1024xbf16>, vector<1024x1024xbf16>, vector<8x1024xf32> -> vector<8x1024xf32>
    %43 = vector.extract_strided_slice %21 {offsets = [2, 0], sizes = [1, 1024], strides = [1, 1]} : vector<3x1024xf32> to vector<1x1024xf32>
    %44 = vector.broadcast %43 : vector<1x1024xf32> to vector<8x1024xf32>
    %45 = arith.addf %42, %44 : vector<8x1024xf32>
    %46 = vector.extract_strided_slice %45 {offsets = [0, 0], sizes = [8, 512], strides = [1, 1]} : vector<8x1024xf32> to vector<8x512xf32>
    %47 = math.tanh %46 : vector<8x512xf32>
    %48 = vector.extract_strided_slice %45 {offsets = [0, 512], sizes = [8, 512], strides = [1, 1]} : vector<8x1024xf32> to vector<8x512xf32>
    %c1_i32_25 = arith.constant 1 : i32
    %49 = arith.subi %c1_i32_25, %9 : i32
    %50 = arith.index_cast %49 : i32 to index
    %c0_26 = arith.constant 0 : index
    %c0_27 = arith.constant 0 : index
    %51 = vector.load %arg4[%50, %c0_26, %c0_27] : memref<2x512x784xf32, #tpu.memory_space<vmem>>, vector<1x512x784xf32>
    %52 = vector.shape_cast %51 : vector<1x512x784xf32> to vector<512x784xf32>
    %cst_28 = arith.constant dense<0.000000e+00> : vector<8x784xf32>
    %53 = tpu.matmul %47, %52, %cst_28 {dimension_numbers = #tpu.dot_dimension_numbers<[1], [0], [0], [1], [0, 0, 1, 1], [], []>} : vector<8x512xf32>, vector<512x784xf32>, vector<8x784xf32> -> vector<8x784xf32>
    %cst_29 = arith.constant dense<0.000000e+00> : vector<8x784xf32>
    %54 = tpu.matmul %48, %52, %cst_29 {dimension_numbers = #tpu.dot_dimension_numbers<[1], [0], [0], [1], [0, 0, 1, 1], [], []>} : vector<8x512xf32>, vector<512x784xf32>, vector<8x784xf32> -> vector<8x784xf32>
    %55 = math.exp %53 : vector<8x784xf32>
    %56 = arith.mulf %13, %55 : vector<8x784xf32>
    %57 = arith.addf %56, %54 : vector<8x784xf32>
    %c0_30 = arith.constant 0 : index
    %c0_31 = arith.constant 0 : index
    %58 = vector.load %arg9[%c0_30, %c0_31] : memref<8x784xf32, #tpu.memory_space<vmem>>, vector<8x784xf32>
    tpu.vector_store %arg9[%c0_30, %c0_31], %57 {strides = array<i32>} : memref<8x784xf32, #tpu.memory_space<vmem>>, vector<8x784xf32>,
    %c0_32 = arith.constant 0 : index
    %c0_33 = arith.constant 0 : index
    %59 = vector.load %arg10[%c0_32, %c0_33] : memref<8x1xf32, #tpu.memory_space<vmem>>, vector<8x1xf32>
    %cst_34 = arith.constant dense<0.000000e+00> : vector<8xf32>
    %60 = vector.multi_reduction <add>, %47, %cst_34 [1] : vector<8x512xf32> to vector<8xf32>
    %61 = vector.shape_cast %60 : vector<8xf32> to vector<8x1xf32>
    %62 = arith.addf %59, %61 : vector<8x1xf32>
    %c0_35 = arith.constant 0 : index
    %c0_36 = arith.constant 0 : index
    %63 = vector.load %arg10[%c0_35, %c0_36] : memref<8x1xf32, #tpu.memory_space<vmem>>, vector<8x1xf32>
    tpu.vector_store %arg10[%c0_35, %c0_36], %62 {strides = array<i32>} : memref<8x1xf32, #tpu.memory_space<vmem>>, vector<8x1xf32>,
    return
  }
  func.func @transform_0(%arg0: i32) -> (i32, i32) {
    %c0_i32 = arith.constant 0 : i32
    %c0_i32_0 = arith.constant 0 : i32
    %c0_i32_1 = arith.constant 0 : i32
    return %c0_i32, %c0_i32_0 : i32, i32
  }
  func.func @transform_1(%arg0: i32) -> (i32, i32) {
    %c0_i32 = arith.constant 0 : i32
    %c0_i32_0 = arith.constant 0 : i32
    %c0_i32_1 = arith.constant 0 : i32
    return %c0_i32, %c0_i32_0 : i32, i32
  }
  func.func @transform_2(%arg0: i32) -> (i32, i32, i32) {
    %c0_i32 = arith.constant 0 : i32
    %c0_i32_0 = arith.constant 0 : i32
    %c0_i32_1 = arith.constant 0 : i32
    %c0_i32_2 = arith.constant 0 : i32
    return %c0_i32, %c0_i32_0, %c0_i32_1 : i32, i32, i32
  }
  func.func @transform_3(%arg0: i32) -> (i32, i32, i32) {
    %c0_i32 = arith.constant 0 : i32
    %c0_i32_0 = arith.constant 0 : i32
    %c0_i32_1 = arith.constant 0 : i32
    %c0_i32_2 = arith.constant 0 : i32
    return %c0_i32, %c0_i32_0, %c0_i32_1 : i32, i32, i32
  }
  func.func @transform_4(%arg0: i32) -> (i32, i32, i32) {
    %c0_i32 = arith.constant 0 : i32
    %c0_i32_0 = arith.constant 0 : i32
    %c0_i32_1 = arith.constant 0 : i32
    return %arg0, %c0_i32, %c0_i32_0 : i32, i32, i32
  }
  func.func @transform_5(%arg0: i32) -> (i32, i32, i32) {
    %c0_i32 = arith.constant 0 : i32
    %c0_i32_0 = arith.constant 0 : i32
    %c0_i32_1 = arith.constant 0 : i32
    return %arg0, %c0_i32, %c0_i32_0 : i32, i32, i32
  }
  func.func @transform_6(%arg0: i32) -> (i32, i32, i32) {
    %c0_i32 = arith.constant 0 : i32
    %c0_i32_0 = arith.constant 0 : i32
    %c0_i32_1 = arith.constant 0 : i32
    return %arg0, %c0_i32, %c0_i32_0 : i32, i32, i32
  }
  func.func @transform_7(%arg0: i32) -> (i32, i32, i32) {
    %c0_i32 = arith.constant 0 : i32
    %c0_i32_0 = arith.constant 0 : i32
    %c0_i32_1 = arith.constant 0 : i32
    return %arg0, %c0_i32, %c0_i32_0 : i32, i32, i32
  }
  func.func @transform_8(%arg0: i32) -> (i32, i32) {
    %c0_i32 = arith.constant 0 : i32
    %c0_i32_0 = arith.constant 0 : i32
    %c0_i32_1 = arith.constant 0 : i32
    return %c0_i32, %c0_i32_0 : i32, i32
  }
  func.func @transform_9(%arg0: i32) -> (i32, i32) {
    %c0_i32 = arith.constant 0 : i32
    %c0_i32_0 = arith.constant 0 : i32
    %c0_i32_1 = arith.constant 0 : i32
    return %c0_i32, %c0_i32_0 : i32, i32
  }
}

</mosaic_0001>

<bundles_post_ra>
// kernel: tpu_custom_call.1
= control target key start
LH: loop header
LB: loop body
LE: loop exit
PB: predicated region body
PF: predicated region fallthrough
CT: control target
= control target key end

     0   :  { %s19475_s0 = inlined_call_operand.hbm [shape: f32[8,784], index: 0, kind: input, shape index: {}]   ;;  %s19476_s1 = inlined_call_operand.vmem [shape: f32[8,1], index: 1, kind: input, shape index: {}]   ;;  %s19477_s2 = inlined_call_operand.vmem [shape: bf16[2,784,512], index: 2, kind: input, shape index: {}]   ;;  %s19478_s3 = inlined_call_operand.vmem [shape: f32[2,512,784], index: 3, kind: input, shape index: {}]   ;;  %s19479_s4 = inlined_call_operand.hbm [shape: bf16[8,512,1024], index: 4, kind: input, shape index: {}]   ;;  %s19480_s5 = inlined_call_operand.hbm [shape: bf16[8,1024,1024], index: 5, kind: input, shape index: {}]   ;;  %s19481_s6 = inlined_call_operand.hbm [shape: bf16[8,1024,1024], index: 6, kind: input, shape index: {}]   ;;  %s19482_s7 = inlined_call_operand.vmem [shape: f32[8,3,1024], index: 7, kind: input, shape index: {}]   ;;  %s19483_s8 = inlined_call_operand.hbm [shape: f32[8,784], index: 8, kind: output, shape index: {0}]   ;;  %s19484_s9 = inlined_call_operand.vmem [shape: f32[8,1], index: 9, kind: output, shape index: {1}]  }
   0x1   :  { %19522 = sst [smem:[#allocation50_spill]] %s19475_s0 }
   0x2   :  { %19523 = sst [smem:[#allocation51_spill]] %s19479_s4 }
   0x3   :  { %19524 = sst [smem:[#allocation52_spill]] %s19480_s5 }
   0x4   :  { %15 = vsyncpa [#allocation3], 0 }
   0x5   :  { %16 = vsyncpa [#allocation6], 0 }
   0x6   :  { %18 = vsyncpa [#allocation6 + $0x1], 0 }
   0x7   :  { %19 = vsyncpa [#allocation9], 0 }
   0x8   :  { %21 = vsyncpa [#allocation9 + $0x1], 0 }
   0x9   :  { %22 = vsyncpa [#allocation4], 0  ;;  %s16018_s30 = smov 0   ;;  %s16020_s10 = smov 0  }
   0xa   :  { %s16022_s11 = smov 0   ;;  %s16024_s12 = smov 0  }
   0xb LB: > { %s16039_s13 = sadd.s32 1, %s15958_s12   ;;  %s119_s14 = sadd.s32 1, %s15954_s11  ;;  %s15958_s12 = sphi %s16024_s12, %s19614_s12   ;;  %s15954_s11 = sphi %s16022_s11, %s19613_s11   ;;  %s15950_s10 = sphi %s16020_s10, %s19612_s10   ;;  %s15946_s30 = sphi %s16018_s30, %s19611_s30  }
   0xc   : > { %s116_s15 = ssub.s32 %s15958_s12, %s16039_s13  ;;  %p126_p0 = scmp.ne.s32.totalorder %s15954_s11, %s15950_s10 }
   0xd   : > { %p117_p1 = scmp.eq.s32.totalorder %s116_s15, 0  ;;  %p127_p2 = scmp.eq.s32.totalorder %s15958_s12, 0 }
   0xe   : > { %p15036_p3 = scmp.lt.s32.totalorder %s15958_s12, 8  ;;  %s296_s17 = sand.u32 1, %s15958_s12  }
   0xf   : > { %s16049_s16 = scalar_select %p117_p1, %s15954_s11, %s119_s14  }
  0x10   : > { %p128_p4 = por %p127_p2, %p126_p0  ;;  %s16053_s18 = sand.u32 1, %s15954_s11  }
  0x11   : > { %19525 = sst [smem:[#allocation15_spill]] %s16049_s16  ;;  %s13357_s19 = sshll.u32 %s16053_s18, 11 }
  0x12   : > { %s14861_s20 = sshll.u32 %s15958_s12, 15  ;;  %s19526_s4 = sld [smem:[#allocation51_spill]] }
  0x13   : > { %s300_s24 = scalar_lea.vmem [#allocation5], %s13357_s19  ;;  %p16062_p5 = pnand %p15036_p3, %p128_p4 }
  0x14   : > { %s307_s25 = sshll.u32 %s300_s24, 4  ;;  %s16068_s27 = scalar_lea.sflag [#allocation6], %s296_s17  ;;  %s16066_s25 = int_to_ptr.vmem [resolvable:$true] %s307_s25 }
  0x15   : > { %p16074_p7 = pneg %p16062_p5 }
  0x18   : > { %s16060_s23 = scalar_lea.hbm %s19526_s4, %s14861_s20  ;;  %s15783_s19 = scalar_lea.hbm %s19526_s4, 262144 }
  0x19   : > { %s15778_s28 = scalar_lea.hbm %s16060_s23, 32768  ;;  %p15784_p10 = scmp.lt.s32.totalorder %s16060_s23, %s19526_s4 }
  0x1a   : > { %p15779_p6 = scmp.ne.s32.totalorder %s16060_s23, %s15778_s28  ;;  %p15785_p11 = scmp.lt.s32.totalorder %s15783_s19, %s15778_s28 }
  0x1c   : > { %p15781_p8 = pnand %p16074_p7, %p15779_p6  ;;  %p15786_p12 = por %p15785_p11, %p15784_p10 }
  0x1e   : > { %p15782_p9 = pneg %p15781_p8 }
  0x20   : > { %p15787_p13 = pnand %p15786_p12, %p15782_p9 }
  0x22   : > { %15790 = shalt.err (!%p15787_p13)
}
  0x23   : > { %s15791_s17 = scalar_lea.vmem %s16066_s25, 32768  ;;  %s15960_s22 = smov [#allocation5]  }
  0x24   : > { %p15792_p0 = scmp.ne.s32.totalorder %s16066_s25, %s15791_s17  ;;  %s15796_s24 = sshll.u32 %s15960_s22, 4  ;;  %s15797_s24 = int_to_ptr.vmem [resolvable:$false] %s15796_s24 }
  0x25   : > { %s15798_s14 = scalar_lea.vmem %s15797_s24, 65536  ;;  %p15799_p3 = scmp.lt.s32.totalorder %s16066_s25, %s15797_s24 }
  0x26   : > { %p15794_p1 = pnand %p15792_p0, %p16074_p7  ;;  %p15800_p4 = scmp.lt.s32.totalorder %s15798_s14, %s15791_s17 }
  0x28   : > { %p15795_p2 = pneg %p15794_p1  ;;  %p15801_p6 = por %p15800_p4, %p15799_p3 }
  0x2a   : > { %p15802_p8 = pnand %p15801_p6, %p15795_p2 }
  0x2c   : > { %15805 = shalt.err (!%p15802_p8)
}
  0x2d   : > { %s19485_s28 = smov 512   ;;  %s19487_s15 = smov 32  }
  0x2e   : > { %15028 = dma.hbm_to_vmem [thread:$0]  (!%p16062_p5), %s16060_s23, 32768, %s16066_s25, %s16068_s27, %s19485_s28, %s19485_s28, %s19487_s15  }
  0x2f   : > { %s16101_s19 = sadd.s32 4294967295, %s15958_s12   ;;  %p132_p10 = scmp.ne.s32.totalorder %s15950_s10, %s15946_s30 }
  0x30   : > { %p19491_p9 = scmp.eq.s32.totalorder %s16101_s19, 0  ;;  %p13354_p11 = scmp.ge.s32.totalorder %s15958_s12, 1 }
  0x31   : > { %p263_p12 = scmp.lt.s32.totalorder %s15958_s12, 9  ;;  %s15963_s23 = smov [#allocation2]  }
  0x32   : > { %p16111_p0 = por %p19491_p9, %p132_p10  ;;  %s276_s25 = sshll.u32 %s15963_s23, 4  ;;  %s277_s25 = int_to_ptr.vmem [resolvable:$true] %s276_s25 }
  0x33   : > { %p16115_p1 = pnand %p13354_p11, %p263_p12  ;;  %s19490_s17 = sshll.u32 %s16053_s18, 12 }
  0x34   : > { %s19529_s20 = scalar_select %p16111_p0, 1, 0 }
  0x35   : > { %s19530_s21 = scalar_select %p16115_p1, 1, 0 }
  0x36   : > { %p15021_p2 = pneg %p16115_p1  ;;  %s19493_s30 = sshll.u32 %s15958_s12, 16 }
  0x37   : > { %s321_s22 = scalar_lea.vmem [#allocation7], %s19490_s17  ;;  %s19531_s5 = sld [smem:[#allocation52_spill]] }
  0x38   : > { %s328_s24 = sshll.u32 %s321_s22, 4  ;;  %p15022_p3 = pnand %p15021_p2, %p19491_p9  ;;  %s16134_s24 = int_to_ptr.vmem [resolvable:$true] %s328_s24 }
  0x39   : > { %s15817_s23 = scalar_lea.vmem %s277_s25, 896  ;;  %p15825_p11 = scmp.lt.s32.totalorder %s277_s25, %s277_s25 }
  0x3a   : > { %p15808_p4 = pneg %p15022_p3  ;;  %p15818_p6 = scmp.ne.s32.totalorder %s277_s25, %s15817_s23 }
  0x3b   : > { %p15826_p12 = scmp.lt.s32.totalorder %s15817_s23, %s15817_s23 }
  0x3c   : > { %p15820_p8 = pnand %p15818_p6, %p15808_p4 }
  0x3d   : > { %s16132_s15 = scalar_lea.hbm %s19531_s5, %s19493_s30  ;;  %p15827_p13 = por %p15826_p12, %p15825_p11 }
  0x3e   : > { %p15821_p10 = pneg %p15820_p8 }
  0x40   : > { %p15828_p0 = pnand %p15827_p13, %p15821_p10 }
  0x42   : > { %15831 = shalt.err (!%p15828_p0)
}
  0x43   : > { %s19532_s0 = sld [smem:[#allocation50_spill]]  ;;  %s15832_s28 = scalar_lea.hbm %s16132_s15, 65536 }
  0x44   : > { %p15833_p2 = scmp.ne.s32.totalorder %s16132_s15, %s15832_s28  ;;  %s15837_s23 = scalar_lea.hbm %s19531_s5, 524288 }
  0x45   : > { %p15838_p13 = scmp.lt.s32.totalorder %s16132_s15, %s19531_s5  ;;  %p15839_p0 = scmp.lt.s32.totalorder %s15837_s23, %s15832_s28 }
  0x46   : > { %p15835_p9 = pnand %p15833_p2, %p16074_p7 }
  0x47   : > { %p15840_p4 = por %p15839_p0, %p15838_p13 }
  0x48   : > { %p15836_p1 = pneg %p15835_p9 }
  0x49   : > { %15024 = dma.hbm_to_vmem [thread:$0]  (!%p15022_p3), %s19532_s0, 896, %s277_s25, [#allocation3]  }
  0x4a   : > { %p15841_p6 = pnand %p15840_p4, %p15836_p1 }
  0x4c   : > { %15844 = shalt.err (!%p15841_p6)
}
  0x4d   : > { %s15845_s25 = scalar_lea.vmem %s16134_s24, 65536  ;;  %s15964_s17 = smov [#allocation7]  }
  0x4e   : > { %p15846_p3 = scmp.ne.s32.totalorder %s16134_s24, %s15845_s25  ;;  %s15850_s30 = sshll.u32 %s15964_s17, 4  ;;  %s15851_s30 = int_to_ptr.vmem [resolvable:$false] %s15850_s30 }
  0x4f   : > { %s15852_s22 = scalar_lea.vmem %s15851_s30, 131072  ;;  %p15853_p10 = scmp.lt.s32.totalorder %s16134_s24, %s15851_s30 }
  0x50   : > { %p15848_p9 = pnand %p15846_p3, %p16074_p7  ;;  %p15854_p11 = scmp.lt.s32.totalorder %s15852_s22, %s15845_s25 }
  0x52   : > { %p15849_p8 = pneg %p15848_p9  ;;  %p15855_p12 = por %p15854_p11, %p15853_p10 }
  0x54   : > { %p15856_p2 = pnand %p15855_p12, %p15849_p8 }
  0x56   : > { %15859 = shalt.err (!%p15856_p2)
}
  0x57   : > { %s19533_s4 = smov 32   ;;  %s19534_s16 = smov 512  }
  0x58   : > { %15031 = dma.hbm_to_vmem [thread:$0]  (!%p16062_p5), %s16132_s15, 65536, %s16134_s24, %s16068_s27, %s19534_s16, %s19534_s16, %s19533_s4  }
  0x59   : > { %s19535_s28 = sshll.u32 %s15958_s12, 16  ;;  %s19536_s17 = sshll.u32 %s16053_s18, 12 }
  0x5a   : > { %s16168_s25 = scalar_lea.hbm %s19481_s6, %s19535_s28  ;;  %s342_s30 = scalar_lea.vmem [#allocation8], %s19536_s17 }
  0x5b   : > { %s349_s22 = sshll.u32 %s342_s30, 4  ;;  %s339_s0 = scalar_lea.sflag [#allocation9], %s16053_s18  ;;  %s16172_s22 = int_to_ptr.vmem [resolvable:$true] %s349_s22 }
  0x5c   : > { %s15860_s5 = scalar_lea.hbm %s16168_s25, 65536  ;;  %s15865_s15 = scalar_lea.hbm %s19481_s6, 524288 }
  0x5d   : > { %p15861_p1 = scmp.ne.s32.totalorder %s16168_s25, %s15860_s5  ;;  %p15866_p4 = scmp.lt.s32.totalorder %s16168_s25, %s19481_s6 }
  0x5e   : > { %p15867_p6 = scmp.lt.s32.totalorder %s15865_s15, %s15860_s5 }
  0x5f   : > { %p15863_p13 = pnand %p15861_p1, %p16074_p7 }
  0x60   : > { %p15868_p3 = por %p15867_p6, %p15866_p4 }
  0x61   : > { %p15864_p0 = pneg %p15863_p13 }
  0x63   : > { %p15869_p9 = pnand %p15868_p3, %p15864_p0 }
  0x65   : > { %15872 = shalt.err (!%p15869_p9)
}
  0x66   : > { %s15873_s18 = scalar_lea.vmem %s16172_s22, 65536  ;;  %s15965_s14 = smov [#allocation8]  }
  0x67   : > { %p15874_p8 = scmp.ne.s32.totalorder %s16172_s22, %s15873_s18  ;;  %s15878_s23 = sshll.u32 %s15965_s14, 4  ;;  %s15879_s23 = int_to_ptr.vmem [resolvable:$false] %s15878_s23 }
  0x68   : > { %s15880_s17 = scalar_lea.vmem %s15879_s23, 131072  ;;  %p15881_p12 = scmp.lt.s32.totalorder %s16172_s22, %s15879_s23 }
  0x69   : > { %p15876_p10 = pnand %p15874_p8, %p16074_p7  ;;  %p15882_p2 = scmp.lt.s32.totalorder %s15880_s17, %s15873_s18 }
  0x6b   : > { %p15877_p11 = pneg %p15876_p10  ;;  %p15883_p1 = por %p15882_p2, %p15881_p12 }
  0x6d   : > { %p15884_p13 = pnand %p15883_p1, %p15877_p11 }
  0x6f   : > { %15887 = shalt.err (!%p15884_p13)
}
  0x70   : > { %15034 = dma.hbm_to_vmem [thread:$0]  (!%p16062_p5), %s16168_s25, 65536, %s16172_s22, %s339_s0, %s19534_s16, %s19534_s16, %s19533_s4  }
  0x71   : > { %p19537_p7 = scmp.ne.s32.totalorder %s19530_s21, 0 }
  0x73   : > { %369 = sbr.rel (%p19537_p7) target bundleno = 2587 (0xa1b), region = 52 }
  0x78   : > { %p19538_p0 = scmp.eq.s32.totalorder %s16101_s19, 0 }
  0x7a   : > { %15929 = dma.done.wait (%p19538_p0), [#allocation3], 896   ;;  %p19539_p4 = pmov %p19538_p0 }
  0x7b   : > { %s375_s5 = sand.u32 1, %s16101_s19   ;;  %s377_s26 = sand.u32 1, %s15950_s10  }
  0x7c   : > { %15931 = vsyncadd (%p19539_p4), [#allocation3], 4294966400  ;;  %s13368_s29 = sshll.u32 %s377_s26, 11  ;;  %s376_s30 = scalar_lea.sflag [#allocation6], %s375_s5 }
  0x7d   : > { %s16206_s12 = scalar_lea.vmem [#allocation5], %s13368_s29  ;;  %p19540_p6 = scmp.ne.s32.totalorder %s19529_s20, 0 }
  0x7f   : > { %15933 = dma.done.wait (%p19540_p6), %s376_s30, 98304  }
  0x80   : > { %15935 = vsyncadd (%p19540_p6), %s376_s30, 4294868992  ;;  %s13369_s0 = sshll.u32 %s377_s26, 12  ;;  %s394_s4 = scalar_lea.sflag [#allocation9], %s377_s26 }
  0x81   : > { %s16212_s21 = scalar_lea.vmem [#allocation7], %s13369_s0  ;;  %s16214_s16 = scalar_lea.vmem [#allocation8], %s13369_s0 }
  0x82   : > { %15937 = dma.done.wait (%p19540_p6), %s394_s4, 65536  }
  0x83   : > { %15939 = vsyncadd (%p19540_p6), %s394_s4, 4294901760  ;;  %p442_p5 = scmp.lt.s32.totalorder %s16101_s19, 7  ;;  %p448_p3 = scmp.lt.s32.totalorder %s16101_s19, 0 }
  0x84   : > { %s449_s25 = ssub.s32 0, %s16101_s19  ;;  %p19541_p8 = scmp.ne.s32.totalorder %s16101_s19, 0 }
  0x85   : > { %s443_s22 = scalar_select %p442_p5, %s16101_s19, 7 }
  0x86   : > { %s13373_s27 = smin.u32 %s16101_s19, %s449_s25 }
  0x87   : > { %s14864_s15 = sshll.u32 %s443_s22, 5  ;;  %s451_s24 = sand.u32 1, %s13373_s27  }
  0x88   : > { %s16228_s14 = scalar_lea.vmem %s19482_s7, %s14864_s15  ;;  %s452_s23 = ssub.s32 0, %s451_s24 }
  0x89   : > { %s19616_s23 = smov (!%p448_p3, %s452_s23), %s451_s24  ;;  %463 = sbr.rel (%p19541_p8) target bundleno = 148 (0x94), region = 72 }
  0x8a   : > { %p13375_p9 = scmp.lt.s32.totalorder %s19616_s23, 0  ;;  %s458_s20 = sadd.s32 2, %s19616_s23 }
  0x8c   : > { %s19618_s20 = smov (!%p13375_p9, %s458_s20), %s19616_s23 }
  0x8e   : > { %v464_v0 = vld [vmem:[#allocation2] sm:$0xff]  ;;  %v465_v1 = vld [vmem:[#allocation2 + $0x8] sm:$0xff]  ;;  %v466_v2 = vld [vmem:[#allocation2 + $0x10] sm:$0xff]  ;;  %vm477_vm0 = vcmask 130048   ;;  %vm480_vm1 = vcmask 7168  }
  0x8f   : > { %471 = vst [vmem:[#allocation10] sm:$0xff] %v464_v0  ;;  %472 = vst [vmem:[#allocation10 + $0x8] sm:$0xff] %v465_v1  ;;  %v467_v3 = vld [vmem:[#allocation2 + $0x18] sm:$0xff]  ;;  %v468_v4 = vld [vmem:[#allocation2 + $0x20] sm:$0xff] }
  0x90   : > { %473 = vst [vmem:[#allocation10 + $0x10] sm:$0xff] %v466_v2  ;;  %v469_v5 = vld [vmem:[#allocation2 + $0x28] sm:$0xff]  ;;  %474 = vst [vmem:[#allocation10 + $0x18] sm:$0xff] %v467_v3  ;;  %v470_v6 = vld [vmem:[#allocation2 + $0x30] sm:$0xff] }
  0x91   : > { %475 = vst [vmem:[#allocation10 + $0x20] sm:$0xff] %v468_v4  ;;  %476 = vst [vmem:[#allocation10 + $0x28] sm:$0xff] %v469_v5  ;;  %v479_v7 = vld [vmem:[%s19476_s1] sm:$0xff] }
  0x92   : > { %478 = vst.msk [vmem:[#allocation10 + $0x30] sm:$0xff] %vm477_vm0, %v470_v6 }
  0x93   : > { %481 = vst.msk [vmem:[%s19484_s9] sm:$0xff] %vm480_vm1, %v479_v7 }
  0x94 PF: > { %s14865_s30 = smul.u32 1568, %s19618_s20  ;;  %vm1675_vm2 = vcmask 130048   ;;  %vm13217_vm3 = vcmask 7168   ;;  %p15038_p10 = scmp.eq.s32.totalorder %s16101_s19, 7 }
  0x96   : > { %v483_v8 = vld [vmem:[#allocation10 + $0x8] sm:$0xff]  ;;  %s16248_s25 = scalar_lea.vmem %s19477_s2, %s14865_s30 }
  0x97   : > { %v485_v9 = vld [vmem:[#allocation10 + $0x18] sm:$0xff]  ;;  %v16241_v10 = vpack.c.bf16 %v483_v8, %v483_v8 }
  0x98   : > { %v16243_v11 = vpack.c.bf16 %v485_v9, %v485_v9  ;;  %v15077_v12 = vld [vmem:[%s16248_s25 + $0xe4] ss:$16 sps:$4 sm:$0xff]   ;;  %v15081_v14 = vld [vmem:[%s16248_s25 + $0xe0] ss:$16 sps:$4 sm:$0xff]  }
  0x99   : > { %1711 = vmatprep.mubr.bf16.mxu0 %v16241_v10  ;;  %v15079_v13 = vld [vmem:[%s16248_s25 + $0x2e4] ss:$16 sps:$4 sm:$0xff]   ;;  %1679 = vmatprep.subr.bf16.mxu0 %v15077_v12  ;;  %v15082_v15 = vld [vmem:[%s16248_s25 + $0x2e0] ss:$16 sps:$4 sm:$0xff]   ;;  %v482_v12 = vld [vmem:[#allocation10] sm:$0xff] }
  0x9a   : > { %1752 = vmatprep.mubr.bf16.mxu1 %v16243_v11  ;;  %1720 = vmatprep.subr.bf16.mxu1 %v15079_v13  ;;  %v15083_v16 = vld [vmem:[%s16248_s25 + $0xc4] ss:$16 sps:$4 sm:$0xff]   ;;  %v15087_v18 = vld [vmem:[%s16248_s25 + $0xc0] ss:$16 sps:$4 sm:$0xff]   ;;  %v484_v13 = vld [vmem:[#allocation10 + $0x10] sm:$0xff] }
  0x9b   : > { %1680 = vmatpush1.bf16.msra.mxu0 %v15081_v14  ;;  %1721 = vmatpush1.bf16.msra.mxu1 %v15082_v15  ;;  %v15085_v17 = vld [vmem:[%s16248_s25 + $0x2c4] ss:$16 sps:$4 sm:$0xff]   ;;  %v15088_v19 = vld [vmem:[%s16248_s25 + $0x2c0] ss:$16 sps:$4 sm:$0xff]  }
  0x9c   : > { %1681 = vmatprep.subr.bf16.mxu0 %v15083_v16  ;;  %1722 = vmatprep.subr.bf16.mxu1 %v15085_v17  ;;  %v15089_v20 = vld [vmem:[%s16248_s25 + $0xa4] ss:$16 sps:$4 sm:$0xff]   ;;  %v15093_v22 = vld [vmem:[%s16248_s25 + $0xa0] ss:$16 sps:$4 sm:$0xff]  }
  0x9d   : > { %v15091_v21 = vld [vmem:[%s16248_s25 + $0x2a4] ss:$16 sps:$4 sm:$0xff]   ;;  %v15094_v23 = vld [vmem:[%s16248_s25 + $0x2a0] ss:$16 sps:$4 sm:$0xff]  }
  0x9e   : > { %v15095_v24 = vld [vmem:[%s16248_s25 + $0x84] ss:$16 sps:$4 sm:$0xff]   ;;  %v15099_v26 = vld [vmem:[%s16248_s25 + $0x80] ss:$16 sps:$4 sm:$0xff]  }
  0x9f   : > { %1682 = vmatpush1.bf16.msra.mxu0 %v15087_v18  ;;  %1723 = vmatpush1.bf16.msra.mxu1 %v15088_v19  ;;  %v15097_v25 = vld [vmem:[%s16248_s25 + $0x284] ss:$16 sps:$4 sm:$0xff]   ;;  %v15100_v27 = vld [vmem:[%s16248_s25 + $0x280] ss:$16 sps:$4 sm:$0xff]   ;;  %v16318_v18 = vpack.c.bf16 %v482_v12, %v482_v12  ;;  %v16320_v19 = vpack.c.bf16 %v484_v13, %v484_v13  ;;  %v15248_v12 = vld [vmem:[%s16248_s25 + $0x188] ss:$16 sps:$4 sm:$0xff]  }
  0xa0   : > { %1683 = vmatprep.subr.bf16.mxu0 %v15089_v20  ;;  %1724 = vmatprep.subr.bf16.mxu1 %v15091_v21  ;;  %v15101_v28 = vld [vmem:[%s16248_s25 + $0x64] ss:$16 sps:$4 sm:$0xff]   ;;  %v15105_v30 = vld [vmem:[%s16248_s25 + $0x60] ss:$16 sps:$4 sm:$0xff]  }
  0xa1   : > { %v15103_v29 = vld [vmem:[%s16248_s25 + $0x264] ss:$16 sps:$4 sm:$0xff]   ;;  %v15106_v31 = vld [vmem:[%s16248_s25 + $0x260] ss:$16 sps:$4 sm:$0xff]  }
  0xa2   : > { %v15107_v32 = vld [vmem:[%s16248_s25 + $0x44] ss:$16 sps:$4 sm:$0xff]   ;;  %v15111_v34 = vld [vmem:[%s16248_s25 + $0x40] ss:$16 sps:$4 sm:$0xff]  }
  0xa3   : > { %1684 = vmatpush1.bf16.msra.mxu0 %v15093_v22  ;;  %1725 = vmatpush1.bf16.msra.mxu1 %v15094_v23  ;;  %v15109_v33 = vld [vmem:[%s16248_s25 + $0x244] ss:$16 sps:$4 sm:$0xff]   ;;  %v15112_v35 = vld [vmem:[%s16248_s25 + $0x240] ss:$16 sps:$4 sm:$0xff]   ;;  %v15184_v23 = vld [vmem:[%s16248_s25 + $0xec] ss:$16 sps:$4 sm:$0xff]  }
  0xa4   : > { %1685 = vmatprep.subr.bf16.mxu0 %v15095_v24  ;;  %1726 = vmatprep.subr.bf16.mxu1 %v15097_v25  ;;  %v15113_v36 = vld [vmem:[%s16248_s25 + $0x24] ss:$16 sps:$4 sm:$0xff]   ;;  %v15117_v38 = vld [vmem:[%s16248_s25 + $0x20] ss:$16 sps:$4 sm:$0xff]   ;;  %v488_v24 = vld [vmem:[#allocation10 + $0x30] sm:$0xff] }
  0xa5   : > { %v15115_v37 = vld [vmem:[%s16248_s25 + $0x224] ss:$16 sps:$4 sm:$0xff]   ;;  %v15118_v39 = vld [vmem:[%s16248_s25 + $0x220] ss:$16 sps:$4 sm:$0xff]  }
  0xa6   : > { %v15119_v40 = vld [vmem:[%s16248_s25 + $0x4] ss:$16 sps:$4 sm:$0xff]   ;;  %v15123_v42 = vld [vmem:[%s16248_s25] ss:$16 sps:$4 sm:$0xff]  }
  0xa7   : > { %1686 = vmatpush1.bf16.msra.mxu0 %v15099_v26  ;;  %1727 = vmatpush1.bf16.msra.mxu1 %v15100_v27  ;;  %v15121_v41 = vld [vmem:[%s16248_s25 + $0x204] ss:$16 sps:$4 sm:$0xff]   ;;  %v15124_v43 = vld [vmem:[%s16248_s25 + $0x200] ss:$16 sps:$4 sm:$0xff]   ;;  %v15966_v26 = vmov 0  }
  0xa8   : > { %1687 = vmatprep.subr.bf16.mxu0 %v15101_v28  ;;  %1728 = vmatprep.subr.bf16.mxu1 %v15103_v29  ;;  %v15125_v44 = vld [vmem:[%s16248_s25 + $0x1e4] ss:$16 sps:$4 sm:$0xff]   ;;  %v15129_v46 = vld [vmem:[%s16248_s25 + $0x1e0] ss:$16 sps:$4 sm:$0xff]   ;;  %v15182_v28 = vld [vmem:[%s16248_s25 + $0xe8] ss:$16 sps:$4 sm:$0xff]  }
  0xa9   : > { %v15127_v45 = vld [vmem:[%s16248_s25 + $0x3e4] ss:$16 sps:$4 sm:$0xff]   ;;  %v15130_v47 = vld [vmem:[%s16248_s25 + $0x3e0] ss:$16 sps:$4 sm:$0xff]  }
  0xaa   : > { %v15131_v48 = vld [vmem:[%s16248_s25 + $0x1c4] ss:$16 sps:$4 sm:$0xff]   ;;  %v15135_v50 = vld [vmem:[%s16248_s25 + $0x1c0] ss:$16 sps:$4 sm:$0xff]  }
  0xab   : > { %1688 = vmatpush1.bf16.msra.mxu0 %v15105_v30  ;;  %1729 = vmatpush1.bf16.msra.mxu1 %v15106_v31  ;;  %v15133_v49 = vld [vmem:[%s16248_s25 + $0x3c4] ss:$16 sps:$4 sm:$0xff]   ;;  %v15136_v51 = vld [vmem:[%s16248_s25 + $0x3c0] ss:$16 sps:$4 sm:$0xff]   ;;  %v16333_v30 = vpack.c.bf16 %v488_v24, %v488_v24  ;;  %v15190_v31 = vld [vmem:[%s16248_s25 + $0xcc] ss:$16 sps:$4 sm:$0xff]  }
  0xac   : > { %1689 = vmatprep.subr.bf16.mxu0 %v15107_v32  ;;  %1730 = vmatprep.subr.bf16.mxu1 %v15109_v33  ;;  %v15137_v52 = vld [vmem:[%s16248_s25 + $0x1a4] ss:$16 sps:$4 sm:$0xff]   ;;  %v15141_v54 = vld [vmem:[%s16248_s25 + $0x1a0] ss:$16 sps:$4 sm:$0xff]   ;;  %v15188_v33 = vld [vmem:[%s16248_s25 + $0xc8] ss:$16 sps:$4 sm:$0xff]  }
  0xad   : > { %v15139_v53 = vld [vmem:[%s16248_s25 + $0x3a4] ss:$16 sps:$4 sm:$0xff]   ;;  %v15142_v55 = vld [vmem:[%s16248_s25 + $0x3a0] ss:$16 sps:$4 sm:$0xff]   ;;  %v486_v24 = vld [vmem:[#allocation10 + $0x20] sm:$0xff] }
  0xae   : > { %v15143_v56 = vld [vmem:[%s16248_s25 + $0x184] ss:$16 sps:$4 sm:$0xff]   ;;  %v15147_v58 = vld [vmem:[%s16248_s25 + $0x180] ss:$16 sps:$4 sm:$0xff]  }
  0xaf   : > { %1690 = vmatpush1.bf16.msra.mxu0 %v15111_v34  ;;  %1731 = vmatpush1.bf16.msra.mxu1 %v15112_v35  ;;  %v15145_v57 = vld [vmem:[%s16248_s25 + $0x384] ss:$16 sps:$4 sm:$0xff]   ;;  %v15148_v59 = vld [vmem:[%s16248_s25 + $0x380] ss:$16 sps:$4 sm:$0xff]   ;;  %v15196_v35 = vld [vmem:[%s16248_s25 + $0xac] ss:$16 sps:$4 sm:$0xff]  }
  0xb0   : > { %1691 = vmatprep.subr.bf16.mxu0 %v15113_v36  ;;  %1732 = vmatprep.subr.bf16.mxu1 %v15115_v37  ;;  %v15149_v60 = vld [vmem:[%s16248_s25 + $0x164] ss:$16 sps:$4 sm:$0xff]   ;;  %v15153_v62 = vld [vmem:[%s16248_s25 + $0x160] ss:$16 sps:$4 sm:$0xff]   ;;  %v15194_v37 = vld [vmem:[%s16248_s25 + $0xa8] ss:$16 sps:$4 sm:$0xff]  }
  0xb1   : > { %v15151_v61 = vld [vmem:[%s16248_s25 + $0x364] ss:$16 sps:$4 sm:$0xff]   ;;  %v15154_v63 = vld [vmem:[%s16248_s25 + $0x360] ss:$16 sps:$4 sm:$0xff]  }
  0xb2   : > { %v15155_v0 = vld [vmem:[%s16248_s25 + $0x144] ss:$16 sps:$4 sm:$0xff]   ;;  %v15159_v2 = vld [vmem:[%s16248_s25 + $0x140] ss:$16 sps:$4 sm:$0xff]  }
  0xb3   : > { %1692 = vmatpush1.bf16.msra.mxu0 %v15117_v38  ;;  %1733 = vmatpush1.bf16.msra.mxu1 %v15118_v39  ;;  %v15157_v1 = vld [vmem:[%s16248_s25 + $0x344] ss:$16 sps:$4 sm:$0xff]   ;;  %v15160_v3 = vld [vmem:[%s16248_s25 + $0x340] ss:$16 sps:$4 sm:$0xff]   ;;  %v15202_v39 = vld [vmem:[%s16248_s25 + $0x8c] ss:$16 sps:$4 sm:$0xff]  }
  0xb4   : > { %1693 = vmatprep.subr.bf16.mxu0 %v15119_v40  ;;  %1734 = vmatprep.subr.bf16.mxu1 %v15121_v41  ;;  %v15161_v4 = vld [vmem:[%s16248_s25 + $0x124] ss:$16 sps:$4 sm:$0xff]   ;;  %v15165_v6 = vld [vmem:[%s16248_s25 + $0x120] ss:$16 sps:$4 sm:$0xff]   ;;  %v15200_v41 = vld [vmem:[%s16248_s25 + $0x88] ss:$16 sps:$4 sm:$0xff]  }
  0xb5   : > { %v15163_v5 = vld [vmem:[%s16248_s25 + $0x324] ss:$16 sps:$4 sm:$0xff]   ;;  %v15166_v7 = vld [vmem:[%s16248_s25 + $0x320] ss:$16 sps:$4 sm:$0xff]  }
  0xb6   : > { %v15167_v8 = vld [vmem:[%s16248_s25 + $0x104] ss:$16 sps:$4 sm:$0xff]   ;;  %v15171_v14 = vld [vmem:[%s16248_s25 + $0x100] ss:$16 sps:$4 sm:$0xff]  }
  0xb7   : > { %1694 = vmatpush1.bf16.msra.mxu0 %v15123_v42  ;;  %1735 = vmatpush1.bf16.msra.mxu1 %v15124_v43  ;;  %v15169_v9 = vld [vmem:[%s16248_s25 + $0x304] ss:$16 sps:$4 sm:$0xff]   ;;  %v15172_v15 = vld [vmem:[%s16248_s25 + $0x300] ss:$16 sps:$4 sm:$0xff]  }
  0xb8   : > { %1695 = vmatprep.subr.bf16.mxu0 %v15125_v44  ;;  %1736 = vmatprep.subr.bf16.mxu1 %v15127_v45  ;;  %v15175_v16 = vld [vmem:[%s16248_s25 + $0x4e4] ss:$16 sps:$4 sm:$0xff]   ;;  %v15173_v20 = vld [vmem:[%s16248_s25 + $0x4e0] ss:$16 sps:$4 sm:$0xff]  }
  0xb9   : > { %v15178_v17 = vld [vmem:[%s16248_s25 + $0x604] ss:$16 sps:$4 sm:$0xff]   ;;  %v15176_v21 = vld [vmem:[%s16248_s25 + $0x600] ss:$16 sps:$4 sm:$0xff]  }
  0xba   : > { %v15181_v22 = vld [vmem:[%s16248_s25 + $0x4c4] ss:$16 sps:$4 sm:$0xff]   ;;  %v15179_v25 = vld [vmem:[%s16248_s25 + $0x4c0] ss:$16 sps:$4 sm:$0xff]  }
  0xbb   : > { %1696 = vmatpush2.bf16.msra.mxu0 %v15129_v46  ;;  %1737 = vmatpush2.bf16.msra.mxu1 %v15130_v47  ;;  %v15187_v27 = vld [vmem:[%s16248_s25 + $0x4a4] ss:$16 sps:$4 sm:$0xff]   ;;  %v15185_v29 = vld [vmem:[%s16248_s25 + $0x4a0] ss:$16 sps:$4 sm:$0xff]   ;;  %v15206_v46 = vld [vmem:[%s16248_s25 + $0x68] ss:$16 sps:$4 sm:$0xff]  }
  0xbc   : > { %1697 = vmatprep.subr.bf16.mxu0 %v15131_v48  ;;  %1738 = vmatprep.subr.bf16.mxu1 %v15133_v49  ;;  %v15193_v32 = vld [vmem:[%s16248_s25 + $0x484] ss:$16 sps:$4 sm:$0xff]   ;;  %v15191_v34 = vld [vmem:[%s16248_s25 + $0x480] ss:$16 sps:$4 sm:$0xff]   ;;  %v15214_v48 = vld [vmem:[%s16248_s25 + $0x4c] ss:$16 sps:$4 sm:$0xff]  }
  0xbd   : > { %v15199_v36 = vld [vmem:[%s16248_s25 + $0x464] ss:$16 sps:$4 sm:$0xff]   ;;  %v15197_v38 = vld [vmem:[%s16248_s25 + $0x460] ss:$16 sps:$4 sm:$0xff]  }
  0xbe   : > { %v15205_v40 = vld [vmem:[%s16248_s25 + $0x444] ss:$16 sps:$4 sm:$0xff]   ;;  %v15203_v42 = vld [vmem:[%s16248_s25 + $0x440] ss:$16 sps:$4 sm:$0xff]  }
  0xbf   : > { %1698 = vmatpush2.bf16.msra.mxu0 %v15135_v50  ;;  %1739 = vmatpush2.bf16.msra.mxu1 %v15136_v51  ;;  %v487_v43 = vld [vmem:[#allocation10 + $0x28] sm:$0xff]  ;;  %v15212_v50 = vld [vmem:[%s16248_s25 + $0x48] ss:$16 sps:$4 sm:$0xff]  }
  0xc0   : > { %1699 = vmatprep.subr.bf16.mxu0 %v15137_v52  ;;  %1740 = vmatprep.subr.bf16.mxu1 %v15139_v53  ;;  %v15211_v44 = vld [vmem:[%s16248_s25 + $0x424] ss:$16 sps:$4 sm:$0xff]   ;;  %v16352_v45 = vpack.c.bf16 %v487_v43, %v487_v43  ;;  %v15209_v47 = vld [vmem:[%s16248_s25 + $0x420] ss:$16 sps:$4 sm:$0xff]   ;;  %v15220_v52 = vld [vmem:[%s16248_s25 + $0x2c] ss:$16 sps:$4 sm:$0xff]  }
  0xc1   : > { %v15217_v49 = vld [vmem:[%s16248_s25 + $0x404] ss:$16 sps:$4 sm:$0xff]   ;;  %v15215_v51 = vld [vmem:[%s16248_s25 + $0x400] ss:$16 sps:$4 sm:$0xff]   ;;  %v15292_v43 = vld [vmem:[%s16248_s25 + $0x4ac] ss:$16 sps:$4 sm:$0xff]  }
  0xc2   : > { %v15223_v53 = vld [vmem:[%s16248_s25 + $0x5e4] ss:$16 sps:$4 sm:$0xff]   ;;  %v15251_v13 = vld [vmem:[%s16248_s25 + $0x540] ss:$16 sps:$4 sm:$0xff]  }
  0xc3   : > { %1700 = vmatpush2.bf16.msra.mxu0 %v15141_v54  ;;  %1741 = vmatpush2.bf16.msra.mxu1 %v15142_v55  ;;  %v15218_v54 = vld [vmem:[%s16248_s25 + $0x28] ss:$16 sps:$4 sm:$0xff]   ;;  %v15221_v55 = vld [vmem:[%s16248_s25 + $0x5e0] ss:$16 sps:$4 sm:$0xff]  }
  0xc4   : > { %1701 = vmatprep.subr.bf16.mxu0 %v15143_v56  ;;  %1742 = vmatprep.subr.bf16.mxu1 %v15145_v57  ;;  %v15226_v56 = vld [vmem:[%s16248_s25 + $0xc] ss:$16 sps:$4 sm:$0xff]   ;;  %v15229_v57 = vld [vmem:[%s16248_s25 + $0x5c4] ss:$16 sps:$4 sm:$0xff]  }
  0xc7   : > { %1702 = vmatpush2.bf16.msra.mxu0 %v15147_v58  ;;  %1743 = vmatpush2.bf16.msra.mxu1 %v15148_v59  ;;  %v15224_v58 = vld [vmem:[%s16248_s25 + $0x8] ss:$16 sps:$4 sm:$0xff]   ;;  %v15227_v59 = vld [vmem:[%s16248_s25 + $0x5c0] ss:$16 sps:$4 sm:$0xff]  }
  0xc8   : > { %1703 = vmatprep.subr.bf16.mxu0 %v15149_v60  ;;  %1744 = vmatprep.subr.bf16.mxu1 %v15151_v61  ;;  %v15232_v60 = vld [vmem:[%s16248_s25 + $0x1ec] ss:$16 sps:$4 sm:$0xff]   ;;  %v15235_v61 = vld [vmem:[%s16248_s25 + $0x5a4] ss:$16 sps:$4 sm:$0xff]  }
  0xcb   : > { %1704 = vmatpush2.bf16.msra.mxu0 %v15153_v62  ;;  %1745 = vmatpush2.bf16.msra.mxu1 %v15154_v63  ;;  %v15230_v62 = vld [vmem:[%s16248_s25 + $0x1e8] ss:$16 sps:$4 sm:$0xff]   ;;  %v15233_v63 = vld [vmem:[%s16248_s25 + $0x5a0] ss:$16 sps:$4 sm:$0xff]  }
  0xcc   : > { %1705 = vmatprep.subr.bf16.mxu0 %v15155_v0  ;;  %1746 = vmatprep.subr.bf16.mxu1 %v15157_v1  ;;  %v15238_v0 = vld [vmem:[%s16248_s25 + $0x1cc] ss:$16 sps:$4 sm:$0xff]   ;;  %v15241_v1 = vld [vmem:[%s16248_s25 + $0x584] ss:$16 sps:$4 sm:$0xff]  }
  0xcf   : > { %1706 = vmatpush2.bf16.msra.mxu0 %v15159_v2  ;;  %1747 = vmatpush2.bf16.msra.mxu1 %v15160_v3  ;;  %v15236_v2 = vld [vmem:[%s16248_s25 + $0x1c8] ss:$16 sps:$4 sm:$0xff]   ;;  %v15239_v3 = vld [vmem:[%s16248_s25 + $0x580] ss:$16 sps:$4 sm:$0xff]  }
  0xd0   : > { %1707 = vmatprep.subr.bf16.mxu0 %v15161_v4  ;;  %1748 = vmatprep.subr.bf16.mxu1 %v15163_v5  ;;  %v15244_v4 = vld [vmem:[%s16248_s25 + $0x1ac] ss:$16 sps:$4 sm:$0xff]   ;;  %v15247_v5 = vld [vmem:[%s16248_s25 + $0x564] ss:$16 sps:$4 sm:$0xff]  }
  0xd3   : > { %1708 = vmatpush2.bf16.msra.mxu0 %v15165_v6  ;;  %1749 = vmatpush2.bf16.msra.mxu1 %v15166_v7  ;;  %v15242_v6 = vld [vmem:[%s16248_s25 + $0x1a8] ss:$16 sps:$4 sm:$0xff]   ;;  %v15245_v7 = vld [vmem:[%s16248_s25 + $0x560] ss:$16 sps:$4 sm:$0xff]  }
  0xd4   : > { %1709 = vmatprep.subr.bf16.mxu0 %v15167_v8  ;;  %1750 = vmatprep.subr.bf16.mxu1 %v15169_v9  ;;  %v15250_v8 = vld [vmem:[%s16248_s25 + $0x18c] ss:$16 sps:$4 sm:$0xff]   ;;  %v15253_v9 = vld [vmem:[%s16248_s25 + $0x544] ss:$16 sps:$4 sm:$0xff]  }
  0xd7   : > { %1710 = vmatpush2.bf16.msra.mxu0 %v15171_v14  ;;  %1751 = vmatpush2.bf16.msra.mxu1 %v15172_v15  ;;  %v15256_v14 = vld [vmem:[%s16248_s25 + $0x16c] ss:$16 sps:$4 sm:$0xff]   ;;  %v15259_v15 = vld [vmem:[%s16248_s25 + $0x524] ss:$16 sps:$4 sm:$0xff]  }
  0xd8   : > { %1761 = vmatprep.subr.bf16.mxu0 %v15175_v16  ;;  %1816 = vmatprep.subr.bf16.mxu1 %v15178_v17  ;;  %v15254_v16 = vld [vmem:[%s16248_s25 + $0x168] ss:$16 sps:$4 sm:$0xff]   ;;  %v15257_v17 = vld [vmem:[%s16248_s25 + $0x520] ss:$16 sps:$4 sm:$0xff]  }
  0xda   : > { %1712 = vmatmul.mubr.bf16.vlgmr.msra.gmra.mxu0 %v16318_v18  ;;  %1753 = vmatmul.mubr.bf16.vlgmr.msra.gmra.mxu1 %v16320_v19 }
  0xdb   : > { %1762 = vmatpush1.bf16.msra.mxu0 %v15173_v20  ;;  %1817 = vmatpush1.bf16.msra.mxu1 %v15176_v21  ;;  %v15262_v20 = vld [vmem:[%s16248_s25 + $0x14c] ss:$16 sps:$4 sm:$0xff]   ;;  %v15265_v21 = vld [vmem:[%s16248_s25 + $0x504] ss:$16 sps:$4 sm:$0xff]  }
  0xdc   : > { %1763 = vmatprep.subr.bf16.mxu0 %v15181_v22  ;;  %1834 = vmatprep.mubr.bf16.mxu1 %v15966_v26  ;;  %v15260_v22 = vld [vmem:[%s16248_s25 + $0x148] ss:$16 sps:$4 sm:$0xff]  }
  0xdd   : > { %1843 = vmatprep.subr.bf16.mxu1 %v15184_v23  ;;  %1793 = vmatprep.mubr.bf16.mxu0 %v16352_v45  ;;  %v15263_v23 = vld [vmem:[%s16248_s25 + $0x500] ss:$16 sps:$4 sm:$0xff]  }
  0xdf   : > { %1764 = vmatpush1.bf16.msra.mxu0 %v15179_v25  ;;  %v15268_v25 = vld [vmem:[%s16248_s25 + $0x12c] ss:$16 sps:$4 sm:$0xff]  }
  0xe0   : > { %1765 = vmatprep.subr.bf16.mxu0 %v15187_v27  ;;  %v15271_v27 = vld [vmem:[%s16248_s25 + $0x2ec] ss:$16 sps:$4 sm:$0xff]  }
  0xe2   : > { %13574 = vmatmul.mubr.msk.bf16.vlgmr.msra.gmra.mxu1 %vm1675_vm2, %v16333_v30 }
  0xe3   : > { %1844 = vmatpush1.bf16.msra.mxu1 %v15182_v28  ;;  %1766 = vmatpush1.bf16.msra.mxu0 %v15185_v29  ;;  %v16395_v28 = vpack.c.bf16 %v486_v24, %v486_v24  ;;  %v15266_v29 = vld [vmem:[%s16248_s25 + $0x128] ss:$16 sps:$4 sm:$0xff]  }
  0xe4   : > { %1845 = vmatprep.subr.bf16.mxu1 %v15190_v31  ;;  %1767 = vmatprep.subr.bf16.mxu0 %v15193_v32  ;;  %v15269_v31 = vld [vmem:[%s16248_s25 + $0x2e8] ss:$16 sps:$4 sm:$0xff]   ;;  %v15274_v32 = vld [vmem:[%s16248_s25 + $0x10c] ss:$16 sps:$4 sm:$0xff]  }
  0xe5   : > { %1875 = vmatprep.mubr.bf16.mxu1 %v16241_v10  ;;  %v15208_v10 = vld [vmem:[%s16248_s25 + $0x6c] ss:$16 sps:$4 sm:$0xff]   ;;  %v15353_v24 = vld [vmem:[%s16248_s25 + $0x328] ss:$16 sps:$4 sm:$0xff]  }
  0xe7   : > { %1846 = vmatpush1.bf16.msra.mxu1 %v15188_v33  ;;  %1768 = vmatpush1.bf16.msra.mxu0 %v15191_v34  ;;  %v15277_v33 = vld [vmem:[%s16248_s25 + $0x2cc] ss:$16 sps:$4 sm:$0xff]   ;;  %v15272_v34 = vld [vmem:[%s16248_s25 + $0x108] ss:$16 sps:$4 sm:$0xff]  }
  0xe8   : > { %1847 = vmatprep.subr.bf16.mxu1 %v15196_v35  ;;  %1769 = vmatprep.subr.bf16.mxu0 %v15199_v36  ;;  %v15275_v35 = vld [vmem:[%s16248_s25 + $0x2c8] ss:$16 sps:$4 sm:$0xff]   ;;  %v15280_v36 = vld [vmem:[%s16248_s25 + $0x4ec] ss:$16 sps:$4 sm:$0xff]  }
  0xeb   : > { %1848 = vmatpush1.bf16.msra.mxu1 %v15194_v37  ;;  %1770 = vmatpush1.bf16.msra.mxu0 %v15197_v38  ;;  %v15283_v37 = vld [vmem:[%s16248_s25 + $0x2ac] ss:$16 sps:$4 sm:$0xff]   ;;  %v15278_v38 = vld [vmem:[%s16248_s25 + $0x4e8] ss:$16 sps:$4 sm:$0xff]  }
  0xec   : > { %1849 = vmatprep.subr.bf16.mxu1 %v15202_v39  ;;  %1771 = vmatprep.subr.bf16.mxu0 %v15205_v40  ;;  %v15281_v39 = vld [vmem:[%s16248_s25 + $0x2a8] ss:$16 sps:$4 sm:$0xff]   ;;  %v15286_v40 = vld [vmem:[%s16248_s25 + $0x4cc] ss:$16 sps:$4 sm:$0xff]  }
  0xef   : > { %1850 = vmatpush1.bf16.msra.mxu1 %v15200_v41  ;;  %1772 = vmatpush1.bf16.msra.mxu0 %v15203_v42  ;;  %v15289_v41 = vld [vmem:[%s16248_s25 + $0x28c] ss:$16 sps:$4 sm:$0xff]   ;;  %v15284_v42 = vld [vmem:[%s16248_s25 + $0x4c8] ss:$16 sps:$4 sm:$0xff]  }
  0xf0   : > { %1851 = vmatprep.subr.bf16.mxu1 %v15208_v10  ;;  %1773 = vmatprep.subr.bf16.mxu0 %v15211_v44  ;;  %v15295_v10 = vld [vmem:[%s16248_s25 + $0x26c] ss:$16 sps:$4 sm:$0xff]   ;;  %v15290_v44 = vld [vmem:[%s16248_s25 + $0x4a8] ss:$16 sps:$4 sm:$0xff]  }
  0xf3   : > { %1852 = vmatpush1.bf16.msra.mxu1 %v15206_v46  ;;  %1774 = vmatpush1.bf16.msra.mxu0 %v15209_v47  ;;  %v15298_v46 = vld [vmem:[%s16248_s25 + $0x48c] ss:$16 sps:$4 sm:$0xff]  }
  0xf4   : > { %1853 = vmatprep.subr.bf16.mxu1 %v15214_v48  ;;  %1775 = vmatprep.subr.bf16.mxu0 %v15217_v49  ;;  %v15301_v47 = vld [vmem:[%s16248_s25 + $0x24c] ss:$16 sps:$4 sm:$0xff]   ;;  %v15296_v48 = vld [vmem:[%s16248_s25 + $0x488] ss:$16 sps:$4 sm:$0xff]  }
  0xf5   : > { %v15299_v49 = vld [vmem:[%s16248_s25 + $0x248] ss:$16 sps:$4 sm:$0xff]  }
  0xf7   : > { %1854 = vmatpush1.bf16.msra.mxu1 %v15212_v50  ;;  %1776 = vmatpush1.bf16.msra.mxu0 %v15215_v51  ;;  %v15307_v50 = vld [vmem:[%s16248_s25 + $0x22c] ss:$16 sps:$4 sm:$0xff]   ;;  %v15302_v51 = vld [vmem:[%s16248_s25 + $0x468] ss:$16 sps:$4 sm:$0xff]  }
  0xf8   : > { %1855 = vmatprep.subr.bf16.mxu1 %v15220_v52  ;;  %1777 = vmatprep.subr.bf16.mxu0 %v15223_v53  ;;  %v15305_v52 = vld [vmem:[%s16248_s25 + $0x228] ss:$16 sps:$4 sm:$0xff]   ;;  %v15310_v53 = vld [vmem:[%s16248_s25 + $0x44c] ss:$16 sps:$4 sm:$0xff]  }
  0xfb   : > { %1856 = vmatpush1.bf16.msra.mxu1 %v15218_v54  ;;  %1778 = vmatpush2.bf16.msra.mxu0 %v15221_v55  ;;  %v15313_v54 = vld [vmem:[%s16248_s25 + $0x20c] ss:$16 sps:$4 sm:$0xff]   ;;  %v15308_v55 = vld [vmem:[%s16248_s25 + $0x448] ss:$16 sps:$4 sm:$0xff]  }
  0xfc   : > { %1857 = vmatprep.subr.bf16.mxu1 %v15226_v56  ;;  %1779 = vmatprep.subr.bf16.mxu0 %v15229_v57  ;;  %v15311_v56 = vld [vmem:[%s16248_s25 + $0x208] ss:$16 sps:$4 sm:$0xff]   ;;  %v15316_v57 = vld [vmem:[%s16248_s25 + $0x42c] ss:$16 sps:$4 sm:$0xff]  }
  0xff   : > { %1858 = vmatpush1.bf16.msra.mxu1 %v15224_v58  ;;  %1780 = vmatpush2.bf16.msra.mxu0 %v15227_v59  ;;  %v15319_v58 = vld [vmem:[%s16248_s25 + $0x3ec] ss:$16 sps:$4 sm:$0xff]   ;;  %v15314_v59 = vld [vmem:[%s16248_s25 + $0x428] ss:$16 sps:$4 sm:$0xff]  }
 0x100   : > { %1859 = vmatprep.subr.bf16.mxu1 %v15232_v60  ;;  %1781 = vmatprep.subr.bf16.mxu0 %v15235_v61  ;;  %v15317_v60 = vld [vmem:[%s16248_s25 + $0x3e8] ss:$16 sps:$4 sm:$0xff]   ;;  %v15322_v61 = vld [vmem:[%s16248_s25 + $0x40c] ss:$16 sps:$4 sm:$0xff]  }
 0x103   : > { %1860 = vmatpush2.bf16.msra.mxu1 %v15230_v62  ;;  %1782 = vmatpush2.bf16.msra.mxu0 %v15233_v63  ;;  %v15325_v62 = vld [vmem:[%s16248_s25 + $0x3cc] ss:$16 sps:$4 sm:$0xff]   ;;  %v15320_v63 = vld [vmem:[%s16248_s25 + $0x408] ss:$16 sps:$4 sm:$0xff]  }
 0x104   : > { %1861 = vmatprep.subr.bf16.mxu1 %v15238_v0  ;;  %1783 = vmatprep.subr.bf16.mxu0 %v15241_v1  ;;  %v15323_v0 = vld [vmem:[%s16248_s25 + $0x3c8] ss:$16 sps:$4 sm:$0xff]   ;;  %v15328_v1 = vld [vmem:[%s16248_s25 + $0x5ec] ss:$16 sps:$4 sm:$0xff]  }
 0x107   : > { %1862 = vmatpush2.bf16.msra.mxu1 %v15236_v2  ;;  %1784 = vmatpush2.bf16.msra.mxu0 %v15239_v3  ;;  %v15331_v2 = vld [vmem:[%s16248_s25 + $0x3ac] ss:$16 sps:$4 sm:$0xff]   ;;  %v15326_v3 = vld [vmem:[%s16248_s25 + $0x5e8] ss:$16 sps:$4 sm:$0xff]  }
 0x108   : > { %1863 = vmatprep.subr.bf16.mxu1 %v15244_v4  ;;  %1785 = vmatprep.subr.bf16.mxu0 %v15247_v5  ;;  %v15329_v4 = vld [vmem:[%s16248_s25 + $0x3a8] ss:$16 sps:$4 sm:$0xff]   ;;  %v15334_v5 = vld [vmem:[%s16248_s25 + $0x5cc] ss:$16 sps:$4 sm:$0xff]  }
 0x10b   : > { %1864 = vmatpush2.bf16.msra.mxu1 %v15242_v6  ;;  %1786 = vmatpush2.bf16.msra.mxu0 %v15245_v7  ;;  %v15337_v6 = vld [vmem:[%s16248_s25 + $0x38c] ss:$16 sps:$4 sm:$0xff]   ;;  %v15332_v7 = vld [vmem:[%s16248_s25 + $0x5c8] ss:$16 sps:$4 sm:$0xff]  }
 0x10c   : > { %1865 = vmatprep.subr.bf16.mxu1 %v15250_v8  ;;  %1787 = vmatprep.subr.bf16.mxu0 %v15253_v9  ;;  %v15335_v8 = vld [vmem:[%s16248_s25 + $0x388] ss:$16 sps:$4 sm:$0xff]   ;;  %v15340_v9 = vld [vmem:[%s16248_s25 + $0x5ac] ss:$16 sps:$4 sm:$0xff]  }
 0x10f   : > { %1866 = vmatpush2.bf16.msra.mxu1 %v15248_v12  ;;  %1788 = vmatpush2.bf16.msra.mxu0 %v15251_v13  ;;  %v15343_v12 = vld [vmem:[%s16248_s25 + $0x36c] ss:$16 sps:$4 sm:$0xff]   ;;  %v15338_v13 = vld [vmem:[%s16248_s25 + $0x5a8] ss:$16 sps:$4 sm:$0xff]  }
 0x110   : > { %1867 = vmatprep.subr.bf16.mxu1 %v15256_v14  ;;  %1789 = vmatprep.subr.bf16.mxu0 %v15259_v15  ;;  %v15341_v14 = vld [vmem:[%s16248_s25 + $0x368] ss:$16 sps:$4 sm:$0xff]   ;;  %v15346_v15 = vld [vmem:[%s16248_s25 + $0x58c] ss:$16 sps:$4 sm:$0xff]  }
 0x113   : > { %1868 = vmatpush2.bf16.msra.mxu1 %v15254_v16  ;;  %1790 = vmatpush2.bf16.msra.mxu0 %v15257_v17  ;;  %v15349_v16 = vld [vmem:[%s16248_s25 + $0x34c] ss:$16 sps:$4 sm:$0xff]   ;;  %v15344_v17 = vld [vmem:[%s16248_s25 + $0x588] ss:$16 sps:$4 sm:$0xff]  }
 0x114   : > { %1869 = vmatprep.subr.bf16.mxu1 %v15262_v20  ;;  %1791 = vmatprep.subr.bf16.mxu0 %v15265_v21  ;;  %v15347_v20 = vld [vmem:[%s16248_s25 + $0x348] ss:$16 sps:$4 sm:$0xff]   ;;  %v15352_v21 = vld [vmem:[%s16248_s25 + $0x56c] ss:$16 sps:$4 sm:$0xff]  }
 0x117   : > { %1870 = vmatpush2.bf16.msra.mxu1 %v15260_v22  ;;  %1792 = vmatpush2.bf16.msra.mxu0 %v15263_v23  ;;  %v15355_v22 = vld [vmem:[%s16248_s25 + $0x32c] ss:$16 sps:$4 sm:$0xff]   ;;  %v15350_v23 = vld [vmem:[%s16248_s25 + $0x568] ss:$16 sps:$4 sm:$0xff]  }
 0x118   : > { %1871 = vmatprep.subr.bf16.mxu1 %v15268_v25  ;;  %1884 = vmatprep.subr.bf16.mxu0 %v15271_v27  ;;  %v15358_v25 = vld [vmem:[%s16248_s25 + $0x54c] ss:$16 sps:$4 sm:$0xff]  }
 0x119   : > { %v15361_v27 = vld [vmem:[%s16248_s25 + $0x30c] ss:$16 sps:$4 sm:$0xff]  }
 0x11a   : > { %1794 = vmatmul.mubr.bf16.vlgmr.msra.gmra.mxu0 %v16395_v28 }
 0x11b   : > { %1872 = vmatpush2.bf16.msra.mxu1 %v15266_v29  ;;  %1885 = vmatpush1.bf16.msra.mxu0 %v15269_v31  ;;  %v15356_v29 = vld [vmem:[%s16248_s25 + $0x548] ss:$16 sps:$4 sm:$0xff]  }
 0x11c   : > { %1873 = vmatprep.subr.bf16.mxu1 %v15274_v32  ;;  %1886 = vmatprep.subr.bf16.mxu0 %v15277_v33  ;;  %v15359_v31 = vld [vmem:[%s16248_s25 + $0x308] ss:$16 sps:$4 sm:$0xff]   ;;  %v15364_v32 = vld [vmem:[%s16248_s25 + $0x52c] ss:$16 sps:$4 sm:$0xff]  }
 0x11d   : > { %1916 = vmatprep.mubr.bf16.mxu0 %v16243_v11  ;;  %v15287_v11 = vld [vmem:[%s16248_s25 + $0x288] ss:$16 sps:$4 sm:$0xff]   ;;  %v15367_v33 = vld [vmem:[%s16248_s25 + $0x60c] ss:$16 sps:$4 sm:$0xff]  }
 0x11f   : > { %1874 = vmatpush2.bf16.msra.mxu1 %v15272_v34  ;;  %1887 = vmatpush1.bf16.msra.mxu0 %v15275_v35  ;;  %v2071_v34 = vld [vmem:[%s16206_s12 + $0x1c0] sm:$0xff] }
 0x120   : > { %1925 = vmatprep.subr.bf16.mxu1 %v15280_v36  ;;  %1888 = vmatprep.subr.bf16.mxu0 %v15283_v37  ;;  %v2075_v35 = vld [vmem:[%s16206_s12 + $0x1e0] sm:$0xff] }
 0x121   : > { %v15362_v36 = vld [vmem:[%s16248_s25 + $0x528] ss:$16 sps:$4 sm:$0xff]  }
 0x122   : > { %1876 = vmatmul.mubr.bf16.vlgmr.msra.gmra.mxu1 %v16318_v18  ;;  %v15293_v18 = vld [vmem:[%s16248_s25 + $0x268] ss:$16 sps:$4 sm:$0xff]  }
 0x123   : > { %1926 = vmatpush1.bf16.msra.mxu1 %v15278_v38  ;;  %1889 = vmatpush1.bf16.msra.mxu0 %v15281_v39  ;;  %v15365_v37 = vld [vmem:[%s16248_s25 + $0x608] ss:$16 sps:$4 sm:$0xff]   ;;  %v15370_v38 = vld [vmem:[%s16248_s25 + $0x50c] ss:$16 sps:$4 sm:$0xff]   ;;  %v13633_v39 = vcombine.high %v2071_v34, %v2075_v35 }
 0x124   : > { %1927 = vmatprep.subr.bf16.mxu1 %v15286_v40  ;;  %1890 = vmatprep.subr.bf16.mxu0 %v15289_v41  ;;  %v15368_v40 = vld [vmem:[%s16248_s25 + $0x508] ss:$16 sps:$4 sm:$0xff]  }
 0x125   : > { %1957 = vmatprep.mubr.bf16.mxu1 %v16352_v45  ;;  %v15304_v45 = vld [vmem:[%s16248_s25 + $0x46c] ss:$16 sps:$4 sm:$0xff]  }
 0x126   : > { %v2063_v41 = vld [vmem:[%s16206_s12 + $0x180] sm:$0xff] }
 0x127   : > { %1928 = vmatpush1.bf16.msra.mxu1 %v15284_v42  ;;  %1891 = vmatpush1.bf16.msra.mxu0 %v15287_v11  ;;  %v2067_v42 = vld [vmem:[%s16206_s12 + $0x1a0] sm:$0xff]  ;;  %v13632_v11 = vcombine.low %v2071_v34, %v2075_v35 }
 0x128   : > { %1929 = vmatprep.subr.bf16.mxu1 %v15292_v43  ;;  %1892 = vmatprep.subr.bf16.mxu0 %v15295_v10  ;;  %v13625_v43 = vcombine.high %v2063_v41, %v2067_v42  ;;  %v2055_v10 = vld [vmem:[%s16206_s12 + $0x140] sm:$0xff] }
 0x129   : > { %v2127_v34 = vld [vmem:[%s16206_s12 + $0x380] sm:$0xff] }
 0x12a   : > { %v2131_v35 = vld [vmem:[%s16206_s12 + $0x3a0] sm:$0xff] }
 0x12b   : > { %1930 = vmatpush1.bf16.msra.mxu1 %v15290_v44  ;;  %1893 = vmatpush1.bf16.msra.mxu0 %v15293_v18  ;;  %v2059_v44 = vld [vmem:[%s16206_s12 + $0x160] sm:$0xff]  ;;  %v16478_v18 = vld [vmem:[%s16206_s12 + $0x1c8] sm:$0xff] }
 0x12c   : > { %1931 = vmatprep.subr.bf16.mxu1 %v15298_v46  ;;  %1894 = vmatprep.subr.bf16.mxu0 %v15301_v47  ;;  %v13617_v47 = vcombine.high %v2055_v10, %v2059_v44 }
 0x12f   : > { %1932 = vmatpush1.bf16.msra.mxu1 %v15296_v48  ;;  %1895 = vmatpush1.bf16.msra.mxu0 %v15299_v49  ;;  %v2047_v48 = vld [vmem:[%s16206_s12 + $0x100] sm:$0xff] }
 0x130   : > { %1933 = vmatprep.subr.bf16.mxu1 %v15304_v45  ;;  %1896 = vmatprep.subr.bf16.mxu0 %v15307_v50  ;;  %v2051_v49 = vld [vmem:[%s16206_s12 + $0x120] sm:$0xff]  ;;  %v13616_v45 = vcombine.low %v2055_v10, %v2059_v44  ;;  %v13688_v44 = vcombine.low %v2127_v34, %v2131_v35 }
 0x131   : > { %v2199_v50 = vld [vmem:[%s16206_s12 + $0x5c0] sm:$0xff] }
 0x133   : > { %1934 = vmatpush1.bf16.msra.mxu1 %v15302_v51  ;;  %1897 = vmatpush1.bf16.msra.mxu0 %v15305_v52  ;;  %v2203_v51 = vld [vmem:[%s16206_s12 + $0x5e0] sm:$0xff] }
 0x134   : > { %1935 = vmatprep.subr.bf16.mxu1 %v15310_v53  ;;  %1898 = vmatprep.subr.bf16.mxu0 %v15313_v54  ;;  %v2043_v52 = vld [vmem:[%s16206_s12 + $0xe0] sm:$0xff]  ;;  %v13760_v53 = vcombine.low %v2199_v50, %v2203_v51  ;;  %v13761_v54 = vcombine.high %v2199_v50, %v2203_v51 }
 0x137   : > { %1936 = vmatpush1.bf16.msra.mxu1 %v15308_v55  ;;  %1899 = vmatpush1.bf16.msra.mxu0 %v15311_v56  ;;  %v13608_v55 = vcombine.low %v2047_v48, %v2051_v49 }
 0x138   : > { %1937 = vmatprep.subr.bf16.mxu1 %v15316_v57  ;;  %1900 = vmatprep.subr.bf16.mxu0 %v15319_v58  ;;  %v2191_v57 = vld [vmem:[%s16206_s12 + $0x580] sm:$0xff] }
 0x139   : > { %v2195_v58 = vld [vmem:[%s16206_s12 + $0x5a0] sm:$0xff] }
 0x13b   : > { %1938 = vmatpush1.bf16.msra.mxu1 %v15314_v59  ;;  %1901 = vmatpush2.bf16.msra.mxu0 %v15317_v60  ;;  %v2031_v59 = vld [vmem:[%s16206_s12 + $0x80] sm:$0xff] }
 0x13c   : > { %1939 = vmatprep.subr.bf16.mxu1 %v15322_v61  ;;  %1902 = vmatprep.subr.bf16.mxu0 %v15325_v62  ;;  %v2035_v60 = vld [vmem:[%s16206_s12 + $0xa0] sm:$0xff]  ;;  %v13752_v61 = vcombine.low %v2191_v57, %v2195_v58  ;;  %v13753_v62 = vcombine.high %v2191_v57, %v2195_v58 }
 0x13f   : > { %1940 = vmatpush1.bf16.msra.mxu1 %v15320_v63  ;;  %1903 = vmatpush2.bf16.msra.mxu0 %v15323_v0  ;;  %v13593_v0 = vcombine.high %v2031_v59, %v2035_v60 }
 0x140   : > { %1941 = vmatprep.subr.bf16.mxu1 %v15328_v1  ;;  %1904 = vmatprep.subr.bf16.mxu0 %v15331_v2  ;;  %v2183_v1 = vld [vmem:[%s16206_s12 + $0x540] sm:$0xff] }
 0x141   : > { %v2187_v2 = vld [vmem:[%s16206_s12 + $0x560] sm:$0xff] }
 0x143   : > { %1942 = vmatpush2.bf16.msra.mxu1 %v15326_v3  ;;  %1905 = vmatpush2.bf16.msra.mxu0 %v15329_v4  ;;  %v2023_v3 = vld [vmem:[%s16206_s12 + $0x40] sm:$0xff] }
 0x144   : > { %1943 = vmatprep.subr.bf16.mxu1 %v15334_v5  ;;  %1906 = vmatprep.subr.bf16.mxu0 %v15337_v6  ;;  %v2027_v4 = vld [vmem:[%s16206_s12 + $0x60] sm:$0xff]  ;;  %v13744_v5 = vcombine.low %v2183_v1, %v2187_v2  ;;  %v13745_v6 = vcombine.high %v2183_v1, %v2187_v2 }
 0x147   : > { %1944 = vmatpush2.bf16.msra.mxu1 %v15332_v7  ;;  %1907 = vmatpush2.bf16.msra.mxu0 %v15335_v8  ;;  %v13592_v7 = vcombine.low %v2031_v59, %v2035_v60  ;;  %v13585_v8 = vcombine.high %v2023_v3, %v2027_v4  ;;  %v2255_v60 = vld [vmem:[%s16206_s12 + $0x780] sm:$0xff] }
 0x148   : > { %1945 = vmatprep.subr.bf16.mxu1 %v15340_v9  ;;  %1908 = vmatprep.subr.bf16.mxu0 %v15343_v12  ;;  %v2175_v9 = vld [vmem:[%s16206_s12 + $0x500] sm:$0xff] }
 0x149   : > { %v2179_v12 = vld [vmem:[%s16206_s12 + $0x520] sm:$0xff] }
 0x14b   : > { %1946 = vmatpush2.bf16.msra.mxu1 %v15338_v13  ;;  %1909 = vmatpush2.bf16.msra.mxu0 %v15341_v14  ;;  %v2015_v13 = vld [vmem:[%s16206_s12] sm:$0xff] }
 0x14c   : > { %1947 = vmatprep.subr.bf16.mxu1 %v15346_v15  ;;  %1910 = vmatprep.subr.bf16.mxu0 %v15349_v16  ;;  %v2019_v14 = vld [vmem:[%s16206_s12 + $0x20] sm:$0xff]  ;;  %v13736_v15 = vcombine.low %v2175_v9, %v2179_v12  ;;  %v13737_v16 = vcombine.high %v2175_v9, %v2179_v12 }
 0x14f   : > { %1948 = vmatpush2.bf16.msra.mxu1 %v15344_v17  ;;  %1911 = vmatpush2.bf16.msra.mxu0 %v15347_v20  ;;  %v13584_v17 = vcombine.low %v2023_v3, %v2027_v4  ;;  %v13577_v20 = vcombine.high %v2015_v13, %v2019_v14  ;;  %v2247_v4 = vld [vmem:[%s16206_s12 + $0x740] sm:$0xff] }
 0x150   : > { %1949 = vmatprep.subr.bf16.mxu1 %v15352_v21  ;;  %1912 = vmatprep.subr.bf16.mxu0 %v15355_v22  ;;  %v2167_v21 = vld [vmem:[%s16206_s12 + $0x4c0] sm:$0xff] }
 0x151   : > { %v2171_v22 = vld [vmem:[%s16206_s12 + $0x4e0] sm:$0xff] }
 0x153   : > { %1950 = vmatpush2.bf16.msra.mxu1 %v15350_v23  ;;  %1913 = vmatpush2.bf16.msra.mxu0 %v15353_v24  ;;  %v2135_v23 = vld [vmem:[%s16206_s12 + $0x3c0] sm:$0xff] }
 0x154   : > { %1951 = vmatprep.subr.bf16.mxu1 %v15358_v25  ;;  %1914 = vmatprep.subr.bf16.mxu0 %v15361_v27  ;;  %v2139_v24 = vld [vmem:[%s16206_s12 + $0x3e0] sm:$0xff]  ;;  %v13728_v25 = vcombine.low %v2167_v21, %v2171_v22  ;;  %v13729_v27 = vcombine.high %v2167_v21, %v2171_v22 }
 0x157   : > { %1952 = vmatpush2.bf16.msra.mxu1 %v15356_v29  ;;  %1915 = vmatpush2.bf16.msra.mxu0 %v15359_v31  ;;  %v13576_v29 = vcombine.low %v2015_v13, %v2019_v14  ;;  %v13697_v31 = vcombine.high %v2135_v23, %v2139_v24  ;;  %v2239_v14 = vld [vmem:[%s16206_s12 + $0x700] sm:$0xff] }
 0x158   : > { %1953 = vmatprep.subr.bf16.mxu1 %v15364_v32  ;;  %1980 = vmatprep.subr.bf16.mxu0 %v15367_v33  ;;  %v2159_v32 = vld [vmem:[%s16206_s12 + $0x480] sm:$0xff] }
 0x159   : > { %v2163_v33 = vld [vmem:[%s16206_s12 + $0x4a0] sm:$0xff] }
 0x15a   : > { %1917 = vmatmul.mubr.bf16.vlgmr.msra.gmra.mxu0 %v16320_v19  ;;  %v16481_v19 = vld [vmem:[%s16206_s12 + $0x1e8] sm:$0xff] }
 0x15b   : > { %1954 = vmatpush2.bf16.msra.mxu1 %v15362_v36  ;;  %1981 = vmatpush1.bf16.msra.mxu0 %v15365_v37  ;;  %v13634_v46 = vcombine.low %v16478_v18, %v16481_v19  ;;  %v13720_v36 = vcombine.low %v2159_v32, %v2163_v33  ;;  %v13721_v37 = vcombine.high %v2159_v32, %v2163_v33 }
 0x15c   : > { %1955 = vmatprep.subr.bf16.mxu1 %v15370_v38  ;;  %1998 = vmatprep.mubr.bf16.mxu0 %v15966_v26  ;;  %v13624_v26 = vcombine.low %v2063_v41, %v2067_v42  ;;  %v13696_v38 = vcombine.low %v2135_v23, %v2139_v24  ;;  %v2155_v41 = vld [vmem:[%s16206_s12 + $0x460] sm:$0xff] }
 0x15d   : > { %3627 = vmatprep.subr.bf16.mxu0 %v13633_v39  ;;  %v13689_v39 = vcombine.high %v2127_v34, %v2131_v35  ;;  %v2119_v42 = vld [vmem:[%s16206_s12 + $0x340] sm:$0xff] }
 0x15e   : > { %v2231_v24 = vld [vmem:[%s16206_s12 + $0x6c0] sm:$0xff] }
 0x15f   : > { %1956 = vmatpush2.bf16.msra.mxu1 %v15368_v40  ;;  %v2151_v40 = vld [vmem:[%s16206_s12 + $0x440] sm:$0xff] }
 0x160   : > { %3668 = vmatprep.subr.bf16.mxu1 %v13761_v54  ;;  %v13713_v10 = vcombine.high %v2151_v40, %v2155_v41  ;;  %v2103_v54 = vld [vmem:[%s16206_s12 + $0x2c0] sm:$0xff] }
 0x162   : > { %1958 = vmatmul.mubr.bf16.vlgmr.msra.gmra.mxu1 %v16395_v28  ;;  %13575 = vmatmul.mubr.msk.bf16.vlgmr.msra.gmra.mxu0 %vm1675_vm2, %v16333_v30  ;;  %v13609_v28 = vcombine.high %v2047_v48, %v2051_v49  ;;  %v2039_v30 = vld [vmem:[%s16206_s12 + $0xc0] sm:$0xff] }
 0x163   : > { %3628 = vmatpush1.bf16.msra.mxu0 %v13632_v11  ;;  %v13601_v56 = vcombine.high %v2039_v30, %v2043_v52  ;;  %3669 = vmatpush1.bf16.msra.mxu1 %v13760_v53  ;;  %v13600_v63 = vcombine.low %v2039_v30, %v2043_v52  ;;  %v2123_v11 = vld [vmem:[%s16206_s12 + $0x360] sm:$0xff] }
 0x164   : > { %3629 = vmatprep.subr.bf16.mxu0 %v13625_v43  ;;  %3670 = vmatprep.subr.bf16.mxu1 %v13753_v62  ;;  %v13712_v43 = vcombine.low %v2151_v40, %v2155_v41  ;;  %v2147_v48 = vld [vmem:[%s16206_s12 + $0x420] sm:$0xff]  ;;  %v13680_v51 = vcombine.low %v2119_v42, %v2123_v11 }
 0x165   : > { %v2111_v49 = vld [vmem:[%s16206_s12 + $0x300] sm:$0xff] }
 0x166   : > { %v2263_v52 = vld [vmem:[%s16206_s12 + $0x7c0] sm:$0xff] }
 0x167   : > { %3630 = vmatpush1.bf16.msra.mxu0 %v13624_v26  ;;  %3671 = vmatpush1.bf16.msra.mxu1 %v13752_v61  ;;  %v13681_v26 = vcombine.high %v2119_v42, %v2123_v11  ;;  %v2267_v53 = vld [vmem:[%s16206_s12 + $0x7e0] sm:$0xff] }
 0x168   : > { %3631 = vmatprep.subr.bf16.mxu0 %v13617_v47  ;;  %3672 = vmatprep.subr.bf16.mxu1 %v13745_v6  ;;  %v2143_v47 = vld [vmem:[%s16206_s12 + $0x400] sm:$0xff]  ;;  %v13825_v57 = vcombine.high %v2263_v52, %v2267_v53 }
 0x169   : > { %v13705_v50 = vcombine.high %v2143_v47, %v2147_v48  ;;  %v2259_v61 = vld [vmem:[%s16206_s12 + $0x7a0] sm:$0xff] }
 0x16a   : > { %v2095_v62 = vld [vmem:[%s16206_s12 + $0x280] sm:$0xff]  ;;  %v13817_v1 = vcombine.high %v2255_v60, %v2259_v61 }
 0x16b   : > { %3632 = vmatpush1.bf16.msra.mxu0 %v13616_v45  ;;  %3673 = vmatpush1.bf16.msra.mxu1 %v13744_v5  ;;  %v2115_v45 = vld [vmem:[%s16206_s12 + $0x320] sm:$0xff] }
 0x16c   : > { %3633 = vmatprep.subr.bf16.mxu0 %v13609_v28  ;;  %3674 = vmatprep.subr.bf16.mxu1 %v13737_v16  ;;  %v13704_v28 = vcombine.low %v2143_v47, %v2147_v48  ;;  %v13673_v30 = vcombine.high %v2111_v49, %v2115_v45  ;;  %v13672_v58 = vcombine.low %v2111_v49, %v2115_v45  ;;  %v2251_v5 = vld [vmem:[%s16206_s12 + $0x760] sm:$0xff] }
 0x16d   : > { %v2087_v6 = vld [vmem:[%s16206_s12 + $0x240] sm:$0xff]  ;;  %v13809_v9 = vcombine.high %v2247_v4, %v2251_v5 }
 0x16e   : > { %v2079_v16 = vld [vmem:[%s16206_s12 + $0x200] sm:$0xff] }
 0x16f   : > { %3634 = vmatpush1.bf16.msra.mxu0 %v13608_v55  ;;  %3675 = vmatpush1.bf16.msra.mxu1 %v13736_v15  ;;  %v2107_v55 = vld [vmem:[%s16206_s12 + $0x2e0] sm:$0xff] }
 0x170   : > { %3635 = vmatprep.subr.bf16.mxu0 %v13601_v56  ;;  %3676 = vmatprep.subr.bf16.mxu1 %v13729_v27  ;;  %v13824_v56 = vcombine.low %v2263_v52, %v2267_v53  ;;  %v13665_v59 = vcombine.high %v2103_v54, %v2107_v55  ;;  %v13664_v2 = vcombine.low %v2103_v54, %v2107_v55  ;;  %v2243_v15 = vld [vmem:[%s16206_s12 + $0x720] sm:$0xff]  ;;  %v16549_v54 = vld [vmem:[%s16206_s12 + $0x5c8] sm:$0xff] }
 0x171   : > { %v13801_v21 = vcombine.high %v2239_v14, %v2243_v15  ;;  %v16552_v55 = vld [vmem:[%s16206_s12 + $0x5e8] sm:$0xff] }
 0x173   : > { %3636 = vmatpush1.bf16.msra.mxu0 %v13600_v63  ;;  %3677 = vmatpush1.bf16.msra.mxu1 %v13728_v25  ;;  %v2099_v63 = vld [vmem:[%s16206_s12 + $0x2a0] sm:$0xff] }
 0x174   : > { %3637 = vmatprep.subr.bf16.mxu0 %v13593_v0  ;;  %3678 = vmatprep.subr.bf16.mxu1 %v13721_v37  ;;  %v13816_v0 = vcombine.low %v2255_v60, %v2259_v61  ;;  %v13657_v3 = vcombine.high %v2095_v62, %v2099_v63  ;;  %v13656_v12 = vcombine.low %v2095_v62, %v2099_v63  ;;  %v2235_v25 = vld [vmem:[%s16206_s12 + $0x6e0] sm:$0xff] }
 0x175   : > { %v13793_v27 = vcombine.high %v2231_v24, %v2235_v25  ;;  %v13792_v32 = vcombine.low %v2231_v24, %v2235_v25  ;;  %v13635_v37 = vcombine.high %v16478_v18, %v16481_v19  ;;  %v2040_v24 = vld [vmem:[%s16206_s12 + $0xc8] sm:$0xff] }
 0x176   : > { %v2044_v18 = vld [vmem:[%s16206_s12 + $0xe8] sm:$0xff] }
 0x177   : > { %3638 = vmatpush1.bf16.msra.mxu0 %v13592_v7  ;;  %3679 = vmatpush1.bf16.msra.mxu1 %v13720_v36  ;;  %v2091_v7 = vld [vmem:[%s16206_s12 + $0x260] sm:$0xff]  ;;  %v2032_v25 = vld [vmem:[%s16206_s12 + $0x88] sm:$0xff] }
 0x178   : > { %3639 = vmatprep.subr.bf16.mxu0 %v13585_v8  ;;  %3680 = vmatprep.subr.bf16.mxu1 %v13713_v10  ;;  %v13808_v8 = vcombine.low %v2247_v4, %v2251_v5  ;;  %v13649_v13 = vcombine.high %v2087_v6, %v2091_v7  ;;  %v13648_v22 = vcombine.low %v2087_v6, %v2091_v7 }
 0x17b   : > { %3640 = vmatpush1.bf16.msra.mxu0 %v13584_v17  ;;  %3681 = vmatpush1.bf16.msra.mxu1 %v13712_v43  ;;  %v2083_v17 = vld [vmem:[%s16206_s12 + $0x220] sm:$0xff] }
 0x17c   : > { %3641 = vmatprep.subr.bf16.mxu0 %v13577_v20  ;;  %3682 = vmatprep.subr.bf16.mxu1 %v13705_v50  ;;  %v13800_v20 = vcombine.low %v2239_v14, %v2243_v15  ;;  %v13641_v23 = vcombine.high %v2079_v16, %v2083_v17  ;;  %v13640_v34 = vcombine.low %v2079_v16, %v2083_v17  ;;  %v2211_v50 = vld [vmem:[%s16206_s12 + $0x620] sm:$0xff]  ;;  %v2048_v17 = vld [vmem:[%s16206_s12 + $0x108] sm:$0xff] }
 0x17f   : > { %3642 = vmatpush1.bf16.msra.mxu0 %v13576_v29  ;;  %3683 = vmatpush1.bf16.msra.mxu1 %v13704_v28  ;;  %v2207_v28 = vld [vmem:[%s16206_s12 + $0x600] sm:$0xff] }
 0x180   : > { %3643 = vmatprep.subr.bf16.mxu0 %v13697_v31  ;;  %3684 = vmatprep.subr.bf16.mxu1 %v13825_v57  ;;  %v13768_v52 = vcombine.low %v2207_v28, %v2211_v50  ;;  %v13762_v57 = vcombine.low %v16549_v54, %v16552_v55 }
 0x183   : > { %3644 = vmatpush2.bf16.msra.mxu0 %v13696_v38  ;;  %3685 = vmatpush2.bf16.msra.mxu1 %v13824_v56  ;;  %v2223_v38 = vld [vmem:[%s16206_s12 + $0x680] sm:$0xff]  ;;  %v13763_v56 = vcombine.high %v16549_v54, %v16552_v55 }
 0x184   : > { %3645 = vmatprep.subr.bf16.mxu0 %v13689_v39  ;;  %3686 = vmatprep.subr.bf16.mxu1 %v13817_v1  ;;  %v2227_v39 = vld [vmem:[%s16206_s12 + $0x6a0] sm:$0xff] }
 0x185   : > { %v13785_v40 = vcombine.high %v2223_v38, %v2227_v39  ;;  %v13784_v11 = vcombine.low %v2223_v38, %v2227_v39 }
 0x187   : > { %3646 = vmatpush2.bf16.msra.mxu0 %v13688_v44  ;;  %3687 = vmatpush2.bf16.msra.mxu1 %v13816_v0  ;;  %v2215_v44 = vld [vmem:[%s16206_s12 + $0x640] sm:$0xff] }
 0x188   : > { %3647 = vmatprep.subr.bf16.mxu0 %v13681_v26  ;;  %3688 = vmatprep.subr.bf16.mxu1 %v13809_v9  ;;  %v2219_v26 = vld [vmem:[%s16206_s12 + $0x660] sm:$0xff]  ;;  %v2056_v9 = vld [vmem:[%s16206_s12 + $0x148] sm:$0xff] }
 0x189   : > { %v13777_v47 = vcombine.high %v2215_v44, %v2219_v26  ;;  %v13776_v49 = vcombine.low %v2215_v44, %v2219_v26 }
 0x18b   : > { %3648 = vmatpush2.bf16.msra.mxu0 %v13680_v51  ;;  %3689 = vmatpush2.bf16.msra.mxu1 %v13808_v8  ;;  %v13769_v51 = vcombine.high %v2207_v28, %v2211_v50  ;;  %v2112_v28 = vld [vmem:[%s16206_s12 + $0x308] sm:$0xff] }
 0x18c   : > { %3649 = vmatprep.subr.bf16.mxu0 %v13673_v30  ;;  %3690 = vmatprep.subr.bf16.mxu1 %v13801_v21  ;;  %v2116_v50 = vld [vmem:[%s16206_s12 + $0x328] sm:$0xff] }
 0x18f   : > { %3650 = vmatpush2.bf16.msra.mxu0 %v13672_v58  ;;  %3691 = vmatpush2.bf16.msra.mxu1 %v13800_v20  ;;  %v2052_v20 = vld [vmem:[%s16206_s12 + $0x128] sm:$0xff] }
 0x190   : > { %3651 = vmatprep.subr.bf16.mxu0 %v13665_v59  ;;  %3692 = vmatprep.subr.bf16.mxu1 %v13793_v27  ;;  %v13610_v19 = vcombine.low %v2048_v17, %v2052_v20  ;;  %v2036_v27 = vld [vmem:[%s16206_s12 + $0xa8] sm:$0xff] }
 0x193   : > { %3652 = vmatpush2.bf16.msra.mxu0 %v13664_v2  ;;  %3693 = vmatpush2.bf16.msra.mxu1 %v13792_v32  ;;  %v2064_v2 = vld [vmem:[%s16206_s12 + $0x188] sm:$0xff] }
 0x194   : > { %3653 = vmatprep.subr.bf16.mxu0 %v13657_v3  ;;  %3694 = vmatprep.subr.bf16.mxu1 %v13785_v40  ;;  %v2068_v3 = vld [vmem:[%s16206_s12 + $0x1a8] sm:$0xff] }
 0x195   : > { %v13627_v8 = vcombine.high %v2064_v2, %v2068_v3  ;;  %v13626_v14 = vcombine.low %v2064_v2, %v2068_v3  ;;  %v2024_v32 = vld [vmem:[%s16206_s12 + $0x48] sm:$0xff] }
 0x196   : > { %v2136_v40 = vld [vmem:[%s16206_s12 + $0x3c8] sm:$0xff] }
 0x197   : > { %3654 = vmatpush2.bf16.msra.mxu0 %v13656_v12  ;;  %3695 = vmatpush2.bf16.msra.mxu1 %v13784_v11  ;;  %v2060_v12 = vld [vmem:[%s16206_s12 + $0x168] sm:$0xff] }
 0x198   : > { %3655 = vmatprep.subr.bf16.mxu0 %v13649_v13  ;;  %3696 = vmatprep.subr.bf16.mxu1 %v13777_v47  ;;  %v13619_v16 = vcombine.high %v2056_v9, %v2060_v12  ;;  %v2120_v47 = vld [vmem:[%s16206_s12 + $0x348] sm:$0xff] }
 0x199   : > { %v2080_v3 = vld [vmem:[%s16206_s12 + $0x208] sm:$0xff] }
 0x19a   : > { %v1713_v29 = vpop.f32.mrf.mxu0  ;;  %v1754_v31 = vpop.f32.mrf.mxu1 }
 0x19b   : > { %v1755_v33 = vadd.f32 %v1754_v31, %v1713_v29  ;;  %3656 = vmatpush2.bf16.msra.mxu0 %v13648_v22  ;;  %3697 = vmatpush2.bf16.msra.mxu1 %v13776_v49  ;;  %v13618_v22 = vcombine.low %v2056_v9, %v2060_v12  ;;  %v13602_v29 = vcombine.low %v2040_v24, %v2044_v18 }
 0x19c   : > { %v1715_v35 = vpop.f32.mrf.mxu0  ;;  %v1756_v36 = vpop.f32.mrf.mxu1  ;;  %3657 = vmatprep.subr.bf16.mxu0 %v13641_v23  ;;  %3698 = vmatprep.subr.bf16.mxu1 %v13769_v51  ;;  %v13611_v23 = vcombine.high %v2048_v17, %v2052_v20  ;;  %v13595_v31 = vcombine.high %v2032_v25, %v2036_v27 }
 0x19d   : > { %v1757_v59 = vadd.f32 %v1756_v36, %v1715_v35  ;;  %v2016_v36 = vld [vmem:[%s16206_s12 + $0x8] sm:$0xff] }
 0x19e   : > { %v1717_v41 = vpop.f32.mrf.mxu0  ;;  %v1758_v42 = vpop.f32.mrf.mxu1 }
 0x19f   : > { %3658 = vmatpush2.bf16.msra.mxu0 %v13640_v34  ;;  %3699 = vmatpush2.bf16.msra.mxu1 %v13768_v52  ;;  %v13594_v34 = vcombine.low %v2032_v25, %v2036_v27  ;;  %v2140_v41 = vld [vmem:[%s16206_s12 + $0x3e8] sm:$0xff] }
 0x1a0   : > { %v1718_v43 = vpop.f32.mrf.mxu0  ;;  %v1759_v10 = vpop.f32.mrf.mxu1  ;;  %3709 = vmatprep.subr.bf16.mxu0 %v13635_v37  ;;  %3750 = vmatprep.subr.bf16.mxu1 %v13763_v56  ;;  %v2020_v37 = vld [vmem:[%s16206_s12 + $0x28] sm:$0xff]  ;;  %v13699_v11 = vcombine.high %v2136_v40, %v2140_v41  ;;  %v13698_v44 = vcombine.low %v2136_v40, %v2140_v41  ;;  %v13674_v56 = vcombine.low %v2112_v28, %v2116_v50 }
 0x1a1   : > { %v13579_v39 = vcombine.high %v2016_v36, %v2020_v37  ;;  %v13578_v42 = vcombine.low %v2016_v36, %v2020_v37  ;;  %v2128_v43 = vld [vmem:[%s16206_s12 + $0x388] sm:$0xff] }
 0x1a2   : > { %v1836_v48 = vpop.f32.mrf.mxu1  ;;  %v2132_v10 = vld [vmem:[%s16206_s12 + $0x3a8] sm:$0xff] }
 0x1a3   : > { %v13691_v26 = vcombine.high %v2128_v43, %v2132_v10  ;;  %v13690_v49 = vcombine.low %v2128_v43, %v2132_v10  ;;  %v2104_v52 = vld [vmem:[%s16206_s12 + $0x2c8] sm:$0xff]  ;;  %v2049_v10 = vld [vmem:[%s16206_s12 + $0x110] sm:$0xff] }
 0x1a4   : > { %v1838_v45 = vpop.f32.mrf.mxu1  ;;  %v2192_v41 = vld [vmem:[%s16206_s12 + $0x588] sm:$0xff] }
 0x1a6   : > { %v1840_v30 = vpop.f32.mrf.mxu1 }
 0x1a7   : > { %v13675_v30 = vcombine.high %v2112_v28, %v2116_v50  ;;  %v2184_v28 = vld [vmem:[%s16206_s12 + $0x548] sm:$0xff] }
 0x1a8   : > { %v1841_v53 = vpop.f32.mrf.mxu1  ;;  %v2188_v50 = vld [vmem:[%s16206_s12 + $0x568] sm:$0xff] }
 0x1a9   : > { %v2108_v53 = vld [vmem:[%s16206_s12 + $0x2e8] sm:$0xff]  ;;  %v13746_v54 = vcombine.low %v2184_v28, %v2188_v50 }
 0x1da   : > { %v1795_v58 = vpop.f32.mrf.mxu0 }
 0x1db   : > { %v1796_v60 = vadd.f32 %v1795_v58, %v1755_v33  ;;  %v2028_v33 = vld [vmem:[%s16206_s12 + $0x68] sm:$0xff]  ;;  %v13667_v58 = vcombine.high %v2104_v52, %v2108_v53 }
 0x1dc   : > { %v1797_v61 = vpop.f32.mrf.mxu0  ;;  %v13587_v35 = vcombine.high %v2024_v32, %v2028_v33  ;;  %v13586_v38 = vcombine.low %v2024_v32, %v2028_v33  ;;  %v2057_v32 = vld [vmem:[%s16206_s12 + $0x150] sm:$0xff] }
 0x1dd   : > { %v1798_v62 = vadd.f32 %v1797_v61, %v1757_v59  ;;  %v1837_v63 = vadd.f32 %v1836_v48, %v1796_v60  ;;  %v2124_v48 = vld [vmem:[%s16206_s12 + $0x368] sm:$0xff]  ;;  %v13666_v61 = vcombine.low %v2104_v52, %v2108_v53  ;;  %v2061_v33 = vld [vmem:[%s16206_s12 + $0x170] sm:$0xff] }
 0x1de   : > { %v1799_v0 = vpop.f32.mrf.mxu0  ;;  %v13682_v51 = vcombine.low %v2120_v47, %v2124_v48  ;;  %v2096_v59 = vld [vmem:[%s16206_s12 + $0x288] sm:$0xff] }
 0x1df   : > { %v1839_v1 = vadd.f32 %v1838_v45, %v1798_v62  ;;  %v16562_v6 = vpack.c.bf16 %v1837_v63, %v1837_v63  ;;  %v13683_v45 = vcombine.high %v2120_v47, %v2124_v48  ;;  %v2100_v60 = vld [vmem:[%s16206_s12 + $0x2a8] sm:$0xff]  ;;  %v13620_v48 = vcombine.low %v2057_v32, %v2061_v33 }
 0x1e0   : > { %v1800_v4 = vpop.f32.mrf.mxu0  ;;  %v13659_v62 = vcombine.high %v2096_v59, %v2100_v60  ;;  %v2088_v63 = vld [vmem:[%s16206_s12 + $0x248] sm:$0xff] }
 0x1e1   : > { %v16560_v5 = vpack.c.bf16 %v1839_v1, %v1839_v1  ;;  %v2092_v0 = vld [vmem:[%s16206_s12 + $0x268] sm:$0xff]  ;;  %v13658_v1 = vcombine.low %v2096_v59, %v2100_v60 }
 0x1e2   : > { %v16564_v7 = vpop.f32.mrf.mxu1  ;;  %v13651_v2 = vcombine.high %v2088_v63, %v2092_v0  ;;  %v2084_v4 = vld [vmem:[%s16206_s12 + $0x228] sm:$0xff] }
 0x1e3   : > { %3659 = vmatprep.mubr.bf16.mxu0 %v16560_v5  ;;  %v13643_v12 = vcombine.high %v2080_v3, %v2084_v4  ;;  %v13642_v17 = vcombine.low %v2080_v3, %v2084_v4  ;;  %v2176_v59 = vld [vmem:[%s16206_s12 + $0x508] sm:$0xff]  ;;  %v2029_v3 = vld [vmem:[%s16206_s12 + $0x70] sm:$0xff] }
 0x1e4   : > { %v16569_v13 = vpop.f32.mrf.mxu1  ;;  %3660 = vmatmul.mubr.bf16.vlgmr.msra.gmra.mxu0 %v16562_v6  ;;  %v2180_v60 = vld [vmem:[%s16206_s12 + $0x528] sm:$0xff] }
 0x1e5   : > { %3710 = vmatpush1.bf16.msra.mxu0 %v13634_v46  ;;  %3741 = vmatprep.mubr.bf16.mxu0 %v16560_v5  ;;  %v13603_v46 = vcombine.high %v2040_v24, %v2044_v18  ;;  %v13738_v4 = vcombine.low %v2176_v59, %v2180_v60 }
 0x1e6   : > { %v1881_v15 = vpop.f32.mrf.mxu1  ;;  %3711 = vmatprep.subr.bf16.mxu0 %v13627_v8  ;;  %v13650_v8 = vcombine.low %v2088_v63, %v2092_v0  ;;  %v2168_v0 = vld [vmem:[%s16206_s12 + $0x4c8] sm:$0xff] }
 0x1e7   : > { %v2077_v15 = vld [vmem:[%s16206_s12 + $0x1f0] sm:$0xff] }
 0x1e8   : > { %v1882_v21 = vpop.f32.mrf.mxu1 }
 0x1e9   : > { %3712 = vmatpush1.bf16.msra.mxu0 %v13626_v14  ;;  %v2073_v14 = vld [vmem:[%s16206_s12 + $0x1d0] sm:$0xff] }
 0x1ea   : > { %3713 = vmatprep.subr.bf16.mxu0 %v13619_v16  ;;  %v13637_v21 = vcombine.high %v2073_v14, %v2077_v15 }
 0x1ed   : > { %3714 = vmatpush1.bf16.msra.mxu0 %v13618_v22  ;;  %v2065_v22 = vld [vmem:[%s16206_s12 + $0x190] sm:$0xff] }
 0x1ee   : > { %3715 = vmatprep.subr.bf16.mxu0 %v13611_v23  ;;  %v2069_v23 = vld [vmem:[%s16206_s12 + $0x1b0] sm:$0xff] }
 0x1ef   : > { %v13629_v27 = vcombine.high %v2065_v22, %v2069_v23  ;;  %v13628_v36 = vcombine.low %v2065_v22, %v2069_v23 }
 0x1f1   : > { %3716 = vmatpush1.bf16.msra.mxu0 %v13610_v19  ;;  %v13636_v19 = vcombine.low %v2073_v14, %v2077_v15  ;;  %v2160_v14 = vld [vmem:[%s16206_s12 + $0x488] sm:$0xff] }
 0x1f2   : > { %3717 = vmatprep.subr.bf16.mxu0 %v13603_v46  ;;  %v2164_v15 = vld [vmem:[%s16206_s12 + $0x4a8] sm:$0xff] }
 0x1f3   : > { %v13723_v22 = vcombine.high %v2160_v14, %v2164_v15 }
 0x1f5   : > { %3718 = vmatpush1.bf16.msra.mxu0 %v13602_v29 }
 0x1f6   : > { %3719 = vmatprep.subr.bf16.mxu0 %v13595_v31 }
 0x1f9   : > { %3720 = vmatpush1.bf16.msra.mxu0 %v13594_v34 }
 0x1fa   : > { %3721 = vmatprep.subr.bf16.mxu0 %v13587_v35 }
 0x1fd   : > { %3722 = vmatpush1.bf16.msra.mxu0 %v13586_v38 }
 0x1fe   : > { %3723 = vmatprep.subr.bf16.mxu0 %v13579_v39 }
 0x201   : > { %3724 = vmatpush1.bf16.msra.mxu0 %v13578_v42  ;;  %v2196_v42 = vld [vmem:[%s16206_s12 + $0x5a8] sm:$0xff] }
 0x202   : > { %3725 = vmatprep.subr.bf16.mxu0 %v13699_v11  ;;  %v13754_v52 = vcombine.low %v2192_v41, %v2196_v42 }
 0x205   : > { %3726 = vmatpush2.bf16.msra.mxu0 %v13698_v44  ;;  %v2053_v44 = vld [vmem:[%s16206_s12 + $0x130] sm:$0xff] }
 0x206   : > { %3727 = vmatprep.subr.bf16.mxu0 %v13691_v26  ;;  %v13612_v53 = vcombine.low %v2049_v10, %v2053_v44 }
 0x209   : > { %3728 = vmatpush2.bf16.msra.mxu0 %v13690_v49  ;;  %v13755_v49 = vcombine.high %v2192_v41, %v2196_v42  ;;  %v2125_v41 = vld [vmem:[%s16206_s12 + $0x370] sm:$0xff] }
 0x20a   : > { %3729 = vmatprep.subr.bf16.mxu0 %v13683_v45  ;;  %v13613_v45 = vcombine.high %v2049_v10, %v2053_v44  ;;  %v2256_v44 = vld [vmem:[%s16206_s12 + $0x788] sm:$0xff] }
 0x20d   : > { %3730 = vmatpush2.bf16.msra.mxu0 %v13682_v51  ;;  %v2041_v51 = vld [vmem:[%s16206_s12 + $0xd0] sm:$0xff] }
 0x20e   : > { %3731 = vmatprep.subr.bf16.mxu0 %v13675_v30  ;;  %v2045_v30 = vld [vmem:[%s16206_s12 + $0xf0] sm:$0xff] }
 0x20f   : > { %v13604_v55 = vcombine.low %v2041_v51, %v2045_v30 }
 0x211   : > { %3732 = vmatpush2.bf16.msra.mxu0 %v13674_v56  ;;  %v13747_v56 = vcombine.high %v2184_v28, %v2188_v50 }
 0x212   : > { %3733 = vmatprep.subr.bf16.mxu0 %v13667_v58  ;;  %v13605_v58 = vcombine.high %v2041_v51, %v2045_v30 }
 0x215   : > { %3734 = vmatpush2.bf16.msra.mxu0 %v13666_v61  ;;  %v2033_v61 = vld [vmem:[%s16206_s12 + $0x90] sm:$0xff] }
 0x216   : > { %3735 = vmatprep.subr.bf16.mxu0 %v13659_v62  ;;  %v2037_v62 = vld [vmem:[%s16206_s12 + $0xb0] sm:$0xff] }
 0x217   : > { %v13597_v63 = vcombine.high %v2033_v61, %v2037_v62 }
 0x219   : > { %3736 = vmatpush2.bf16.msra.mxu0 %v13658_v1  ;;  %v2172_v1 = vld [vmem:[%s16206_s12 + $0x4e8] sm:$0xff] }
 0x21a   : > { %v1918_v9 = vpop.f32.mrf.mxu0  ;;  %3737 = vmatprep.subr.bf16.mxu0 %v13651_v2  ;;  %v2025_v2 = vld [vmem:[%s16206_s12 + $0x50] sm:$0xff] }
 0x21b   : > { %v1919_v18 = vadd.f32 %v1918_v9, %v16564_v7  ;;  %v13731_v9 = vcombine.high %v2168_v0, %v2172_v1 }
 0x21c   : > { %v1920_v16 = vpop.f32.mrf.mxu0 }
 0x21d   : > { %3738 = vmatpush2.bf16.msra.mxu0 %v13650_v8  ;;  %v1921_v29 = vadd.f32 %v1920_v16, %v16569_v13  ;;  %v13621_v13 = vcombine.high %v2057_v32, %v2061_v33  ;;  %v13596_v8 = vcombine.low %v2033_v61, %v2037_v62  ;;  %v2017_v16 = vld [vmem:[%s16206_s12 + $0x10] sm:$0xff]  ;;  %v2144_v32 = vld [vmem:[%s16206_s12 + $0x408] sm:$0xff] }
 0x21e   : > { %v1922_v20 = vpop.f32.mrf.mxu0  ;;  %3739 = vmatprep.subr.bf16.mxu0 %v13643_v12  ;;  %v13589_v12 = vcombine.high %v2025_v2, %v2029_v3  ;;  %v2148_v33 = vld [vmem:[%s16206_s12 + $0x428] sm:$0xff] }
 0x21f   : > { %v13730_v20 = vcombine.low %v2168_v0, %v2172_v1  ;;  %v13706_v42 = vcombine.low %v2144_v32, %v2148_v33 }
 0x220   : > { %v1923_v24 = vpop.f32.mrf.mxu0 }
 0x221   : > { %3740 = vmatpush2.bf16.msra.mxu0 %v13642_v17  ;;  %v2021_v17 = vld [vmem:[%s16206_s12 + $0x30] sm:$0xff]  ;;  %v2152_v24 = vld [vmem:[%s16206_s12 + $0x448] sm:$0xff] }
 0x222   : > { %v1959_v46 = vpop.f32.mrf.mxu1  ;;  %v2000_v25 = vpop.f32.mrf.mxu0  ;;  %3791 = vmatprep.subr.bf16.mxu0 %v13637_v21  ;;  %v13588_v21 = vcombine.low %v2025_v2, %v2029_v3  ;;  %v13581_v23 = vcombine.high %v2017_v16, %v2021_v17 }
 0x223   : > { %v1960_v31 = vadd.f32 %v1959_v46, %v1919_v18  ;;  %v2156_v18 = vld [vmem:[%s16206_s12 + $0x468] sm:$0xff]  ;;  %v2141_v46 = vld [vmem:[%s16206_s12 + $0x3f0] sm:$0xff] }
 0x224   : > { %v1961_v34 = vpop.f32.mrf.mxu1  ;;  %3742 = vmatmul.mubr.bf16.vlgmr.msra.gmra.mxu0 %v16562_v6  ;;  %v2002_v35 = vpop.f32.mrf.mxu0 }
 0x225   : > { %v1962_v7 = vadd.f32 %v1961_v34, %v1921_v29  ;;  %3792 = vmatpush1.bf16.msra.mxu0 %v13636_v19  ;;  %3823 = vmatprep.mubr.bf16.mxu0 %v16560_v5  ;;  %v2001_v37 = vadd.f32 %v2000_v25, %v1960_v31  ;;  %v2137_v19 = vld [vmem:[%s16206_s12 + $0x3d0] sm:$0xff]  ;;  %v13722_v25 = vcombine.low %v2160_v14, %v2164_v15 }
 0x226   : > { %v1963_v38 = vpop.f32.mrf.mxu1  ;;  %v2004_v39 = vpop.f32.mrf.mxu0  ;;  %3793 = vmatprep.subr.bf16.mxu0 %v13629_v27  ;;  %v13580_v27 = vcombine.low %v2017_v16, %v2021_v17  ;;  %v13715_v29 = vcombine.high %v2152_v24, %v2156_v18  ;;  %v13701_v31 = vcombine.high %v2137_v19, %v2141_v46  ;;  %v2129_v34 = vld [vmem:[%s16206_s12 + $0x390] sm:$0xff] }
 0x227   : > { %v2003_v40 = vadd.f32 %v2002_v35, %v1962_v7  ;;  %v16618_v47 = vpack.c.bf16 %v2001_v37, %v2001_v37  ;;  %v2133_v35 = vld [vmem:[%s16206_s12 + $0x3b0] sm:$0xff]  ;;  %v13714_v7 = vcombine.low %v2152_v24, %v2156_v18  ;;  %v13707_v37 = vcombine.high %v2144_v32, %v2148_v33  ;;  %v2264_v39 = vld [vmem:[%s16206_s12 + $0x7c8] sm:$0xff] }
 0x228   : > { %v1964_v11 = vpop.f32.mrf.mxu1  ;;  %v2005_v43 = vpop.f32.mrf.mxu0  ;;  %v13693_v38 = vcombine.high %v2129_v34, %v2133_v35 }
 0x229   : > { %v16616_v26 = vpack.c.bf16 %v2003_v40, %v2003_v40  ;;  %3794 = vmatpush1.bf16.msra.mxu0 %v13628_v36  ;;  %v13700_v36 = vcombine.low %v2137_v19, %v2141_v46  ;;  %v2121_v40 = vld [vmem:[%s16206_s12 + $0x350] sm:$0xff]  ;;  %v13692_v11 = vcombine.low %v2129_v34, %v2133_v35 }
 0x22a   : > { %3795 = vmatprep.subr.bf16.mxu0 %v13621_v13  ;;  %v2268_v13 = vld [vmem:[%s16206_s12 + $0x7e8] sm:$0xff]  ;;  %v13685_v10 = vcombine.high %v2121_v40, %v2125_v41  ;;  %v13684_v50 = vcombine.low %v2121_v40, %v2125_v41 }
 0x22b   : > { %3700 = vmatprep.mubr.bf16.mxu1 %v16616_v26  ;;  %v13827_v43 = vcombine.high %v2264_v39, %v2268_v13  ;;  %v13826_v28 = vcombine.low %v2264_v39, %v2268_v13 }
 0x22c   : > { %3701 = vmatmul.mubr.bf16.vlgmr.msra.gmra.mxu1 %v16618_v47 }
 0x22d   : > { %3751 = vmatpush1.bf16.msra.mxu1 %v13762_v57  ;;  %3782 = vmatprep.mubr.bf16.mxu1 %v16616_v26  ;;  %v13739_v57 = vcombine.high %v2176_v59, %v2180_v60 }
 0x22e   : > { %3796 = vmatpush1.bf16.msra.mxu0 %v13620_v48  ;;  %3752 = vmatprep.subr.bf16.mxu1 %v13755_v49  ;;  %v2260_v48 = vld [vmem:[%s16206_s12 + $0x7a8] sm:$0xff]  ;;  %v2113_v49 = vld [vmem:[%s16206_s12 + $0x310] sm:$0xff] }
 0x22f   : > { %3797 = vmatprep.subr.bf16.mxu0 %v13613_v45  ;;  %v2117_v45 = vld [vmem:[%s16206_s12 + $0x330] sm:$0xff]  ;;  %v13819_v51 = vcombine.high %v2256_v44, %v2260_v48  ;;  %v13818_v59 = vcombine.low %v2256_v44, %v2260_v48 }
 0x230   : > { %v13677_v30 = vcombine.high %v2113_v49, %v2117_v45  ;;  %v13676_v60 = vcombine.low %v2113_v49, %v2117_v45 }
 0x231   : > { %3753 = vmatpush1.bf16.msra.mxu1 %v13754_v52  ;;  %v2248_v52 = vld [vmem:[%s16206_s12 + $0x748] sm:$0xff] }
 0x232   : > { %3798 = vmatpush1.bf16.msra.mxu0 %v13612_v53  ;;  %3754 = vmatprep.subr.bf16.mxu1 %v13747_v56  ;;  %v2252_v53 = vld [vmem:[%s16206_s12 + $0x768] sm:$0xff]  ;;  %v2105_v56 = vld [vmem:[%s16206_s12 + $0x2d0] sm:$0xff] }
 0x233   : > { %3799 = vmatprep.subr.bf16.mxu0 %v13605_v58  ;;  %v2109_v58 = vld [vmem:[%s16206_s12 + $0x2f0] sm:$0xff]  ;;  %v13811_v61 = vcombine.high %v2248_v52, %v2252_v53  ;;  %v13810_v0 = vcombine.low %v2248_v52, %v2252_v53 }
 0x234   : > { %v13669_v62 = vcombine.high %v2105_v56, %v2109_v58  ;;  %v13668_v1 = vcombine.low %v2105_v56, %v2109_v58  ;;  %v2185_v58 = vld [vmem:[%s16206_s12 + $0x550] sm:$0xff] }
 0x235   : > { %3755 = vmatpush1.bf16.msra.mxu1 %v13746_v54  ;;  %v2240_v54 = vld [vmem:[%s16206_s12 + $0x708] sm:$0xff] }
 0x236   : > { %3800 = vmatpush1.bf16.msra.mxu0 %v13604_v55  ;;  %3756 = vmatprep.subr.bf16.mxu1 %v13739_v57  ;;  %v2244_v55 = vld [vmem:[%s16206_s12 + $0x728] sm:$0xff]  ;;  %v2097_v57 = vld [vmem:[%s16206_s12 + $0x290] sm:$0xff] }
 0x237   : > { %3801 = vmatprep.subr.bf16.mxu0 %v13597_v63  ;;  %v2101_v63 = vld [vmem:[%s16206_s12 + $0x2b0] sm:$0xff]  ;;  %v13803_v2 = vcombine.high %v2240_v54, %v2244_v55  ;;  %v13802_v14 = vcombine.low %v2240_v54, %v2244_v55 }
 0x238   : > { %v13661_v3 = vcombine.high %v2097_v57, %v2101_v63  ;;  %v13660_v15 = vcombine.low %v2097_v57, %v2101_v63  ;;  %v2177_v63 = vld [vmem:[%s16206_s12 + $0x510] sm:$0xff] }
 0x239   : > { %3757 = vmatpush1.bf16.msra.mxu1 %v13738_v4  ;;  %v2232_v4 = vld [vmem:[%s16206_s12 + $0x6c8] sm:$0xff] }
 0x23a   : > { %3802 = vmatpush1.bf16.msra.mxu0 %v13596_v8  ;;  %3758 = vmatprep.subr.bf16.mxu1 %v13731_v9  ;;  %v2236_v8 = vld [vmem:[%s16206_s12 + $0x6e8] sm:$0xff]  ;;  %v2089_v9 = vld [vmem:[%s16206_s12 + $0x250] sm:$0xff] }
 0x23b   : > { %3803 = vmatprep.subr.bf16.mxu0 %v13589_v12  ;;  %v2093_v12 = vld [vmem:[%s16206_s12 + $0x270] sm:$0xff]  ;;  %v13795_v16 = vcombine.high %v2232_v4, %v2236_v8  ;;  %v13794_v24 = vcombine.low %v2232_v4, %v2236_v8 }
 0x23c   : > { %v13653_v17 = vcombine.high %v2089_v9, %v2093_v12  ;;  %v13652_v18 = vcombine.low %v2089_v9, %v2093_v12  ;;  %v2169_v12 = vld [vmem:[%s16206_s12 + $0x4d0] sm:$0xff] }
 0x23d   : > { %3759 = vmatpush1.bf16.msra.mxu1 %v13730_v20  ;;  %v2224_v20 = vld [vmem:[%s16206_s12 + $0x688] sm:$0xff] }
 0x23e   : > { %3804 = vmatpush1.bf16.msra.mxu0 %v13588_v21  ;;  %3760 = vmatprep.subr.bf16.mxu1 %v13723_v22  ;;  %v2228_v21 = vld [vmem:[%s16206_s12 + $0x6a8] sm:$0xff]  ;;  %v2081_v22 = vld [vmem:[%s16206_s12 + $0x210] sm:$0xff] }
 0x23f   : > { %3805 = vmatprep.subr.bf16.mxu0 %v13581_v23  ;;  %v2085_v23 = vld [vmem:[%s16206_s12 + $0x230] sm:$0xff]  ;;  %v13787_v19 = vcombine.high %v2224_v20, %v2228_v21  ;;  %v13786_v32 = vcombine.low %v2224_v20, %v2228_v21 }
 0x240   : > { %v13645_v46 = vcombine.high %v2081_v22, %v2085_v23  ;;  %v13644_v33 = vcombine.low %v2081_v22, %v2085_v23  ;;  %v2161_v23 = vld [vmem:[%s16206_s12 + $0x490] sm:$0xff] }
 0x241   : > { %3761 = vmatpush1.bf16.msra.mxu1 %v13722_v25  ;;  %v2216_v25 = vld [vmem:[%s16206_s12 + $0x648] sm:$0xff] }
 0x242   : > { %3806 = vmatpush1.bf16.msra.mxu0 %v13580_v27  ;;  %3762 = vmatprep.subr.bf16.mxu1 %v13715_v29  ;;  %v2220_v27 = vld [vmem:[%s16206_s12 + $0x668] sm:$0xff]  ;;  %v2074_v29 = vld [vmem:[%s16206_s12 + $0x1d8] sm:$0xff] }
 0x243   : > { %3807 = vmatprep.subr.bf16.mxu0 %v13701_v31  ;;  %v2078_v31 = vld [vmem:[%s16206_s12 + $0x1f8] sm:$0xff]  ;;  %v13779_v34 = vcombine.high %v2216_v25, %v2220_v27  ;;  %v13778_v39 = vcombine.low %v2216_v25, %v2220_v27 }
 0x244   : > { %v13639_v35 = vcombine.high %v2074_v29, %v2078_v31  ;;  %v13638_v13 = vcombine.low %v2074_v29, %v2078_v31  ;;  %v2153_v31 = vld [vmem:[%s16206_s12 + $0x450] sm:$0xff] }
 0x245   : > { %3763 = vmatpush1.bf16.msra.mxu1 %v13714_v7  ;;  %v2208_v7 = vld [vmem:[%s16206_s12 + $0x608] sm:$0xff] }
 0x246   : > { %3808 = vmatpush2.bf16.msra.mxu0 %v13700_v36  ;;  %3764 = vmatprep.subr.bf16.mxu1 %v13707_v37  ;;  %v2212_v36 = vld [vmem:[%s16206_s12 + $0x628] sm:$0xff]  ;;  %v2066_v37 = vld [vmem:[%s16206_s12 + $0x198] sm:$0xff] }
 0x247   : > { %3809 = vmatprep.subr.bf16.mxu0 %v13693_v38  ;;  %v2070_v38 = vld [vmem:[%s16206_s12 + $0x1b8] sm:$0xff]  ;;  %v13771_v40 = vcombine.high %v2208_v7, %v2212_v36  ;;  %v13770_v44 = vcombine.low %v2208_v7, %v2212_v36 }
 0x248   : > { %v13631_v41 = vcombine.high %v2066_v37, %v2070_v38  ;;  %v13630_v48 = vcombine.low %v2066_v37, %v2070_v38  ;;  %v2145_v38 = vld [vmem:[%s16206_s12 + $0x410] sm:$0xff] }
 0x249   : > { %3765 = vmatpush1.bf16.msra.mxu1 %v13706_v42  ;;  %v2201_v42 = vld [vmem:[%s16206_s12 + $0x5d0] sm:$0xff] }
 0x24a   : > { %3810 = vmatpush2.bf16.msra.mxu0 %v13692_v11  ;;  %3766 = vmatprep.subr.bf16.mxu1 %v13827_v43  ;;  %v2205_v11 = vld [vmem:[%s16206_s12 + $0x5f0] sm:$0xff]  ;;  %v2058_v43 = vld [vmem:[%s16206_s12 + $0x158] sm:$0xff] }
 0x24b   : > { %3811 = vmatprep.subr.bf16.mxu0 %v13685_v10  ;;  %v2062_v10 = vld [vmem:[%s16206_s12 + $0x178] sm:$0xff]  ;;  %v13765_v49 = vcombine.high %v2201_v42, %v2205_v11  ;;  %v13764_v52 = vcombine.low %v2201_v42, %v2205_v11 }
 0x24c   : > { %v13623_v45 = vcombine.high %v2058_v43, %v2062_v10  ;;  %v13622_v53 = vcombine.low %v2058_v43, %v2062_v10  ;;  %v2265_v10 = vld [vmem:[%s16206_s12 + $0x7d0] sm:$0xff] }
 0x24d   : > { %3767 = vmatpush2.bf16.msra.mxu1 %v13826_v28  ;;  %v2193_v28 = vld [vmem:[%s16206_s12 + $0x590] sm:$0xff] }
 0x24e   : > { %3812 = vmatpush2.bf16.msra.mxu0 %v13684_v50  ;;  %3768 = vmatprep.subr.bf16.mxu1 %v13819_v51  ;;  %v2197_v50 = vld [vmem:[%s16206_s12 + $0x5b0] sm:$0xff]  ;;  %v2050_v51 = vld [vmem:[%s16206_s12 + $0x118] sm:$0xff] }
 0x24f   : > { %3813 = vmatprep.subr.bf16.mxu0 %v13677_v30  ;;  %v2054_v30 = vld [vmem:[%s16206_s12 + $0x138] sm:$0xff]  ;;  %v13757_v56 = vcombine.high %v2193_v28, %v2197_v50 }
 0x250   : > { %v13614_v54 = vcombine.low %v2050_v51, %v2054_v30 }
 0x251   : > { %3769 = vmatpush2.bf16.msra.mxu1 %v13818_v59  ;;  %v2189_v59 = vld [vmem:[%s16206_s12 + $0x570] sm:$0xff] }
 0x252   : > { %3814 = vmatpush2.bf16.msra.mxu0 %v13676_v60  ;;  %3770 = vmatprep.subr.bf16.mxu1 %v13811_v61  ;;  %v2042_v60 = vld [vmem:[%s16206_s12 + $0xd8] sm:$0xff]  ;;  %v13749_v55 = vcombine.high %v2185_v58, %v2189_v59 }
 0x253   : > { %3815 = vmatprep.subr.bf16.mxu0 %v13669_v62  ;;  %v2046_v61 = vld [vmem:[%s16206_s12 + $0xf8] sm:$0xff]  ;;  %v13756_v62 = vcombine.low %v2193_v28, %v2197_v50 }
 0x254   : > { %v13607_v57 = vcombine.high %v2042_v60, %v2046_v61  ;;  %v13606_v4 = vcombine.low %v2042_v60, %v2046_v61  ;;  %v2249_v61 = vld [vmem:[%s16206_s12 + $0x750] sm:$0xff] }
 0x255   : > { %3771 = vmatpush2.bf16.msra.mxu1 %v13810_v0  ;;  %v2181_v0 = vld [vmem:[%s16206_s12 + $0x530] sm:$0xff] }
 0x256   : > { %3816 = vmatpush2.bf16.msra.mxu0 %v13668_v1  ;;  %3772 = vmatprep.subr.bf16.mxu1 %v13803_v2  ;;  %v2034_v1 = vld [vmem:[%s16206_s12 + $0x98] sm:$0xff]  ;;  %v13741_v8 = vcombine.high %v2177_v63, %v2181_v0 }
 0x257   : > { %3817 = vmatprep.subr.bf16.mxu0 %v13661_v3  ;;  %v2038_v2 = vld [vmem:[%s16206_s12 + $0xb8] sm:$0xff]  ;;  %v13748_v3 = vcombine.low %v2185_v58, %v2189_v59 }
 0x258   : > { %v13599_v9 = vcombine.high %v2034_v1, %v2038_v2  ;;  %v13598_v20 = vcombine.low %v2034_v1, %v2038_v2  ;;  %v2241_v2 = vld [vmem:[%s16206_s12 + $0x710] sm:$0xff] }
 0x259   : > { %3773 = vmatpush2.bf16.msra.mxu1 %v13802_v14  ;;  %v2173_v14 = vld [vmem:[%s16206_s12 + $0x4f0] sm:$0xff] }
 0x25a   : > { %3818 = vmatpush2.bf16.msra.mxu0 %v13660_v15  ;;  %3774 = vmatprep.subr.bf16.mxu1 %v13795_v16  ;;  %v2026_v15 = vld [vmem:[%s16206_s12 + $0x58] sm:$0xff]  ;;  %v13733_v21 = vcombine.high %v2169_v12, %v2173_v14 }
 0x25b   : > { %3819 = vmatprep.subr.bf16.mxu0 %v13653_v17  ;;  %v2030_v16 = vld [vmem:[%s16206_s12 + $0x78] sm:$0xff]  ;;  %v13740_v17 = vcombine.low %v2177_v63, %v2181_v0 }
 0x25c   : > { %v13591_v22 = vcombine.high %v2026_v15, %v2030_v16  ;;  %v13590_v25 = vcombine.low %v2026_v15, %v2030_v16  ;;  %v2233_v16 = vld [vmem:[%s16206_s12 + $0x6d0] sm:$0xff] }
 0x25d   : > { %3775 = vmatpush2.bf16.msra.mxu1 %v13794_v24  ;;  %v2165_v24 = vld [vmem:[%s16206_s12 + $0x4b0] sm:$0xff] }
 0x25e   : > { %3820 = vmatpush2.bf16.msra.mxu0 %v13652_v18  ;;  %3776 = vmatprep.subr.bf16.mxu1 %v13787_v19  ;;  %v2018_v18 = vld [vmem:[%s16206_s12 + $0x18] sm:$0xff]  ;;  %v13725_v27 = vcombine.high %v2161_v23, %v2165_v24 }
 0x25f   : > { %3821 = vmatprep.subr.bf16.mxu0 %v13645_v46  ;;  %v2022_v19 = vld [vmem:[%s16206_s12 + $0x38] sm:$0xff]  ;;  %v13732_v46 = vcombine.low %v2169_v12, %v2173_v14 }
 0x260   : > { %v13583_v29 = vcombine.high %v2018_v18, %v2022_v19  ;;  %v13582_v7 = vcombine.low %v2018_v18, %v2022_v19  ;;  %v2225_v19 = vld [vmem:[%s16206_s12 + $0x690] sm:$0xff] }
 0x261   : > { %3777 = vmatpush2.bf16.msra.mxu1 %v13786_v32  ;;  %v2157_v32 = vld [vmem:[%s16206_s12 + $0x470] sm:$0xff] }
 0x262   : > { %3822 = vmatpush2.bf16.msra.mxu0 %v13644_v33  ;;  %3778 = vmatprep.subr.bf16.mxu1 %v13779_v34  ;;  %v2138_v33 = vld [vmem:[%s16206_s12 + $0x3d8] sm:$0xff]  ;;  %v13717_v36 = vcombine.high %v2153_v31, %v2157_v32 }
 0x263   : > { %3873 = vmatprep.subr.bf16.mxu0 %v13639_v35  ;;  %v2142_v34 = vld [vmem:[%s16206_s12 + $0x3f8] sm:$0xff]  ;;  %v13724_v35 = vcombine.low %v2161_v23, %v2165_v24 }
 0x264   : > { %v13703_v37 = vcombine.high %v2138_v33, %v2142_v34  ;;  %v13702_v42 = vcombine.low %v2138_v33, %v2142_v34  ;;  %v2217_v34 = vld [vmem:[%s16206_s12 + $0x650] sm:$0xff] }
 0x265   : > { %3779 = vmatpush2.bf16.msra.mxu1 %v13778_v39  ;;  %3824 = vmatmul.mubr.bf16.vlgmr.msra.gmra.mxu0 %v16562_v6  ;;  %v2149_v39 = vld [vmem:[%s16206_s12 + $0x430] sm:$0xff] }
 0x266   : > { %3874 = vmatpush1.bf16.msra.mxu0 %v13638_v13  ;;  %3905 = vmatprep.mubr.bf16.mxu0 %v16560_v5  ;;  %v13615_v5 = vcombine.high %v2050_v51, %v2054_v30  ;;  %v2130_v13 = vld [vmem:[%s16206_s12 + $0x398] sm:$0xff]  ;;  %v13709_v11 = vcombine.high %v2145_v38, %v2149_v39  ;;  %v2257_v30 = vld [vmem:[%s16206_s12 + $0x790] sm:$0xff] }
 0x267   : > { %3780 = vmatprep.subr.bf16.mxu1 %v13771_v40  ;;  %3875 = vmatprep.subr.bf16.mxu0 %v13631_v41  ;;  %v2134_v40 = vld [vmem:[%s16206_s12 + $0x3b8] sm:$0xff]  ;;  %v13716_v41 = vcombine.low %v2153_v31, %v2157_v32 }
 0x268   : > { %v13695_v43 = vcombine.high %v2130_v13, %v2134_v40  ;;  %v13694_v28 = vcombine.low %v2130_v13, %v2134_v40  ;;  %v2209_v13 = vld [vmem:[%s16206_s12 + $0x610] sm:$0xff] }
 0x269   : > { %3781 = vmatpush2.bf16.msra.mxu1 %v13770_v44  ;;  %v2269_v44 = vld [vmem:[%s16206_s12 + $0x7f0] sm:$0xff] }
 0x26a   : > { %3876 = vmatpush1.bf16.msra.mxu0 %v13630_v48  ;;  %3832 = vmatprep.subr.bf16.mxu1 %v13765_v49  ;;  %v2122_v48 = vld [vmem:[%s16206_s12 + $0x358] sm:$0xff]  ;;  %v13829_v50 = vcombine.high %v2265_v10, %v2269_v44  ;;  %v2213_v40 = vld [vmem:[%s16206_s12 + $0x630] sm:$0xff] }
 0x26b   : > { %3877 = vmatprep.subr.bf16.mxu0 %v13623_v45  ;;  %v2126_v49 = vld [vmem:[%s16206_s12 + $0x378] sm:$0xff]  ;;  %v13708_v45 = vcombine.low %v2145_v38, %v2149_v39 }
 0x26c   : > { %3783 = vmatmul.mubr.bf16.vlgmr.msra.gmra.mxu1 %v16618_v47  ;;  %v13687_v51 = vcombine.high %v2122_v48, %v2126_v49  ;;  %v13686_v58 = vcombine.low %v2122_v48, %v2126_v49  ;;  %v2202_v48 = vld [vmem:[%s16206_s12 + $0x5d8] sm:$0xff] }
 0x26d   : > { %3833 = vmatpush1.bf16.msra.mxu1 %v13764_v52  ;;  %3864 = vmatprep.mubr.bf16.mxu1 %v16616_v26  ;;  %v2261_v52 = vld [vmem:[%s16206_s12 + $0x7b0] sm:$0xff]  ;;  %v2206_v49 = vld [vmem:[%s16206_s12 + $0x5f8] sm:$0xff] }
 0x26e   : > { %3878 = vmatpush1.bf16.msra.mxu0 %v13622_v53  ;;  %3834 = vmatprep.subr.bf16.mxu1 %v13757_v56  ;;  %v2114_v53 = vld [vmem:[%s16206_s12 + $0x318] sm:$0xff]  ;;  %v13821_v59 = vcombine.high %v2257_v30, %v2261_v52 }
 0x26f   : > { %3879 = vmatprep.subr.bf16.mxu0 %v13615_v5  ;;  %v2118_v56 = vld [vmem:[%s16206_s12 + $0x338] sm:$0xff]  ;;  %v13828_v5 = vcombine.low %v2265_v10, %v2269_v44  ;;  %v13773_v10 = vcombine.high %v2209_v13, %v2213_v40 }
 0x270   : > { %v13679_v60 = vcombine.high %v2114_v53, %v2118_v56  ;;  %v13678_v63 = vcombine.low %v2114_v53, %v2118_v56  ;;  %v13767_v53 = vcombine.high %v2202_v48, %v2206_v49 }
 0x271   : > { %3835 = vmatpush1.bf16.msra.mxu1 %v13756_v62  ;;  %v2253_v62 = vld [vmem:[%s16206_s12 + $0x770] sm:$0xff] }
 0x272   : > { %3880 = vmatpush1.bf16.msra.mxu0 %v13614_v54  ;;  %3836 = vmatprep.subr.bf16.mxu1 %v13749_v55  ;;  %v2106_v54 = vld [vmem:[%s16206_s12 + $0x2d8] sm:$0xff]  ;;  %v13813_v0 = vcombine.high %v2249_v61, %v2253_v62 }
 0x273   : > { %3881 = vmatprep.subr.bf16.mxu0 %v13607_v57  ;;  %v2110_v55 = vld [vmem:[%s16206_s12 + $0x2f8] sm:$0xff]  ;;  %v13820_v57 = vcombine.low %v2257_v30, %v2261_v52  ;;  %v13772_v30 = vcombine.low %v2209_v13, %v2213_v40  ;;  %v4091_v13 = vld [vmem:[%s16212_s21 + $0x3c0] sm:$0xff] }
 0x274   : > { %v13671_v1 = vcombine.high %v2106_v54, %v2110_v55  ;;  %v13670_v12 = vcombine.low %v2106_v54, %v2110_v55  ;;  %v4095_v40 = vld [vmem:[%s16212_s21 + $0x3e0] sm:$0xff] }
 0x275   : > { %3837 = vmatpush1.bf16.msra.mxu1 %v13748_v3  ;;  %v2245_v3 = vld [vmem:[%s16206_s12 + $0x730] sm:$0xff] }
 0x276   : > { %3882 = vmatpush1.bf16.msra.mxu0 %v13606_v4  ;;  %3838 = vmatprep.subr.bf16.mxu1 %v13741_v8  ;;  %v2098_v4 = vld [vmem:[%s16206_s12 + $0x298] sm:$0xff]  ;;  %v13805_v14 = vcombine.high %v2241_v2, %v2245_v3 }
 0x277   : > { %3883 = vmatprep.subr.bf16.mxu0 %v13599_v9  ;;  %v2102_v8 = vld [vmem:[%s16206_s12 + $0x2b8] sm:$0xff]  ;;  %v13812_v9 = vcombine.low %v2249_v61, %v2253_v62  ;;  %v4003_v61 = vld [vmem:[%s16212_s21 + $0x100] sm:$0xff] }
 0x278   : > { %v13663_v15 = vcombine.high %v2098_v4, %v2102_v8  ;;  %v13662_v23 = vcombine.low %v2098_v4, %v2102_v8  ;;  %v4007_v62 = vld [vmem:[%s16212_s21 + $0x120] sm:$0xff] }
 0x279   : > { %3839 = vmatpush1.bf16.msra.mxu1 %v13740_v17  ;;  %v2237_v17 = vld [vmem:[%s16206_s12 + $0x6f0] sm:$0xff] }
 0x27a   : > { %3884 = vmatpush1.bf16.msra.mxu0 %v13598_v20  ;;  %3840 = vmatprep.subr.bf16.mxu1 %v13733_v21  ;;  %v2090_v20 = vld [vmem:[%s16206_s12 + $0x258] sm:$0xff]  ;;  %v13797_v24 = vcombine.high %v2233_v16, %v2237_v17 }
 0x27b   : > { %3885 = vmatprep.subr.bf16.mxu0 %v13591_v22  ;;  %v2094_v21 = vld [vmem:[%s16206_s12 + $0x278] sm:$0xff]  ;;  %v13804_v22 = vcombine.low %v2241_v2, %v2245_v3  ;;  %v3995_v2 = vld [vmem:[%s16212_s21 + $0xc0] sm:$0xff] }
 0x27c   : > { %v13655_v18 = vcombine.high %v2090_v20, %v2094_v21  ;;  %v13654_v31 = vcombine.low %v2090_v20, %v2094_v21  ;;  %v3999_v3 = vld [vmem:[%s16212_s21 + $0xe0] sm:$0xff] }
 0x27d   : > { %3841 = vmatpush1.bf16.msra.mxu1 %v13732_v46  ;;  %v2229_v46 = vld [vmem:[%s16206_s12 + $0x6b0] sm:$0xff]  ;;  %v13856_v21 = vcombine.low %v3995_v2, %v3999_v3 }
 0x27e   : > { %3886 = vmatpush1.bf16.msra.mxu0 %v13590_v25  ;;  %3842 = vmatprep.subr.bf16.mxu1 %v13725_v27  ;;  %v2082_v25 = vld [vmem:[%s16206_s12 + $0x218] sm:$0xff]  ;;  %v13789_v32 = vcombine.high %v2225_v19, %v2229_v46 }
 0x27f   : > { %3887 = vmatprep.subr.bf16.mxu0 %v13583_v29  ;;  %v2086_v27 = vld [vmem:[%s16206_s12 + $0x238] sm:$0xff]  ;;  %v13796_v29 = vcombine.low %v2233_v16, %v2237_v17  ;;  %v3987_v16 = vld [vmem:[%s16212_s21 + $0x80] sm:$0xff] }
 0x280   : > { %v13647_v33 = vcombine.high %v2082_v25, %v2086_v27  ;;  %v13646_v38 = vcombine.low %v2082_v25, %v2086_v27  ;;  %v3991_v17 = vld [vmem:[%s16212_s21 + $0xa0] sm:$0xff] }
 0x281   : > { %3843 = vmatpush1.bf16.msra.mxu1 %v13724_v35  ;;  %v2221_v35 = vld [vmem:[%s16206_s12 + $0x670] sm:$0xff]  ;;  %v13848_v27 = vcombine.low %v3987_v16, %v3991_v17 }
 0x282   : > { %3888 = vmatpush1.bf16.msra.mxu0 %v13582_v7  ;;  %3844 = vmatprep.subr.bf16.mxu1 %v13717_v36  ;;  %v4027_v7 = vld [vmem:[%s16212_s21 + $0x1c0] sm:$0xff]  ;;  %v13781_v39 = vcombine.high %v2217_v34, %v2221_v35 }
 0x283   : > { %3889 = vmatprep.subr.bf16.mxu0 %v13703_v37  ;;  %v4031_v36 = vld [vmem:[%s16212_s21 + $0x1e0] sm:$0xff]  ;;  %v13788_v37 = vcombine.low %v2225_v19, %v2229_v46 }
 0x284   : > { %v13888_v44 = vcombine.low %v4027_v7, %v4031_v36  ;;  %v3983_v19 = vld [vmem:[%s16212_s21 + $0x60] sm:$0xff] }
 0x285   : > { %3845 = vmatpush1.bf16.msra.mxu1 %v13716_v41  ;;  %v13889_v41 = vcombine.high %v4027_v7, %v4031_v36 }
 0x286   : > { %3890 = vmatpush2.bf16.msra.mxu0 %v13702_v42  ;;  %3846 = vmatprep.subr.bf16.mxu1 %v13709_v11  ;;  %v4019_v42 = vld [vmem:[%s16212_s21 + $0x180] sm:$0xff] }
 0x287   : > { %3891 = vmatprep.subr.bf16.mxu0 %v13695_v43  ;;  %v4023_v11 = vld [vmem:[%s16212_s21 + $0x1a0] sm:$0xff]  ;;  %v13780_v43 = vcombine.low %v2217_v34, %v2221_v35 }
 0x288   : > { %v13880_v56 = vcombine.low %v4019_v42, %v4023_v11  ;;  %v3975_v34 = vld [vmem:[%s16212_s21 + $0x20] sm:$0xff] }
 0x289   : > { %3847 = vmatpush1.bf16.msra.mxu1 %v13708_v45  ;;  %v13881_v45 = vcombine.high %v4019_v42, %v4023_v11 }
 0x28a   : > { %3892 = vmatpush2.bf16.msra.mxu0 %v13694_v28  ;;  %3848 = vmatprep.subr.bf16.mxu1 %v13829_v50  ;;  %v4011_v50 = vld [vmem:[%s16212_s21 + $0x140] sm:$0xff] }
 0x28b   : > { %3893 = vmatprep.subr.bf16.mxu0 %v13687_v51  ;;  %v4015_v51 = vld [vmem:[%s16212_s21 + $0x160] sm:$0xff] }
 0x28d   : > { %3849 = vmatpush2.bf16.msra.mxu1 %v13828_v5  ;;  %v2194_v5 = vld [vmem:[%s16206_s12 + $0x598] sm:$0xff] }
 0x28e   : > { %3894 = vmatpush2.bf16.msra.mxu0 %v13686_v58  ;;  %3850 = vmatprep.subr.bf16.mxu1 %v13821_v59  ;;  %v2198_v58 = vld [vmem:[%s16206_s12 + $0x5b8] sm:$0xff]  ;;  %v13873_v59 = vcombine.high %v4011_v50, %v4015_v51 }
 0x28f   : > { %3895 = vmatprep.subr.bf16.mxu0 %v13679_v60  ;;  %v13759_v55 = vcombine.high %v2194_v5, %v2198_v58  ;;  %v13758_v4 = vcombine.low %v2194_v5, %v2198_v58  ;;  %v4075_v5 = vld [vmem:[%s16212_s21 + $0x340] sm:$0xff] }
 0x290   : > { %v4079_v58 = vld [vmem:[%s16212_s21 + $0x360] sm:$0xff] }
 0x291   : > { %3851 = vmatpush2.bf16.msra.mxu1 %v13820_v57  ;;  %v13872_v57 = vcombine.low %v4011_v50, %v4015_v51  ;;  %v13952_v51 = vcombine.low %v4091_v13, %v4095_v40 }
 0x292   : > { %3896 = vmatpush2.bf16.msra.mxu0 %v13678_v63  ;;  %3852 = vmatprep.subr.bf16.mxu1 %v13813_v0  ;;  %v2186_v63 = vld [vmem:[%s16206_s12 + $0x558] sm:$0xff] }
 0x293   : > { %3897 = vmatprep.subr.bf16.mxu0 %v13671_v1  ;;  %v2190_v0 = vld [vmem:[%s16206_s12 + $0x578] sm:$0xff]  ;;  %v13865_v1 = vcombine.high %v4003_v61, %v4007_v62 }
 0x294   : > { %v13751_v8 = vcombine.high %v2186_v63, %v2190_v0  ;;  %v13750_v20 = vcombine.low %v2186_v63, %v2190_v0 }
 0x295   : > { %3853 = vmatpush2.bf16.msra.mxu1 %v13812_v9  ;;  %v13864_v9 = vcombine.low %v4003_v61, %v4007_v62  ;;  %v2258_v62 = vld [vmem:[%s16206_s12 + $0x798] sm:$0xff] }
 0x296   : > { %3898 = vmatpush2.bf16.msra.mxu0 %v13670_v12  ;;  %3854 = vmatprep.subr.bf16.mxu1 %v13805_v14  ;;  %v2178_v12 = vld [vmem:[%s16206_s12 + $0x518] sm:$0xff] }
 0x297   : > { %3899 = vmatprep.subr.bf16.mxu0 %v13663_v15  ;;  %v2182_v14 = vld [vmem:[%s16206_s12 + $0x538] sm:$0xff]  ;;  %v13857_v15 = vcombine.high %v3995_v2, %v3999_v3 }
 0x298   : > { %v13742_v46 = vcombine.low %v2178_v12, %v2182_v14  ;;  %v2250_v2 = vld [vmem:[%s16206_s12 + $0x758] sm:$0xff] }
 0x299   : > { %3855 = vmatpush2.bf16.msra.mxu1 %v13804_v22  ;;  %v2170_v22 = vld [vmem:[%s16206_s12 + $0x4d8] sm:$0xff] }
 0x29a   : > { %3900 = vmatpush2.bf16.msra.mxu0 %v13662_v23  ;;  %3856 = vmatprep.subr.bf16.mxu1 %v13797_v24  ;;  %v2174_v23 = vld [vmem:[%s16206_s12 + $0x4f8] sm:$0xff]  ;;  %v13849_v24 = vcombine.high %v3987_v16, %v3991_v17 }
 0x29b   : > { %3901 = vmatprep.subr.bf16.mxu0 %v13655_v18  ;;  %v3979_v18 = vld [vmem:[%s16212_s21 + $0x40] sm:$0xff]  ;;  %v13735_v25 = vcombine.high %v2170_v22, %v2174_v23  ;;  %v13734_v35 = vcombine.low %v2170_v22, %v2174_v23  ;;  %v2254_v3 = vld [vmem:[%s16206_s12 + $0x778] sm:$0xff] }
 0x29c   : > { %v13840_v36 = vcombine.low %v3979_v18, %v3983_v19  ;;  %v2242_v16 = vld [vmem:[%s16206_s12 + $0x718] sm:$0xff]  ;;  %v13814_v22 = vcombine.low %v2250_v2, %v2254_v3 }
 0x29d   : > { %3857 = vmatpush2.bf16.msra.mxu1 %v13796_v29  ;;  %v2162_v29 = vld [vmem:[%s16206_s12 + $0x498] sm:$0xff] }
 0x29e   : > { %3902 = vmatpush2.bf16.msra.mxu0 %v13654_v31  ;;  %3858 = vmatprep.subr.bf16.mxu1 %v13789_v32  ;;  %v2166_v31 = vld [vmem:[%s16206_s12 + $0x4b8] sm:$0xff]  ;;  %v13841_v32 = vcombine.high %v3979_v18, %v3983_v19 }
 0x29f   : > { %3903 = vmatprep.subr.bf16.mxu0 %v13647_v33  ;;  %v3971_v33 = vld [vmem:[%s16212_s21] sm:$0xff]  ;;  %v13727_v7 = vcombine.high %v2162_v29, %v2166_v31  ;;  %v2246_v17 = vld [vmem:[%s16206_s12 + $0x738] sm:$0xff] }
 0x2a0   : > { %v13832_v11 = vcombine.low %v3971_v33, %v3975_v34  ;;  %v13807_v23 = vcombine.high %v2242_v16, %v2246_v17  ;;  %v2234_v18 = vld [vmem:[%s16206_s12 + $0x6d8] sm:$0xff] }
 0x2a1   : > { %3859 = vmatpush2.bf16.msra.mxu1 %v13788_v37  ;;  %v2154_v37 = vld [vmem:[%s16206_s12 + $0x458] sm:$0xff] }
 0x2a2   : > { %3904 = vmatpush2.bf16.msra.mxu0 %v13646_v38  ;;  %3860 = vmatprep.subr.bf16.mxu1 %v13781_v39  ;;  %v2158_v38 = vld [vmem:[%s16206_s12 + $0x478] sm:$0xff]  ;;  %v13833_v39 = vcombine.high %v3971_v33, %v3975_v34  ;;  %v2275_v33 = vlaneseq }
 0x2a3   : > { %7115 = vmatprep.subr.bf16.mxu0 %v13889_v41  ;;  %v13726_v41 = vcombine.low %v2162_v29, %v2166_v31  ;;  %v13719_v42 = vcombine.high %v2154_v37, %v2158_v38  ;;  %v2238_v19 = vld [vmem:[%s16206_s12 + $0x6f8] sm:$0xff]  ;;  %v13806_v29 = vcombine.low %v2242_v16, %v2246_v17 }
 0x2a4   : > { %v16752_v28 = vpop.f32.mrf.mxu0  ;;  %v13799_v31 = vcombine.high %v2234_v18, %v2238_v19  ;;  %v2226_v34 = vld [vmem:[%s16206_s12 + $0x698] sm:$0xff] }
 0x2a5   : > { %3861 = vmatpush2.bf16.msra.mxu1 %v13780_v43  ;;  %3906 = vmatmul.mubr.bf16.vlgmr.msra.gmra.mxu0 %v16562_v6  ;;  %v13766_v6 = vcombine.low %v2202_v48, %v2206_v49  ;;  %v2146_v43 = vld [vmem:[%s16206_s12 + $0x418] sm:$0xff]  ;;  %v4083_v48 = vld [vmem:[%s16212_s21 + $0x380] sm:$0xff] }
 0x2a6   : > { %v16757_v52 = vpop.f32.mrf.mxu0  ;;  %3862 = vmatprep.subr.bf16.mxu1 %v13773_v10  ;;  %7116 = vmatpush1.bf16.msra.mxu0 %v13888_v44  ;;  %v2150_v10 = vld [vmem:[%s16206_s12 + $0x438] sm:$0xff]  ;;  %v13953_v44 = vcombine.high %v4091_v13, %v4095_v40  ;;  %v4087_v49 = vld [vmem:[%s16212_s21 + $0x3a0] sm:$0xff]  ;;  %v16813_v40 = vshrl.u32 %v2275_v33, 7 }
 0x2a7   : > { %7117 = vmatprep.subr.bf16.mxu0 %v13881_v45  ;;  %v13718_v45 = vcombine.low %v2154_v37, %v2158_v38  ;;  %v13711_v50 = vcombine.high %v2146_v43, %v2150_v10  ;;  %v13944_v61 = vcombine.low %v4083_v48, %v4087_v49  ;;  %v4039_v37 = vld [vmem:[%s16212_s21 + $0x220] sm:$0xff]  ;;  %v13798_v38 = vcombine.low %v2234_v18, %v2238_v19 }
 0x2a8   : > { %v3665_v60 = vpop.f32.mrf.mxu0  ;;  %v4123_v33 = vld [vmem:[%s16212_s21 + $0x4c0] sm:$0xff] }
 0x2a9   : > { %3863 = vmatpush2.bf16.msra.mxu1 %v13772_v30  ;;  %v2266_v30 = vld [vmem:[%s16206_s12 + $0x7d8] sm:$0xff] }
 0x2aa   : > { %v3666_v54 = vpop.f32.mrf.mxu0  ;;  %3914 = vmatprep.subr.bf16.mxu1 %v13767_v53  ;;  %7118 = vmatpush1.bf16.msra.mxu0 %v13880_v56  ;;  %v2270_v53 = vld [vmem:[%s16206_s12 + $0x7f8] sm:$0xff]  ;;  %v13945_v56 = vcombine.high %v4083_v48, %v4087_v49 }
 0x2ab   : > { %7119 = vmatprep.subr.bf16.mxu0 %v13873_v59  ;;  %v13710_v59 = vcombine.low %v2146_v43, %v2150_v10  ;;  %v13831_v60 = vcombine.high %v2266_v30, %v2270_v53  ;;  %v13937_v54 = vcombine.high %v4075_v5, %v4079_v58  ;;  %v13830_v63 = vcombine.low %v2266_v30, %v2270_v53  ;;  %v16818_v43 = vld [vmem:[%s16212_s21 + $0x9c0] sm:$0xff]  ;;  %v2011_v53 = vld [vmem:[%s16228_s14] sm:$0x77] }
 0x2ac   : > { %3865 = vmatmul.mubr.bf16.vlgmr.msra.gmra.mxu1 %v16618_v47  ;;  %v16821_v10 = vld [vmem:[%s16212_s21 + $0x9e0] sm:$0xff] }
 0x2ad   : > { %3915 = vmatpush1.bf16.msra.mxu1 %v13766_v6  ;;  %3946 = vmatprep.mubr.bf16.mxu1 %v16616_v26  ;;  %v13743_v26 = vcombine.high %v2178_v12, %v2182_v14  ;;  %v2262_v6 = vld [vmem:[%s16206_s12 + $0x7b8] sm:$0xff]  ;;  %v13815_v14 = vcombine.high %v2250_v2, %v2254_v3  ;;  %v14145_v30 = vcombine.high %v16818_v43, %v16821_v10 }
 0x2ae   : > { %3916 = vmatprep.subr.bf16.mxu1 %v13759_v55  ;;  %7120 = vmatpush1.bf16.msra.mxu0 %v13872_v57  ;;  %v4067_v55 = vld [vmem:[%s16212_s21 + $0x300] sm:$0xff]  ;;  %v13823_v0 = vcombine.high %v2258_v62, %v2262_v6  ;;  %v13822_v12 = vcombine.low %v2258_v62, %v2262_v6 }
 0x2af   : > { %7121 = vmatprep.subr.bf16.mxu0 %v13865_v1  ;;  %v4071_v57 = vld [vmem:[%s16212_s21 + $0x320] sm:$0xff]  ;;  %v13936_v1 = vcombine.low %v4075_v5, %v4079_v58 }
 0x2b1   : > { %3917 = vmatpush1.bf16.msra.mxu1 %v13758_v4  ;;  %v13929_v4 = vcombine.high %v4067_v55, %v4071_v57 }
 0x2b2   : > { %3918 = vmatprep.subr.bf16.mxu1 %v13751_v8  ;;  %7122 = vmatpush1.bf16.msra.mxu0 %v13864_v9  ;;  %v4059_v8 = vld [vmem:[%s16212_s21 + $0x2c0] sm:$0xff] }
 0x2b3   : > { %7123 = vmatprep.subr.bf16.mxu0 %v13857_v15  ;;  %v4063_v9 = vld [vmem:[%s16212_s21 + $0x2e0] sm:$0xff]  ;;  %v13928_v15 = vcombine.low %v4067_v55, %v4071_v57 }
 0x2b5   : > { %3919 = vmatpush1.bf16.msra.mxu1 %v13750_v20  ;;  %v13921_v20 = vcombine.high %v4059_v8, %v4063_v9 }
 0x2b6   : > { %3920 = vmatprep.subr.bf16.mxu1 %v13743_v26  ;;  %7124 = vmatpush1.bf16.msra.mxu0 %v13856_v21  ;;  %v4051_v26 = vld [vmem:[%s16212_s21 + $0x280] sm:$0xff] }
 0x2b7   : > { %7125 = vmatprep.subr.bf16.mxu0 %v13849_v24  ;;  %v4055_v21 = vld [vmem:[%s16212_s21 + $0x2a0] sm:$0xff]  ;;  %v13920_v24 = vcombine.low %v4059_v8, %v4063_v9 }
 0x2b9   : > { %3921 = vmatpush1.bf16.msra.mxu1 %v13742_v46  ;;  %v13913_v46 = vcombine.high %v4051_v26, %v4055_v21 }
 0x2ba   : > { %3922 = vmatprep.subr.bf16.mxu1 %v13735_v25  ;;  %7126 = vmatpush1.bf16.msra.mxu0 %v13848_v27  ;;  %v4043_v25 = vld [vmem:[%s16212_s21 + $0x240] sm:$0xff] }
 0x2bb   : > { %7127 = vmatprep.subr.bf16.mxu0 %v13841_v32  ;;  %v4047_v27 = vld [vmem:[%s16212_s21 + $0x260] sm:$0xff]  ;;  %v13912_v32 = vcombine.low %v4051_v26, %v4055_v21 }
 0x2bc   : > { %v13904_v13 = vcombine.low %v4043_v25, %v4047_v27 }
 0x2bd   : > { %3923 = vmatpush1.bf16.msra.mxu1 %v13734_v35  ;;  %v2230_v35 = vld [vmem:[%s16206_s12 + $0x6b8] sm:$0xff] }
 0x2be   : > { %3924 = vmatprep.subr.bf16.mxu1 %v13727_v7  ;;  %7128 = vmatpush1.bf16.msra.mxu0 %v13840_v36  ;;  %v13905_v7 = vcombine.high %v4043_v25, %v4047_v27  ;;  %v4035_v36 = vld [vmem:[%s16212_s21 + $0x200] sm:$0xff] }
 0x2bf   : > { %7129 = vmatprep.subr.bf16.mxu0 %v13833_v39  ;;  %v13791_v39 = vcombine.high %v2226_v34, %v2230_v35  ;;  %v13896_v49 = vcombine.low %v4035_v36, %v4039_v37  ;;  %v4279_v25 = vld [vmem:[%s16212_s21 + $0x9a0] sm:$0xff] }
 0x2c1   : > { %3925 = vmatpush1.bf16.msra.mxu1 %v13726_v41  ;;  %v2218_v41 = vld [vmem:[%s16206_s12 + $0x658] sm:$0xff] }
 0x2c2   : > { %3926 = vmatprep.subr.bf16.mxu1 %v13719_v42  ;;  %7130 = vmatpush1.bf16.msra.mxu0 %v13832_v11  ;;  %v2222_v42 = vld [vmem:[%s16206_s12 + $0x678] sm:$0xff]  ;;  %v13897_v11 = vcombine.high %v4035_v36, %v4039_v37 }
 0x2c3   : > { %7131 = vmatprep.subr.bf16.mxu0 %v13953_v44  ;;  %v13790_v44 = vcombine.low %v2226_v34, %v2230_v35  ;;  %v13783_v48 = vcombine.high %v2218_v41, %v2222_v42  ;;  %v13782_v5 = vcombine.low %v2218_v41, %v2222_v42  ;;  %v4127_v34 = vld [vmem:[%s16212_s21 + $0x4e0] sm:$0xff]  ;;  %v14144_v35 = vcombine.low %v16818_v43, %v16821_v10 }
 0x2c4   : > { %v4271_v41 = vld [vmem:[%s16212_s21 + $0x960] sm:$0xff]  ;;  %v13985_v42 = vcombine.high %v4123_v33, %v4127_v34 }
 0x2c5   : > { %3927 = vmatpush1.bf16.msra.mxu1 %v13718_v45  ;;  %v16824_v45 = vsub.s32 0, %v16813_v40  ;;  %v4119_v43 = vld [vmem:[%s16212_s21 + $0x4a0] sm:$0xff] }
 0x2c6   : > { %3928 = vmatprep.subr.bf16.mxu1 %v13711_v50  ;;  %7132 = vmatpush2.bf16.msra.mxu0 %v13952_v51  ;;  %v2210_v50 = vld [vmem:[%s16206_s12 + $0x618] sm:$0xff] }
 0x2c7   : > { %7133 = vmatprep.subr.bf16.mxu0 %v13945_v56  ;;  %v2214_v51 = vld [vmem:[%s16206_s12 + $0x638] sm:$0xff]  ;;  %v16832_v56 = vsub.s32 4, %v16813_v40  ;;  %s11591_s12 = ssub.s32 1, %s19618_s20 }
 0x2c8   : > { %v13775_v58 = vcombine.high %v2210_v50, %v2214_v51 }
 0x2c9   : > { %3929 = vmatpush1.bf16.msra.mxu1 %v13710_v59  ;;  %v2278_v59 = vrot.slane %v2011_v53, %v16824_v45  ;;  %v2282_v6 = vrot.slane %v2011_v53, %v16832_v56  ;;  %v4111_v53 = vld [vmem:[%s16212_s21 + $0x460] sm:$0xff] }
 0x2ca   : > { %3930 = vmatprep.subr.bf16.mxu1 %v13831_v60  ;;  %7134 = vmatpush2.bf16.msra.mxu0 %v13944_v61  ;;  %v4155_v60 = vld [vmem:[%s16212_s21 + $0x5c0] sm:$0xff] }
 0x2cb   : > { %7135 = vmatprep.subr.bf16.mxu0 %v13937_v54  ;;  %v4159_v61 = vld [vmem:[%s16212_s21 + $0x5e0] sm:$0xff]  ;;  %v13774_v54 = vcombine.low %v2210_v50, %v2214_v51  ;;  %v2322_v3 = vrot.slane %v2282_v6, %v16824_v45 }
 0x2cc   : > { %v14017_v57 = vcombine.high %v4155_v60, %v4159_v61  ;;  %v4263_v50 = vld [vmem:[%s16212_s21 + $0x920] sm:$0xff] }
 0x2cd   : > { %3931 = vmatpush2.bf16.msra.mxu1 %v13830_v63  ;;  %v2318_v63 = vrot.slane %v2278_v59, %v16824_v45  ;;  %v3664_v17 = vadd.f32 %v16757_v52, %v2322_v3  ;;  %v4275_v52 = vld [vmem:[%s16212_s21 + $0x980] sm:$0xff] }
 0x2ce   : > { %3932 = vmatprep.subr.bf16.mxu1 %v13823_v0  ;;  %7136 = vmatpush2.bf16.msra.mxu0 %v13936_v1  ;;  %v4147_v0 = vld [vmem:[%s16212_s21 + $0x580] sm:$0xff]  ;;  %v14137_v37 = vcombine.high %v4275_v52, %v4279_v25  ;;  %v14136_v10 = vcombine.low %v4275_v52, %v4279_v25 }
 0x2cf   : > { %7137 = vmatprep.subr.bf16.mxu0 %v13929_v4  ;;  %v4151_v1 = vld [vmem:[%s16212_s21 + $0x5a0] sm:$0xff]  ;;  %v14016_v4 = vcombine.low %v4155_v60, %v4159_v61 }
 0x2d0   : > { %v14009_v9 = vcombine.high %v4147_v0, %v4151_v1  ;;  %v14008_v26 = vcombine.low %v4147_v0, %v4151_v1  ;;  %v4251_v60 = vld [vmem:[%s16212_s21 + $0x8c0] sm:$0xff] }
 0x2d1   : > { %3933 = vmatpush2.bf16.msra.mxu1 %v13822_v12  ;;  %v3662_v12 = vadd.f32 %v16752_v28, %v2318_v63  ;;  %v4131_v28 = vld [vmem:[%s16212_s21 + $0x500] sm:$0xff] }
 0x2d2   : > { %3934 = vmatprep.subr.bf16.mxu1 %v13815_v14  ;;  %7138 = vmatpush2.bf16.msra.mxu0 %v13928_v15  ;;  %v4139_v14 = vld [vmem:[%s16212_s21 + $0x540] sm:$0xff] }
 0x2d3   : > { %7139 = vmatprep.subr.bf16.mxu0 %v13921_v20  ;;  %v4143_v15 = vld [vmem:[%s16212_s21 + $0x560] sm:$0xff] }
 0x2d4   : > { %v4255_v61 = vld [vmem:[%s16212_s21 + $0x8e0] sm:$0xff] }
 0x2d5   : > { %3935 = vmatpush2.bf16.msra.mxu1 %v13814_v22  ;;  %v14001_v22 = vcombine.high %v4139_v14, %v4143_v15  ;;  %v14113_v0 = vcombine.high %v4251_v60, %v4255_v61  ;;  %v4247_v3 = vld [vmem:[%s16212_s21 + $0x8a0] sm:$0xff] }
 0x2d6   : > { %3936 = vmatprep.subr.bf16.mxu1 %v13807_v23  ;;  %7140 = vmatpush2.bf16.msra.mxu0 %v13920_v24  ;;  %v4135_v24 = vld [vmem:[%s16212_s21 + $0x520] sm:$0xff] }
 0x2d7   : > { %7141 = vmatprep.subr.bf16.mxu0 %v13913_v46  ;;  %v14000_v46 = vcombine.low %v4139_v14, %v4143_v15 }
 0x2d9   : > { %3937 = vmatpush2.bf16.msra.mxu1 %v13806_v29  ;;  %v13993_v29 = vcombine.high %v4131_v28, %v4135_v24 }
 0x2da   : > { %3938 = vmatprep.subr.bf16.mxu1 %v13799_v31  ;;  %7142 = vmatpush2.bf16.msra.mxu0 %v13912_v32  ;;  %v16856_v31 = vld [vmem:[%s16212_s21 + $0x1c8] sm:$0xff] }
 0x2db   : > { %7143 = vmatprep.subr.bf16.mxu0 %v13905_v7  ;;  %v16865_v7 = vld [vmem:[%s16212_s21 + $0x1e8] sm:$0xff] }
 0x2dd   : > { %3939 = vmatpush2.bf16.msra.mxu1 %v13798_v38  ;;  %v13890_v38 = vcombine.low %v16856_v31, %v16865_v7 }
 0x2de   : > { %3940 = vmatprep.subr.bf16.mxu1 %v13791_v39  ;;  %7144 = vmatpush2.bf16.msra.mxu0 %v13904_v13  ;;  %v13992_v39 = vcombine.low %v4131_v28, %v4135_v24  ;;  %v4267_v13 = vld [vmem:[%s16212_s21 + $0x940] sm:$0xff] }
 0x2df   : > { %7145 = vmatprep.subr.bf16.mxu0 %v13897_v11  ;;  %v4115_v11 = vld [vmem:[%s16212_s21 + $0x480] sm:$0xff] }
 0x2e0   : > { %v13977_v51 = vcombine.high %v4115_v11, %v4119_v43  ;;  %v13976_v59 = vcombine.low %v4115_v11, %v4119_v43  ;;  %v4227_v24 = vld [vmem:[%s16212_s21 + $0x800] sm:$0xff] }
 0x2e1   : > { %3941 = vmatpush2.bf16.msra.mxu1 %v13790_v44  ;;  %v14129_v44 = vcombine.high %v4267_v13, %v4271_v41  ;;  %v4343_v11 = vld [vmem:[%s16212_s21 + $0xba0] sm:$0xff] }
 0x2e2   : > { %3942 = vmatprep.subr.bf16.mxu1 %v13783_v48  ;;  %7146 = vmatpush2.bf16.msra.mxu0 %v13896_v49  ;;  %v13984_v48 = vcombine.low %v4123_v33, %v4127_v34  ;;  %v4259_v49 = vld [vmem:[%s16212_s21 + $0x900] sm:$0xff] }
 0x2e3   : > { %7197 = vmatprep.subr.bf16.mxu0 %v14145_v30  ;;  %v4107_v30 = vld [vmem:[%s16212_s21 + $0x440] sm:$0xff]  ;;  %v14120_v63 = vcombine.low %v4259_v49, %v4263_v50 }
 0x2e4   : > { %v16837_v62 = vpop.f32.mrf.mxu0  ;;  %v13969_v6 = vcombine.high %v4107_v30, %v4111_v53  ;;  %v13968_v1 = vcombine.low %v4107_v30, %v4111_v53  ;;  %v4351_v33 = vld [vmem:[%s16212_s21 + $0xbe0] sm:$0xff] }
 0x2e5   : > { %3943 = vmatpush2.bf16.msra.mxu1 %v13782_v5  ;;  %v14128_v5 = vcombine.low %v4267_v13, %v4271_v41  ;;  %v4335_v30 = vld [vmem:[%s16212_s21 + $0xb60] sm:$0xff] }
 0x2e6   : > { %v16840_v55 = vpop.f32.mrf.mxu0  ;;  %3944 = vmatprep.subr.bf16.mxu1 %v13775_v58  ;;  %v14121_v58 = vcombine.high %v4259_v49, %v4263_v50 }
 0x2e8   : > { %v3747_v2 = vpop.f32.mrf.mxu0 }
 0x2e9   : > { %3945 = vmatpush2.bf16.msra.mxu1 %v13774_v54  ;;  %v4099_v54 = vld [vmem:[%s16212_s21 + $0x400] sm:$0xff] }
 0x2ea   : > { %v3748_v8 = vpop.f32.mrf.mxu0  ;;  %7156 = vmatprep.subr.bf16.mxu1 %v14017_v57  ;;  %v4103_v57 = vld [vmem:[%s16212_s21 + $0x420] sm:$0xff] }
 0x2eb   : > { %v4243_v2 = vld [vmem:[%s16212_s21 + $0x880] sm:$0xff]  ;;  %v13960_v15 = vcombine.low %v4099_v54, %v4103_v57 }
 0x2ec   : > { %3947 = vmatmul.mubr.bf16.vlgmr.msra.gmra.mxu1 %v16618_v47  ;;  %v3702_v16 = vpop.f32.mrf.mxu1  ;;  %v4219_v8 = vld [vmem:[%s16212_s21 + $0x7c0] sm:$0xff]  ;;  %v14105_v14 = vcombine.high %v4243_v2, %v4247_v3 }
 0x2ed   : > { %v3703_v20 = vadd.f32 %v3702_v16, %v3662_v12  ;;  %7157 = vmatpush1.bf16.msra.mxu1 %v14016_v4  ;;  %v13961_v4 = vcombine.high %v4099_v54, %v4103_v57  ;;  %v14112_v12 = vcombine.low %v4251_v60, %v4255_v61  ;;  %v4235_v16 = vld [vmem:[%s16212_s21 + $0x840] sm:$0xff] }
 0x2ee   : > { %v3704_v21 = vpop.f32.mrf.mxu1  ;;  %7158 = vmatprep.subr.bf16.mxu1 %v14009_v9  ;;  %v4223_v9 = vld [vmem:[%s16212_s21 + $0x7e0] sm:$0xff] }
 0x2ef   : > { %v3705_v23 = vadd.f32 %v3704_v21, %v3664_v17  ;;  %v3955_v18 = vmax.f32 %v3703_v20, 0.0  ;;  %v4239_v17 = vld [vmem:[%s16212_s21 + $0x860] sm:$0xff]  ;;  %v14081_v20 = vcombine.high %v4219_v8, %v4223_v9  ;;  %v14080_v28 = vcombine.low %v4219_v8, %v4223_v9 }
 0x2f0   : > { %v3706_v47 = vpop.f32.mrf.mxu1  ;;  %v4215_v21 = vld [vmem:[%s16212_s21 + $0x7a0] sm:$0xff]  ;;  %v14096_v52 = vcombine.low %v4235_v16, %v4239_v17 }
 0x2f1   : > { %v3956_v19 = vmax.f32 %v3705_v23, 0.0  ;;  %7159 = vmatpush1.bf16.msra.mxu1 %v14008_v26  ;;  %v16867_v36 = vpack.c.bf16 %v3955_v18, %v3955_v18  ;;  %v4211_v26 = vld [vmem:[%s16212_s21 + $0x780] sm:$0xff]  ;;  %v14097_v23 = vcombine.high %v4235_v16, %v4239_v17  ;;  %v2012_v16 = vld [vmem:[%s16228_s14 + $0x8] sm:$0x77] }
 0x2f2   : > { %v3707_v27 = vpop.f32.mrf.mxu1  ;;  %7160 = vmatprep.subr.bf16.mxu1 %v14001_v22  ;;  %v14104_v22 = vcombine.low %v4243_v2, %v4247_v3  ;;  %v4231_v18 = vld [vmem:[%s16212_s21 + $0x820] sm:$0xff]  ;;  %v14073_v47 = vcombine.high %v4211_v26, %v4215_v21 }
 0x2f3   : > { %v16858_v32 = vpack.c.bf16 %v3956_v19, %v3956_v19  ;;  %v4203_v19 = vld [vmem:[%s16212_s21 + $0x740] sm:$0xff]  ;;  %v14089_v25 = vcombine.high %v4227_v24, %v4231_v18  ;;  %v14072_v27 = vcombine.low %v4211_v26, %v4215_v21 }
 0x2f4   : > { %v4327_v54 = vld [vmem:[%s16212_s21 + $0xb20] sm:$0xff] }
 0x2f5   : > { %7147 = vmatprep.mubr.bf16.mxu0 %v16858_v32  ;;  %7161 = vmatpush1.bf16.msra.mxu1 %v14000_v46  ;;  %v4207_v46 = vld [vmem:[%s16212_s21 + $0x760] sm:$0xff] }
 0x2f6   : > { %7148 = vmatmul.mubr.bf16.vlgmr.msra.gmra.mxu0 %v16867_v36  ;;  %7162 = vmatprep.subr.bf16.mxu1 %v13993_v29  ;;  %v4347_v29 = vld [vmem:[%s16212_s21 + $0xbc0] sm:$0xff]  ;;  %v14065_v34 = vcombine.high %v4203_v19, %v4207_v46  ;;  %v14064_v41 = vcombine.low %v4203_v19, %v4207_v46  ;;  %v2290_v19 = vrot.slane %v2012_v16, %v16832_v56 }
 0x2f7   : > { %7198 = vmatpush1.bf16.msra.mxu0 %v14144_v35  ;;  %v4195_v35 = vld [vmem:[%s16212_s21 + $0x700] sm:$0xff]  ;;  %v14209_v13 = vcombine.high %v4347_v29, %v4351_v33 }
 0x2f8   : > { %7199 = vmatprep.subr.bf16.mxu0 %v14137_v37  ;;  %v4199_v37 = vld [vmem:[%s16212_s21 + $0x720] sm:$0xff] }
 0x2f9   : > { %7163 = vmatpush1.bf16.msra.mxu1 %v13992_v39  ;;  %v14088_v39 = vcombine.low %v4227_v24, %v4231_v18  ;;  %v14057_v43 = vcombine.high %v4195_v35, %v4199_v37  ;;  %v14056_v50 = vcombine.low %v4195_v35, %v4199_v37  ;;  %v4319_v8 = vld [vmem:[%s16212_s21 + $0xae0] sm:$0xff] }
 0x2fa   : > { %7164 = vmatprep.subr.bf16.mxu1 %v13985_v42  ;;  %v4339_v42 = vld [vmem:[%s16212_s21 + $0xb80] sm:$0xff] }
 0x2fb   : > { %7200 = vmatpush1.bf16.msra.mxu0 %v14136_v10  ;;  %v4187_v10 = vld [vmem:[%s16212_s21 + $0x6c0] sm:$0xff]  ;;  %v14201_v49 = vcombine.high %v4339_v42, %v4343_v11 }
 0x2fc   : > { %7201 = vmatprep.subr.bf16.mxu0 %v14129_v44  ;;  %v4191_v44 = vld [vmem:[%s16212_s21 + $0x6e0] sm:$0xff] }
 0x2fd   : > { %7165 = vmatpush1.bf16.msra.mxu1 %v13984_v48  ;;  %v14208_v48 = vcombine.low %v4347_v29, %v4351_v33  ;;  %v14049_v53 = vcombine.high %v4187_v10, %v4191_v44  ;;  %v14048_v61 = vcombine.low %v4187_v10, %v4191_v44  ;;  %v4307_v26 = vld [vmem:[%s16212_s21 + $0xa80] sm:$0xff] }
 0x2fe   : > { %7166 = vmatprep.subr.bf16.mxu1 %v13977_v51  ;;  %v4331_v51 = vld [vmem:[%s16212_s21 + $0xb40] sm:$0xff] }
 0x2ff   : > { %7202 = vmatpush1.bf16.msra.mxu0 %v14128_v5  ;;  %v4179_v5 = vld [vmem:[%s16212_s21 + $0x680] sm:$0xff]  ;;  %v14193_v60 = vcombine.high %v4331_v51, %v4335_v30 }
 0x300   : > { %7203 = vmatprep.subr.bf16.mxu0 %v14121_v58  ;;  %v4183_v58 = vld [vmem:[%s16212_s21 + $0x6a0] sm:$0xff] }
 0x301   : > { %7167 = vmatpush1.bf16.msra.mxu1 %v13976_v59  ;;  %v14200_v59 = vcombine.low %v4339_v42, %v4343_v11  ;;  %v14041_v57 = vcombine.high %v4179_v5, %v4183_v58  ;;  %v14040_v3 = vcombine.low %v4179_v5, %v4183_v58  ;;  %v4311_v21 = vld [vmem:[%s16212_s21 + $0xaa0] sm:$0xff] }
 0x302   : > { %7168 = vmatprep.subr.bf16.mxu1 %v13969_v6  ;;  %v4323_v6 = vld [vmem:[%s16212_s21 + $0xb00] sm:$0xff]  ;;  %v14168_v35 = vcombine.low %v4307_v26, %v4311_v21 }
 0x303   : > { %7204 = vmatpush1.bf16.msra.mxu0 %v14120_v63  ;;  %v4171_v63 = vld [vmem:[%s16212_s21 + $0x640] sm:$0xff]  ;;  %v14185_v2 = vcombine.high %v4323_v6, %v4327_v54 }
 0x304   : > { %7205 = vmatprep.subr.bf16.mxu0 %v14113_v0  ;;  %v4175_v0 = vld [vmem:[%s16212_s21 + $0x660] sm:$0xff] }
 0x305   : > { %7169 = vmatpush1.bf16.msra.mxu1 %v13968_v1  ;;  %v14192_v1 = vcombine.low %v4331_v51, %v4335_v30  ;;  %v14033_v9 = vcombine.high %v4171_v63, %v4175_v0  ;;  %v4411_v24 = vld [vmem:[%s16212_s21 + $0xdc0] sm:$0xff] }
 0x306   : > { %7170 = vmatprep.subr.bf16.mxu1 %v13961_v4  ;;  %v4315_v4 = vld [vmem:[%s16212_s21 + $0xac0] sm:$0xff] }
 0x307   : > { %7206 = vmatpush1.bf16.msra.mxu0 %v14112_v12  ;;  %v4163_v12 = vld [vmem:[%s16212_s21 + $0x600] sm:$0xff]  ;;  %v14177_v17 = vcombine.high %v4315_v4, %v4319_v8 }
 0x308   : > { %7207 = vmatprep.subr.bf16.mxu0 %v14105_v14  ;;  %v4167_v14 = vld [vmem:[%s16212_s21 + $0x620] sm:$0xff] }
 0x309   : > { %7171 = vmatpush1.bf16.msra.mxu1 %v13960_v15  ;;  %v14184_v15 = vcombine.low %v4323_v6, %v4327_v54  ;;  %v4415_v18 = vld [vmem:[%s16212_s21 + $0xde0] sm:$0xff] }
 0x30a   : > { %7172 = vmatprep.subr.bf16.mxu1 %v14081_v20  ;;  %v14032_v20 = vcombine.low %v4171_v63, %v4175_v0  ;;  %v14273_v29 = vcombine.high %v4411_v24, %v4415_v18  ;;  %v4295_v42 = vld [vmem:[%s16212_s21 + $0xa20] sm:$0xff]  ;;  %v14272_v54 = vcombine.low %v4411_v24, %v4415_v18  ;;  %v16946_v63 = vld [vmem:[%s16212_s21 + $0x5e8] sm:$0xff] }
 0x30b   : > { %7208 = vmatpush1.bf16.msra.mxu0 %v14104_v22  ;;  %v14025_v22 = vcombine.high %v4163_v12, %v4167_v14  ;;  %v4363_v18 = vld [vmem:[%s16212_s21 + $0xc40] sm:$0xff] }
 0x30c   : > { %7209 = vmatprep.subr.bf16.mxu0 %v14097_v23  ;;  %v2286_v23 = vrot.slane %v2012_v16, %v16824_v45 }
 0x30d   : > { %7173 = vmatpush2.bf16.msra.mxu1 %v14080_v28  ;;  %v14176_v28 = vcombine.low %v4315_v4, %v4319_v8 }
 0x30e   : > { %7174 = vmatprep.subr.bf16.mxu1 %v14073_v47  ;;  %v14169_v47 = vcombine.high %v4307_v26, %v4311_v21  ;;  %v2326_v33 = vrot.slane %v2286_v23, %v16824_v45  ;;  %v4375_v23 = vld [vmem:[%s16212_s21 + $0xca0] sm:$0xff] }
 0x30f   : > { %7210 = vmatpush1.bf16.msra.mxu0 %v14096_v52  ;;  %v14024_v52 = vcombine.low %v4163_v12, %v4167_v14  ;;  %v4387_v12 = vld [vmem:[%s16212_s21 + $0xd00] sm:$0xff] }
 0x310   : > { %7211 = vmatprep.subr.bf16.mxu0 %v14089_v25  ;;  %v4299_v25 = vld [vmem:[%s16212_s21 + $0xa40] sm:$0xff]  ;;  %v3744_v11 = vadd.f32 %v16837_v62, %v2326_v33  ;;  %v13891_v62 = vcombine.high %v16856_v31, %v16865_v7 }
 0x311   : > { %7175 = vmatpush2.bf16.msra.mxu1 %v14072_v27  ;;  %v4303_v27 = vld [vmem:[%s16212_s21 + $0xa60] sm:$0xff] }
 0x312   : > { %7176 = vmatprep.subr.bf16.mxu1 %v14065_v34  ;;  %v14161_v37 = vcombine.high %v4299_v25, %v4303_v27  ;;  %v14160_v10 = vcombine.low %v4299_v25, %v4303_v27  ;;  %v4391_v14 = vld [vmem:[%s16212_s21 + $0xd20] sm:$0xff] }
 0x313   : > { %7212 = vmatpush1.bf16.msra.mxu0 %v14088_v39  ;;  %v2330_v39 = vrot.slane %v2290_v19, %v16824_v45  ;;  %v14249_v16 = vcombine.high %v4387_v12, %v4391_v14  ;;  %v14248_v26 = vcombine.low %v4387_v12, %v4391_v14  ;;  %v4355_v25 = vld [vmem:[%s16212_s21 + $0xc00] sm:$0xff] }
 0x314   : > { %7213 = vmatprep.subr.bf16.mxu0 %v14209_v13  ;;  %v4359_v27 = vld [vmem:[%s16212_s21 + $0xc20] sm:$0xff] }
 0x315   : > { %7177 = vmatpush2.bf16.msra.mxu1 %v14064_v41  ;;  %v4291_v41 = vld [vmem:[%s16212_s21 + $0xa00] sm:$0xff]  ;;  %v14217_v33 = vcombine.high %v4355_v25, %v4359_v27 }
 0x316   : > { %7178 = vmatprep.subr.bf16.mxu1 %v14057_v43  ;;  %v4431_v12 = vld [vmem:[%s16212_s21 + $0xe60] sm:$0xff] }
 0x317   : > { %7214 = vmatpush2.bf16.msra.mxu0 %v14208_v48  ;;  %v14153_v48 = vcombine.high %v4291_v41, %v4295_v42 }
 0x318   : > { %7215 = vmatprep.subr.bf16.mxu0 %v14201_v49  ;;  %v3746_v49 = vadd.f32 %v16840_v55, %v2330_v39  ;;  %v14216_v39 = vcombine.low %v4355_v25, %v4359_v27 }
 0x319   : > { %7179 = vmatpush2.bf16.msra.mxu1 %v14056_v50 }
 0x31a   : > { %7180 = vmatprep.subr.bf16.mxu1 %v14049_v53  ;;  %v14152_v53 = vcombine.low %v4291_v41, %v4295_v42  ;;  %v4467_v41 = vld [vmem:[%s16212_s21 + $0xf80] sm:$0xff] }
 0x31b   : > { %7216 = vmatpush2.bf16.msra.mxu0 %v14200_v59  ;;  %v4471_v42 = vld [vmem:[%s16212_s21 + $0xfa0] sm:$0xff] }
 0x31c   : > { %7217 = vmatprep.subr.bf16.mxu0 %v14193_v60  ;;  %v4403_v60 = vld [vmem:[%s16212_s21 + $0xd80] sm:$0xff] }
 0x31d   : > { %7181 = vmatpush2.bf16.msra.mxu1 %v14048_v61  ;;  %v4407_v61 = vld [vmem:[%s16212_s21 + $0xda0] sm:$0xff] }
 0x31e   : > { %7182 = vmatprep.subr.bf16.mxu1 %v14041_v57  ;;  %v16943_v57 = vld [vmem:[%s16212_s21 + $0x5c8] sm:$0xff]  ;;  %v14264_v8 = vcombine.low %v4403_v60, %v4407_v61 }
 0x31f   : > { %7218 = vmatpush2.bf16.msra.mxu0 %v14192_v1  ;;  %v14265_v1 = vcombine.high %v4403_v60, %v4407_v61  ;;  %v14018_v4 = vcombine.low %v16943_v57, %v16946_v63  ;;  %v4435_v61 = vld [vmem:[%s16212_s21 + $0xe80] sm:$0xff] }
 0x320   : > { %7219 = vmatprep.subr.bf16.mxu0 %v14185_v2  ;;  %v4395_v2 = vld [vmem:[%s16212_s21 + $0xd40] sm:$0xff] }
 0x321   : > { %7183 = vmatpush2.bf16.msra.mxu1 %v14040_v3  ;;  %v4399_v3 = vld [vmem:[%s16212_s21 + $0xd60] sm:$0xff] }
 0x322   : > { %7184 = vmatprep.subr.bf16.mxu1 %v14033_v9  ;;  %v14257_v9 = vcombine.high %v4395_v2, %v4399_v3 }
 0x323   : > { %7220 = vmatpush2.bf16.msra.mxu0 %v14184_v15  ;;  %v14256_v15 = vcombine.low %v4395_v2, %v4399_v3 }
 0x324   : > { %7221 = vmatprep.subr.bf16.mxu0 %v14177_v17  ;;  %v4379_v17 = vld [vmem:[%s16212_s21 + $0xcc0] sm:$0xff] }
 0x325   : > { %v16924_v46 = vpop.f32.mrf.mxu0  ;;  %7185 = vmatpush2.bf16.msra.mxu1 %v14032_v20  ;;  %v4383_v20 = vld [vmem:[%s16212_s21 + $0xce0] sm:$0xff] }
 0x326   : > { %7186 = vmatprep.subr.bf16.mxu1 %v14025_v22  ;;  %v14241_v21 = vcombine.high %v4379_v17, %v4383_v20  ;;  %v4371_v22 = vld [vmem:[%s16212_s21 + $0xc80] sm:$0xff] }
 0x327   : > { %v16929_v34 = vpop.f32.mrf.mxu0  ;;  %7222 = vmatpush2.bf16.msra.mxu0 %v14176_v28  ;;  %v14240_v28 = vcombine.low %v4379_v17, %v4383_v20  ;;  %v14233_v24 = vcombine.high %v4371_v22, %v4375_v23  ;;  %v14232_v19 = vcombine.low %v4371_v22, %v4375_v23  ;;  %v4423_v22 = vld [vmem:[%s16212_s21 + $0xe20] sm:$0xff] }
 0x328   : > { %7223 = vmatprep.subr.bf16.mxu0 %v14169_v47  ;;  %v4367_v47 = vld [vmem:[%s16212_s21 + $0xc60] sm:$0xff] }
 0x329   : > { %v3829_v13 = vpop.f32.mrf.mxu0  ;;  %7187 = vmatpush2.bf16.msra.mxu1 %v14024_v52  ;;  %v14225_v52 = vcombine.high %v4363_v18, %v4367_v47 }
 0x32a   : > { %7238 = vmatprep.subr.bf16.mxu1 %v14273_v29  ;;  %v14224_v29 = vcombine.low %v4363_v18, %v4367_v47 }
 0x32b   : > { %v3830_v43 = vpop.f32.mrf.mxu0  ;;  %7224 = vmatpush2.bf16.msra.mxu0 %v14168_v35  ;;  %v4475_v35 = vld [vmem:[%s16212_s21 + $0xfc0] sm:$0xff] }
 0x32c   : > { %v3784_v44 = vpop.f32.mrf.mxu1  ;;  %7225 = vmatprep.subr.bf16.mxu0 %v14161_v37  ;;  %v4479_v37 = vld [vmem:[%s16212_s21 + $0xfe0] sm:$0xff]  ;;  %v14329_v43 = vcombine.high %v4467_v41, %v4471_v42 }
 0x32d   : > { %v3785_v50 = vadd.f32 %v3784_v44, %v3744_v11  ;;  %v14337_v13 = vcombine.high %v4475_v35, %v4479_v37  ;;  %v14336_v11 = vcombine.low %v4475_v35, %v4479_v37  ;;  %v4463_v44 = vld [vmem:[%s16212_s21 + $0xf60] sm:$0xff] }
 0x32e   : > { %v3786_v51 = vpop.f32.mrf.mxu1 }
 0x32f   : > { %v3787_v30 = vadd.f32 %v3786_v51, %v3746_v49  ;;  %7226 = vmatpush2.bf16.msra.mxu0 %v14160_v10  ;;  %v3957_v5 = vmax.f32 %v3785_v50, 0.0  ;;  %v4459_v10 = vld [vmem:[%s16212_s21 + $0xf40] sm:$0xff] }
 0x330   : > { %v3788_v58 = vpop.f32.mrf.mxu1  ;;  %7227 = vmatprep.subr.bf16.mxu0 %v14153_v48  ;;  %v14328_v48 = vcombine.low %v4467_v41, %v4471_v42  ;;  %v14321_v49 = vcombine.high %v4459_v10, %v4463_v44  ;;  %v4451_v50 = vld [vmem:[%s16212_s21 + $0xf00] sm:$0xff] }
 0x331   : > { %v3958_v59 = vmax.f32 %v3787_v30, 0.0  ;;  %v16948_v0 = vpack.c.bf16 %v3957_v5, %v3957_v5  ;;  %v4455_v51 = vld [vmem:[%s16212_s21 + $0xf20] sm:$0xff]  ;;  %v14320_v30 = vcombine.low %v4459_v10, %v4463_v44  ;;  %v4016_v10 = vld [vmem:[%s16212_s21 + $0x168] sm:$0xff] }
 0x332   : > { %v3789_v6 = vpop.f32.mrf.mxu1  ;;  %v4443_v5 = vld [vmem:[%s16212_s21 + $0xec0] sm:$0xff] }
 0x333   : > { %v16940_v55 = vpack.c.bf16 %v3958_v59, %v3958_v59  ;;  %7228 = vmatpush2.bf16.msra.mxu0 %v14152_v53  ;;  %v14313_v53 = vcombine.high %v4451_v50, %v4455_v51  ;;  %v4447_v58 = vld [vmem:[%s16212_s21 + $0xee0] sm:$0xff]  ;;  %v2013_v59 = vld [vmem:[%s16228_s14 + $0x10] sm:$0x77] }
 0x334   : > { %7279 = vmatprep.subr.bf16.mxu0 %v13891_v62  ;;  %v14312_v62 = vcombine.low %v4451_v50, %v4455_v51  ;;  %v14305_v60 = vcombine.high %v4443_v5, %v4447_v58  ;;  %v4439_v6 = vld [vmem:[%s16212_s21 + $0xea0] sm:$0xff]  ;;  %v2298_v3 = vrot.slane %v2013_v59, %v16832_v56  ;;  %v4008_v50 = vld [vmem:[%s16212_s21 + $0x128] sm:$0xff] }
 0x335   : > { %7188 = vmatprep.mubr.bf16.mxu1 %v16940_v55  ;;  %v14297_v2 = vcombine.high %v4435_v61, %v4439_v6 }
 0x336   : > { %7189 = vmatmul.mubr.bf16.vlgmr.msra.gmra.mxu1 %v16948_v0  ;;  %v2338_v20 = vrot.slane %v2298_v3, %v16824_v45 }
 0x337   : > { %7239 = vmatpush1.bf16.msra.mxu1 %v14272_v54  ;;  %v2294_v54 = vrot.slane %v2013_v59, %v16824_v45 }
 0x338   : > { %7240 = vmatprep.subr.bf16.mxu1 %v14265_v1  ;;  %v14304_v1 = vcombine.low %v4443_v5, %v4447_v58  ;;  %v4000_v5 = vld [vmem:[%s16212_s21 + $0xe8] sm:$0xff] }
 0x339   : > { %v2334_v14 = vrot.slane %v2294_v54, %v16824_v45  ;;  %v3992_v58 = vld [vmem:[%s16212_s21 + $0xa8] sm:$0xff] }
 0x33b   : > { %7241 = vmatpush1.bf16.msra.mxu1 %v14264_v8  ;;  %v3826_v23 = vadd.f32 %v16924_v46, %v2334_v14  ;;  %v14019_v46 = vcombine.high %v16943_v57, %v16946_v63  ;;  %v4096_v14 = vld [vmem:[%s16212_s21 + $0x3e8] sm:$0xff] }
 0x33c   : > { %7242 = vmatprep.subr.bf16.mxu1 %v14257_v9  ;;  %v4427_v9 = vld [vmem:[%s16212_s21 + $0xe40] sm:$0xff]  ;;  %v4260_v57 = vld [vmem:[%s16212_s21 + $0x908] sm:$0xff] }
 0x33d   : > { %v14289_v17 = vcombine.high %v4427_v9, %v4431_v12  ;;  %v4264_v63 = vld [vmem:[%s16212_s21 + $0x928] sm:$0xff] }
 0x33f   : > { %7243 = vmatpush1.bf16.msra.mxu1 %v14256_v15 }
 0x340   : > { %7244 = vmatprep.subr.bf16.mxu1 %v14249_v16  ;;  %v14296_v16 = vcombine.low %v4435_v61, %v4439_v6  ;;  %v3984_v61 = vld [vmem:[%s16212_s21 + $0x68] sm:$0xff] }
 0x343   : > { %7245 = vmatpush1.bf16.msra.mxu1 %v14248_v26 }
 0x344   : > { %7246 = vmatprep.subr.bf16.mxu1 %v14241_v21  ;;  %v4419_v21 = vld [vmem:[%s16212_s21 + $0xe00] sm:$0xff] }
 0x345   : > { %v14281_v47 = vcombine.high %v4419_v21, %v4423_v22 }
 0x347   : > { %7247 = vmatpush1.bf16.msra.mxu1 %v14240_v28 }
 0x348   : > { %7248 = vmatprep.subr.bf16.mxu1 %v14233_v24  ;;  %v14288_v24 = vcombine.low %v4427_v9, %v4431_v12  ;;  %v4092_v12 = vld [vmem:[%s16212_s21 + $0x3c8] sm:$0xff] }
 0x34b   : > { %7249 = vmatpush1.bf16.msra.mxu1 %v14232_v19  ;;  %v3828_v19 = vadd.f32 %v16929_v34, %v2338_v20  ;;  %v4084_v20 = vld [vmem:[%s16212_s21 + $0x388] sm:$0xff] }
 0x34c   : > { %7250 = vmatprep.subr.bf16.mxu1 %v14225_v52 }
 0x34f   : > { %7251 = vmatpush1.bf16.msra.mxu1 %v14224_v29  ;;  %v14280_v29 = vcombine.low %v4419_v21, %v4423_v22  ;;  %v13954_v21 = vcombine.low %v4092_v12, %v4096_v14 }
 0x350   : > { %7252 = vmatprep.subr.bf16.mxu1 %v14217_v33 }
 0x353   : > { %7253 = vmatpush1.bf16.msra.mxu1 %v14216_v39  ;;  %v4020_v39 = vld [vmem:[%s16212_s21 + $0x188] sm:$0xff] }
 0x354   : > { %7254 = vmatprep.subr.bf16.mxu1 %v14337_v13  ;;  %v4024_v13 = vld [vmem:[%s16212_s21 + $0x1a8] sm:$0xff] }
 0x355   : > { %v13882_v44 = vcombine.low %v4020_v39, %v4024_v13 }
 0x357   : > { %7255 = vmatpush2.bf16.msra.mxu1 %v14336_v11  ;;  %v13883_v11 = vcombine.high %v4020_v39, %v4024_v13  ;;  %v4056_v39 = vld [vmem:[%s16212_s21 + $0x2a8] sm:$0xff] }
 0x358   : > { %7256 = vmatprep.subr.bf16.mxu1 %v14329_v43  ;;  %v4012_v43 = vld [vmem:[%s16212_s21 + $0x148] sm:$0xff] }
 0x359   : > { %v13874_v51 = vcombine.low %v4012_v43, %v4016_v10 }
 0x35b   : > { %7257 = vmatpush2.bf16.msra.mxu1 %v14328_v48  ;;  %v13875_v48 = vcombine.high %v4012_v43, %v4016_v10  ;;  %v4044_v10 = vld [vmem:[%s16212_s21 + $0x248] sm:$0xff] }
 0x35c   : > { %7258 = vmatprep.subr.bf16.mxu1 %v14321_v49  ;;  %v4004_v49 = vld [vmem:[%s16212_s21 + $0x108] sm:$0xff] }
 0x35d   : > { %v13866_v31 = vcombine.low %v4004_v49, %v4008_v50 }
 0x35f   : > { %7259 = vmatpush2.bf16.msra.mxu1 %v14320_v30  ;;  %v13867_v30 = vcombine.high %v4004_v49, %v4008_v50 }
 0x360   : > { %7260 = vmatprep.subr.bf16.mxu1 %v14313_v53  ;;  %v3996_v53 = vld [vmem:[%s16212_s21 + $0xc8] sm:$0xff] }
 0x361   : > { %v13859_v7 = vcombine.high %v3996_v53, %v4000_v5 }
 0x363   : > { %7261 = vmatpush2.bf16.msra.mxu1 %v14312_v62  ;;  %v13858_v62 = vcombine.low %v3996_v53, %v4000_v5  ;;  %v4040_v53 = vld [vmem:[%s16212_s21 + $0x228] sm:$0xff] }
 0x364   : > { %7262 = vmatprep.subr.bf16.mxu1 %v14305_v60  ;;  %v3980_v60 = vld [vmem:[%s16212_s21 + $0x48] sm:$0xff] }
 0x365   : > { %v16981_v8 = vpop.f32.mrf.mxu0  ;;  %v13843_v54 = vcombine.high %v3980_v60, %v3984_v61  ;;  %v13842_v3 = vcombine.low %v3980_v60, %v3984_v61 }
 0x367   : > { %v16986_v15 = vpop.f32.mrf.mxu0  ;;  %7263 = vmatpush2.bf16.msra.mxu1 %v14304_v1  ;;  %v3972_v1 = vld [vmem:[%s16212_s21 + $0x8] sm:$0xff] }
 0x368   : > { %7264 = vmatprep.subr.bf16.mxu1 %v14297_v2  ;;  %v3976_v2 = vld [vmem:[%s16212_s21 + $0x28] sm:$0xff] }
 0x369   : > { %v3911_v26 = vpop.f32.mrf.mxu0  ;;  %v13835_v9 = vcombine.high %v3972_v1, %v3976_v2 }
 0x36a   : > { %v4088_v26 = vld [vmem:[%s16212_s21 + $0x3a8] sm:$0xff] }
 0x36b   : > { %v3912_v28 = vpop.f32.mrf.mxu0  ;;  %7265 = vmatpush2.bf16.msra.mxu1 %v14296_v16  ;;  %v13834_v16 = vcombine.low %v3972_v1, %v3976_v2  ;;  %v13947_v22 = vcombine.high %v4084_v20, %v4088_v26  ;;  %v4148_v2 = vld [vmem:[%s16212_s21 + $0x588] sm:$0xff] }
 0x36c   : > { %v3866_v18 = vpop.f32.mrf.mxu1  ;;  %7266 = vmatprep.subr.bf16.mxu1 %v14289_v17  ;;  %v13955_v17 = vcombine.high %v4092_v12, %v4096_v14  ;;  %v4080_v28 = vld [vmem:[%s16212_s21 + $0x368] sm:$0xff] }
 0x36d   : > { %v3867_v52 = vadd.f32 %v3866_v18, %v3826_v23  ;;  %v4076_v23 = vld [vmem:[%s16212_s21 + $0x348] sm:$0xff] }
 0x36e   : > { %v3868_v25 = vpop.f32.mrf.mxu1  ;;  %v13939_v18 = vcombine.high %v4076_v23, %v4080_v28  ;;  %v4280_v12 = vld [vmem:[%s16212_s21 + $0x9a8] sm:$0xff] }
 0x36f   : > { %v3869_v27 = vadd.f32 %v3868_v25, %v3828_v19  ;;  %7267 = vmatpush2.bf16.msra.mxu1 %v14288_v24  ;;  %v3959_v33 = vmax.f32 %v3867_v52, 0.0  ;;  %v13946_v24 = vcombine.low %v4084_v20, %v4088_v26  ;;  %v4072_v19 = vld [vmem:[%s16212_s21 + $0x328] sm:$0xff]  ;;  %v13938_v52 = vcombine.low %v4076_v23, %v4080_v28 }
 0x370   : > { %v3870_v35 = vpop.f32.mrf.mxu1  ;;  %7268 = vmatprep.subr.bf16.mxu1 %v14281_v47  ;;  %v4068_v47 = vld [vmem:[%s16212_s21 + $0x308] sm:$0xff] }
 0x371   : > { %v3960_v37 = vmax.f32 %v3869_v27, 0.0  ;;  %v16999_v42 = vpack.c.bf16 %v3959_v33, %v3959_v33  ;;  %v13931_v25 = vcombine.high %v4068_v47, %v4072_v19  ;;  %v4060_v27 = vld [vmem:[%s16212_s21 + $0x2c8] sm:$0xff]  ;;  %v13930_v33 = vcombine.low %v4068_v47, %v4072_v19  ;;  %v2014_v35 = vld [vmem:[%s16228_s14 + $0x18] sm:$0x77] }
 0x372   : > { %v3871_v41 = vpop.f32.mrf.mxu1  ;;  %v2302_v13 = vrot.slane %v2014_v35, %v16824_v45  ;;  %v2306_v43 = vrot.slane %v2014_v35, %v16832_v56  ;;  %v4140_v20 = vld [vmem:[%s16212_s21 + $0x548] sm:$0xff] }
 0x373   : > { %v16997_v34 = vpack.c.bf16 %v3960_v37, %v3960_v37  ;;  %7269 = vmatpush2.bf16.msra.mxu1 %v14280_v29  ;;  %v4064_v29 = vld [vmem:[%s16212_s21 + $0x2e8] sm:$0xff] }
 0x374   : > { %7320 = vmatprep.subr.bf16.mxu1 %v14019_v46  ;;  %v13923_v46 = vcombine.high %v4060_v27, %v4064_v29  ;;  %v4052_v37 = vld [vmem:[%s16212_s21 + $0x288] sm:$0xff]  ;;  %v13922_v41 = vcombine.low %v4060_v27, %v4064_v29 }
 0x375   : > { %7229 = vmatprep.mubr.bf16.mxu0 %v16997_v34  ;;  %v13914_v49 = vcombine.low %v4052_v37, %v4056_v39  ;;  %v4268_v23 = vld [vmem:[%s16212_s21 + $0x948] sm:$0xff] }
 0x376   : > { %7230 = vmatmul.mubr.bf16.vlgmr.msra.gmra.mxu0 %v16999_v42  ;;  %v4272_v28 = vld [vmem:[%s16212_s21 + $0x968] sm:$0xff] }
 0x377   : > { %7280 = vmatpush1.bf16.msra.mxu0 %v13890_v38  ;;  %7311 = vmatprep.mubr.bf16.mxu0 %v16858_v32  ;;  %v3988_v38 = vld [vmem:[%s16212_s21 + $0x88] sm:$0xff]  ;;  %v14130_v35 = vcombine.low %v4268_v23, %v4272_v28 }
 0x378   : > { %7281 = vmatprep.subr.bf16.mxu0 %v13883_v11  ;;  %v13851_v59 = vcombine.high %v3988_v38, %v3992_v58  ;;  %v13850_v6 = vcombine.low %v3988_v38, %v3992_v58  ;;  %v13915_v11 = vcombine.high %v4052_v37, %v4056_v39  ;;  %v4132_v27 = vld [vmem:[%s16212_s21 + $0x508] sm:$0xff]  ;;  %v14123_v39 = vcombine.high %v4260_v57, %v4264_v63 }
 0x379   : > { %v4136_v29 = vld [vmem:[%s16212_s21 + $0x528] sm:$0xff] }
 0x37a   : > { %v13995_v37 = vcombine.high %v4132_v27, %v4136_v29 }
 0x37b   : > { %7282 = vmatpush1.bf16.msra.mxu0 %v13882_v44  ;;  %v4048_v44 = vld [vmem:[%s16212_s21 + $0x268] sm:$0xff] }
 0x37c   : > { %7283 = vmatprep.subr.bf16.mxu0 %v13875_v48  ;;  %v2342_v48 = vrot.slane %v2302_v13, %v16824_v45  ;;  %v13907_v50 = vcombine.high %v4044_v10, %v4048_v44  ;;  %v4124_v13 = vld [vmem:[%s16212_s21 + $0x4c8] sm:$0xff] }
 0x37e   : > { %v3908_v5 = vadd.f32 %v16981_v8, %v2342_v48 }
 0x37f   : > { %7284 = vmatpush1.bf16.msra.mxu0 %v13874_v51  ;;  %v2346_v51 = vrot.slane %v2306_v43, %v16824_v45  ;;  %v4256_v43 = vld [vmem:[%s16212_s21 + $0x8e8] sm:$0xff] }
 0x380   : > { %7285 = vmatprep.subr.bf16.mxu0 %v13867_v30  ;;  %v4036_v30 = vld [vmem:[%s16212_s21 + $0x208] sm:$0xff] }
 0x381   : > { %v13899_v56 = vcombine.high %v4036_v30, %v4040_v53  ;;  %v3910_v38 = vadd.f32 %v16986_v15, %v2346_v51  ;;  %v13898_v61 = vcombine.low %v4036_v30, %v4040_v53  ;;  %v4120_v51 = vld [vmem:[%s16212_s21 + $0x4a8] sm:$0xff] }
 0x382   : > { %v4244_v30 = vld [vmem:[%s16212_s21 + $0x888] sm:$0xff] }
 0x383   : > { %7286 = vmatpush1.bf16.msra.mxu0 %v13866_v31  ;;  %v13906_v31 = vcombine.low %v4044_v10, %v4048_v44  ;;  %v13994_v10 = vcombine.low %v4132_v27, %v4136_v29  ;;  %v14122_v44 = vcombine.low %v4260_v57, %v4264_v63  ;;  %v4248_v53 = vld [vmem:[%s16212_s21 + $0x8a8] sm:$0xff] }
 0x384   : > { %7287 = vmatprep.subr.bf16.mxu0 %v13859_v7  ;;  %v4344_v27 = vld [vmem:[%s16212_s21 + $0xba8] sm:$0xff] }
 0x387   : > { %7288 = vmatpush1.bf16.msra.mxu0 %v13858_v62  ;;  %v4284_v62 = vld [vmem:[%s16212_s21 + $0x9c8] sm:$0xff] }
 0x388   : > { %7289 = vmatprep.subr.bf16.mxu0 %v13851_v59  ;;  %v4288_v59 = vld [vmem:[%s16212_s21 + $0x9e8] sm:$0xff] }
 0x38b   : > { %7290 = vmatpush1.bf16.msra.mxu0 %v13850_v6 }
 0x38c   : > { %7291 = vmatprep.subr.bf16.mxu0 %v13843_v54  ;;  %v14147_v54 = vcombine.high %v4284_v62, %v4288_v59 }
 0x38f   : > { %7292 = vmatpush1.bf16.msra.mxu0 %v13842_v3  ;;  %v4152_v3 = vld [vmem:[%s16212_s21 + $0x5a8] sm:$0xff] }
 0x390   : > { %7293 = vmatprep.subr.bf16.mxu0 %v13835_v9  ;;  %v4276_v9 = vld [vmem:[%s16212_s21 + $0x988] sm:$0xff]  ;;  %v14011_v26 = vcombine.high %v4148_v2, %v4152_v3 }
 0x391   : > { %v14138_v47 = vcombine.low %v4276_v9, %v4280_v12 }
 0x393   : > { %7294 = vmatpush1.bf16.msra.mxu0 %v13834_v16  ;;  %v14146_v16 = vcombine.low %v4284_v62, %v4288_v59  ;;  %v4236_v62 = vld [vmem:[%s16212_s21 + $0x848] sm:$0xff] }
 0x394   : > { %7295 = vmatprep.subr.bf16.mxu0 %v13955_v17  ;;  %v4240_v59 = vld [vmem:[%s16212_s21 + $0x868] sm:$0xff] }
 0x397   : > { %7296 = vmatpush2.bf16.msra.mxu0 %v13954_v21  ;;  %v14139_v21 = vcombine.high %v4276_v9, %v4280_v12 }
 0x398   : > { %7297 = vmatprep.subr.bf16.mxu0 %v13947_v22  ;;  %v4144_v22 = vld [vmem:[%s16212_s21 + $0x568] sm:$0xff] }
 0x39b   : > { %7298 = vmatpush2.bf16.msra.mxu0 %v13946_v24 }
 0x39c   : > { %7299 = vmatprep.subr.bf16.mxu0 %v13939_v18  ;;  %v14010_v18 = vcombine.low %v4148_v2, %v4152_v3  ;;  %v4232_v2 = vld [vmem:[%s16212_s21 + $0x828] sm:$0xff]  ;;  %v14098_v3 = vcombine.low %v4236_v62, %v4240_v59 }
 0x39f   : > { %7300 = vmatpush2.bf16.msra.mxu0 %v13938_v52  ;;  %v14003_v52 = vcombine.high %v4140_v20, %v4144_v22 }
 0x3a0   : > { %7301 = vmatprep.subr.bf16.mxu0 %v13931_v25  ;;  %v14131_v25 = vcombine.high %v4268_v23, %v4272_v28 }
 0x3a3   : > { %7302 = vmatpush2.bf16.msra.mxu0 %v13930_v33  ;;  %v14002_v33 = vcombine.low %v4140_v20, %v4144_v22  ;;  %v4224_v20 = vld [vmem:[%s16212_s21 + $0x7e8] sm:$0xff] }
 0x3a4   : > { %7303 = vmatprep.subr.bf16.mxu0 %v13923_v46 }
 0x3a7   : > { %7304 = vmatpush2.bf16.msra.mxu0 %v13922_v41  ;;  %v4128_v41 = vld [vmem:[%s16212_s21 + $0x4e8] sm:$0xff] }
 0x3a8   : > { %7305 = vmatprep.subr.bf16.mxu0 %v13915_v11  ;;  %v4252_v11 = vld [vmem:[%s16212_s21 + $0x8c8] sm:$0xff]  ;;  %v13987_v48 = vcombine.high %v4124_v13, %v4128_v41 }
 0x3ab   : > { %7306 = vmatpush2.bf16.msra.mxu0 %v13914_v49  ;;  %v14115_v49 = vcombine.high %v4252_v11, %v4256_v43 }
 0x3ac   : > { %v3948_v7 = vpop.f32.mrf.mxu1  ;;  %7307 = vmatprep.subr.bf16.mxu0 %v13907_v50  ;;  %v4116_v50 = vld [vmem:[%s16212_s21 + $0x488] sm:$0xff] }
 0x3ad   : > { %v3949_v58 = vadd.f32 %v3948_v7, %v3908_v5  ;;  %v13986_v5 = vcombine.low %v4124_v13, %v4128_v41  ;;  %v13979_v7 = vcombine.high %v4116_v50, %v4120_v51 }
 0x3ae   : > { %v3950_v60 = vpop.f32.mrf.mxu1 }
 0x3af   : > { %v3951_v45 = vadd.f32 %v3950_v60, %v3910_v38  ;;  %7308 = vmatpush2.bf16.msra.mxu0 %v13906_v31  ;;  %v3961_v8 = vmax.f32 %v3949_v58, 0.0  ;;  %v14114_v31 = vcombine.low %v4252_v11, %v4256_v43  ;;  %v4108_v38 = vld [vmem:[%s16212_s21 + $0x448] sm:$0xff]  ;;  %v13978_v60 = vcombine.low %v4116_v50, %v4120_v51 }
 0x3b0   : > { %v3952_v6 = vpop.f32.mrf.mxu1  ;;  %7309 = vmatprep.subr.bf16.mxu0 %v13899_v56  ;;  %v14107_v56 = vcombine.high %v4244_v30, %v4248_v53  ;;  %v4112_v58 = vld [vmem:[%s16212_s21 + $0x468] sm:$0xff] }
 0x3b1   : > { %v3962_v1 = vmax.f32 %v3951_v45, 0.0  ;;  %v17050_v17 = vpack.c.bf16 %v3961_v8, %v3961_v8  ;;  %v14106_v45 = vcombine.low %v4244_v30, %v4248_v53  ;;  %v14099_v8 = vcombine.high %v4236_v62, %v4240_v59  ;;  %v4100_v6 = vld [vmem:[%s16212_s21 + $0x408] sm:$0xff] }
 0x3b2   : > { %v3953_v15 = vpop.f32.mrf.mxu1  ;;  %v4196_v43 = vld [vmem:[%s16212_s21 + $0x708] sm:$0xff] }
 0x3b3   : > { %v17048_v14 = vpack.c.bf16 %v3962_v1, %v3962_v1  ;;  %7310 = vmatpush2.bf16.msra.mxu0 %v13898_v61  ;;  %v13971_v61 = vcombine.high %v4108_v38, %v4112_v58  ;;  %v4228_v1 = vld [vmem:[%s16212_s21 + $0x808] sm:$0xff]  ;;  %v13970_v15 = vcombine.low %v4108_v38, %v4112_v58 }
 0x3b4   : > { %7361 = vmatprep.subr.bf16.mxu0 %v14147_v54  ;;  %v4104_v54 = vld [vmem:[%s16212_s21 + $0x428] sm:$0xff]  ;;  %v14091_v12 = vcombine.high %v4228_v1, %v4232_v2  ;;  %v14090_v23 = vcombine.low %v4228_v1, %v4232_v2 }
 0x3b5   : > { %7270 = vmatprep.mubr.bf16.mxu1 %v17048_v14  ;;  %v13963_v9 = vcombine.high %v4100_v6, %v4104_v54  ;;  %v13962_v22 = vcombine.low %v4100_v6, %v4104_v54  ;;  %v4188_v53 = vld [vmem:[%s16212_s21 + $0x6c8] sm:$0xff] }
 0x3b6   : > { %7312 = vmatmul.mubr.bf16.vlgmr.msra.gmra.mxu0 %v16867_v36  ;;  %7271 = vmatmul.mubr.bf16.vlgmr.msra.gmra.mxu1 %v17050_v17  ;;  %v17059_v24 = vpop.f32.mrf.mxu0  ;;  %v4180_v59 = vld [vmem:[%s16212_s21 + $0x688] sm:$0xff] }
 0x3b7   : > { %7321 = vmatpush1.bf16.msra.mxu1 %v14018_v4  ;;  %7362 = vmatpush1.bf16.msra.mxu0 %v14146_v16  ;;  %v4220_v16 = vld [vmem:[%s16212_s21 + $0x7c8] sm:$0xff] }
 0x3b8   : > { %7393 = vmatprep.mubr.bf16.mxu0 %v16997_v34  ;;  %7352 = vmatprep.mubr.bf16.mxu1 %v16940_v55  ;;  %v17066_v19 = vpop.f32.mrf.mxu0  ;;  %v14083_v28 = vcombine.high %v4220_v16, %v4224_v20  ;;  %v14082_v29 = vcombine.low %v4220_v16, %v4224_v20  ;;  %v4172_v2 = vld [vmem:[%s16212_s21 + $0x648] sm:$0xff] }
 0x3b9   : > { %7322 = vmatprep.subr.bf16.mxu1 %v14011_v26  ;;  %7363 = vmatprep.subr.bf16.mxu0 %v14139_v21  ;;  %v4348_v26 = vld [vmem:[%s16212_s21 + $0xbc8] sm:$0xff] }
 0x3ba   : > { %v7153_v4 = vpop.f32.mrf.mxu0  ;;  %v4352_v21 = vld [vmem:[%s16212_s21 + $0xbe8] sm:$0xff] }
 0x3bb   : > { %7323 = vmatpush1.bf16.msra.mxu1 %v14010_v18  ;;  %7364 = vmatpush1.bf16.msra.mxu0 %v14138_v47  ;;  %v14211_v18 = vcombine.high %v4348_v26, %v4352_v21  ;;  %v4212_v47 = vld [vmem:[%s16212_s21 + $0x788] sm:$0xff]  ;;  %v14210_v57 = vcombine.low %v4348_v26, %v4352_v21 }
 0x3bc   : > { %v7154_v46 = vpop.f32.mrf.mxu0  ;;  %7324 = vmatprep.subr.bf16.mxu1 %v14003_v52  ;;  %7365 = vmatprep.subr.bf16.mxu0 %v14131_v25  ;;  %v4216_v52 = vld [vmem:[%s16212_s21 + $0x7a8] sm:$0xff] }
 0x3bd   : > { %v4340_v25 = vld [vmem:[%s16212_s21 + $0xb88] sm:$0xff]  ;;  %v14075_v63 = vcombine.high %v4212_v47, %v4216_v52 }
 0x3be   : > { %v14203_v4 = vcombine.high %v4340_v25, %v4344_v27  ;;  %v4332_v46 = vld [vmem:[%s16212_s21 + $0xb48] sm:$0xff]  ;;  %v14202_v13 = vcombine.low %v4340_v25, %v4344_v27 }
 0x3bf   : > { %7325 = vmatpush1.bf16.msra.mxu1 %v14002_v33  ;;  %7366 = vmatpush1.bf16.msra.mxu0 %v14130_v35  ;;  %v4204_v33 = vld [vmem:[%s16212_s21 + $0x748] sm:$0xff] }
 0x3c0   : > { %7326 = vmatprep.subr.bf16.mxu1 %v13995_v37  ;;  %7367 = vmatprep.subr.bf16.mxu0 %v14123_v39  ;;  %v4208_v35 = vld [vmem:[%s16212_s21 + $0x768] sm:$0xff]  ;;  %v14074_v39 = vcombine.low %v4212_v47, %v4216_v52  ;;  %v17124_v47 = vsub.s32 5, %v16813_v40 }
 0x3c1   : > { %v4336_v37 = vld [vmem:[%s16212_s21 + $0xb68] sm:$0xff]  ;;  %v14067_v41 = vcombine.high %v4204_v33, %v4208_v35 }
 0x3c2   : > { %v14195_v11 = vcombine.high %v4332_v46, %v4336_v37  ;;  %v14194_v50 = vcombine.low %v4332_v46, %v4336_v37  ;;  %v4164_v21 = vld [vmem:[%s16212_s21 + $0x608] sm:$0xff]  ;;  %v4033_v46 = vld [vmem:[%s16212_s21 + $0x1f0] sm:$0xff] }
 0x3c3   : > { %7327 = vmatpush1.bf16.msra.mxu1 %v13994_v10  ;;  %7368 = vmatpush1.bf16.msra.mxu0 %v14122_v44  ;;  %v4200_v10 = vld [vmem:[%s16212_s21 + $0x728] sm:$0xff] }
 0x3c4   : > { %7328 = vmatprep.subr.bf16.mxu1 %v13987_v48  ;;  %7369 = vmatprep.subr.bf16.mxu0 %v14115_v49  ;;  %v4324_v44 = vld [vmem:[%s16212_s21 + $0xb08] sm:$0xff]  ;;  %v14066_v49 = vcombine.low %v4204_v33, %v4208_v35  ;;  %v14059_v51 = vcombine.high %v4196_v43, %v4200_v10  ;;  %v4029_v35 = vld [vmem:[%s16212_s21 + $0x1d0] sm:$0xff] }
 0x3c5   : > { %v4328_v48 = vld [vmem:[%s16212_s21 + $0xb28] sm:$0xff] }
 0x3c6   : > { %v14187_v30 = vcombine.high %v4324_v44, %v4328_v48  ;;  %v14186_v38 = vcombine.low %v4324_v44, %v4328_v48  ;;  %v4416_v33 = vld [vmem:[%s16212_s21 + $0xde8] sm:$0xff]  ;;  %v4021_v48 = vld [vmem:[%s16212_s21 + $0x190] sm:$0xff] }
 0x3c7   : > { %7329 = vmatpush1.bf16.msra.mxu1 %v13986_v5  ;;  %7370 = vmatpush1.bf16.msra.mxu0 %v14114_v31  ;;  %v4192_v5 = vld [vmem:[%s16212_s21 + $0x6e8] sm:$0xff] }
 0x3c8   : > { %7330 = vmatprep.subr.bf16.mxu1 %v13979_v7  ;;  %7371 = vmatprep.subr.bf16.mxu0 %v14107_v56  ;;  %v4316_v31 = vld [vmem:[%s16212_s21 + $0xac8] sm:$0xff]  ;;  %v14058_v56 = vcombine.low %v4196_v43, %v4200_v10  ;;  %v14051_v58 = vcombine.high %v4188_v53, %v4192_v5 }
 0x3c9   : > { %v4320_v7 = vld [vmem:[%s16212_s21 + $0xae8] sm:$0xff] }
 0x3ca   : > { %v14179_v62 = vcombine.high %v4316_v31, %v4320_v7  ;;  %v14178_v6 = vcombine.low %v4316_v31, %v4320_v7  ;;  %v4404_v10 = vld [vmem:[%s16212_s21 + $0xd88] sm:$0xff] }
 0x3cb   : > { %7331 = vmatpush1.bf16.msra.mxu1 %v13978_v60  ;;  %7372 = vmatpush1.bf16.msra.mxu0 %v14106_v45  ;;  %v4184_v60 = vld [vmem:[%s16212_s21 + $0x6a8] sm:$0xff] }
 0x3cc   : > { %7332 = vmatprep.subr.bf16.mxu1 %v13971_v61  ;;  %7373 = vmatprep.subr.bf16.mxu0 %v14099_v8  ;;  %v4308_v45 = vld [vmem:[%s16212_s21 + $0xa88] sm:$0xff]  ;;  %v14050_v8 = vcombine.low %v4188_v53, %v4192_v5  ;;  %v14043_v54 = vcombine.high %v4180_v59, %v4184_v60 }
 0x3cd   : > { %v4312_v61 = vld [vmem:[%s16212_s21 + $0xaa8] sm:$0xff] }
 0x3ce   : > { %v14171_v1 = vcombine.high %v4308_v45, %v4312_v61  ;;  %v14170_v16 = vcombine.low %v4308_v45, %v4312_v61  ;;  %v4408_v44 = vld [vmem:[%s16212_s21 + $0xda8] sm:$0xff] }
 0x3cf   : > { %7333 = vmatpush1.bf16.msra.mxu1 %v13970_v15  ;;  %7374 = vmatpush1.bf16.msra.mxu0 %v14098_v3  ;;  %v4176_v15 = vld [vmem:[%s16212_s21 + $0x668] sm:$0xff]  ;;  %v14267_v5 = vcombine.high %v4404_v10, %v4408_v44 }
 0x3d0   : > { %7334 = vmatprep.subr.bf16.mxu1 %v13963_v9  ;;  %7375 = vmatprep.subr.bf16.mxu0 %v14091_v12  ;;  %v4300_v3 = vld [vmem:[%s16212_s21 + $0xa48] sm:$0xff]  ;;  %v14042_v12 = vcombine.low %v4180_v59, %v4184_v60  ;;  %v14035_v20 = vcombine.high %v4172_v2, %v4176_v15  ;;  %v14034_v52 = vcombine.low %v4172_v2, %v4176_v15  ;;  %v4005_v15 = vld [vmem:[%s16212_s21 + $0x110] sm:$0xff] }
 0x3d1   : > { %v4304_v9 = vld [vmem:[%s16212_s21 + $0xa68] sm:$0xff] }
 0x3d2   : > { %v14163_v26 = vcombine.high %v4300_v3, %v4304_v9  ;;  %v14162_v25 = vcombine.low %v4300_v3, %v4304_v9  ;;  %v4396_v7 = vld [vmem:[%s16212_s21 + $0xd48] sm:$0xff]  ;;  %v4009_v3 = vld [vmem:[%s16212_s21 + $0x130] sm:$0xff] }
 0x3d3   : > { %7335 = vmatpush1.bf16.msra.mxu1 %v13962_v22  ;;  %7376 = vmatpush1.bf16.msra.mxu0 %v14090_v23  ;;  %v17118_v22 = vsub.s32 1, %v16813_v40  ;;  %v4168_v23 = vld [vmem:[%s16212_s21 + $0x628] sm:$0xff] }
 0x3d4   : > { %7336 = vmatprep.subr.bf16.mxu1 %v14083_v28  ;;  %7377 = vmatprep.subr.bf16.mxu0 %v14211_v18  ;;  %v4292_v28 = vld [vmem:[%s16212_s21 + $0xa08] sm:$0xff]  ;;  %v14027_v27 = vcombine.high %v4164_v21, %v4168_v23 }
 0x3d5   : > { %v4296_v18 = vld [vmem:[%s16212_s21 + $0xa28] sm:$0xff] }
 0x3d7   : > { %7337 = vmatpush2.bf16.msra.mxu1 %v14082_v29  ;;  %7378 = vmatpush2.bf16.msra.mxu0 %v14210_v57  ;;  %v14155_v29 = vcombine.high %v4292_v28, %v4296_v18  ;;  %v4412_v57 = vld [vmem:[%s16212_s21 + $0xdc8] sm:$0xff] }
 0x3d8   : > { %7338 = vmatprep.subr.bf16.mxu1 %v14075_v63  ;;  %7379 = vmatprep.subr.bf16.mxu0 %v14203_v4  ;;  %v15393_v63 = vld [vmem:[%s16228_s14] sm:$0x77] }
 0x3d9   : > { %v4486_v4 = vrot.slane %v15393_v63, %v17118_v22  ;;  %v4490_v37 = vrot.slane %v15393_v63, %v17124_v47  ;;  %v4376_v63 = vld [vmem:[%s16212_s21 + $0xca8] sm:$0xff] }
 0x3db   : > { %7339 = vmatpush2.bf16.msra.mxu1 %v14074_v39  ;;  %7380 = vmatpush2.bf16.msra.mxu0 %v14202_v13  ;;  %v14026_v39 = vcombine.low %v4164_v21, %v4168_v23  ;;  %v14154_v13 = vcombine.low %v4292_v28, %v4296_v18  ;;  %v4526_v43 = vrot.slane %v4486_v4, %v17118_v22  ;;  %v4380_v21 = vld [vmem:[%s16212_s21 + $0xcc8] sm:$0xff]  ;;  %v3997_v28 = vld [vmem:[%s16212_s21 + $0xd0] sm:$0xff] }
 0x3dc   : > { %7340 = vmatprep.subr.bf16.mxu1 %v14067_v41  ;;  %7381 = vmatprep.subr.bf16.mxu0 %v14195_v11  ;;  %v14275_v41 = vcombine.high %v4412_v57, %v4416_v33  ;;  %v13893_v11 = vcombine.high %v4029_v35, %v4033_v46  ;;  %v4384_v23 = vld [vmem:[%s16212_s21 + $0xce8] sm:$0xff]  ;;  %v4001_v18 = vld [vmem:[%s16212_s21 + $0xf0] sm:$0xff] }
 0x3dd   : > { %v7150_v53 = vadd.f32 %v17059_v24, %v4526_v43  ;;  %v14266_v24 = vcombine.low %v4404_v10, %v4408_v44  ;;  %v3989_v4 = vld [vmem:[%s16212_s21 + $0x90] sm:$0xff] }
 0x3de   : > { %v3985_v43 = vld [vmem:[%s16212_s21 + $0x70] sm:$0xff] }
 0x3df   : > { %7341 = vmatpush2.bf16.msra.mxu1 %v14066_v49  ;;  %7382 = vmatpush2.bf16.msra.mxu0 %v14194_v50  ;;  %v4025_v49 = vld [vmem:[%s16212_s21 + $0x1b0] sm:$0xff]  ;;  %v4530_v50 = vrot.slane %v4490_v37, %v17118_v22 }
 0x3e0   : > { %7342 = vmatprep.subr.bf16.mxu1 %v14059_v51  ;;  %7383 = vmatprep.subr.bf16.mxu0 %v14187_v30  ;;  %v14274_v51 = vcombine.low %v4412_v57, %v4416_v33  ;;  %v13892_v30 = vcombine.low %v4029_v35, %v4033_v46  ;;  %v13885_v31 = vcombine.high %v4021_v48, %v4025_v49  ;;  %v4372_v57 = vld [vmem:[%s16212_s21 + $0xc88] sm:$0xff]  ;;  %v3993_v33 = vld [vmem:[%s16212_s21 + $0xb0] sm:$0xff] }
 0x3e1   : > { %v7152_v59 = vadd.f32 %v17066_v19, %v4530_v50  ;;  %v13884_v61 = vcombine.low %v4021_v48, %v4025_v49  ;;  %v14242_v35 = vcombine.low %v4380_v21, %v4384_v23  ;;  %v13860_v46 = vcombine.low %v3997_v28, %v4001_v18  ;;  %v4356_v50 = vld [vmem:[%s16212_s21 + $0xc08] sm:$0xff] }
 0x3e2   : > { %v14235_v37 = vcombine.high %v4372_v57, %v4376_v63  ;;  %v14234_v10 = vcombine.low %v4372_v57, %v4376_v63  ;;  %v13852_v44 = vcombine.low %v3989_v4, %v3993_v33  ;;  %v4073_v57 = vld [vmem:[%s16212_s21 + $0x330] sm:$0xff] }
 0x3e3   : > { %7343 = vmatpush2.bf16.msra.mxu1 %v14058_v56  ;;  %7384 = vmatpush2.bf16.msra.mxu0 %v14186_v38  ;;  %v4400_v56 = vld [vmem:[%s16212_s21 + $0xd68] sm:$0xff] }
 0x3e4   : > { %7344 = vmatprep.subr.bf16.mxu1 %v14051_v58  ;;  %7385 = vmatprep.subr.bf16.mxu0 %v14179_v62  ;;  %v4013_v58 = vld [vmem:[%s16212_s21 + $0x150] sm:$0xff]  ;;  %v14258_v9 = vcombine.low %v4396_v7, %v4400_v56 }
 0x3e5   : > { %v4017_v62 = vld [vmem:[%s16212_s21 + $0x170] sm:$0xff] }
 0x3e6   : > { %v13877_v19 = vcombine.high %v4013_v58, %v4017_v62 }
 0x3e7   : > { %7345 = vmatpush2.bf16.msra.mxu1 %v14050_v8  ;;  %7386 = vmatpush2.bf16.msra.mxu0 %v14178_v6  ;;  %v14259_v8 = vcombine.high %v4396_v7, %v4400_v56 }
 0x3e8   : > { %7346 = vmatprep.subr.bf16.mxu1 %v14043_v54  ;;  %7387 = vmatprep.subr.bf16.mxu0 %v14171_v1  ;;  %v4388_v54 = vld [vmem:[%s16212_s21 + $0xd08] sm:$0xff] }
 0x3e9   : > { %v4392_v1 = vld [vmem:[%s16212_s21 + $0xd28] sm:$0xff] }
 0x3eb   : > { %7347 = vmatpush2.bf16.msra.mxu1 %v14042_v12  ;;  %7388 = vmatpush2.bf16.msra.mxu0 %v14170_v16  ;;  %v13876_v16 = vcombine.low %v4013_v58, %v4017_v62  ;;  %v4480_v58 = vld [vmem:[%s16212_s21 + $0xfe8] sm:$0xff]  ;;  %v4093_v62 = vld [vmem:[%s16212_s21 + $0x3d0] sm:$0xff] }
 0x3ec   : > { %7348 = vmatprep.subr.bf16.mxu1 %v14035_v20  ;;  %7389 = vmatprep.subr.bf16.mxu0 %v14163_v26  ;;  %v14251_v20 = vcombine.high %v4388_v54, %v4392_v1  ;;  %v13869_v26 = vcombine.high %v4005_v15, %v4009_v3 }
 0x3ef   : > { %7349 = vmatpush2.bf16.msra.mxu1 %v14034_v52  ;;  %7390 = vmatpush2.bf16.msra.mxu0 %v14162_v25  ;;  %v14250_v52 = vcombine.low %v4388_v54, %v4392_v1  ;;  %v13868_v25 = vcombine.low %v4005_v15, %v4009_v3  ;;  %v4472_v54 = vld [vmem:[%s16212_s21 + $0xfa8] sm:$0xff]  ;;  %v4085_v1 = vld [vmem:[%s16212_s21 + $0x390] sm:$0xff] }
 0x3f0   : > { %7350 = vmatprep.subr.bf16.mxu1 %v14027_v27  ;;  %7391 = vmatprep.subr.bf16.mxu0 %v14155_v29  ;;  %v14243_v27 = vcombine.high %v4380_v21, %v4384_v23  ;;  %v13861_v29 = vcombine.high %v3997_v28, %v4001_v18  ;;  %v4081_v21 = vld [vmem:[%s16212_s21 + $0x370] sm:$0xff] }
 0x3f3   : > { %7351 = vmatpush2.bf16.msra.mxu1 %v14026_v39  ;;  %7392 = vmatpush2.bf16.msra.mxu0 %v14154_v13  ;;  %v13853_v39 = vcombine.high %v3989_v4, %v3993_v33  ;;  %v4364_v13 = vld [vmem:[%s16212_s21 + $0xc48] sm:$0xff] }
 0x3f4   : > { %7402 = vmatprep.subr.bf16.mxu1 %v14275_v41  ;;  %7443 = vmatprep.subr.bf16.mxu0 %v13893_v11  ;;  %v4368_v41 = vld [vmem:[%s16212_s21 + $0xc68] sm:$0xff]  ;;  %v3981_v11 = vld [vmem:[%s16212_s21 + $0x50] sm:$0xff] }
 0x3f5   : > { %v14227_v48 = vcombine.high %v4364_v13, %v4368_v41  ;;  %v13845_v49 = vcombine.high %v3981_v11, %v3985_v43 }
 0x3f6   : > { %7353 = vmatmul.mubr.bf16.vlgmr.msra.gmra.mxu1 %v16948_v0  ;;  %7394 = vmatmul.mubr.bf16.vlgmr.msra.gmra.mxu0 %v16999_v42  ;;  %v7190_v38 = vpop.f32.mrf.mxu1 }
 0x3f7   : > { %v17147_v60 = vadd.f32 %v7190_v38, %v7150_v53  ;;  %7403 = vmatpush1.bf16.msra.mxu1 %v14274_v51  ;;  %7434 = vmatprep.mubr.bf16.mxu1 %v17048_v14  ;;  %v4360_v51 = vld [vmem:[%s16212_s21 + $0xc28] sm:$0xff]  ;;  %v3977_v53 = vld [vmem:[%s16212_s21 + $0x30] sm:$0xff] }
 0x3f8   : > { %7444 = vmatpush1.bf16.msra.mxu0 %v13892_v30  ;;  %7475 = vmatprep.mubr.bf16.mxu0 %v16858_v32  ;;  %v7192_v45 = vpop.f32.mrf.mxu1  ;;  %v3973_v30 = vld [vmem:[%s16212_s21 + $0x10] sm:$0xff]  ;;  %v14219_v7 = vcombine.high %v4356_v50, %v4360_v51  ;;  %v4476_v38 = vld [vmem:[%s16212_s21 + $0xfc8] sm:$0xff] }
 0x3f9   : > { %v17151_v6 = vadd.f32 %v7192_v45, %v7152_v59  ;;  %7404 = vmatprep.subr.bf16.mxu1 %v14267_v5  ;;  %7445 = vmatprep.subr.bf16.mxu0 %v13885_v31  ;;  %v14226_v5 = vcombine.low %v4364_v13, %v4368_v41  ;;  %v13844_v31 = vcombine.low %v3981_v11, %v3985_v43  ;;  %v4097_v59 = vld [vmem:[%s16212_s21 + $0x3f0] sm:$0xff] }
 0x3fa   : > { %v7194_v2 = vpop.f32.mrf.mxu1  ;;  %v13837_v56 = vcombine.high %v3973_v30, %v3977_v53  ;;  %v13836_v45 = vcombine.low %v3973_v30, %v3977_v53  ;;  %v14338_v15 = vcombine.low %v4476_v38, %v4480_v58  ;;  %v13956_v3 = vcombine.low %v4093_v62, %v4097_v59  ;;  %v4065_v13 = vld [vmem:[%s16212_s21 + $0x2f0] sm:$0xff] }
 0x3fb   : > { %7405 = vmatpush1.bf16.msra.mxu1 %v14266_v24  ;;  %v14218_v24 = vcombine.low %v4356_v50, %v4360_v51  ;;  %v4089_v2 = vld [vmem:[%s16212_s21 + $0x3b0] sm:$0xff] }
 0x3fc   : > { %7446 = vmatpush1.bf16.msra.mxu0 %v13884_v61  ;;  %v7195_v12 = vpop.f32.mrf.mxu1  ;;  %7406 = vmatprep.subr.bf16.mxu1 %v14259_v8  ;;  %v14339_v61 = vcombine.high %v4476_v38, %v4480_v58  ;;  %v13957_v8 = vcombine.high %v4093_v62, %v4097_v59  ;;  %v13948_v28 = vcombine.low %v4085_v1, %v4089_v2  ;;  %v4057_v50 = vld [vmem:[%s16212_s21 + $0x2b0] sm:$0xff] }
 0x3fd   : > { %7447 = vmatprep.subr.bf16.mxu0 %v13877_v19  ;;  %v4468_v19 = vld [vmem:[%s16212_s21 + $0xf88] sm:$0xff]  ;;  %v13949_v12 = vcombine.high %v4085_v1, %v4089_v2  ;;  %v4049_v38 = vld [vmem:[%s16212_s21 + $0x270] sm:$0xff] }
 0x3fe   : > { %v14330_v23 = vcombine.low %v4468_v19, %v4472_v54 }
 0x3ff   : > { %7407 = vmatpush1.bf16.msra.mxu1 %v14258_v9  ;;  %v14331_v9 = vcombine.high %v4468_v19, %v4472_v54  ;;  %v4041_v19 = vld [vmem:[%s16212_s21 + $0x230] sm:$0xff] }
 0x400   : > { %7448 = vmatpush1.bf16.msra.mxu0 %v13876_v16  ;;  %7408 = vmatprep.subr.bf16.mxu1 %v14251_v20  ;;  %v4460_v16 = vld [vmem:[%s16212_s21 + $0xf48] sm:$0xff] }
 0x401   : > { %7449 = vmatprep.subr.bf16.mxu0 %v13869_v26  ;;  %v4464_v20 = vld [vmem:[%s16212_s21 + $0xf68] sm:$0xff]  ;;  %v4077_v26 = vld [vmem:[%s16212_s21 + $0x350] sm:$0xff] }
 0x402   : > { %v14323_v18 = vcombine.high %v4460_v16, %v4464_v20  ;;  %v14322_v63 = vcombine.low %v4460_v16, %v4464_v20  ;;  %v13940_v4 = vcombine.low %v4077_v26, %v4081_v21  ;;  %v4289_v16 = vld [vmem:[%s16212_s21 + $0x9f0] sm:$0xff] }
 0x403   : > { %7409 = vmatpush1.bf16.msra.mxu1 %v14250_v52  ;;  %v13941_v52 = vcombine.high %v4077_v26, %v4081_v21 }
 0x404   : > { %7450 = vmatpush1.bf16.msra.mxu0 %v13868_v25  ;;  %7410 = vmatprep.subr.bf16.mxu1 %v14243_v27  ;;  %v4452_v25 = vld [vmem:[%s16212_s21 + $0xf08] sm:$0xff] }
 0x405   : > { %7451 = vmatprep.subr.bf16.mxu0 %v13861_v29  ;;  %v4456_v27 = vld [vmem:[%s16212_s21 + $0xf28] sm:$0xff]  ;;  %v4069_v29 = vld [vmem:[%s16212_s21 + $0x310] sm:$0xff] }
 0x406   : > { %v14315_v33 = vcombine.high %v4452_v25, %v4456_v27  ;;  %v14314_v41 = vcombine.low %v4452_v25, %v4456_v27  ;;  %v13932_v11 = vcombine.low %v4069_v29, %v4073_v57  ;;  %v4277_v25 = vld [vmem:[%s16212_s21 + $0x990] sm:$0xff] }
 0x407   : > { %7411 = vmatpush1.bf16.msra.mxu1 %v14242_v35  ;;  %v13933_v35 = vcombine.high %v4069_v29, %v4073_v57  ;;  %v4281_v27 = vld [vmem:[%s16212_s21 + $0x9b0] sm:$0xff] }
 0x408   : > { %7452 = vmatpush1.bf16.msra.mxu0 %v13860_v46  ;;  %7412 = vmatprep.subr.bf16.mxu1 %v14235_v37  ;;  %v4444_v46 = vld [vmem:[%s16212_s21 + $0xec8] sm:$0xff] }
 0x409   : > { %7453 = vmatprep.subr.bf16.mxu0 %v13853_v39  ;;  %v4448_v37 = vld [vmem:[%s16212_s21 + $0xee8] sm:$0xff]  ;;  %v4061_v39 = vld [vmem:[%s16212_s21 + $0x2d0] sm:$0xff] }
 0x40a   : > { %v14307_v43 = vcombine.high %v4444_v46, %v4448_v37  ;;  %v14306_v51 = vcombine.low %v4444_v46, %v4448_v37  ;;  %v13924_v30 = vcombine.low %v4061_v39, %v4065_v13  ;;  %v4269_v46 = vld [vmem:[%s16212_s21 + $0x950] sm:$0xff] }
 0x40b   : > { %7413 = vmatpush1.bf16.msra.mxu1 %v14234_v10  ;;  %v13925_v10 = vcombine.high %v4061_v39, %v4065_v13  ;;  %v4273_v37 = vld [vmem:[%s16212_s21 + $0x970] sm:$0xff] }
 0x40c   : > { %7454 = vmatpush1.bf16.msra.mxu0 %v13852_v44  ;;  %7414 = vmatprep.subr.bf16.mxu1 %v14227_v48  ;;  %v4436_v44 = vld [vmem:[%s16212_s21 + $0xe88] sm:$0xff] }
 0x40d   : > { %7455 = vmatprep.subr.bf16.mxu0 %v13845_v49  ;;  %v4440_v48 = vld [vmem:[%s16212_s21 + $0xea8] sm:$0xff]  ;;  %v4053_v49 = vld [vmem:[%s16212_s21 + $0x290] sm:$0xff] }
 0x40e   : > { %v14299_v53 = vcombine.high %v4436_v44, %v4440_v48  ;;  %v14298_v58 = vcombine.low %v4436_v44, %v4440_v48  ;;  %v13916_v62 = vcombine.low %v4053_v49, %v4057_v50  ;;  %v14133_v44 = vcombine.high %v4269_v46, %v4273_v37  ;;  %v4137_v48 = vld [vmem:[%s16212_s21 + $0x530] sm:$0xff] }
 0x40f   : > { %7415 = vmatpush1.bf16.msra.mxu1 %v14226_v5  ;;  %v13917_v5 = vcombine.high %v4053_v49, %v4057_v50  ;;  %v4261_v50 = vld [vmem:[%s16212_s21 + $0x910] sm:$0xff] }
 0x410   : > { %7456 = vmatpush1.bf16.msra.mxu0 %v13844_v31  ;;  %7416 = vmatprep.subr.bf16.mxu1 %v14219_v7  ;;  %v4428_v31 = vld [vmem:[%s16212_s21 + $0xe48] sm:$0xff] }
 0x411   : > { %7457 = vmatprep.subr.bf16.mxu0 %v13837_v56  ;;  %v4432_v7 = vld [vmem:[%s16212_s21 + $0xe68] sm:$0xff]  ;;  %v4045_v56 = vld [vmem:[%s16212_s21 + $0x250] sm:$0xff] }
 0x412   : > { %v14291_v59 = vcombine.high %v4428_v31, %v4432_v7  ;;  %v14290_v54 = vcombine.low %v4428_v31, %v4432_v7  ;;  %v13908_v1 = vcombine.low %v4045_v56, %v4049_v38  ;;  %v4125_v7 = vld [vmem:[%s16212_s21 + $0x4d0] sm:$0xff] }
 0x413   : > { %7417 = vmatpush1.bf16.msra.mxu1 %v14218_v24  ;;  %v13909_v24 = vcombine.high %v4045_v56, %v4049_v38  ;;  %v4129_v56 = vld [vmem:[%s16212_s21 + $0x4f0] sm:$0xff] }
 0x414   : > { %7458 = vmatpush1.bf16.msra.mxu0 %v13836_v45  ;;  %7418 = vmatprep.subr.bf16.mxu1 %v14339_v61  ;;  %v4420_v45 = vld [vmem:[%s16212_s21 + $0xe08] sm:$0xff]  ;;  %v4253_v38 = vld [vmem:[%s16212_s21 + $0x8d0] sm:$0xff] }
 0x415   : > { %7459 = vmatprep.subr.bf16.mxu0 %v13957_v8  ;;  %v4424_v61 = vld [vmem:[%s16212_s21 + $0xe28] sm:$0xff]  ;;  %v4037_v8 = vld [vmem:[%s16212_s21 + $0x210] sm:$0xff] }
 0x416   : > { %v14283_v2 = vcombine.high %v4420_v45, %v4424_v61  ;;  %v14282_v20 = vcombine.low %v4420_v45, %v4424_v61  ;;  %v13900_v26 = vcombine.low %v4037_v8, %v4041_v19  ;;  %v4117_v61 = vld [vmem:[%s16212_s21 + $0x490] sm:$0xff] }
 0x417   : > { %7419 = vmatpush2.bf16.msra.mxu1 %v14338_v15  ;;  %v13901_v15 = vcombine.high %v4037_v8, %v4041_v19  ;;  %v4121_v8 = vld [vmem:[%s16212_s21 + $0x4b0] sm:$0xff] }
 0x418   : > { %7460 = vmatpush2.bf16.msra.mxu0 %v13956_v3  ;;  %7420 = vmatprep.subr.bf16.mxu1 %v14331_v9  ;;  %v4157_v3 = vld [vmem:[%s16212_s21 + $0x5d0] sm:$0xff] }
 0x419   : > { %7461 = vmatprep.subr.bf16.mxu0 %v13949_v12  ;;  %v4161_v9 = vld [vmem:[%s16212_s21 + $0x5f0] sm:$0xff] }
 0x41a   : > { %v4285_v12 = vld [vmem:[%s16212_s21 + $0x9d0] sm:$0xff]  ;;  %v14021_v21 = vcombine.high %v4157_v3, %v4161_v9 }
 0x41b   : > { %7421 = vmatpush2.bf16.msra.mxu1 %v14330_v23  ;;  %v14149_v23 = vcombine.high %v4285_v12, %v4289_v16  ;;  %v14148_v29 = vcombine.low %v4285_v12, %v4289_v16  ;;  %v4245_v19 = vld [vmem:[%s16212_s21 + $0x890] sm:$0xff] }
 0x41c   : > { %7462 = vmatpush2.bf16.msra.mxu0 %v13948_v28  ;;  %7422 = vmatprep.subr.bf16.mxu1 %v14323_v18  ;;  %v4149_v28 = vld [vmem:[%s16212_s21 + $0x590] sm:$0xff] }
 0x41d   : > { %7463 = vmatprep.subr.bf16.mxu0 %v13941_v52  ;;  %v4153_v18 = vld [vmem:[%s16212_s21 + $0x5b0] sm:$0xff]  ;;  %v14020_v52 = vcombine.low %v4157_v3, %v4161_v9 }
 0x41e   : > { %v14013_v57 = vcombine.high %v4149_v28, %v4153_v18  ;;  %v14012_v13 = vcombine.low %v4149_v28, %v4153_v18  ;;  %v4109_v9 = vld [vmem:[%s16212_s21 + $0x450] sm:$0xff] }
 0x41f   : > { %7423 = vmatpush2.bf16.msra.mxu1 %v14322_v63  ;;  %v4141_v63 = vld [vmem:[%s16212_s21 + $0x550] sm:$0xff] }
 0x420   : > { %7464 = vmatpush2.bf16.msra.mxu0 %v13940_v4  ;;  %7424 = vmatprep.subr.bf16.mxu1 %v14315_v33  ;;  %v4145_v4 = vld [vmem:[%s16212_s21 + $0x570] sm:$0xff] }
 0x421   : > { %7465 = vmatprep.subr.bf16.mxu0 %v13933_v35  ;;  %v14141_v35 = vcombine.high %v4277_v25, %v4281_v27  ;;  %v4113_v12 = vld [vmem:[%s16212_s21 + $0x470] sm:$0xff] }
 0x422   : > { %v4237_v16 = vld [vmem:[%s16212_s21 + $0x850] sm:$0xff] }
 0x423   : > { %7425 = vmatpush2.bf16.msra.mxu1 %v14314_v41  ;;  %v4101_v18 = vld [vmem:[%s16212_s21 + $0x410] sm:$0xff] }
 0x424   : > { %7466 = vmatpush2.bf16.msra.mxu0 %v13932_v11  ;;  %7426 = vmatprep.subr.bf16.mxu1 %v14307_v43  ;;  %v14140_v11 = vcombine.low %v4277_v25, %v4281_v27  ;;  %v14005_v43 = vcombine.high %v4141_v63, %v4145_v4  ;;  %v4229_v25 = vld [vmem:[%s16212_s21 + $0x810] sm:$0xff] }
 0x425   : > { %7467 = vmatprep.subr.bf16.mxu0 %v13925_v10  ;;  %v4233_v27 = vld [vmem:[%s16212_s21 + $0x830] sm:$0xff] }
 0x427   : > { %7427 = vmatpush2.bf16.msra.mxu1 %v14306_v51  ;;  %v4265_v51 = vld [vmem:[%s16212_s21 + $0x930] sm:$0xff] }
 0x428   : > { %7468 = vmatpush2.bf16.msra.mxu0 %v13924_v30  ;;  %7428 = vmatprep.subr.bf16.mxu1 %v14299_v53  ;;  %v14004_v30 = vcombine.low %v4141_v63, %v4145_v4  ;;  %v14125_v31 = vcombine.high %v4261_v50, %v4265_v51  ;;  %v14093_v4 = vcombine.high %v4229_v25, %v4233_v27 }
 0x429   : > { %7469 = vmatprep.subr.bf16.mxu0 %v13917_v5  ;;  %v14132_v5 = vcombine.low %v4269_v46, %v4273_v37  ;;  %v4349_v46 = vld [vmem:[%s16212_s21 + $0xbd0] sm:$0xff] }
 0x42a   : > { %v4353_v37 = vld [vmem:[%s16212_s21 + $0xbf0] sm:$0xff] }
 0x42b   : > { %7429 = vmatpush2.bf16.msra.mxu1 %v14298_v58  ;;  %v4257_v58 = vld [vmem:[%s16212_s21 + $0x8f0] sm:$0xff] }
 0x42c   : > { %7470 = vmatpush2.bf16.msra.mxu0 %v13916_v62  ;;  %7430 = vmatprep.subr.bf16.mxu1 %v14291_v59  ;;  %v14124_v59 = vcombine.low %v4261_v50, %v4265_v51  ;;  %v14117_v45 = vcombine.high %v4253_v38, %v4257_v58  ;;  %v14212_v51 = vcombine.low %v4349_v46, %v4353_v37 }
 0x42d   : > { %7471 = vmatprep.subr.bf16.mxu0 %v13909_v24  ;;  %v13989_v24 = vcombine.high %v4125_v7, %v4129_v56 }
 0x42f   : > { %7431 = vmatpush2.bf16.msra.mxu1 %v14290_v54  ;;  %v4249_v54 = vld [vmem:[%s16212_s21 + $0x8b0] sm:$0xff] }
 0x430   : > { %7472 = vmatpush2.bf16.msra.mxu0 %v13908_v1  ;;  %7432 = vmatprep.subr.bf16.mxu1 %v14283_v2  ;;  %v13988_v1 = vcombine.low %v4125_v7, %v4129_v56  ;;  %v14116_v2 = vcombine.low %v4253_v38, %v4257_v58  ;;  %v14109_v3 = vcombine.high %v4245_v19, %v4249_v54  ;;  %v4337_v7 = vld [vmem:[%s16212_s21 + $0xb70] sm:$0xff] }
 0x431   : > { %7473 = vmatprep.subr.bf16.mxu0 %v13901_v15  ;;  %v13981_v15 = vcombine.high %v4117_v61, %v4121_v8 }
 0x433   : > { %7433 = vmatpush2.bf16.msra.mxu1 %v14282_v20  ;;  %v4241_v20 = vld [vmem:[%s16212_s21 + $0x870] sm:$0xff] }
 0x434   : > { %7474 = vmatpush2.bf16.msra.mxu0 %v13900_v26  ;;  %7484 = vmatprep.subr.bf16.mxu1 %v14021_v21  ;;  %v13980_v26 = vcombine.low %v4117_v61, %v4121_v8  ;;  %v14108_v21 = vcombine.low %v4245_v19, %v4249_v54  ;;  %v14101_v28 = vcombine.high %v4237_v16, %v4241_v20  ;;  %v4329_v61 = vld [vmem:[%s16212_s21 + $0xb30] sm:$0xff] }
 0x435   : > { %7525 = vmatprep.subr.bf16.mxu0 %v14149_v23  ;;  %v13973_v23 = vcombine.high %v4109_v9, %v4113_v12 }
 0x436   : > { %7435 = vmatmul.mubr.bf16.vlgmr.msra.gmra.mxu1 %v17050_v17  ;;  %v7231_v33 = vpop.f32.mrf.mxu0 }
 0x437   : > { %7476 = vmatmul.mubr.bf16.vlgmr.msra.gmra.mxu0 %v16867_v36  ;;  %v17220_v39 = vadd.f32 %v7231_v33, %v17147_v60  ;;  %7485 = vmatpush1.bf16.msra.mxu1 %v14020_v52  ;;  %v4133_v60 = vld [vmem:[%s16212_s21 + $0x510] sm:$0xff] }
 0x438   : > { %7516 = vmatprep.mubr.bf16.mxu1 %v16940_v55  ;;  %7526 = vmatpush1.bf16.msra.mxu0 %v14148_v29  ;;  %v7233_v41 = vpop.f32.mrf.mxu0  ;;  %v13996_v62 = vcombine.low %v4133_v60, %v4137_v48  ;;  %v4105_v52 = vld [vmem:[%s16212_s21 + $0x430] sm:$0xff]  ;;  %v13972_v29 = vcombine.low %v4109_v9, %v4113_v12 }
 0x439   : > { %7557 = vmatprep.mubr.bf16.mxu0 %v16997_v34  ;;  %v17225_v10 = vadd.f32 %v7233_v41, %v17151_v6  ;;  %7486 = vmatprep.subr.bf16.mxu1 %v14013_v57  ;;  %v13997_v6 = vcombine.high %v4133_v60, %v4137_v48  ;;  %v14100_v57 = vcombine.low %v4237_v16, %v4241_v20  ;;  %v4221_v33 = vld [vmem:[%s16212_s21 + $0x7d0] sm:$0xff] }
 0x43a   : > { %7527 = vmatprep.subr.bf16.mxu0 %v14141_v35  ;;  %v7235_v49 = vpop.f32.mrf.mxu0  ;;  %v13965_v63 = vcombine.high %v4101_v18, %v4105_v52  ;;  %v4225_v35 = vld [vmem:[%s16212_s21 + $0x7f0] sm:$0xff]  ;;  %v14092_v41 = vcombine.low %v4229_v25, %v4233_v27 }
 0x43b   : > { %7487 = vmatpush1.bf16.msra.mxu1 %v14012_v13  ;;  %v13964_v13 = vcombine.low %v4101_v18, %v4105_v52  ;;  %v4217_v60 = vld [vmem:[%s16212_s21 + $0x7b0] sm:$0xff]  ;;  %v14084_v50 = vcombine.low %v4221_v33, %v4225_v35 }
 0x43c   : > { %7528 = vmatpush1.bf16.msra.mxu0 %v14140_v11  ;;  %v7236_v53 = vpop.f32.mrf.mxu0  ;;  %7488 = vmatprep.subr.bf16.mxu1 %v14005_v43  ;;  %v14085_v11 = vcombine.high %v4221_v33, %v4225_v35  ;;  %v14213_v43 = vcombine.high %v4349_v46, %v4353_v37  ;;  %v4341_v48 = vld [vmem:[%s16212_s21 + $0xb90] sm:$0xff] }
 0x43d   : > { %7529 = vmatprep.subr.bf16.mxu0 %v14133_v44  ;;  %v4213_v44 = vld [vmem:[%s16212_s21 + $0x790] sm:$0xff] }
 0x43e   : > { %v4345_v49 = vld [vmem:[%s16212_s21 + $0xbb0] sm:$0xff]  ;;  %v14076_v56 = vcombine.low %v4213_v44, %v4217_v60 }
 0x43f   : > { %7489 = vmatpush1.bf16.msra.mxu1 %v14004_v30  ;;  %v14077_v30 = vcombine.high %v4213_v44, %v4217_v60  ;;  %v14205_v53 = vcombine.high %v4341_v48, %v4345_v49  ;;  %v14204_v38 = vcombine.low %v4341_v48, %v4345_v49  ;;  %v4321_v9 = vld [vmem:[%s16212_s21 + $0xaf0] sm:$0xff] }
 0x440   : > { %7530 = vmatpush1.bf16.msra.mxu0 %v14132_v5  ;;  %7490 = vmatprep.subr.bf16.mxu1 %v13997_v6  ;;  %v4205_v5 = vld [vmem:[%s16212_s21 + $0x750] sm:$0xff] }
 0x441   : > { %7531 = vmatprep.subr.bf16.mxu0 %v14125_v31  ;;  %v4209_v6 = vld [vmem:[%s16212_s21 + $0x770] sm:$0xff] }
 0x442   : > { %v4333_v31 = vld [vmem:[%s16212_s21 + $0xb50] sm:$0xff]  ;;  %v14069_v58 = vcombine.high %v4205_v5, %v4209_v6  ;;  %v14068_v8 = vcombine.low %v4205_v5, %v4209_v6  ;;  %v4034_v5 = vld [vmem:[%s16212_s21 + $0x1f8] sm:$0xff] }
 0x443   : > { %7491 = vmatpush1.bf16.msra.mxu1 %v13996_v62  ;;  %v14197_v62 = vcombine.high %v4333_v31, %v4337_v7  ;;  %v14196_v19 = vcombine.low %v4333_v31, %v4337_v7  ;;  %v4313_v18 = vld [vmem:[%s16212_s21 + $0xab0] sm:$0xff] }
 0x444   : > { %7532 = vmatpush1.bf16.msra.mxu0 %v14124_v59  ;;  %7492 = vmatprep.subr.bf16.mxu1 %v13989_v24  ;;  %v4197_v59 = vld [vmem:[%s16212_s21 + $0x710] sm:$0xff] }
 0x445   : > { %7533 = vmatprep.subr.bf16.mxu0 %v14117_v45  ;;  %v4201_v24 = vld [vmem:[%s16212_s21 + $0x730] sm:$0xff] }
 0x446   : > { %v4325_v45 = vld [vmem:[%s16212_s21 + $0xb10] sm:$0xff]  ;;  %v14061_v54 = vcombine.high %v4197_v59, %v4201_v24  ;;  %v14060_v12 = vcombine.low %v4197_v59, %v4201_v24  ;;  %v4022_v59 = vld [vmem:[%s16212_s21 + $0x198] sm:$0xff] }
 0x447   : > { %7493 = vmatpush1.bf16.msra.mxu1 %v13988_v1  ;;  %v14189_v1 = vcombine.high %v4325_v45, %v4329_v61  ;;  %v14188_v16 = vcombine.low %v4325_v45, %v4329_v61  ;;  %v4305_v33 = vld [vmem:[%s16212_s21 + $0xa70] sm:$0xff]  ;;  %v4026_v24 = vld [vmem:[%s16212_s21 + $0x1b8] sm:$0xff] }
 0x448   : > { %7534 = vmatpush1.bf16.msra.mxu0 %v14116_v2  ;;  %7494 = vmatprep.subr.bf16.mxu1 %v13981_v15  ;;  %v4189_v2 = vld [vmem:[%s16212_s21 + $0x6d0] sm:$0xff] }
 0x449   : > { %7535 = vmatprep.subr.bf16.mxu0 %v14109_v3  ;;  %v4193_v15 = vld [vmem:[%s16212_s21 + $0x6f0] sm:$0xff] }
 0x44a   : > { %v4317_v3 = vld [vmem:[%s16212_s21 + $0xad0] sm:$0xff]  ;;  %v14053_v20 = vcombine.high %v4189_v2, %v4193_v15  ;;  %v14052_v52 = vcombine.low %v4189_v2, %v4193_v15  ;;  %v13887_v2 = vcombine.high %v4022_v59, %v4026_v24  ;;  %v4014_v15 = vld [vmem:[%s16212_s21 + $0x158] sm:$0xff] }
 0x44b   : > { %7495 = vmatpush1.bf16.msra.mxu1 %v13980_v26  ;;  %v14181_v26 = vcombine.high %v4317_v3, %v4321_v9  ;;  %v14180_v25 = vcombine.low %v4317_v3, %v4321_v9  ;;  %v4297_v44 = vld [vmem:[%s16212_s21 + $0xa30] sm:$0xff]  ;;  %v4018_v3 = vld [vmem:[%s16212_s21 + $0x178] sm:$0xff] }
 0x44c   : > { %7536 = vmatpush1.bf16.msra.mxu0 %v14108_v21  ;;  %7496 = vmatprep.subr.bf16.mxu1 %v13973_v23  ;;  %v4181_v21 = vld [vmem:[%s16212_s21 + $0x690] sm:$0xff] }
 0x44d   : > { %7537 = vmatprep.subr.bf16.mxu0 %v14101_v28  ;;  %v4185_v23 = vld [vmem:[%s16212_s21 + $0x6b0] sm:$0xff] }
 0x44e   : > { %v4309_v28 = vld [vmem:[%s16212_s21 + $0xa90] sm:$0xff]  ;;  %v14045_v27 = vcombine.high %v4181_v21, %v4185_v23  ;;  %v14044_v35 = vcombine.low %v4181_v21, %v4185_v23 }
 0x44f   : > { %7497 = vmatpush1.bf16.msra.mxu1 %v13972_v29  ;;  %v14173_v29 = vcombine.high %v4309_v28, %v4313_v18  ;;  %v14172_v46 = vcombine.low %v4309_v28, %v4313_v18  ;;  %v4389_v28 = vld [vmem:[%s16212_s21 + $0xd10] sm:$0xff] }
 0x450   : > { %7538 = vmatpush1.bf16.msra.mxu0 %v14100_v57  ;;  %7498 = vmatprep.subr.bf16.mxu1 %v13965_v63  ;;  %v4173_v57 = vld [vmem:[%s16212_s21 + $0x650] sm:$0xff] }
 0x451   : > { %7539 = vmatprep.subr.bf16.mxu0 %v14093_v4  ;;  %v4177_v63 = vld [vmem:[%s16212_s21 + $0x670] sm:$0xff] }
 0x452   : > { %v4301_v4 = vld [vmem:[%s16212_s21 + $0xa50] sm:$0xff]  ;;  %v14037_v37 = vcombine.high %v4173_v57, %v4177_v63  ;;  %v14036_v60 = vcombine.low %v4173_v57, %v4177_v63 }
 0x453   : > { %7499 = vmatpush1.bf16.msra.mxu1 %v13964_v13  ;;  %v14165_v13 = vcombine.high %v4301_v4, %v4305_v33  ;;  %v14164_v48 = vcombine.low %v4301_v4, %v4305_v33  ;;  %v4393_v18 = vld [vmem:[%s16212_s21 + $0xd30] sm:$0xff] }
 0x454   : > { %7540 = vmatpush1.bf16.msra.mxu0 %v14092_v41  ;;  %7500 = vmatprep.subr.bf16.mxu1 %v14085_v11  ;;  %v4165_v41 = vld [vmem:[%s16212_s21 + $0x610] sm:$0xff]  ;;  %v14253_v4 = vcombine.high %v4389_v28, %v4393_v18 }
 0x455   : > { %7541 = vmatprep.subr.bf16.mxu0 %v14213_v43  ;;  %v4169_v11 = vld [vmem:[%s16212_s21 + $0x630] sm:$0xff] }
 0x456   : > { %v4293_v43 = vld [vmem:[%s16212_s21 + $0xa10] sm:$0xff]  ;;  %v14029_v49 = vcombine.high %v4165_v41, %v4169_v11  ;;  %v14028_v6 = vcombine.low %v4165_v41, %v4169_v11  ;;  %v14252_v41 = vcombine.low %v4389_v28, %v4393_v18 }
 0x457   : > { %7501 = vmatpush2.bf16.msra.mxu1 %v14084_v50  ;;  %v14157_v50 = vcombine.high %v4293_v43, %v4297_v44  ;;  %v14156_v31 = vcombine.low %v4293_v43, %v4297_v44 }
 0x458   : > { %7542 = vmatpush2.bf16.msra.mxu0 %v14212_v51  ;;  %7502 = vmatprep.subr.bf16.mxu1 %v14077_v30  ;;  %v4413_v51 = vld [vmem:[%s16212_s21 + $0xdd0] sm:$0xff] }
 0x459   : > { %7543 = vmatprep.subr.bf16.mxu0 %v14205_v53  ;;  %v4417_v30 = vld [vmem:[%s16212_s21 + $0xdf0] sm:$0xff]  ;;  %v4030_v53 = vld [vmem:[%s16212_s21 + $0x1d8] sm:$0xff] }
 0x45a   : > { %v14277_v7 = vcombine.high %v4413_v51, %v4417_v30  ;;  %v13894_v45 = vcombine.low %v4030_v53, %v4034_v5 }
 0x45b   : > { %7503 = vmatpush2.bf16.msra.mxu1 %v14076_v56  ;;  %v13895_v56 = vcombine.high %v4030_v53, %v4034_v5 }
 0x45c   : > { %7544 = vmatpush2.bf16.msra.mxu0 %v14204_v38  ;;  %7504 = vmatprep.subr.bf16.mxu1 %v14069_v58  ;;  %v4405_v38 = vld [vmem:[%s16212_s21 + $0xd90] sm:$0xff] }
 0x45d   : > { %7545 = vmatprep.subr.bf16.mxu0 %v14197_v62  ;;  %v4409_v58 = vld [vmem:[%s16212_s21 + $0xdb0] sm:$0xff]  ;;  %v14276_v62 = vcombine.low %v4413_v51, %v4417_v30 }
 0x45e   : > { %v14269_v61 = vcombine.high %v4405_v38, %v4409_v58 }
 0x45f   : > { %7505 = vmatpush2.bf16.msra.mxu1 %v14068_v8  ;;  %v4397_v8 = vld [vmem:[%s16212_s21 + $0xd50] sm:$0xff] }
 0x460   : > { %7546 = vmatpush2.bf16.msra.mxu0 %v14196_v19  ;;  %7506 = vmatprep.subr.bf16.mxu1 %v14061_v54  ;;  %v4401_v19 = vld [vmem:[%s16212_s21 + $0xd70] sm:$0xff] }
 0x461   : > { %7547 = vmatprep.subr.bf16.mxu0 %v14189_v1  ;;  %v14261_v21 = vcombine.high %v4397_v8, %v4401_v19  ;;  %v14260_v57 = vcombine.low %v4397_v8, %v4401_v19  ;;  %v3978_v8 = vld [vmem:[%s16212_s21 + $0x38] sm:$0xff] }
 0x463   : > { %7507 = vmatpush2.bf16.msra.mxu1 %v14060_v12  ;;  %v14268_v12 = vcombine.low %v4405_v38, %v4409_v58 }
 0x464   : > { %7548 = vmatpush2.bf16.msra.mxu0 %v14188_v16  ;;  %7508 = vmatprep.subr.bf16.mxu1 %v14053_v20 }
 0x465   : > { %7549 = vmatprep.subr.bf16.mxu0 %v14181_v26  ;;  %v13886_v26 = vcombine.low %v4022_v59, %v4026_v24  ;;  %v4357_v24 = vld [vmem:[%s16212_s21 + $0xc10] sm:$0xff] }
 0x467   : > { %7509 = vmatpush2.bf16.msra.mxu1 %v14052_v52 }
 0x468   : > { %7550 = vmatpush2.bf16.msra.mxu0 %v14180_v25  ;;  %7510 = vmatprep.subr.bf16.mxu1 %v14045_v27  ;;  %v4006_v27 = vld [vmem:[%s16212_s21 + $0x118] sm:$0xff] }
 0x469   : > { %7551 = vmatprep.subr.bf16.mxu0 %v14173_v29  ;;  %v4010_v29 = vld [vmem:[%s16212_s21 + $0x138] sm:$0xff] }
 0x46a   : > { %v13871_v33 = vcombine.high %v4006_v27, %v4010_v29  ;;  %v13870_v11 = vcombine.low %v4006_v27, %v4010_v29  ;;  %v4086_v27 = vld [vmem:[%s16212_s21 + $0x398] sm:$0xff] }
 0x46b   : > { %7511 = vmatpush2.bf16.msra.mxu1 %v14044_v35  ;;  %v4381_v35 = vld [vmem:[%s16212_s21 + $0xcd0] sm:$0xff]  ;;  %v4090_v29 = vld [vmem:[%s16212_s21 + $0x3b8] sm:$0xff] }
 0x46c   : > { %7552 = vmatpush2.bf16.msra.mxu0 %v14172_v46  ;;  %7512 = vmatprep.subr.bf16.mxu1 %v14037_v37  ;;  %v4385_v46 = vld [vmem:[%s16212_s21 + $0xcf0] sm:$0xff]  ;;  %v3998_v37 = vld [vmem:[%s16212_s21 + $0xd8] sm:$0xff] }
 0x46d   : > { %7553 = vmatprep.subr.bf16.mxu0 %v14165_v13  ;;  %v4002_v13 = vld [vmem:[%s16212_s21 + $0xf8] sm:$0xff]  ;;  %v14245_v43 = vcombine.high %v4381_v35, %v4385_v46  ;;  %v14244_v51 = vcombine.low %v4381_v35, %v4385_v46 }
 0x46e   : > { %v13863_v44 = vcombine.high %v3998_v37, %v4002_v13  ;;  %v13862_v30 = vcombine.low %v3998_v37, %v4002_v13  ;;  %v4078_v35 = vld [vmem:[%s16212_s21 + $0x358] sm:$0xff]  ;;  %v13950_v13 = vcombine.low %v4086_v27, %v4090_v29 }
 0x46f   : > { %7513 = vmatpush2.bf16.msra.mxu1 %v14036_v60  ;;  %v4373_v60 = vld [vmem:[%s16212_s21 + $0xc90] sm:$0xff]  ;;  %v4082_v46 = vld [vmem:[%s16212_s21 + $0x378] sm:$0xff] }
 0x470   : > { %7554 = vmatpush2.bf16.msra.mxu0 %v14164_v48  ;;  %7514 = vmatprep.subr.bf16.mxu1 %v14029_v49  ;;  %v4377_v48 = vld [vmem:[%s16212_s21 + $0xcb0] sm:$0xff]  ;;  %v3990_v49 = vld [vmem:[%s16212_s21 + $0x98] sm:$0xff] }
 0x471   : > { %7555 = vmatprep.subr.bf16.mxu0 %v14157_v50  ;;  %v3994_v50 = vld [vmem:[%s16212_s21 + $0xb8] sm:$0xff]  ;;  %v14237_v53 = vcombine.high %v4373_v60, %v4377_v48  ;;  %v14236_v38 = vcombine.low %v4373_v60, %v4377_v48 }
 0x472   : > { %v13855_v5 = vcombine.high %v3990_v49, %v3994_v50  ;;  %v13854_v58 = vcombine.low %v3990_v49, %v3994_v50  ;;  %v4070_v60 = vld [vmem:[%s16212_s21 + $0x318] sm:$0xff]  ;;  %v13942_v50 = vcombine.low %v4078_v35, %v4082_v46 }
 0x473   : > { %7515 = vmatpush2.bf16.msra.mxu1 %v14028_v6  ;;  %v4365_v6 = vld [vmem:[%s16212_s21 + $0xc50] sm:$0xff]  ;;  %v4074_v48 = vld [vmem:[%s16212_s21 + $0x338] sm:$0xff] }
 0x474   : > { %7556 = vmatpush2.bf16.msra.mxu0 %v14156_v31  ;;  %7566 = vmatprep.subr.bf16.mxu1 %v14277_v7  ;;  %v4369_v31 = vld [vmem:[%s16212_s21 + $0xc70] sm:$0xff]  ;;  %v3982_v7 = vld [vmem:[%s16212_s21 + $0x58] sm:$0xff] }
 0x475   : > { %7607 = vmatprep.subr.bf16.mxu0 %v13895_v56  ;;  %v3986_v56 = vld [vmem:[%s16212_s21 + $0x78] sm:$0xff]  ;;  %v14228_v19 = vcombine.low %v4365_v6, %v4369_v31 }
 0x476   : > { %v17289_v54 = vpop.f32.mrf.mxu0  ;;  %7517 = vmatmul.mubr.bf16.vlgmr.msra.gmra.mxu1 %v16948_v0  ;;  %v7272_v1 = vpop.f32.mrf.mxu1  ;;  %v13847_v59 = vcombine.high %v3982_v7, %v3986_v56 }
 0x477   : > { %7558 = vmatmul.mubr.bf16.vlgmr.msra.gmra.mxu0 %v16999_v42  ;;  %v17296_v9 = vadd.f32 %v7272_v1, %v17220_v39  ;;  %7567 = vmatpush1.bf16.msra.mxu1 %v14276_v62  ;;  %v13879_v39 = vcombine.high %v4014_v15, %v4018_v3  ;;  %v14229_v62 = vcombine.high %v4365_v6, %v4369_v31  ;;  %v4062_v6 = vld [vmem:[%s16212_s21 + $0x2d8] sm:$0xff] }
 0x478   : > { %7598 = vmatprep.mubr.bf16.mxu1 %v17048_v14  ;;  %7608 = vmatpush1.bf16.msra.mxu0 %v13894_v45  ;;  %v17299_v16 = vpop.f32.mrf.mxu0  ;;  %v7274_v20 = vpop.f32.mrf.mxu1  ;;  %v4361_v45 = vld [vmem:[%s16212_s21 + $0xc30] sm:$0xff]  ;;  %v13846_v1 = vcombine.low %v3982_v7, %v3986_v56  ;;  %v4066_v31 = vld [vmem:[%s16212_s21 + $0x2f8] sm:$0xff]  ;;  %v13934_v56 = vcombine.low %v4070_v60, %v4074_v48 }
 0x479   : > { %7639 = vmatprep.mubr.bf16.mxu0 %v16858_v32  ;;  %v17303_v23 = vadd.f32 %v7274_v20, %v17225_v10  ;;  %7568 = vmatprep.subr.bf16.mxu1 %v14269_v61  ;;  %v13878_v10 = vcombine.low %v4014_v15, %v4018_v3  ;;  %v3974_v61 = vld [vmem:[%s16212_s21 + $0x18] sm:$0xff]  ;;  %v4477_v3 = vld [vmem:[%s16212_s21 + $0xfd0] sm:$0xff] }
 0x47a   : > { %v7317_v52 = vpop.f32.mrf.mxu0  ;;  %7609 = vmatprep.subr.bf16.mxu0 %v13887_v2  ;;  %v7276_v25 = vpop.f32.mrf.mxu1  ;;  %v14221_v2 = vcombine.high %v4357_v24, %v4361_v45  ;;  %v13839_v15 = vcombine.high %v3974_v61, %v3978_v8  ;;  %v4094_v20 = vld [vmem:[%s16212_s21 + $0x3d8] sm:$0xff] }
 0x47b   : > { %7569 = vmatpush1.bf16.msra.mxu1 %v14268_v12  ;;  %v4481_v12 = vld [vmem:[%s16212_s21 + $0xff0] sm:$0xff] }
 0x47c   : > { %7610 = vmatpush1.bf16.msra.mxu0 %v13886_v26  ;;  %v7318_v32 = vpop.f32.mrf.mxu0  ;;  %v7277_v63 = vpop.f32.mrf.mxu1  ;;  %7570 = vmatprep.subr.bf16.mxu1 %v14261_v21  ;;  %v4098_v26 = vld [vmem:[%s16212_s21 + $0x3f8] sm:$0xff]  ;;  %v14220_v21 = vcombine.low %v4357_v24, %v4361_v45  ;;  %v14341_v28 = vcombine.high %v4477_v3, %v4481_v12  ;;  %v4469_v52 = vld [vmem:[%s16212_s21 + $0xf90] sm:$0xff] }
 0x47d   : > { %7611 = vmatprep.subr.bf16.mxu0 %v13879_v39  ;;  %v13838_v39 = vcombine.low %v3974_v61, %v3978_v8  ;;  %v13959_v18 = vcombine.high %v4094_v20, %v4098_v26  ;;  %v4473_v25 = vld [vmem:[%s16212_s21 + $0xfb0] sm:$0xff]  ;;  %v13958_v32 = vcombine.low %v4094_v20, %v4098_v26  ;;  %v4054_v24 = vld [vmem:[%s16212_s21 + $0x298] sm:$0xff]  ;;  %v13926_v8 = vcombine.low %v4062_v6, %v4066_v31 }
 0x47e   : > { %v14333_v63 = vcombine.high %v4469_v52, %v4473_v25  ;;  %v14332_v37 = vcombine.low %v4469_v52, %v4473_v25  ;;  %v4058_v45 = vld [vmem:[%s16212_s21 + $0x2b8] sm:$0xff] }
 0x47f   : > { %7571 = vmatpush1.bf16.msra.mxu1 %v14260_v57  ;;  %v14340_v57 = vcombine.low %v4477_v3, %v4481_v12  ;;  %v4046_v3 = vld [vmem:[%s16212_s21 + $0x258] sm:$0xff]  ;;  %v13918_v26 = vcombine.low %v4054_v24, %v4058_v45 }
 0x480   : > { %7612 = vmatpush1.bf16.msra.mxu0 %v13878_v10  ;;  %7572 = vmatprep.subr.bf16.mxu1 %v14253_v4  ;;  %v13951_v10 = vcombine.high %v4086_v27, %v4090_v29  ;;  %v4461_v4 = vld [vmem:[%s16212_s21 + $0xf50] sm:$0xff]  ;;  %v4050_v12 = vld [vmem:[%s16212_s21 + $0x278] sm:$0xff] }
 0x481   : > { %7613 = vmatprep.subr.bf16.mxu0 %v13871_v33  ;;  %v4465_v33 = vld [vmem:[%s16212_s21 + $0xf70] sm:$0xff]  ;;  %v4038_v52 = vld [vmem:[%s16212_s21 + $0x218] sm:$0xff]  ;;  %v13910_v29 = vcombine.low %v4046_v3, %v4050_v12 }
 0x482   : > { %v14324_v49 = vcombine.low %v4461_v4, %v4465_v33  ;;  %v4042_v25 = vld [vmem:[%s16212_s21 + $0x238] sm:$0xff] }
 0x483   : > { %7573 = vmatpush1.bf16.msra.mxu1 %v14252_v41  ;;  %v14325_v41 = vcombine.high %v4461_v4, %v4465_v33  ;;  %v4158_v4 = vld [vmem:[%s16212_s21 + $0x5d8] sm:$0xff] }
 0x484   : > { %7614 = vmatpush1.bf16.msra.mxu0 %v13870_v11  ;;  %7574 = vmatprep.subr.bf16.mxu1 %v14245_v43  ;;  %v13943_v11 = vcombine.high %v4078_v35, %v4082_v46  ;;  %v4453_v43 = vld [vmem:[%s16212_s21 + $0xf10] sm:$0xff]  ;;  %v4162_v33 = vld [vmem:[%s16212_s21 + $0x5f8] sm:$0xff] }
 0x485   : > { %7615 = vmatprep.subr.bf16.mxu0 %v13863_v44  ;;  %v4457_v44 = vld [vmem:[%s16212_s21 + $0xf30] sm:$0xff]  ;;  %v4286_v35 = vld [vmem:[%s16212_s21 + $0x9d8] sm:$0xff] }
 0x486   : > { %v14316_v7 = vcombine.low %v4453_v43, %v4457_v44  ;;  %v4290_v46 = vld [vmem:[%s16212_s21 + $0x9f8] sm:$0xff] }
 0x487   : > { %7575 = vmatpush1.bf16.msra.mxu1 %v14244_v51  ;;  %v14317_v51 = vcombine.high %v4453_v43, %v4457_v44  ;;  %v14151_v44 = vcombine.high %v4286_v35, %v4290_v46 }
 0x488   : > { %7616 = vmatpush1.bf16.msra.mxu0 %v13862_v30  ;;  %7576 = vmatprep.subr.bf16.mxu1 %v14237_v53  ;;  %v13935_v30 = vcombine.high %v4070_v60, %v4074_v48  ;;  %v4445_v53 = vld [vmem:[%s16212_s21 + $0xed0] sm:$0xff]  ;;  %v4150_v60 = vld [vmem:[%s16212_s21 + $0x598] sm:$0xff] }
 0x489   : > { %7617 = vmatprep.subr.bf16.mxu0 %v13855_v5  ;;  %v4449_v5 = vld [vmem:[%s16212_s21 + $0xef0] sm:$0xff]  ;;  %v4154_v48 = vld [vmem:[%s16212_s21 + $0x5b8] sm:$0xff] }
 0x48a   : > { %v14308_v61 = vcombine.low %v4445_v53, %v4449_v5 }
 0x48b   : > { %7577 = vmatpush1.bf16.msra.mxu1 %v14236_v38  ;;  %v14309_v38 = vcombine.high %v4445_v53, %v4449_v5  ;;  %v14150_v53 = vcombine.low %v4286_v35, %v4290_v46  ;;  %v4118_v35 = vld [vmem:[%s16212_s21 + $0x498] sm:$0xff] }
 0x48c   : > { %7618 = vmatpush1.bf16.msra.mxu0 %v13854_v58  ;;  %7578 = vmatprep.subr.bf16.mxu1 %v14229_v62  ;;  %v13927_v58 = vcombine.high %v4062_v6, %v4066_v31  ;;  %v4437_v62 = vld [vmem:[%s16212_s21 + $0xe90] sm:$0xff]  ;;  %v14015_v6 = vcombine.high %v4150_v60, %v4154_v48  ;;  %v4142_v31 = vld [vmem:[%s16212_s21 + $0x558] sm:$0xff] }
 0x48d   : > { %7619 = vmatprep.subr.bf16.mxu0 %v13847_v59  ;;  %v4441_v59 = vld [vmem:[%s16212_s21 + $0xeb0] sm:$0xff]  ;;  %v4122_v46 = vld [vmem:[%s16212_s21 + $0x4b8] sm:$0xff] }
 0x48e   : > { %v14300_v20 = vcombine.low %v4437_v62, %v4441_v59 }
 0x48f   : > { %7579 = vmatpush1.bf16.msra.mxu1 %v14228_v19  ;;  %v14301_v19 = vcombine.high %v4437_v62, %v4441_v59  ;;  %v4270_v62 = vld [vmem:[%s16212_s21 + $0x958] sm:$0xff] }
 0x490   : > { %7620 = vmatpush1.bf16.msra.mxu0 %v13846_v1  ;;  %7580 = vmatprep.subr.bf16.mxu1 %v14221_v2  ;;  %v13919_v1 = vcombine.high %v4054_v24, %v4058_v45  ;;  %v4429_v2 = vld [vmem:[%s16212_s21 + $0xe50] sm:$0xff]  ;;  %v4274_v59 = vld [vmem:[%s16212_s21 + $0x978] sm:$0xff] }
 0x491   : > { %7621 = vmatprep.subr.bf16.mxu0 %v13839_v15  ;;  %v4433_v15 = vld [vmem:[%s16212_s21 + $0xe70] sm:$0xff] }
 0x492   : > { %v14292_v27 = vcombine.low %v4429_v2, %v4433_v15 }
 0x493   : > { %7581 = vmatpush1.bf16.msra.mxu1 %v14220_v21  ;;  %v14293_v21 = vcombine.high %v4429_v2, %v4433_v15  ;;  %v14135_v15 = vcombine.high %v4270_v62, %v4274_v59 }
 0x494   : > { %7622 = vmatpush1.bf16.msra.mxu0 %v13838_v39  ;;  %7582 = vmatprep.subr.bf16.mxu1 %v14341_v28  ;;  %v13911_v39 = vcombine.high %v4046_v3, %v4050_v12  ;;  %v4421_v28 = vld [vmem:[%s16212_s21 + $0xe10] sm:$0xff]  ;;  %v4134_v3 = vld [vmem:[%s16212_s21 + $0x518] sm:$0xff] }
 0x495   : > { %7623 = vmatprep.subr.bf16.mxu0 %v13959_v18  ;;  %v4425_v18 = vld [vmem:[%s16212_s21 + $0xe30] sm:$0xff] }
 0x497   : > { %7583 = vmatpush2.bf16.msra.mxu1 %v14340_v57  ;;  %v14285_v57 = vcombine.high %v4421_v28, %v4425_v18 }
 0x498   : > { %7624 = vmatpush2.bf16.msra.mxu0 %v13958_v32  ;;  %7584 = vmatprep.subr.bf16.mxu1 %v14333_v63  ;;  %v15394_v32 = vld [vmem:[%s16228_s14 + $0x8] sm:$0x77] }
 0x499   : > { %7625 = vmatprep.subr.bf16.mxu0 %v13951_v10  ;;  %v4494_v63 = vrot.slane %v15394_v32, %v17118_v22  ;;  %v13903_v10 = vcombine.high %v4038_v52, %v4042_v25 }
 0x49b   : > { %7585 = vmatpush2.bf16.msra.mxu1 %v14332_v37  ;;  %v4498_v37 = vrot.slane %v15394_v32, %v17124_v47  ;;  %v4534_v43 = vrot.slane %v4494_v63, %v17118_v22  ;;  %v4258_v32 = vld [vmem:[%s16212_s21 + $0x8f8] sm:$0xff] }
 0x49c   : > { %7626 = vmatpush2.bf16.msra.mxu0 %v13950_v13  ;;  %7586 = vmatprep.subr.bf16.mxu1 %v14325_v41  ;;  %v14284_v13 = vcombine.low %v4421_v28, %v4425_v18  ;;  %v13902_v41 = vcombine.low %v4038_v52, %v4042_v25  ;;  %v14134_v18 = vcombine.low %v4270_v62, %v4274_v59 }
 0x49d   : > { %7627 = vmatprep.subr.bf16.mxu0 %v13943_v11  ;;  %v14023_v11 = vcombine.high %v4158_v4, %v4162_v33  ;;  %v7314_v5 = vadd.f32 %v17289_v54, %v4534_v43  ;;  %v14014_v54 = vcombine.low %v4150_v60, %v4154_v48  ;;  %v13983_v43 = vcombine.high %v4118_v35, %v4122_v46  ;;  %v4110_v60 = vld [vmem:[%s16212_s21 + $0x458] sm:$0xff] }
 0x49e   : > { %v4114_v48 = vld [vmem:[%s16212_s21 + $0x478] sm:$0xff] }
 0x49f   : > { %7587 = vmatpush2.bf16.msra.mxu1 %v14324_v49  ;;  %v4538_v49 = vrot.slane %v4498_v37, %v17118_v22  ;;  %v4246_v37 = vld [vmem:[%s16212_s21 + $0x898] sm:$0xff] }
 0x4a0   : > { %7628 = vmatpush2.bf16.msra.mxu0 %v13942_v50  ;;  %7588 = vmatprep.subr.bf16.mxu1 %v14317_v51  ;;  %v14022_v50 = vcombine.low %v4158_v4, %v4162_v33  ;;  %v4278_v51 = vld [vmem:[%s16212_s21 + $0x998] sm:$0xff] }
 0x4a1   : > { %7629 = vmatprep.subr.bf16.mxu0 %v13935_v30  ;;  %v4282_v30 = vld [vmem:[%s16212_s21 + $0x9b8] sm:$0xff]  ;;  %v7316_v24 = vadd.f32 %v17299_v16, %v4538_v49 }
 0x4a2   : > { %v4238_v49 = vld [vmem:[%s16212_s21 + $0x858] sm:$0xff] }
 0x4a3   : > { %7589 = vmatpush2.bf16.msra.mxu1 %v14316_v7  ;;  %v4146_v7 = vld [vmem:[%s16212_s21 + $0x578] sm:$0xff] }
 0x4a4   : > { %7630 = vmatpush2.bf16.msra.mxu0 %v13934_v56  ;;  %7590 = vmatprep.subr.bf16.mxu1 %v14309_v38 }
 0x4a5   : > { %7631 = vmatprep.subr.bf16.mxu0 %v13927_v58  ;;  %v14143_v58 = vcombine.high %v4278_v51, %v4282_v30 }
 0x4a7   : > { %7591 = vmatpush2.bf16.msra.mxu1 %v14308_v61 }
 0x4a8   : > { %7632 = vmatpush2.bf16.msra.mxu0 %v13926_v8  ;;  %7592 = vmatprep.subr.bf16.mxu1 %v14301_v19  ;;  %v14142_v19 = vcombine.low %v4278_v51, %v4282_v30  ;;  %v13982_v51 = vcombine.low %v4118_v35, %v4122_v46 }
 0x4a9   : > { %7633 = vmatprep.subr.bf16.mxu0 %v13919_v1  ;;  %v14007_v1 = vcombine.high %v4142_v31, %v4146_v7 }
 0x4ab   : > { %7593 = vmatpush2.bf16.msra.mxu1 %v14300_v20 }
 0x4ac   : > { %7634 = vmatpush2.bf16.msra.mxu0 %v13918_v26  ;;  %7594 = vmatprep.subr.bf16.mxu1 %v14293_v21  ;;  %v4266_v26 = vld [vmem:[%s16212_s21 + $0x938] sm:$0xff] }
 0x4ad   : > { %7635 = vmatprep.subr.bf16.mxu0 %v13911_v39  ;;  %v14006_v39 = vcombine.low %v4142_v31, %v4146_v7  ;;  %v4106_v31 = vld [vmem:[%s16212_s21 + $0x438] sm:$0xff] }
 0x4ae   : > { %v4230_v7 = vld [vmem:[%s16212_s21 + $0x818] sm:$0xff] }
 0x4af   : > { %7595 = vmatpush2.bf16.msra.mxu1 %v14292_v27  ;;  %v4126_v27 = vld [vmem:[%s16212_s21 + $0x4d8] sm:$0xff] }
 0x4b0   : > { %7636 = vmatpush2.bf16.msra.mxu0 %v13910_v29  ;;  %7596 = vmatprep.subr.bf16.mxu1 %v14285_v57  ;;  %v4130_v29 = vld [vmem:[%s16212_s21 + $0x4f8] sm:$0xff] }
 0x4b1   : > { %7637 = vmatprep.subr.bf16.mxu0 %v13903_v10  ;;  %v4254_v57 = vld [vmem:[%s16212_s21 + $0x8d8] sm:$0xff]  ;;  %v13991_v4 = vcombine.high %v4126_v27, %v4130_v29 }
 0x4b2   : > { %v14119_v33 = vcombine.high %v4254_v57, %v4258_v32 }
 0x4b3   : > { %7597 = vmatpush2.bf16.msra.mxu1 %v14284_v13  ;;  %v4250_v13 = vld [vmem:[%s16212_s21 + $0x8b8] sm:$0xff] }
 0x4b4   : > { %7638 = vmatpush2.bf16.msra.mxu0 %v13902_v41  ;;  %7648 = vmatprep.subr.bf16.mxu1 %v14023_v11  ;;  %v13990_v41 = vcombine.low %v4126_v27, %v4130_v29  ;;  %v14118_v11 = vcombine.low %v4254_v57, %v4258_v32  ;;  %v14110_v30 = vcombine.low %v4246_v37, %v4250_v13  ;;  %v4198_v32 = vld [vmem:[%s16212_s21 + $0x718] sm:$0xff] }
 0x4b5   : > { %7689 = vmatprep.subr.bf16.mxu0 %v14151_v44  ;;  %v14111_v44 = vcombine.high %v4246_v37, %v4250_v13  ;;  %v4190_v13 = vld [vmem:[%s16212_s21 + $0x6d8] sm:$0xff] }
 0x4b6   : > { %v7354_v56 = vpop.f32.mrf.mxu1  ;;  %v7395_v38 = vpop.f32.mrf.mxu0  ;;  %7599 = vmatmul.mubr.bf16.vlgmr.msra.gmra.mxu1 %v17050_v17 }
 0x4b7   : > { %v7355_v45 = vadd.f32 %v7354_v56, %v7314_v5  ;;  %7640 = vmatmul.mubr.bf16.vlgmr.msra.gmra.mxu0 %v16867_v36  ;;  %7649 = vmatpush1.bf16.msra.mxu1 %v14022_v50  ;;  %v4138_v36 = vld [vmem:[%s16212_s21 + $0x538] sm:$0xff] }
 0x4b8   : > { %7680 = vmatprep.mubr.bf16.mxu1 %v16940_v55  ;;  %7690 = vmatpush1.bf16.msra.mxu0 %v14150_v53  ;;  %v7356_v61 = vpop.f32.mrf.mxu1  ;;  %v7397_v8 = vpop.f32.mrf.mxu0  ;;  %v4262_v55 = vld [vmem:[%s16212_s21 + $0x918] sm:$0xff]  ;;  %v13999_v52 = vcombine.high %v4134_v3, %v4138_v36  ;;  %v13998_v63 = vcombine.low %v4134_v3, %v4138_v36  ;;  %v13975_v53 = vcombine.high %v4110_v60, %v4114_v48 }
 0x4b9   : > { %v17379_v2 = vadd.f32 %v7395_v38, %v7355_v45  ;;  %7721 = vmatprep.mubr.bf16.mxu0 %v16997_v34  ;;  %v7357_v16 = vadd.f32 %v7356_v61, %v7316_v24  ;;  %7650 = vmatprep.subr.bf16.mxu1 %v14015_v6  ;;  %v14127_v25 = vcombine.high %v4262_v55, %v4266_v26  ;;  %v4242_v50 = vld [vmem:[%s16212_s21 + $0x878] sm:$0xff] }
 0x4ba   : > { %v7358_v12 = vpop.f32.mrf.mxu1  ;;  %v7399_v20 = vpop.f32.mrf.mxu0  ;;  %7691 = vmatprep.subr.bf16.mxu0 %v14143_v58  ;;  %v14126_v10 = vcombine.low %v4262_v55, %v4266_v26  ;;  %v14103_v5 = vcombine.high %v4238_v49, %v4242_v50  ;;  %v4102_v6 = vld [vmem:[%s16212_s21 + $0x418] sm:$0xff]  ;;  %v13974_v38 = vcombine.low %v4110_v60, %v4114_v48  ;;  %v14102_v58 = vcombine.low %v4238_v49, %v4242_v50 }
 0x4bb   : > { %v17386_v21 = vadd.f32 %v7397_v8, %v7357_v16  ;;  %7651 = vmatpush1.bf16.msra.mxu1 %v14014_v54  ;;  %v4234_v56 = vld [vmem:[%s16212_s21 + $0x838] sm:$0xff]  ;;  %v13967_v62 = vcombine.high %v4102_v6, %v4106_v31  ;;  %v13966_v8 = vcombine.low %v4102_v6, %v4106_v31 }
 0x4bc   : > { %7692 = vmatpush1.bf16.msra.mxu0 %v14142_v19  ;;  %v7359_v34 = vpop.f32.mrf.mxu1  ;;  %v7400_v28 = vpop.f32.mrf.mxu0  ;;  %7652 = vmatprep.subr.bf16.mxu1 %v14007_v1  ;;  %v14095_v59 = vcombine.high %v4230_v7, %v4234_v56  ;;  %v4222_v24 = vld [vmem:[%s16212_s21 + $0x7d8] sm:$0xff]  ;;  %v14094_v19 = vcombine.low %v4230_v7, %v4234_v56 }
 0x4bd   : > { %7693 = vmatprep.subr.bf16.mxu0 %v14135_v15  ;;  %v4226_v45 = vld [vmem:[%s16212_s21 + $0x7f8] sm:$0xff] }
 0x4be   : > { %v4350_v54 = vld [vmem:[%s16212_s21 + $0xbd8] sm:$0xff]  ;;  %v14087_v1 = vcombine.high %v4222_v24, %v4226_v45  ;;  %v14086_v20 = vcombine.low %v4222_v24, %v4226_v45 }
 0x4bf   : > { %7653 = vmatpush1.bf16.msra.mxu1 %v14006_v39  ;;  %v4354_v61 = vld [vmem:[%s16212_s21 + $0xbf8] sm:$0xff] }
 0x4c0   : > { %7694 = vmatpush1.bf16.msra.mxu0 %v14134_v18  ;;  %7654 = vmatprep.subr.bf16.mxu1 %v13999_v52  ;;  %v14215_v16 = vcombine.high %v4350_v54, %v4354_v61  ;;  %v4214_v15 = vld [vmem:[%s16212_s21 + $0x798] sm:$0xff]  ;;  %v14214_v55 = vcombine.low %v4350_v54, %v4354_v61 }
 0x4c1   : > { %7695 = vmatprep.subr.bf16.mxu0 %v14127_v25  ;;  %v4218_v3 = vld [vmem:[%s16212_s21 + $0x7b8] sm:$0xff] }
 0x4c2   : > { %v4342_v36 = vld [vmem:[%s16212_s21 + $0xb98] sm:$0xff]  ;;  %v14079_v26 = vcombine.high %v4214_v15, %v4218_v3  ;;  %v14078_v25 = vcombine.low %v4214_v15, %v4218_v3 }
 0x4c3   : > { %7655 = vmatpush1.bf16.msra.mxu1 %v13998_v63  ;;  %v4346_v12 = vld [vmem:[%s16212_s21 + $0xbb8] sm:$0xff] }
 0x4c4   : > { %7696 = vmatpush1.bf16.msra.mxu0 %v14126_v10  ;;  %7656 = vmatprep.subr.bf16.mxu1 %v13991_v4  ;;  %v14207_v39 = vcombine.high %v4342_v36, %v4346_v12  ;;  %v4206_v34 = vld [vmem:[%s16212_s21 + $0x758] sm:$0xff]  ;;  %v14206_v27 = vcombine.low %v4342_v36, %v4346_v12 }
 0x4c5   : > { %7697 = vmatprep.subr.bf16.mxu0 %v14119_v33  ;;  %v4210_v28 = vld [vmem:[%s16212_s21 + $0x778] sm:$0xff] }
 0x4c6   : > { %v4334_v18 = vld [vmem:[%s16212_s21 + $0xb58] sm:$0xff]  ;;  %v14071_v29 = vcombine.high %v4206_v34, %v4210_v28  ;;  %v14070_v33 = vcombine.low %v4206_v34, %v4210_v28 }
 0x4c7   : > { %7657 = vmatpush1.bf16.msra.mxu1 %v13990_v41  ;;  %v4338_v52 = vld [vmem:[%s16212_s21 + $0xb78] sm:$0xff] }
 0x4c8   : > { %7698 = vmatpush1.bf16.msra.mxu0 %v14118_v11  ;;  %7658 = vmatprep.subr.bf16.mxu1 %v13983_v43  ;;  %v14199_v57 = vcombine.high %v4334_v18, %v4338_v52  ;;  %v4202_v63 = vld [vmem:[%s16212_s21 + $0x738] sm:$0xff]  ;;  %v14198_v35 = vcombine.low %v4334_v18, %v4338_v52 }
 0x4c9   : > { %7699 = vmatprep.subr.bf16.mxu0 %v14111_v44  ;;  %v4326_v10 = vld [vmem:[%s16212_s21 + $0xb18] sm:$0xff]  ;;  %v14063_v46 = vcombine.high %v4198_v32, %v4202_v63  ;;  %v14062_v44 = vcombine.low %v4198_v32, %v4202_v63  ;;  %v7839_v32 = vld [vmem:[%s16214_s16 + $0x1a0] sm:$0xff] }
 0x4ca   : > { %v4330_v4 = vld [vmem:[%s16212_s21 + $0xb38] sm:$0xff] }
 0x4cb   : > { %7659 = vmatpush1.bf16.msra.mxu1 %v13982_v51  ;;  %v14191_v37 = vcombine.high %v4326_v10, %v4330_v4  ;;  %v4194_v41 = vld [vmem:[%s16212_s21 + $0x6f8] sm:$0xff]  ;;  %v14190_v60 = vcombine.low %v4326_v10, %v4330_v4 }
 0x4cc   : > { %7700 = vmatpush1.bf16.msra.mxu0 %v14110_v30  ;;  %7660 = vmatprep.subr.bf16.mxu1 %v13975_v53  ;;  %v4318_v11 = vld [vmem:[%s16212_s21 + $0xad8] sm:$0xff]  ;;  %v14055_v48 = vcombine.high %v4190_v13, %v4194_v41 }
 0x4cd   : > { %7701 = vmatprep.subr.bf16.mxu0 %v14103_v5  ;;  %v4322_v43 = vld [vmem:[%s16212_s21 + $0xaf8] sm:$0xff]  ;;  %v14054_v5 = vcombine.low %v4190_v13, %v4194_v41  ;;  %v7831_v13 = vld [vmem:[%s16214_s16 + $0x160] sm:$0xff] }
 0x4ce   : > { %v14183_v49 = vcombine.high %v4318_v11, %v4322_v43  ;;  %v4182_v50 = vld [vmem:[%s16212_s21 + $0x698] sm:$0xff]  ;;  %v14182_v6 = vcombine.low %v4318_v11, %v4322_v43 }
 0x4cf   : > { %7661 = vmatpush1.bf16.msra.mxu1 %v13974_v38  ;;  %v4186_v51 = vld [vmem:[%s16212_s21 + $0x6b8] sm:$0xff] }
 0x4d0   : > { %7702 = vmatpush1.bf16.msra.mxu0 %v14102_v58  ;;  %7662 = vmatprep.subr.bf16.mxu1 %v13967_v62  ;;  %v4310_v30 = vld [vmem:[%s16212_s21 + $0xa98] sm:$0xff]  ;;  %v14047_v31 = vcombine.high %v4182_v50, %v4186_v51 }
 0x4d1   : > { %7703 = vmatprep.subr.bf16.mxu0 %v14095_v59  ;;  %v4314_v53 = vld [vmem:[%s16212_s21 + $0xab8] sm:$0xff]  ;;  %v14046_v59 = vcombine.low %v4182_v50, %v4186_v51  ;;  %v7819_v51 = vld [vmem:[%s16214_s16 + $0x100] sm:$0xff] }
 0x4d2   : > { %v14175_v7 = vcombine.high %v4310_v30, %v4314_v53  ;;  %v4174_v56 = vld [vmem:[%s16212_s21 + $0x658] sm:$0xff]  ;;  %v14174_v24 = vcombine.low %v4310_v30, %v4314_v53 }
 0x4d3   : > { %7663 = vmatpush1.bf16.msra.mxu1 %v13966_v8  ;;  %v4178_v38 = vld [vmem:[%s16212_s21 + $0x678] sm:$0xff] }
 0x4d4   : > { %7704 = vmatpush1.bf16.msra.mxu0 %v14094_v19  ;;  %7664 = vmatprep.subr.bf16.mxu1 %v14087_v1  ;;  %v4302_v58 = vld [vmem:[%s16212_s21 + $0xa58] sm:$0xff]  ;;  %v14039_v45 = vcombine.high %v4174_v56, %v4178_v38 }
 0x4d5   : > { %7705 = vmatprep.subr.bf16.mxu0 %v14215_v16  ;;  %v4306_v62 = vld [vmem:[%s16212_s21 + $0xa78] sm:$0xff]  ;;  %v14038_v16 = vcombine.low %v4174_v56, %v4178_v38 }
 0x4d6   : > { %v14167_v54 = vcombine.high %v4302_v58, %v4306_v62  ;;  %v4166_v61 = vld [vmem:[%s16212_s21 + $0x618] sm:$0xff]  ;;  %v14166_v15 = vcombine.low %v4302_v58, %v4306_v62  ;;  %v7811_v62 = vld [vmem:[%s16214_s16 + $0xc0] sm:$0xff] }
 0x4d7   : > { %7665 = vmatpush2.bf16.msra.mxu1 %v14086_v20  ;;  %v4170_v8 = vld [vmem:[%s16212_s21 + $0x638] sm:$0xff] }
 0x4d8   : > { %7706 = vmatpush2.bf16.msra.mxu0 %v14214_v55  ;;  %7666 = vmatprep.subr.bf16.mxu1 %v14079_v26  ;;  %v4294_v19 = vld [vmem:[%s16212_s21 + $0xa18] sm:$0xff]  ;;  %v14031_v3 = vcombine.high %v4166_v61, %v4170_v8  ;;  %v7843_v55 = vld [vmem:[%s16214_s16 + $0x1c0] sm:$0xff] }
 0x4d9   : > { %7707 = vmatprep.subr.bf16.mxu0 %v14207_v39  ;;  %v4298_v1 = vld [vmem:[%s16212_s21 + $0xa38] sm:$0xff]  ;;  %v7847_v26 = vld [vmem:[%s16214_s16 + $0x1e0] sm:$0xff]  ;;  %v14030_v39 = vcombine.low %v4166_v61, %v4170_v8 }
 0x4da   : > { %v14159_v36 = vcombine.high %v4294_v19, %v4298_v1  ;;  %v4414_v12 = vld [vmem:[%s16212_s21 + $0xdd8] sm:$0xff]  ;;  %v14158_v34 = vcombine.low %v4294_v19, %v4298_v1  ;;  %v14401_v18 = vcombine.high %v7843_v55, %v7847_v26  ;;  %v14400_v63 = vcombine.low %v7843_v55, %v7847_v26  ;;  %v7803_v1 = vld [vmem:[%s16214_s16 + $0x80] sm:$0xff] }
 0x4db   : > { %7667 = vmatpush2.bf16.msra.mxu1 %v14078_v25  ;;  %v4418_v20 = vld [vmem:[%s16212_s21 + $0xdf8] sm:$0xff]  ;;  %v7795_v26 = vld [vmem:[%s16214_s16 + $0x40] sm:$0xff] }
 0x4dc   : > { %7708 = vmatpush2.bf16.msra.mxu0 %v14206_v27  ;;  %7668 = vmatprep.subr.bf16.mxu1 %v14071_v29  ;;  %v14279_v28 = vcombine.high %v4414_v12, %v4418_v20  ;;  %v4406_v52 = vld [vmem:[%s16212_s21 + $0xd98] sm:$0xff]  ;;  %v7772_v27 = vmax.f32 %v17303_v23, 0.0  ;;  %v14278_v29 = vcombine.low %v4414_v12, %v4418_v20 }
 0x4dd   : > { %7709 = vmatprep.subr.bf16.mxu0 %v14199_v57  ;;  %v4410_v25 = vld [vmem:[%s16212_s21 + $0xdb8] sm:$0xff]  ;;  %v7835_v57 = vld [vmem:[%s16214_s16 + $0x180] sm:$0xff] }
 0x4de   : > { %v14271_v10 = vcombine.high %v4406_v52, %v4410_v25  ;;  %v4398_v4 = vld [vmem:[%s16212_s21 + $0xd58] sm:$0xff]  ;;  %v17450_v23 = vpack.c.bf16 %v7772_v27, %v7772_v27  ;;  %v14270_v43 = vcombine.low %v4406_v52, %v4410_v25 }
 0x4df   : > { %7669 = vmatpush2.bf16.msra.mxu1 %v14070_v33  ;;  %v4402_v33 = vld [vmem:[%s16212_s21 + $0xd78] sm:$0xff] }
 0x4e0   : > { %7710 = vmatpush2.bf16.msra.mxu0 %v14198_v35  ;;  %7670 = vmatprep.subr.bf16.mxu1 %v14063_v46  ;;  %v14393_v46 = vcombine.high %v7835_v57, %v7839_v32  ;;  %v4394_v50 = vld [vmem:[%s16212_s21 + $0xd38] sm:$0xff]  ;;  %v14262_v53 = vcombine.low %v4398_v4, %v4402_v33 }
 0x4e1   : > { %7711 = vmatprep.subr.bf16.mxu0 %v14191_v37  ;;  %v7827_v37 = vld [vmem:[%s16214_s16 + $0x140] sm:$0xff]  ;;  %v4382_v38 = vld [vmem:[%s16212_s21 + $0xcd8] sm:$0xff] }
 0x4e2   : > { %v4386_v58 = vld [vmem:[%s16212_s21 + $0xcf8] sm:$0xff] }
 0x4e3   : > { %7671 = vmatpush2.bf16.msra.mxu1 %v14062_v44  ;;  %v14392_v44 = vcombine.low %v7835_v57, %v7839_v32  ;;  %v4374_v8 = vld [vmem:[%s16212_s21 + $0xc98] sm:$0xff]  ;;  %v7791_v57 = vld [vmem:[%s16214_s16 + $0x20] sm:$0xff] }
 0x4e4   : > { %7712 = vmatpush2.bf16.msra.mxu0 %v14190_v60  ;;  %7672 = vmatprep.subr.bf16.mxu1 %v14055_v48  ;;  %v14263_v60 = vcombine.high %v4398_v4, %v4402_v33  ;;  %v4378_v19 = vld [vmem:[%s16212_s21 + $0xcb8] sm:$0xff] }
 0x4e5   : > { %7713 = vmatprep.subr.bf16.mxu0 %v14183_v49  ;;  %v4390_v49 = vld [vmem:[%s16212_s21 + $0xd18] sm:$0xff] }
 0x4e6   : > { %v4366_v20 = vld [vmem:[%s16212_s21 + $0xc58] sm:$0xff] }
 0x4e7   : > { %7673 = vmatpush2.bf16.msra.mxu1 %v14054_v5  ;;  %v4370_v55 = vld [vmem:[%s16212_s21 + $0xc78] sm:$0xff] }
 0x4e8   : > { %7714 = vmatpush2.bf16.msra.mxu0 %v14182_v6  ;;  %7674 = vmatprep.subr.bf16.mxu1 %v14047_v31  ;;  %v14384_v6 = vcombine.low %v7827_v37, %v7831_v13  ;;  %v14255_v31 = vcombine.high %v4390_v49, %v4394_v50  ;;  %v4358_v25 = vld [vmem:[%s16212_s21 + $0xc18] sm:$0xff]  ;;  %v14230_v32 = vcombine.low %v4366_v20, %v4370_v55 }
 0x4e9   : > { %7715 = vmatprep.subr.bf16.mxu0 %v14175_v7  ;;  %v4362_v27 = vld [vmem:[%s16212_s21 + $0xc38] sm:$0xff] }
 0x4ea   : > { %v4478_v33 = vld [vmem:[%s16212_s21 + $0xfd8] sm:$0xff] }
 0x4eb   : > { %7675 = vmatpush2.bf16.msra.mxu1 %v14046_v59  ;;  %v7815_v59 = vld [vmem:[%s16214_s16 + $0xe0] sm:$0xff] }
 0x4ec   : > { %7716 = vmatpush2.bf16.msra.mxu0 %v14174_v24  ;;  %7676 = vmatprep.subr.bf16.mxu1 %v14039_v45  ;;  %v14254_v24 = vcombine.low %v4390_v49, %v4394_v50  ;;  %v14369_v61 = vcombine.high %v7811_v62, %v7815_v59  ;;  %v4474_v49 = vld [vmem:[%s16212_s21 + $0xfb8] sm:$0xff]  ;;  %v7899_v50 = vld [vmem:[%s16214_s16 + $0x380] sm:$0xff] }
 0x4ed   : > { %7717 = vmatprep.subr.bf16.mxu0 %v14167_v54  ;;  %v14247_v54 = vcombine.high %v4382_v38, %v4386_v58 }
 0x4ef   : > { %7677 = vmatpush2.bf16.msra.mxu1 %v14038_v16  ;;  %v7807_v16 = vld [vmem:[%s16214_s16 + $0xa0] sm:$0xff] }
 0x4f0   : > { %7718 = vmatpush2.bf16.msra.mxu0 %v14166_v15  ;;  %7678 = vmatprep.subr.bf16.mxu1 %v14031_v3  ;;  %v14246_v15 = vcombine.low %v4382_v38, %v4386_v58  ;;  %v14368_v3 = vcombine.low %v7811_v62, %v7815_v59  ;;  %v14361_v12 = vcombine.high %v7803_v1, %v7807_v16  ;;  %v4454_v59 = vld [vmem:[%s16212_s21 + $0xf18] sm:$0xff] }
 0x4f1   : > { %7719 = vmatprep.subr.bf16.mxu0 %v14159_v36  ;;  %v14239_v36 = vcombine.high %v4374_v8, %v4378_v19 }
 0x4f3   : > { %7679 = vmatpush2.bf16.msra.mxu1 %v14030_v39  ;;  %v7799_v39 = vld [vmem:[%s16214_s16 + $0x60] sm:$0xff] }
 0x4f4   : > { %7720 = vmatpush2.bf16.msra.mxu0 %v14158_v34  ;;  %7730 = vmatprep.subr.bf16.mxu1 %v14279_v28  ;;  %v14238_v34 = vcombine.low %v4374_v8, %v4378_v19  ;;  %v14360_v28 = vcombine.low %v7803_v1, %v7807_v16  ;;  %v14353_v52 = vcombine.high %v7795_v26, %v7799_v39  ;;  %v4446_v16 = vld [vmem:[%s16212_s21 + $0xed8] sm:$0xff] }
 0x4f5   : > { %10931 = vmatprep.subr.bf16.mxu0 %v14401_v18  ;;  %v14231_v18 = vcombine.high %v4366_v20, %v4370_v55 }
 0x4f6   : > { %v7436_v35 = vpop.f32.mrf.mxu1  ;;  %7681 = vmatmul.mubr.bf16.vlgmr.msra.gmra.mxu1 %v16948_v0 }
 0x4f7   : > { %v17453_v41 = vadd.f32 %v7436_v35, %v17379_v2  ;;  %v17455_v11 = vpop.f32.mrf.mxu0  ;;  %7722 = vmatmul.mubr.bf16.vlgmr.msra.gmra.mxu0 %v16999_v42  ;;  %7731 = vmatpush1.bf16.msra.mxu1 %v14278_v29  ;;  %v14385_v2 = vcombine.high %v7827_v37, %v7831_v13  ;;  %v7787_v29 = vld [vmem:[%s16214_s16] sm:$0xff]  ;;  %v4482_v35 = vld [vmem:[%s16212_s21 + $0xff8] sm:$0xff]  ;;  %v14222_v13 = vcombine.low %v4358_v25, %v4362_v27 }
 0x4f8   : > { %7762 = vmatprep.mubr.bf16.mxu1 %v17048_v14  ;;  %10932 = vmatpush1.bf16.msra.mxu0 %v14400_v63  ;;  %v17459_v0 = vpop.f32.mrf.mxu1  ;;  %v7823_v14 = vld [vmem:[%s16214_s16 + $0x120] sm:$0xff]  ;;  %v14352_v63 = vcombine.low %v7795_v26, %v7799_v39  ;;  %v14345_v4 = vcombine.high %v7787_v29, %v7791_v57  ;;  %v4438_v39 = vld [vmem:[%s16212_s21 + $0xe98] sm:$0xff] }
 0x4f9   : > { %10963 = vmatprep.mubr.bf16.mxu0 %v17450_v23  ;;  %v17462_v48 = vpop.f32.mrf.mxu0  ;;  %7732 = vmatprep.subr.bf16.mxu1 %v14271_v10  ;;  %v14377_v56 = vcombine.high %v7819_v51, %v7823_v14  ;;  %v14376_v45 = vcombine.low %v7819_v51, %v7823_v14  ;;  %v14223_v10 = vcombine.high %v4358_v25, %v4362_v27  ;;  %v7911_v37 = vld [vmem:[%s16214_s16 + $0x3e0] sm:$0xff] }
 0x4fa   : > { %v7440_v42 = vpop.f32.mrf.mxu1  ;;  %10933 = vmatprep.subr.bf16.mxu0 %v14393_v46  ;;  %v7907_v46 = vld [vmem:[%s16214_s16 + $0x3c0] sm:$0xff]  ;;  %v14342_v51 = vcombine.low %v4478_v33, %v4482_v35 }
 0x4fb   : > { %v7481_v30 = vpop.f32.mrf.mxu0  ;;  %7733 = vmatpush1.bf16.msra.mxu1 %v14270_v43  ;;  %v14344_v43 = vcombine.low %v7787_v29, %v7791_v57  ;;  %v7903_v42 = vld [vmem:[%s16214_s16 + $0x3a0] sm:$0xff]  ;;  %v14464_v14 = vcombine.low %v7907_v46, %v7911_v37  ;;  %v4430_v57 = vld [vmem:[%s16212_s21 + $0xe58] sm:$0xff] }
 0x4fc   : > { %10934 = vmatpush1.bf16.msra.mxu0 %v14392_v44  ;;  %v7441_v5 = vpop.f32.mrf.mxu1  ;;  %7734 = vmatprep.subr.bf16.mxu1 %v14263_v60  ;;  %v14343_v44 = vcombine.high %v4478_v33, %v4482_v35  ;;  %v14465_v60 = vcombine.high %v7907_v46, %v7911_v37  ;;  %v14456_v38 = vcombine.low %v7899_v50, %v7903_v42  ;;  %v4422_v37 = vld [vmem:[%s16212_s21 + $0xe18] sm:$0xff] }
 0x4fd   : > { %v7482_v7 = vpop.f32.mrf.mxu0  ;;  %10935 = vmatprep.subr.bf16.mxu0 %v14385_v2  ;;  %v4470_v2 = vld [vmem:[%s16212_s21 + $0xf98] sm:$0xff] }
 0x4fe   : > { %v14335_v30 = vcombine.high %v4470_v2, %v4474_v49  ;;  %v4462_v5 = vld [vmem:[%s16212_s21 + $0xf58] sm:$0xff]  ;;  %v7895_v7 = vld [vmem:[%s16214_s16 + $0x360] sm:$0xff] }
 0x4ff   : > { %7735 = vmatpush1.bf16.msra.mxu1 %v14262_v53  ;;  %v14457_v53 = vcombine.high %v7899_v50, %v7903_v42  ;;  %v17517_v50 = vld [vmem:[%s16228_s14 + $0x10] sm:$0x77] }
 0x500   : > { %10936 = vmatpush1.bf16.msra.mxu0 %v14384_v6  ;;  %7736 = vmatprep.subr.bf16.mxu1 %v14255_v31  ;;  %v4466_v6 = vld [vmem:[%s16212_s21 + $0xf78] sm:$0xff]  ;;  %v7891_v31 = vld [vmem:[%s16214_s16 + $0x340] sm:$0xff]  ;;  %v4502_v42 = vrot.slane %v17517_v50, %v17118_v22 }
 0x501   : > { %10937 = vmatprep.subr.bf16.mxu0 %v14377_v56  ;;  %v14334_v56 = vcombine.low %v4470_v2, %v4474_v49  ;;  %v14327_v58 = vcombine.high %v4462_v5, %v4466_v6  ;;  %v14449_v62 = vcombine.high %v7891_v31, %v7895_v7  ;;  %v14448_v8 = vcombine.low %v7891_v31, %v7895_v7 }
 0x503   : > { %7737 = vmatpush1.bf16.msra.mxu1 %v14254_v24  ;;  %v4458_v24 = vld [vmem:[%s16212_s21 + $0xf38] sm:$0xff] }
 0x504   : > { %10938 = vmatpush1.bf16.msra.mxu0 %v14376_v45  ;;  %7738 = vmatprep.subr.bf16.mxu1 %v14247_v54  ;;  %v7883_v45 = vld [vmem:[%s16214_s16 + $0x300] sm:$0xff]  ;;  %v14319_v19 = vcombine.high %v4454_v59, %v4458_v24 }
 0x505   : > { %10939 = vmatprep.subr.bf16.mxu0 %v14369_v61  ;;  %v7887_v54 = vld [vmem:[%s16214_s16 + $0x320] sm:$0xff]  ;;  %v14326_v61 = vcombine.low %v4462_v5, %v4466_v6 }
 0x506   : > { %v14441_v1 = vcombine.high %v7883_v45, %v7887_v54  ;;  %v14440_v20 = vcombine.low %v7883_v45, %v7887_v54  ;;  %v8099_v5 = vld [vmem:[%s16214_s16 + $0x9c0] sm:$0xff] }
 0x507   : > { %7739 = vmatpush1.bf16.msra.mxu1 %v14246_v15  ;;  %v4450_v15 = vld [vmem:[%s16212_s21 + $0xef8] sm:$0xff]  ;;  %v8103_v6 = vld [vmem:[%s16214_s16 + $0x9e0] sm:$0xff] }
 0x508   : > { %10940 = vmatpush1.bf16.msra.mxu0 %v14368_v3  ;;  %7740 = vmatprep.subr.bf16.mxu1 %v14239_v36  ;;  %v7875_v3 = vld [vmem:[%s16214_s16 + $0x2c0] sm:$0xff]  ;;  %v14311_v55 = vcombine.high %v4446_v16, %v4450_v15 }
 0x509   : > { %10941 = vmatprep.subr.bf16.mxu0 %v14361_v12  ;;  %v7879_v36 = vld [vmem:[%s16214_s16 + $0x2e0] sm:$0xff]  ;;  %v14318_v12 = vcombine.low %v4454_v59, %v4458_v24 }
 0x50a   : > { %v14433_v26 = vcombine.high %v7875_v3, %v7879_v36  ;;  %v14432_v25 = vcombine.low %v7875_v3, %v7879_v36  ;;  %v7967_v59 = vld [vmem:[%s16214_s16 + $0x5a0] sm:$0xff] }
 0x50b   : > { %7741 = vmatpush1.bf16.msra.mxu1 %v14238_v34  ;;  %v4442_v34 = vld [vmem:[%s16212_s21 + $0xeb8] sm:$0xff]  ;;  %v8091_v45 = vld [vmem:[%s16214_s16 + $0x980] sm:$0xff] }
 0x50c   : > { %10942 = vmatpush1.bf16.msra.mxu0 %v14360_v28  ;;  %7742 = vmatprep.subr.bf16.mxu1 %v14231_v18  ;;  %v7867_v28 = vld [vmem:[%s16214_s16 + $0x280] sm:$0xff]  ;;  %v14303_v27 = vcombine.high %v4438_v39, %v4442_v34 }
 0x50d   : > { %10943 = vmatprep.subr.bf16.mxu0 %v14353_v52  ;;  %v7871_v18 = vld [vmem:[%s16214_s16 + $0x2a0] sm:$0xff]  ;;  %v14310_v52 = vcombine.low %v4446_v16, %v4450_v15  ;;  %v14656_v16 = vcombine.low %v8099_v5, %v8103_v6 }
 0x50e   : > { %v14425_v29 = vcombine.high %v7867_v28, %v7871_v18  ;;  %v14424_v33 = vcombine.low %v7867_v28, %v7871_v18  ;;  %v8095_v54 = vld [vmem:[%s16214_s16 + $0x9a0] sm:$0xff] }
 0x50f   : > { %7743 = vmatpush1.bf16.msra.mxu1 %v14230_v32  ;;  %v4434_v32 = vld [vmem:[%s16212_s21 + $0xe78] sm:$0xff]  ;;  %v14649_v36 = vcombine.high %v8091_v45, %v8095_v54  ;;  %v7947_v18 = vld [vmem:[%s16214_s16 + $0x500] sm:$0xff] }
 0x510   : > { %10944 = vmatpush1.bf16.msra.mxu0 %v14352_v63  ;;  %7744 = vmatprep.subr.bf16.mxu1 %v14223_v10  ;;  %v7859_v63 = vld [vmem:[%s16214_s16 + $0x240] sm:$0xff]  ;;  %v14295_v35 = vcombine.high %v4430_v57, %v4434_v32 }
 0x511   : > { %10945 = vmatprep.subr.bf16.mxu0 %v14345_v4  ;;  %v7863_v10 = vld [vmem:[%s16214_s16 + $0x260] sm:$0xff]  ;;  %v14302_v4 = vcombine.low %v4438_v39, %v4442_v34 }
 0x512   : > { %v14417_v46 = vcombine.high %v7859_v63, %v7863_v10  ;;  %v14416_v2 = vcombine.low %v7859_v63, %v7863_v10  ;;  %v8075_v63 = vld [vmem:[%s16214_s16 + $0x900] sm:$0xff] }
 0x513   : > { %7745 = vmatpush1.bf16.msra.mxu1 %v14222_v13  ;;  %v4426_v13 = vld [vmem:[%s16212_s21 + $0xe38] sm:$0xff]  ;;  %v8079_v10 = vld [vmem:[%s16214_s16 + $0x920] sm:$0xff]  ;;  %s14866_s21 = smul.u32 3584, %s11591_s12 }
 0x514   : > { %10946 = vmatpush1.bf16.msra.mxu0 %v14344_v43  ;;  %7746 = vmatprep.subr.bf16.mxu1 %v14343_v44  ;;  %v7851_v43 = vld [vmem:[%s16214_s16 + $0x200] sm:$0xff]  ;;  %v14287_v49 = vcombine.high %v4422_v37, %v4426_v13  ;;  %v14286_v31 = vcombine.low %v4422_v37, %v4426_v13 }
 0x515   : > { %10947 = vmatprep.subr.bf16.mxu0 %v14465_v60  ;;  %v7855_v44 = vld [vmem:[%s16214_s16 + $0x220] sm:$0xff]  ;;  %v14294_v60 = vcombine.low %v4430_v57, %v4434_v32  ;;  %s18081_s15 = scalar_lea.vmem %s19478_s3, %s14866_s21 }
 0x516   : > { %v14408_v7 = vcombine.low %v7851_v43, %v7855_v44  ;;  %v7943_v37 = vld [vmem:[%s16214_s16 + $0x4e0] sm:$0xff] }
 0x517   : > { %7747 = vmatpush2.bf16.msra.mxu1 %v14342_v51  ;;  %v14409_v51 = vcombine.high %v7851_v43, %v7855_v44  ;;  %v14633_v43 = vcombine.high %v8075_v63, %v8079_v10 }
 0x518   : > { %10948 = vmatpush2.bf16.msra.mxu0 %v14464_v14  ;;  %7748 = vmatprep.subr.bf16.mxu1 %v14335_v30  ;;  %v7971_v14 = vld [vmem:[%s16214_s16 + $0x5c0] sm:$0xff] }
 0x519   : > { %10949 = vmatprep.subr.bf16.mxu0 %v14457_v53  ;;  %v7975_v30 = vld [vmem:[%s16214_s16 + $0x5e0] sm:$0xff]  ;;  %v7439_v53 = vadd.f32 %v17459_v0, %v17386_v21  ;;  %v14657_v21 = vcombine.high %v8099_v5, %v8103_v6 }
 0x51a   : > { %v14528_v24 = vcombine.low %v7971_v14, %v7975_v30  ;;  %v8059_v5 = vld [vmem:[%s16214_s16 + $0x880] sm:$0xff] }
 0x51b   : > { %7749 = vmatpush2.bf16.msra.mxu1 %v14334_v56  ;;  %v14529_v56 = vcombine.high %v7971_v14, %v7975_v30  ;;  %v7774_v0 = vmax.f32 %v7439_v53, 0.0  ;;  %v14632_v14 = vcombine.low %v8075_v63, %v8079_v10  ;;  %v8063_v6 = vld [vmem:[%s16214_s16 + $0x8a0] sm:$0xff] }
 0x51c   : > { %10950 = vmatpush2.bf16.msra.mxu0 %v14456_v38  ;;  %7750 = vmatprep.subr.bf16.mxu1 %v14327_v58  ;;  %v7771_v38 = vmax.f32 %v17296_v9, 0.0  ;;  %v4542_v58 = vrot.slane %v4502_v42, %v17118_v22  ;;  %v7931_v42 = vld [vmem:[%s16214_s16 + $0x480] sm:$0xff] }
 0x51d   : > { %10951 = vmatprep.subr.bf16.mxu0 %v14449_v62  ;;  %v7963_v62 = vld [vmem:[%s16214_s16 + $0x580] sm:$0xff]  ;;  %v17538_v15 = vpack.c.bf16 %v7774_v0, %v7774_v0 }
 0x51e   : > { %v7478_v9 = vadd.f32 %v17455_v11, %v4542_v58  ;;  %v8087_v11 = vld [vmem:[%s16214_s16 + $0x960] sm:$0xff]  ;;  %v14617_v58 = vcombine.high %v8059_v5, %v8063_v6 }
 0x51f   : > { %7751 = vmatpush2.bf16.msra.mxu1 %v14326_v61  ;;  %v14521_v61 = vcombine.high %v7963_v62, %v7967_v59  ;;  %v8019_v10 = vld [vmem:[%s16214_s16 + $0x740] sm:$0xff] }
 0x520   : > { %10952 = vmatpush2.bf16.msra.mxu0 %v14448_v8  ;;  %7752 = vmatprep.subr.bf16.mxu1 %v14319_v19  ;;  %v17533_v8 = vpack.c.bf16 %v7771_v38, %v7771_v38  ;;  %v7955_v19 = vld [vmem:[%s16214_s16 + $0x540] sm:$0xff] }
 0x521   : > { %10953 = vmatprep.subr.bf16.mxu0 %v14441_v1  ;;  %v7959_v1 = vld [vmem:[%s16214_s16 + $0x560] sm:$0xff] }
 0x522   : > { %v14513_v34 = vcombine.high %v7955_v19, %v7959_v1  ;;  %v14512_v32 = vcombine.low %v7955_v19, %v7959_v1  ;;  %v8043_v19 = vld [vmem:[%s16214_s16 + $0x800] sm:$0xff] }
 0x523   : > { %7753 = vmatpush2.bf16.msra.mxu1 %v14318_v12  ;;  %v8047_v1 = vld [vmem:[%s16214_s16 + $0x820] sm:$0xff] }
 0x524   : > { %10954 = vmatpush2.bf16.msra.mxu0 %v14440_v20  ;;  %7754 = vmatprep.subr.bf16.mxu1 %v14311_v55  ;;  %v14520_v55 = vcombine.low %v7963_v62, %v7967_v59  ;;  %v8051_v59 = vld [vmem:[%s16214_s16 + $0x840] sm:$0xff] }
 0x525   : > { %10955 = vmatprep.subr.bf16.mxu0 %v14433_v26  ;;  %v8083_v26 = vld [vmem:[%s16214_s16 + $0x940] sm:$0xff] }
 0x526   : > { %v14640_v13 = vcombine.low %v8083_v26, %v8087_v11 }
 0x527   : > { %7755 = vmatpush2.bf16.msra.mxu1 %v14310_v52  ;;  %v7951_v52 = vld [vmem:[%s16214_s16 + $0x520] sm:$0xff] }
 0x528   : > { %10956 = vmatpush2.bf16.msra.mxu0 %v14432_v25  ;;  %7756 = vmatprep.subr.bf16.mxu1 %v14303_v27  ;;  %v14648_v25 = vcombine.low %v8091_v45, %v8095_v54  ;;  %v14504_v44 = vcombine.low %v7947_v18, %v7951_v52  ;;  %v7919_v45 = vld [vmem:[%s16214_s16 + $0x420] sm:$0xff]  ;;  %v14616_v54 = vcombine.low %v8059_v5, %v8063_v6 }
 0x529   : > { %10957 = vmatprep.subr.bf16.mxu0 %v14425_v29  ;;  %v14641_v29 = vcombine.high %v8083_v26, %v8087_v11  ;;  %v8163_v26 = vld [vmem:[%s16214_s16 + $0xbc0] sm:$0xff] }
 0x52a   : > { %v8167_v11 = vld [vmem:[%s16214_s16 + $0xbe0] sm:$0xff] }
 0x52b   : > { %7757 = vmatpush2.bf16.msra.mxu1 %v14302_v4  ;;  %v8007_v5 = vld [vmem:[%s16214_s16 + $0x6e0] sm:$0xff] }
 0x52c   : > { %10958 = vmatpush2.bf16.msra.mxu0 %v14424_v33  ;;  %7758 = vmatprep.subr.bf16.mxu1 %v14295_v35  ;;  %v14505_v33 = vcombine.high %v7947_v18, %v7951_v52  ;;  %v8027_v18 = vld [vmem:[%s16214_s16 + $0x780] sm:$0xff] }
 0x52d   : > { %10959 = vmatprep.subr.bf16.mxu0 %v14417_v46  ;;  %v7939_v46 = vld [vmem:[%s16214_s16 + $0x4c0] sm:$0xff] }
 0x52e   : > { %v14496_v53 = vcombine.low %v7939_v46, %v7943_v37  ;;  %v8031_v52 = vld [vmem:[%s16214_s16 + $0x7a0] sm:$0xff] }
 0x52f   : > { %7759 = vmatpush2.bf16.msra.mxu1 %v14294_v60  ;;  %v8067_v60 = vld [vmem:[%s16214_s16 + $0x8c0] sm:$0xff]  ;;  %v14585_v63 = vcombine.high %v8027_v18, %v8031_v52 }
 0x530   : > { %10960 = vmatpush2.bf16.msra.mxu0 %v14416_v2  ;;  %7760 = vmatprep.subr.bf16.mxu1 %v14287_v49  ;;  %v8071_v2 = vld [vmem:[%s16214_s16 + $0x8e0] sm:$0xff]  ;;  %v14497_v49 = vcombine.high %v7939_v46, %v7943_v37  ;;  %v14584_v46 = vcombine.low %v8027_v18, %v8031_v52 }
 0x531   : > { %10961 = vmatprep.subr.bf16.mxu0 %v14409_v51  ;;  %v7935_v51 = vld [vmem:[%s16214_s16 + $0x4a0] sm:$0xff]  ;;  %v14625_v30 = vcombine.high %v8067_v60, %v8071_v2  ;;  %v14624_v38 = vcombine.low %v8067_v60, %v8071_v2 }
 0x532   : > { %v14488_v62 = vcombine.low %v7931_v42, %v7935_v51  ;;  %v8147_v37 = vld [vmem:[%s16214_s16 + $0xb40] sm:$0xff] }
 0x533   : > { %7761 = vmatpush2.bf16.msra.mxu1 %v14286_v31  ;;  %v14489_v31 = vcombine.high %v7931_v42, %v7935_v51  ;;  %v8015_v60 = vld [vmem:[%s16214_s16 + $0x720] sm:$0xff] }
 0x534   : > { %10962 = vmatpush2.bf16.msra.mxu0 %v14408_v7  ;;  %10972 = vmatprep.subr.bf16.mxu1 %v14529_v56  ;;  %v7923_v7 = vld [vmem:[%s16214_s16 + $0x440] sm:$0xff] }
 0x535   : > { %11013 = vmatprep.subr.bf16.mxu0 %v14657_v21  ;;  %v7927_v56 = vld [vmem:[%s16214_s16 + $0x460] sm:$0xff] }
 0x536   : > { %v7518_v3 = vpop.f32.mrf.mxu1  ;;  %7763 = vmatmul.mubr.bf16.vlgmr.msra.gmra.mxu1 %v17050_v17  ;;  %v8055_v21 = vld [vmem:[%s16214_s16 + $0x860] sm:$0xff]  ;;  %v14481_v0 = vcombine.high %v7923_v7, %v7927_v56 }
 0x537   : > { %v7519_v12 = vadd.f32 %v7518_v3, %v7478_v9  ;;  %v7559_v20 = vpop.f32.mrf.mxu0  ;;  %10964 = vmatmul.mubr.bf16.vlgmr.msra.gmra.mxu0 %v17533_v8  ;;  %10973 = vmatpush1.bf16.msra.mxu1 %v14528_v24  ;;  %v7915_v24 = vld [vmem:[%s16214_s16 + $0x400] sm:$0xff]  ;;  %v14480_v9 = vcombine.low %v7923_v7, %v7927_v56 }
 0x538   : > { %11004 = vmatprep.mubr.bf16.mxu1 %v17538_v15  ;;  %v17545_v39 = vpop.f32.mrf.mxu1  ;;  %10974 = vmatprep.subr.bf16.mxu1 %v14521_v61  ;;  %v14609_v61 = vcombine.high %v8051_v59, %v8055_v21  ;;  %v8035_v3 = vld [vmem:[%s16214_s16 + $0x7c0] sm:$0xff] }
 0x539   : > { %v17547_v17 = vadd.f32 %v7559_v20, %v7519_v12  ;;  %v17549_v28 = vpop.f32.mrf.mxu0  ;;  %11014 = vmatpush1.bf16.msra.mxu0 %v14656_v16  ;;  %v14473_v16 = vcombine.high %v7915_v24, %v7919_v45  ;;  %v14608_v12 = vcombine.low %v8051_v59, %v8055_v21  ;;  %v14601_v20 = vcombine.high %v8043_v19, %v8047_v1  ;;  %v8139_v51 = vld [vmem:[%s16214_s16 + $0xb00] sm:$0xff] }
 0x53a   : > { %v7522_v27 = vpop.f32.mrf.mxu1  ;;  %11015 = vmatprep.subr.bf16.mxu0 %v14649_v36  ;;  %v8039_v36 = vld [vmem:[%s16214_s16 + $0x7e0] sm:$0xff] }
 0x53b   : > { %v7563_v57 = vpop.f32.mrf.mxu0  ;;  %10975 = vmatpush1.bf16.msra.mxu1 %v14520_v55  ;;  %v14472_v55 = vcombine.low %v7915_v24, %v7919_v45  ;;  %v14721_v27 = vcombine.high %v8163_v26, %v8167_v11  ;;  %v8131_v56 = vld [vmem:[%s16214_s16 + $0xac0] sm:$0xff] }
 0x53c   : > { %v7523_v4 = vpop.f32.mrf.mxu1  ;;  %10976 = vmatprep.subr.bf16.mxu1 %v14513_v34  ;;  %v14593_v34 = vcombine.high %v8035_v3, %v8039_v36  ;;  %v8155_v57 = vld [vmem:[%s16214_s16 + $0xb80] sm:$0xff] }
 0x53d   : > { %v7564_v35 = vpop.f32.mrf.mxu0  ;;  %11016 = vmatpush1.bf16.msra.mxu0 %v14648_v25  ;;  %v14600_v25 = vcombine.low %v8043_v19, %v8047_v1  ;;  %v8023_v4 = vld [vmem:[%s16214_s16 + $0x760] sm:$0xff] }
 0x53e   : > { %11017 = vmatprep.subr.bf16.mxu0 %v14641_v29  ;;  %v14592_v29 = vcombine.low %v8035_v3, %v8039_v36  ;;  %v14576_v42 = vcombine.low %v8019_v10, %v8023_v4  ;;  %v7999_v59 = vld [vmem:[%s16214_s16 + $0x6a0] sm:$0xff] }
 0x53f   : > { %10977 = vmatpush1.bf16.msra.mxu1 %v14512_v32  ;;  %v8159_v32 = vld [vmem:[%s16214_s16 + $0xba0] sm:$0xff] }
 0x540   : > { %10978 = vmatprep.subr.bf16.mxu1 %v14505_v33  ;;  %v14720_v33 = vcombine.low %v8163_v26, %v8167_v11  ;;  %v14713_v35 = vcombine.high %v8155_v57, %v8159_v32  ;;  %v14712_v2 = vcombine.low %v8155_v57, %v8159_v32  ;;  %v8123_v45 = vld [vmem:[%s16214_s16 + $0xa80] sm:$0xff] }
 0x541   : > { %11018 = vmatpush1.bf16.msra.mxu0 %v14640_v13  ;;  %v8151_v13 = vld [vmem:[%s16214_s16 + $0xb60] sm:$0xff] }
 0x542   : > { %11019 = vmatprep.subr.bf16.mxu0 %v14633_v43  ;;  %v14577_v43 = vcombine.high %v8019_v10, %v8023_v4  ;;  %v14704_v6 = vcombine.low %v8147_v37, %v8151_v13  ;;  %v7991_v19 = vld [vmem:[%s16214_s16 + $0x660] sm:$0xff] }
 0x543   : > { %10979 = vmatpush1.bf16.msra.mxu1 %v14504_v44  ;;  %v8011_v44 = vld [vmem:[%s16214_s16 + $0x700] sm:$0xff] }
 0x544   : > { %10980 = vmatprep.subr.bf16.mxu1 %v14497_v49  ;;  %v14705_v49 = vcombine.high %v8147_v37, %v8151_v13  ;;  %v14568_v7 = vcombine.low %v8011_v44, %v8015_v60  ;;  %v8115_v36 = vld [vmem:[%s16214_s16 + $0xa40] sm:$0xff] }
 0x545   : > { %11020 = vmatpush1.bf16.msra.mxu0 %v14632_v14  ;;  %v8143_v14 = vld [vmem:[%s16214_s16 + $0xb20] sm:$0xff] }
 0x546   : > { %11021 = vmatprep.subr.bf16.mxu0 %v14625_v30  ;;  %v14569_v30 = vcombine.high %v8011_v44, %v8015_v60  ;;  %v14696_v21 = vcombine.low %v8139_v51, %v8143_v14  ;;  %v7979_v26 = vld [vmem:[%s16214_s16 + $0x600] sm:$0xff] }
 0x547   : > { %10981 = vmatpush1.bf16.msra.mxu1 %v14496_v53  ;;  %v8003_v53 = vld [vmem:[%s16214_s16 + $0x6c0] sm:$0xff] }
 0x548   : > { %10982 = vmatprep.subr.bf16.mxu1 %v14489_v31  ;;  %v14697_v31 = vcombine.high %v8139_v51, %v8143_v14  ;;  %v14560_v24 = vcombine.low %v8003_v53, %v8007_v5  ;;  %v7983_v11 = vld [vmem:[%s16214_s16 + $0x620] sm:$0xff] }
 0x549   : > { %11022 = vmatpush1.bf16.msra.mxu0 %v14624_v38  ;;  %v8135_v38 = vld [vmem:[%s16214_s16 + $0xae0] sm:$0xff]  ;;  %v14536_v4 = vcombine.low %v7979_v26, %v7983_v11 }
 0x54a   : > { %11023 = vmatprep.subr.bf16.mxu0 %v14617_v58  ;;  %v14561_v58 = vcombine.high %v8003_v53, %v8007_v5  ;;  %v14688_v1 = vcombine.low %v8131_v56, %v8135_v38  ;;  %v8227_v32 = vld [vmem:[%s16214_s16 + $0xdc0] sm:$0xff] }
 0x54b   : > { %10983 = vmatpush1.bf16.msra.mxu1 %v14488_v62  ;;  %v7995_v62 = vld [vmem:[%s16214_s16 + $0x680] sm:$0xff] }
 0x54c   : > { %10984 = vmatprep.subr.bf16.mxu1 %v14481_v0  ;;  %v14689_v0 = vcombine.high %v8131_v56, %v8135_v38  ;;  %v14552_v3 = vcombine.low %v7995_v62, %v7999_v59  ;;  %v8219_v44 = vld [vmem:[%s16214_s16 + $0xd80] sm:$0xff] }
 0x54d   : > { %11024 = vmatpush1.bf16.msra.mxu0 %v14616_v54  ;;  %v8127_v54 = vld [vmem:[%s16214_s16 + $0xaa0] sm:$0xff] }
 0x54e   : > { %11025 = vmatprep.subr.bf16.mxu0 %v14609_v61  ;;  %v14553_v61 = vcombine.high %v7995_v62, %v7999_v59  ;;  %v8223_v60 = vld [vmem:[%s16214_s16 + $0xda0] sm:$0xff] }
 0x54f   : > { %10985 = vmatpush1.bf16.msra.mxu1 %v14480_v9  ;;  %v7987_v9 = vld [vmem:[%s16214_s16 + $0x640] sm:$0xff] }
 0x550   : > { %10986 = vmatprep.subr.bf16.mxu1 %v14473_v16  ;;  %v14681_v16 = vcombine.high %v8123_v45, %v8127_v54  ;;  %v14544_v52 = vcombine.low %v7987_v9, %v7991_v19  ;;  %v8211_v14 = vld [vmem:[%s16214_s16 + $0xd40] sm:$0xff] }
 0x551   : > { %11026 = vmatpush1.bf16.msra.mxu0 %v14608_v12  ;;  %v8119_v12 = vld [vmem:[%s16214_s16 + $0xa60] sm:$0xff] }
 0x552   : > { %11027 = vmatprep.subr.bf16.mxu0 %v14601_v20  ;;  %v14545_v20 = vcombine.high %v7987_v9, %v7991_v19  ;;  %v14673_v18 = vcombine.high %v8115_v36, %v8119_v12  ;;  %v8207_v62 = vld [vmem:[%s16214_s16 + $0xd20] sm:$0xff] }
 0x553   : > { %10987 = vmatpush1.bf16.msra.mxu1 %v14472_v55  ;;  %v4506_v55 = vrot.slane %v17517_v50, %v17124_v47  ;;  %v14672_v50 = vcombine.low %v8115_v36, %v8119_v12 }
 0x554   : > { %10988 = vmatprep.subr.bf16.mxu1 %v14593_v34  ;;  %v14680_v34 = vcombine.low %v8123_v45, %v8127_v54 }
 0x555   : > { %11028 = vmatpush1.bf16.msra.mxu0 %v14600_v25  ;;  %v8107_v25 = vld [vmem:[%s16214_s16 + $0xa00] sm:$0xff]  ;;  %v4546_v57 = vrot.slane %v4506_v55, %v17118_v22  ;;  %v17648_v55 = vld [vmem:[%s16214_s16 + $0x5e8] sm:$0xff] }
 0x556   : > { %11029 = vmatprep.subr.bf16.mxu0 %v14721_v27  ;;  %v8111_v27 = vld [vmem:[%s16214_s16 + $0xa20] sm:$0xff] }
 0x557   : > { %10989 = vmatpush2.bf16.msra.mxu1 %v14592_v29  ;;  %v14537_v29 = vcombine.high %v7979_v26, %v7983_v11  ;;  %v14665_v10 = vcombine.high %v8107_v25, %v8111_v27  ;;  %v7480_v13 = vadd.f32 %v17462_v48, %v4546_v57  ;;  %v8215_v48 = vld [vmem:[%s16214_s16 + $0xd60] sm:$0xff]  ;;  %v7828_v26 = vld [vmem:[%s16214_s16 + $0x148] sm:$0xff] }
 0x558   : > { %10990 = vmatprep.subr.bf16.mxu1 %v14585_v63  ;;  %v8231_v63 = vld [vmem:[%s16214_s16 + $0xde0] sm:$0xff]  ;;  %v14768_v45 = vcombine.low %v8211_v14, %v8215_v48  ;;  %v7832_v11 = vld [vmem:[%s16214_s16 + $0x168] sm:$0xff] }
 0x559   : > { %11030 = vmatpush2.bf16.msra.mxu0 %v14720_v33  ;;  %v17609_v33 = vld [vmem:[%s16214_s16 + $0x1c8] sm:$0xff]  ;;  %v14785_v37 = vcombine.high %v8227_v32, %v8231_v63  ;;  %v14387_v57 = vcombine.high %v7828_v26, %v7832_v11 }
 0x55a   : > { %11031 = vmatprep.subr.bf16.mxu0 %v14713_v35  ;;  %v17612_v35 = vld [vmem:[%s16214_s16 + $0x1e8] sm:$0xff] }
 0x55b   : > { %10991 = vmatpush2.bf16.msra.mxu1 %v14584_v46  ;;  %v7773_v46 = vmax.f32 %v17453_v41, 0.0  ;;  %v14777_v41 = vcombine.high %v8219_v44, %v8223_v60 }
 0x55c   : > { %10992 = vmatprep.subr.bf16.mxu1 %v14577_v43  ;;  %v14664_v43 = vcombine.low %v8107_v25, %v8111_v27  ;;  %v8187_v27 = vld [vmem:[%s16214_s16 + $0xc80] sm:$0xff] }
 0x55d   : > { %11032 = vmatpush2.bf16.msra.mxu0 %v14712_v2  ;;  %v14403_v2 = vcombine.high %v17609_v33, %v17612_v35  ;;  %v17621_v51 = vpack.c.bf16 %v7773_v46, %v7773_v46 }
 0x55e   : > { %11033 = vmatprep.subr.bf16.mxu0 %v14705_v49  ;;  %v7521_v49 = vadd.f32 %v17545_v39, %v7480_v13  ;;  %v7816_v13 = vld [vmem:[%s16214_s16 + $0xe8] sm:$0xff] }
 0x55f   : > { %10993 = vmatpush2.bf16.msra.mxu1 %v14576_v42  ;;  %v14784_v42 = vcombine.low %v8227_v32, %v8231_v63  ;;  %v7824_v32 = vld [vmem:[%s16214_s16 + $0x128] sm:$0xff] }
 0x560   : > { %10994 = vmatprep.subr.bf16.mxu1 %v14569_v30  ;;  %v7562_v53 = vadd.f32 %v17549_v28, %v7521_v49  ;;  %v8175_v49 = vld [vmem:[%s16214_s16 + $0xc20] sm:$0xff] }
 0x561   : > { %11034 = vmatpush2.bf16.msra.mxu0 %v14704_v6  ;;  %v14776_v6 = vcombine.low %v8219_v44, %v8223_v60 }
 0x562   : > { %11035 = vmatprep.subr.bf16.mxu0 %v14697_v31 }
 0x563   : > { %10995 = vmatpush2.bf16.msra.mxu1 %v14568_v7  ;;  %v14769_v7 = vcombine.high %v8211_v14, %v8215_v48  ;;  %v7808_v14 = vld [vmem:[%s16214_s16 + $0xa8] sm:$0xff] }
 0x564   : > { %10996 = vmatprep.subr.bf16.mxu1 %v14561_v58  ;;  %v8203_v58 = vld [vmem:[%s16214_s16 + $0xd00] sm:$0xff] }
 0x565   : > { %11036 = vmatpush2.bf16.msra.mxu0 %v14696_v21 }
 0x566   : > { %11037 = vmatprep.subr.bf16.mxu0 %v14689_v0  ;;  %v7836_v0 = vld [vmem:[%s16214_s16 + $0x188] sm:$0xff] }
 0x567   : > { %10997 = vmatpush2.bf16.msra.mxu1 %v14560_v24  ;;  %v7840_v24 = vld [vmem:[%s16214_s16 + $0x1a8] sm:$0xff] }
 0x568   : > { %10998 = vmatprep.subr.bf16.mxu1 %v14553_v61  ;;  %v14761_v61 = vcombine.high %v8203_v58, %v8207_v62  ;;  %v14395_v12 = vcombine.high %v7836_v0, %v7840_v24  ;;  %v14394_v25 = vcombine.low %v7836_v0, %v7840_v24  ;;  %v7788_v0 = vld [vmem:[%s16214_s16 + $0x8] sm:$0xff] }
 0x569   : > { %11038 = vmatpush2.bf16.msra.mxu0 %v14688_v1  ;;  %v14402_v1 = vcombine.low %v17609_v33, %v17612_v35  ;;  %v8179_v33 = vld [vmem:[%s16214_s16 + $0xc40] sm:$0xff]  ;;  %v7792_v24 = vld [vmem:[%s16214_s16 + $0x28] sm:$0xff] }
 0x56a   : > { %11039 = vmatprep.subr.bf16.mxu0 %v14681_v16  ;;  %v8195_v16 = vld [vmem:[%s16214_s16 + $0xcc0] sm:$0xff] }
 0x56b   : > { %10999 = vmatpush2.bf16.msra.mxu1 %v14552_v3  ;;  %v8199_v3 = vld [vmem:[%s16214_s16 + $0xce0] sm:$0xff] }
 0x56c   : > { %11000 = vmatprep.subr.bf16.mxu1 %v14545_v20  ;;  %v17645_v20 = vld [vmem:[%s16214_s16 + $0x5c8] sm:$0xff]  ;;  %v14752_v63 = vcombine.low %v8195_v16, %v8199_v3  ;;  %v8183_v35 = vld [vmem:[%s16214_s16 + $0xc60] sm:$0xff] }
 0x56d   : > { %11040 = vmatpush2.bf16.msra.mxu0 %v14680_v34  ;;  %v14760_v34 = vcombine.low %v8203_v58, %v8207_v62  ;;  %v14737_v44 = vcombine.high %v8179_v33, %v8183_v35  ;;  %v14736_v48 = vcombine.low %v8179_v33, %v8183_v35  ;;  %v7892_v35 = vld [vmem:[%s16214_s16 + $0x348] sm:$0xff] }
 0x56e   : > { %11041 = vmatprep.subr.bf16.mxu0 %v14673_v18  ;;  %v14530_v18 = vcombine.low %v17645_v20, %v17648_v55 }
 0x56f   : > { %11001 = vmatpush2.bf16.msra.mxu1 %v14544_v52  ;;  %v14753_v52 = vcombine.high %v8195_v16, %v8199_v3  ;;  %v14347_v16 = vcombine.high %v7788_v0, %v7792_v24  ;;  %v7908_v3 = vld [vmem:[%s16214_s16 + $0x3c8] sm:$0xff] }
 0x570   : > { %11002 = vmatprep.subr.bf16.mxu1 %v14537_v29  ;;  %v8191_v29 = vld [vmem:[%s16214_s16 + $0xca0] sm:$0xff] }
 0x571   : > { %11042 = vmatpush2.bf16.msra.mxu0 %v14672_v50  ;;  %v7820_v50 = vld [vmem:[%s16214_s16 + $0x108] sm:$0xff] }
 0x572   : > { %11043 = vmatprep.subr.bf16.mxu0 %v14665_v10  ;;  %v14745_v10 = vcombine.high %v8187_v27, %v8191_v29  ;;  %v14379_v46 = vcombine.high %v7820_v50, %v7824_v32  ;;  %v14378_v60 = vcombine.low %v7820_v50, %v7824_v32 }
 0x573   : > { %11003 = vmatpush2.bf16.msra.mxu1 %v14536_v4  ;;  %v14386_v4 = vcombine.low %v7828_v26, %v7832_v11 }
 0x574   : > { %11054 = vmatprep.subr.bf16.mxu1 %v14785_v37  ;;  %v7812_v37 = vld [vmem:[%s16214_s16 + $0xc8] sm:$0xff] }
 0x575   : > { %11044 = vmatpush2.bf16.msra.mxu0 %v14664_v43  ;;  %v14744_v43 = vcombine.low %v8187_v27, %v8191_v29  ;;  %v7900_v29 = vld [vmem:[%s16214_s16 + $0x388] sm:$0xff] }
 0x576   : > { %v7600_v30 = vpop.f32.mrf.mxu1  ;;  %11005 = vmatmul.mubr.bf16.vlgmr.msra.gmra.mxu1 %v17621_v51  ;;  %11095 = vmatprep.subr.bf16.mxu0 %v14403_v2  ;;  %v8171_v2 = vld [vmem:[%s16214_s16 + $0xc00] sm:$0xff] }
 0x577   : > { %v7601_v39 = vadd.f32 %v7600_v30, %v17547_v17  ;;  %v17628_v5 = vpop.f32.mrf.mxu0  ;;  %11055 = vmatpush1.bf16.msra.mxu1 %v14784_v42  ;;  %v14371_v42 = vcombine.high %v7812_v37, %v7816_v13  ;;  %v14729_v30 = vcombine.high %v8171_v2, %v8175_v49  ;;  %v14728_v58 = vcombine.low %v8171_v2, %v8175_v49  ;;  %v7884_v49 = vld [vmem:[%s16214_s16 + $0x308] sm:$0xff] }
 0x578   : > { %v7602_v31 = vpop.f32.mrf.mxu1  ;;  %11056 = vmatprep.subr.bf16.mxu1 %v14777_v41  ;;  %v7804_v41 = vld [vmem:[%s16214_s16 + $0x88] sm:$0xff] }
 0x579   : > { %v7603_v56 = vadd.f32 %v7602_v31, %v7562_v53  ;;  %v17630_v38 = vpop.f32.mrf.mxu0  ;;  %v7775_v59 = vmax.f32 %v7601_v39, 0.0  ;;  %v14370_v53 = vcombine.low %v7812_v37, %v7816_v13  ;;  %v8291_v39 = vld [vmem:[%s16214_s16 + $0xfc0] sm:$0xff]  ;;  %v14363_v31 = vcombine.high %v7804_v41, %v7808_v14 }
 0x57a   : > { %v7604_v28 = vpop.f32.mrf.mxu1 }
 0x57b   : > { %v7776_v21 = vmax.f32 %v7603_v56, 0.0  ;;  %v7645_v17 = vpop.f32.mrf.mxu0  ;;  %11057 = vmatpush1.bf16.msra.mxu1 %v14776_v6  ;;  %v17642_v36 = vpack.c.bf16 %v7775_v59, %v7775_v59  ;;  %v8295_v6 = vld [vmem:[%s16214_s16 + $0xfe0] sm:$0xff]  ;;  %v7800_v56 = vld [vmem:[%s16214_s16 + $0x68] sm:$0xff]  ;;  %v14362_v59 = vcombine.low %v7804_v41, %v7808_v14 }
 0x57c   : > { %v7605_v54 = vpop.f32.mrf.mxu1  ;;  %11058 = vmatprep.subr.bf16.mxu1 %v14769_v7  ;;  %v7796_v7 = vld [vmem:[%s16214_s16 + $0x48] sm:$0xff]  ;;  %v14849_v62 = vcombine.high %v8291_v39, %v8295_v6  ;;  %v8283_v28 = vld [vmem:[%s16214_s16 + $0xf80] sm:$0xff] }
 0x57d   : > { %v17636_v9 = vpack.c.bf16 %v7776_v21, %v7776_v21  ;;  %v7646_v19 = vpop.f32.mrf.mxu0  ;;  %v8287_v21 = vld [vmem:[%s16214_s16 + $0xfa0] sm:$0xff]  ;;  %v14355_v17 = vcombine.high %v7796_v7, %v7800_v56 }
 0x57e   : > { %v14841_v54 = vcombine.high %v8283_v28, %v8287_v21  ;;  %v8275_v19 = vld [vmem:[%s16214_s16 + $0xf40] sm:$0xff]  ;;  %v14840_v26 = vcombine.low %v8283_v28, %v8287_v21  ;;  %v7868_v21 = vld [vmem:[%s16214_s16 + $0x288] sm:$0xff] }
 0x57f   : > { %11045 = vmatprep.mubr.bf16.mxu0 %v17636_v9  ;;  %11059 = vmatpush1.bf16.msra.mxu1 %v14768_v45  ;;  %v14848_v45 = vcombine.low %v8291_v39, %v8295_v6  ;;  %v7876_v6 = vld [vmem:[%s16214_s16 + $0x2c8] sm:$0xff] }
 0x580   : > { %11046 = vmatmul.mubr.bf16.vlgmr.msra.gmra.mxu0 %v17642_v36  ;;  %11060 = vmatprep.subr.bf16.mxu1 %v14761_v61  ;;  %v14354_v61 = vcombine.low %v7796_v7, %v7800_v56 }
 0x581   : > { %11096 = vmatpush1.bf16.msra.mxu0 %v14402_v1  ;;  %11127 = vmatprep.mubr.bf16.mxu0 %v17450_v23  ;;  %v8279_v1 = vld [vmem:[%s16214_s16 + $0xf60] sm:$0xff] }
 0x582   : > { %11097 = vmatprep.subr.bf16.mxu0 %v14395_v12  ;;  %v7912_v12 = vld [vmem:[%s16214_s16 + $0x3e8] sm:$0xff]  ;;  %v14833_v11 = vcombine.high %v8275_v19, %v8279_v1  ;;  %v14832_v50 = vcombine.low %v8275_v19, %v8279_v1 }
 0x583   : > { %11061 = vmatpush1.bf16.msra.mxu1 %v14760_v34  ;;  %v14346_v34 = vcombine.low %v7788_v0, %v7792_v24  ;;  %v14467_v27 = vcombine.high %v7908_v3, %v7912_v12  ;;  %v7860_v1 = vld [vmem:[%s16214_s16 + $0x248] sm:$0xff] }
 0x584   : > { %11062 = vmatprep.subr.bf16.mxu1 %v14753_v52  ;;  %v8267_v52 = vld [vmem:[%s16214_s16 + $0xf00] sm:$0xff] }
 0x585   : > { %11098 = vmatpush1.bf16.msra.mxu0 %v14394_v25  ;;  %v8271_v25 = vld [vmem:[%s16214_s16 + $0xf20] sm:$0xff] }
 0x586   : > { %11099 = vmatprep.subr.bf16.mxu0 %v14387_v57  ;;  %v7904_v57 = vld [vmem:[%s16214_s16 + $0x3a8] sm:$0xff]  ;;  %v14825_v32 = vcombine.high %v8267_v52, %v8271_v25  ;;  %v14824_v37 = vcombine.low %v8267_v52, %v8271_v25 }
 0x587   : > { %11063 = vmatpush1.bf16.msra.mxu1 %v14752_v63  ;;  %v14466_v63 = vcombine.low %v7908_v3, %v7912_v12  ;;  %v14459_v33 = vcombine.high %v7900_v29, %v7904_v57  ;;  %v14531_v12 = vcombine.high %v17645_v20, %v17648_v55  ;;  %v7852_v52 = vld [vmem:[%s16214_s16 + $0x208] sm:$0xff]  ;;  %v7825_v20 = vld [vmem:[%s16214_s16 + $0x130] sm:$0xff] }
 0x588   : > { %11064 = vmatprep.subr.bf16.mxu1 %v14745_v10  ;;  %v8259_v10 = vld [vmem:[%s16214_s16 + $0xec0] sm:$0xff]  ;;  %v7856_v25 = vld [vmem:[%s16214_s16 + $0x228] sm:$0xff] }
 0x589   : > { %11100 = vmatpush1.bf16.msra.mxu0 %v14386_v4  ;;  %v8263_v4 = vld [vmem:[%s16214_s16 + $0xee0] sm:$0xff] }
 0x58a   : > { %11101 = vmatprep.subr.bf16.mxu0 %v14379_v46  ;;  %v7896_v46 = vld [vmem:[%s16214_s16 + $0x368] sm:$0xff]  ;;  %v14817_v13 = vcombine.high %v8259_v10, %v8263_v4  ;;  %v14816_v41 = vcombine.low %v8259_v10, %v8263_v4 }
 0x58b   : > { %11065 = vmatpush1.bf16.msra.mxu1 %v14744_v43  ;;  %v14458_v43 = vcombine.low %v7900_v29, %v7904_v57  ;;  %v14451_v2 = vcombine.high %v7892_v35, %v7896_v46  ;;  %v8100_v10 = vld [vmem:[%s16214_s16 + $0x9c8] sm:$0xff] }
 0x58c   : > { %11066 = vmatprep.subr.bf16.mxu1 %v14737_v44  ;;  %v8251_v44 = vld [vmem:[%s16214_s16 + $0xe80] sm:$0xff]  ;;  %v8104_v4 = vld [vmem:[%s16214_s16 + $0x9e8] sm:$0xff] }
 0x58d   : > { %11102 = vmatpush1.bf16.msra.mxu0 %v14378_v60  ;;  %v8255_v60 = vld [vmem:[%s16214_s16 + $0xea0] sm:$0xff] }
 0x58e   : > { %11103 = vmatprep.subr.bf16.mxu0 %v14371_v42  ;;  %v7888_v42 = vld [vmem:[%s16214_s16 + $0x328] sm:$0xff]  ;;  %v14809_v14 = vcombine.high %v8251_v44, %v8255_v60  ;;  %v14808_v7 = vcombine.low %v8251_v44, %v8255_v60 }
 0x58f   : > { %11067 = vmatpush1.bf16.msra.mxu1 %v14736_v48  ;;  %v14450_v48 = vcombine.low %v7892_v35, %v7896_v46  ;;  %v14443_v39 = vcombine.high %v7884_v49, %v7888_v42  ;;  %v8092_v44 = vld [vmem:[%s16214_s16 + $0x988] sm:$0xff] }
 0x590   : > { %11068 = vmatprep.subr.bf16.mxu1 %v14729_v30  ;;  %v8243_v30 = vld [vmem:[%s16214_s16 + $0xe40] sm:$0xff]  ;;  %v8096_v60 = vld [vmem:[%s16214_s16 + $0x9a8] sm:$0xff] }
 0x591   : > { %11104 = vmatpush1.bf16.msra.mxu0 %v14370_v53  ;;  %v8247_v53 = vld [vmem:[%s16214_s16 + $0xe60] sm:$0xff] }
 0x592   : > { %11105 = vmatprep.subr.bf16.mxu0 %v14363_v31  ;;  %v7880_v31 = vld [vmem:[%s16214_s16 + $0x2e8] sm:$0xff]  ;;  %v14801_v56 = vcombine.high %v8243_v30, %v8247_v53  ;;  %v14800_v0 = vcombine.low %v8243_v30, %v8247_v53  ;;  %v14650_v30 = vcombine.low %v8092_v44, %v8096_v60 }
 0x593   : > { %11069 = vmatpush1.bf16.msra.mxu1 %v14728_v58  ;;  %v14442_v58 = vcombine.low %v7884_v49, %v7888_v42  ;;  %v14435_v28 = vcombine.high %v7876_v6, %v7880_v31  ;;  %v14658_v42 = vcombine.low %v8100_v10, %v8104_v4 }
 0x594   : > { %11070 = vmatprep.subr.bf16.mxu1 %v14849_v62  ;;  %v8235_v62 = vld [vmem:[%s16214_s16 + $0xe00] sm:$0xff] }
 0x595   : > { %11106 = vmatpush1.bf16.msra.mxu0 %v14362_v59  ;;  %v8239_v59 = vld [vmem:[%s16214_s16 + $0xe20] sm:$0xff] }
 0x596   : > { %11107 = vmatprep.subr.bf16.mxu0 %v14355_v17  ;;  %v7872_v17 = vld [vmem:[%s16214_s16 + $0x2a8] sm:$0xff]  ;;  %v14793_v24 = vcombine.high %v8235_v62, %v8239_v59  ;;  %v14792_v3 = vcombine.low %v8235_v62, %v8239_v59 }
 0x597   : > { %11071 = vmatpush2.bf16.msra.mxu1 %v14848_v45  ;;  %v17702_v45 = vld [vmem:[%s16228_s14 + $0x18] sm:$0x77]  ;;  %v14427_v19 = vcombine.high %v7868_v21, %v7872_v17 }
 0x598   : > { %11072 = vmatprep.subr.bf16.mxu1 %v14841_v54  ;;  %v4510_v54 = vrot.slane %v17702_v45, %v17118_v22 }
 0x599   : > { %11108 = vmatpush1.bf16.msra.mxu0 %v14354_v61  ;;  %v14434_v61 = vcombine.low %v7876_v6, %v7880_v31  ;;  %v8080_v6 = vld [vmem:[%s16214_s16 + $0x928] sm:$0xff] }
 0x59a   : > { %11109 = vmatprep.subr.bf16.mxu0 %v14347_v16  ;;  %v7864_v16 = vld [vmem:[%s16214_s16 + $0x268] sm:$0xff] }
 0x59b   : > { %11073 = vmatpush2.bf16.msra.mxu1 %v14840_v26  ;;  %v4550_v26 = vrot.slane %v4510_v54, %v17118_v22  ;;  %v14418_v29 = vcombine.low %v7860_v1, %v7864_v16  ;;  %v8056_v54 = vld [vmem:[%s16214_s16 + $0x868] sm:$0xff] }
 0x59c   : > { %11074 = vmatprep.subr.bf16.mxu1 %v14833_v11  ;;  %v14426_v11 = vcombine.low %v7868_v21, %v7872_v17  ;;  %v8064_v21 = vld [vmem:[%s16214_s16 + $0x8a8] sm:$0xff] }
 0x59d   : > { %11110 = vmatpush1.bf16.msra.mxu0 %v14346_v34  ;;  %v14419_v34 = vcombine.high %v7860_v1, %v7864_v16  ;;  %v8044_v1 = vld [vmem:[%s16214_s16 + $0x808] sm:$0xff] }
 0x59e   : > { %11111 = vmatprep.subr.bf16.mxu0 %v14467_v27  ;;  %v7642_v27 = vadd.f32 %v17628_v5, %v4550_v26  ;;  %v14410_v5 = vcombine.low %v7852_v52, %v7856_v25  ;;  %v8048_v16 = vld [vmem:[%s16214_s16 + $0x828] sm:$0xff] }
 0x59f   : > { %11075 = vmatpush2.bf16.msra.mxu1 %v14832_v50  ;;  %v14411_v50 = vcombine.high %v7852_v52, %v7856_v25  ;;  %v8164_v26 = vld [vmem:[%s16214_s16 + $0xbc8] sm:$0xff] }
 0x5a0   : > { %11076 = vmatprep.subr.bf16.mxu1 %v14825_v32  ;;  %v8156_v25 = vld [vmem:[%s16214_s16 + $0xb88] sm:$0xff] }
 0x5a1   : > { %11112 = vmatpush2.bf16.msra.mxu0 %v14466_v63 }
 0x5a2   : > { %11113 = vmatprep.subr.bf16.mxu0 %v14459_v33 }
 0x5a3   : > { %11077 = vmatpush2.bf16.msra.mxu1 %v14824_v37 }
 0x5a4   : > { %11078 = vmatprep.subr.bf16.mxu1 %v14817_v13  ;;  %v14659_v13 = vcombine.high %v8100_v10, %v8104_v4  ;;  %v8140_v4 = vld [vmem:[%s16214_s16 + $0xb08] sm:$0xff] }
 0x5a5   : > { %11114 = vmatpush2.bf16.msra.mxu0 %v14458_v43 }
 0x5a6   : > { %11115 = vmatprep.subr.bf16.mxu0 %v14451_v2 }
 0x5a7   : > { %11079 = vmatpush2.bf16.msra.mxu1 %v14816_v41  ;;  %v14651_v41 = vcombine.high %v8092_v44, %v8096_v60  ;;  %v8136_v44 = vld [vmem:[%s16214_s16 + $0xae8] sm:$0xff]  ;;  %v4514_v60 = vrot.slane %v17702_v45, %v17124_v47 }
 0x5a8   : > { %11080 = vmatprep.subr.bf16.mxu1 %v14809_v14  ;;  %v8084_v14 = vld [vmem:[%s16214_s16 + $0x948] sm:$0xff] }
 0x5a9   : > { %11116 = vmatpush2.bf16.msra.mxu0 %v14450_v48  ;;  %v8088_v48 = vld [vmem:[%s16214_s16 + $0x968] sm:$0xff] }
 0x5aa   : > { %11117 = vmatprep.subr.bf16.mxu0 %v14443_v39  ;;  %v14643_v53 = vcombine.high %v8084_v14, %v8088_v48  ;;  %v8076_v39 = vld [vmem:[%s16214_s16 + $0x908] sm:$0xff]  ;;  %v14642_v31 = vcombine.low %v8084_v14, %v8088_v48  ;;  %v4554_v14 = vrot.slane %v4514_v60, %v17118_v22  ;;  %v7821_v60 = vld [vmem:[%s16214_s16 + $0x110] sm:$0xff] }
 0x5ab   : > { %11081 = vmatpush2.bf16.msra.mxu1 %v14808_v7  ;;  %v14635_v7 = vcombine.high %v8076_v39, %v8080_v6  ;;  %v14634_v62 = vcombine.low %v8076_v39, %v8080_v6  ;;  %v8120_v39 = vld [vmem:[%s16214_s16 + $0xa68] sm:$0xff] }
 0x5ac   : > { %11082 = vmatprep.subr.bf16.mxu1 %v14801_v56  ;;  %v8068_v56 = vld [vmem:[%s16214_s16 + $0x8c8] sm:$0xff]  ;;  %v7644_v6 = vadd.f32 %v17630_v38, %v4554_v14  ;;  %v7813_v14 = vld [vmem:[%s16214_s16 + $0xd0] sm:$0xff] }
 0x5ad   : > { %11118 = vmatpush2.bf16.msra.mxu0 %v14442_v58  ;;  %v8072_v58 = vld [vmem:[%s16214_s16 + $0x8e8] sm:$0xff] }
 0x5ae   : > { %11119 = vmatprep.subr.bf16.mxu0 %v14435_v28  ;;  %v14627_v59 = vcombine.high %v8068_v56, %v8072_v58  ;;  %v8060_v28 = vld [vmem:[%s16214_s16 + $0x888] sm:$0xff]  ;;  %v14626_v17 = vcombine.low %v8068_v56, %v8072_v58 }
 0x5af   : > { %11083 = vmatpush2.bf16.msra.mxu1 %v14800_v0  ;;  %v14619_v0 = vcombine.high %v8060_v28, %v8064_v21  ;;  %v8112_v56 = vld [vmem:[%s16214_s16 + $0xa28] sm:$0xff] }
 0x5b0   : > { %11084 = vmatprep.subr.bf16.mxu1 %v14793_v24  ;;  %v8052_v24 = vld [vmem:[%s16214_s16 + $0x848] sm:$0xff] }
 0x5b1   : > { %11120 = vmatpush2.bf16.msra.mxu0 %v14434_v61  ;;  %v14618_v61 = vcombine.low %v8060_v28, %v8064_v21  ;;  %v7845_v21 = vld [vmem:[%s16214_s16 + $0x1d0] sm:$0xff] }
 0x5b2   : > { %11121 = vmatprep.subr.bf16.mxu0 %v14427_v19  ;;  %v14611_v19 = vcombine.high %v8052_v24, %v8056_v54 }
 0x5b3   : > { %11085 = vmatpush2.bf16.msra.mxu1 %v14792_v3  ;;  %v14610_v3 = vcombine.low %v8052_v24, %v8056_v54 }
 0x5b4   : > { %11136 = vmatprep.subr.bf16.mxu1 %v14531_v12  ;;  %v14603_v12 = vcombine.high %v8044_v1, %v8048_v16 }
 0x5b5   : > { %11122 = vmatpush2.bf16.msra.mxu0 %v14426_v11  ;;  %v8168_v11 = vld [vmem:[%s16214_s16 + $0xbe8] sm:$0xff] }
 0x5b6   : > { %v7682_v57 = vpop.f32.mrf.mxu1  ;;  %11123 = vmatprep.subr.bf16.mxu0 %v14419_v34  ;;  %v14602_v34 = vcombine.low %v8044_v1, %v8048_v16  ;;  %v14723_v52 = vcombine.high %v8164_v26, %v8168_v11  ;;  %v7964_v16 = vld [vmem:[%s16214_s16 + $0x588] sm:$0xff] }
 0x5b7   : > { %v7683_v32 = vadd.f32 %v7682_v57, %v7642_v27  ;;  %v7723_v63 = vpop.f32.mrf.mxu0  ;;  %v8160_v27 = vld [vmem:[%s16214_s16 + $0xba8] sm:$0xff] }
 0x5b8   : > { %v17716_v33 = vpop.f32.mrf.mxu1  ;;  %v14715_v57 = vcombine.high %v8156_v25, %v8160_v27 }
 0x5b9   : > { %v17718_v35 = vadd.f32 %v7723_v63, %v7683_v32  ;;  %v17720_v46 = vpop.f32.mrf.mxu0  ;;  %11124 = vmatpush2.bf16.msra.mxu0 %v14418_v29  ;;  %v14722_v29 = vcombine.low %v8164_v26, %v8168_v11  ;;  %v8152_v32 = vld [vmem:[%s16214_s16 + $0xb68] sm:$0xff]  ;;  %v14714_v63 = vcombine.low %v8156_v25, %v8160_v27  ;;  %v7837_v26 = vld [vmem:[%s16214_s16 + $0x190] sm:$0xff] }
 0x5ba   : > { %v7686_v37 = vpop.f32.mrf.mxu1  ;;  %11125 = vmatprep.subr.bf16.mxu0 %v14411_v50  ;;  %v8148_v50 = vld [vmem:[%s16214_s16 + $0xb48] sm:$0xff]  ;;  %v7841_v11 = vld [vmem:[%s16214_s16 + $0x1b0] sm:$0xff] }
 0x5bb   : > { %v7727_v43 = vpop.f32.mrf.mxu0  ;;  %v14707_v10 = vcombine.high %v8148_v50, %v8152_v32  ;;  %v14706_v37 = vcombine.low %v8148_v50, %v8152_v32  ;;  %v14397_v50 = vcombine.high %v7837_v26, %v7841_v11  ;;  %v7960_v32 = vld [vmem:[%s16214_s16 + $0x568] sm:$0xff] }
 0x5bc   : > { %v7687_v2 = vpop.f32.mrf.mxu1  ;;  %v8132_v43 = vld [vmem:[%s16214_s16 + $0xac8] sm:$0xff] }
 0x5bd   : > { %v7728_v49 = vpop.f32.mrf.mxu0  ;;  %11126 = vmatpush2.bf16.msra.mxu0 %v14410_v5  ;;  %v8144_v5 = vld [vmem:[%s16214_s16 + $0xb28] sm:$0xff]  ;;  %v14690_v48 = vcombine.low %v8132_v43, %v8136_v44 }
 0x5be   : > { %11177 = vmatprep.subr.bf16.mxu0 %v14659_v13  ;;  %v14699_v13 = vcombine.high %v8140_v4, %v8144_v5  ;;  %v14698_v2 = vcombine.low %v8140_v4, %v8144_v5  ;;  %v14691_v49 = vcombine.high %v8132_v43, %v8136_v44  ;;  %v14396_v5 = vcombine.low %v7837_v26, %v7841_v11  ;;  %v7948_v43 = vld [vmem:[%s16214_s16 + $0x508] sm:$0xff] }
 0x5bf   : > { %v7952_v44 = vld [vmem:[%s16214_s16 + $0x528] sm:$0xff] }
 0x5c0   : > { %11128 = vmatmul.mubr.bf16.vlgmr.msra.gmra.mxu0 %v17533_v8  ;;  %v8036_v11 = vld [vmem:[%s16214_s16 + $0x7c8] sm:$0xff] }
 0x5c1   : > { %11178 = vmatpush1.bf16.msra.mxu0 %v14658_v42  ;;  %11209 = vmatprep.mubr.bf16.mxu0 %v17636_v9  ;;  %v8124_v42 = vld [vmem:[%s16214_s16 + $0xa88] sm:$0xff] }
 0x5c2   : > { %11179 = vmatprep.subr.bf16.mxu0 %v14651_v41  ;;  %v8128_v41 = vld [vmem:[%s16214_s16 + $0xaa8] sm:$0xff] }
 0x5c3   : > { %v14682_v47 = vcombine.low %v8124_v42, %v8128_v41 }
 0x5c5   : > { %11180 = vmatpush1.bf16.msra.mxu0 %v14650_v30  ;;  %v14683_v30 = vcombine.high %v8124_v42, %v8128_v41  ;;  %v7940_v42 = vld [vmem:[%s16214_s16 + $0x4c8] sm:$0xff] }
 0x5c6   : > { %11181 = vmatprep.subr.bf16.mxu0 %v14643_v53  ;;  %v8116_v53 = vld [vmem:[%s16214_s16 + $0xa48] sm:$0xff] }
 0x5c7   : > { %v14675_v45 = vcombine.high %v8116_v53, %v8120_v39  ;;  %v14674_v22 = vcombine.low %v8116_v53, %v8120_v39  ;;  %v7944_v41 = vld [vmem:[%s16214_s16 + $0x4e8] sm:$0xff]  ;;  %v14380_v53 = vcombine.low %v7821_v60, %v7825_v20 }
 0x5c8   : > { %v14499_v39 = vcombine.high %v7940_v42, %v7944_v41 }
 0x5c9   : > { %11182 = vmatpush1.bf16.msra.mxu0 %v14642_v31  ;;  %v7685_v31 = vadd.f32 %v17716_v33, %v7644_v6 }
 0x5ca   : > { %11183 = vmatprep.subr.bf16.mxu0 %v14635_v7  ;;  %v8108_v7 = vld [vmem:[%s16214_s16 + $0xa08] sm:$0xff] }
 0x5cb   : > { %v14666_v54 = vcombine.low %v8108_v7, %v8112_v56 }
 0x5cd   : > { %11184 = vmatpush1.bf16.msra.mxu0 %v14634_v62  ;;  %v14667_v62 = vcombine.high %v8108_v7, %v8112_v56  ;;  %v7809_v7 = vld [vmem:[%s16214_s16 + $0xb0] sm:$0xff]  ;;  %v14498_v56 = vcombine.low %v7940_v42, %v7944_v41 }
 0x5ce   : > { %11185 = vmatprep.subr.bf16.mxu0 %v14627_v59  ;;  %v7726_v59 = vadd.f32 %v17720_v46, %v7685_v31  ;;  %v7805_v31 = vld [vmem:[%s16214_s16 + $0x90] sm:$0xff] }
 0x5d1   : > { %11186 = vmatpush1.bf16.msra.mxu0 %v14626_v17  ;;  %v7849_v17 = vld [vmem:[%s16214_s16 + $0x1f0] sm:$0xff] }
 0x5d2   : > { %11187 = vmatprep.subr.bf16.mxu0 %v14619_v0  ;;  %v14405_v46 = vcombine.high %v7845_v21, %v7849_v17  ;;  %v14404_v25 = vcombine.low %v7845_v21, %v7849_v17  ;;  %v7797_v21 = vld [vmem:[%s16214_s16 + $0x50] sm:$0xff] }
 0x5d3   : > { %v7801_v17 = vld [vmem:[%s16214_s16 + $0x70] sm:$0xff] }
 0x5d5   : > { %11188 = vmatpush1.bf16.msra.mxu0 %v14618_v61 }
 0x5d6   : > { %11189 = vmatprep.subr.bf16.mxu0 %v14611_v19 }
 0x5d9   : > { %11190 = vmatpush1.bf16.msra.mxu0 %v14610_v3 }
 0x5da   : > { %11191 = vmatprep.subr.bf16.mxu0 %v14603_v12  ;;  %v7968_v12 = vld [vmem:[%s16214_s16 + $0x5a8] sm:$0xff] }
 0x5db   : > { %v14522_v4 = vcombine.low %v7964_v16, %v7968_v12 }
 0x5dd   : > { %11192 = vmatpush1.bf16.msra.mxu0 %v14602_v34 }
 0x5de   : > { %11193 = vmatprep.subr.bf16.mxu0 %v14723_v52 }
 0x5e1   : > { %11194 = vmatpush2.bf16.msra.mxu0 %v14722_v29  ;;  %v7956_v29 = vld [vmem:[%s16214_s16 + $0x548] sm:$0xff] }
 0x5e2   : > { %11195 = vmatprep.subr.bf16.mxu0 %v14715_v57  ;;  %v14523_v57 = vcombine.high %v7964_v16, %v7968_v12  ;;  %v14514_v55 = vcombine.low %v7956_v29, %v7960_v32 }
 0x5e5   : > { %11196 = vmatpush2.bf16.msra.mxu0 %v14714_v63  ;;  %v7829_v63 = vld [vmem:[%s16214_s16 + $0x150] sm:$0xff] }
 0x5e6   : > { %11197 = vmatprep.subr.bf16.mxu0 %v14707_v10  ;;  %v7833_v10 = vld [vmem:[%s16214_s16 + $0x170] sm:$0xff] }
 0x5e9   : > { %11198 = vmatpush2.bf16.msra.mxu0 %v14706_v37  ;;  %v14515_v37 = vcombine.high %v7956_v29, %v7960_v32  ;;  %v7913_v29 = vld [vmem:[%s16214_s16 + $0x3f0] sm:$0xff] }
 0x5ea   : > { %11199 = vmatprep.subr.bf16.mxu0 %v14699_v13  ;;  %v14389_v13 = vcombine.high %v7829_v63, %v7833_v10 }
 0x5ed   : > { %11200 = vmatpush2.bf16.msra.mxu0 %v14698_v2  ;;  %v14507_v2 = vcombine.high %v7948_v43, %v7952_v44 }
 0x5ee   : > { %11201 = vmatprep.subr.bf16.mxu0 %v14691_v49  ;;  %v14381_v49 = vcombine.high %v7821_v60, %v7825_v20  ;;  %v8020_v20 = vld [vmem:[%s16214_s16 + $0x748] sm:$0xff] }
 0x5f1   : > { %11202 = vmatpush2.bf16.msra.mxu0 %v14690_v48  ;;  %v7817_v48 = vld [vmem:[%s16214_s16 + $0xf0] sm:$0xff] }
 0x5f2   : > { %11203 = vmatprep.subr.bf16.mxu0 %v14683_v30  ;;  %v14506_v30 = vcombine.low %v7948_v43, %v7952_v44  ;;  %v14373_v6 = vcombine.high %v7813_v14, %v7817_v48 }
 0x5f5   : > { %11204 = vmatpush2.bf16.msra.mxu0 %v14682_v47  ;;  %v7932_v47 = vld [vmem:[%s16214_s16 + $0x488] sm:$0xff] }
 0x5f6   : > { %v7764_v58 = vpop.f32.mrf.mxu1  ;;  %11205 = vmatprep.subr.bf16.mxu0 %v14675_v45  ;;  %v7936_v45 = vld [vmem:[%s16214_s16 + $0x4a8] sm:$0xff] }
 0x5f7   : > { %v7765_v38 = vadd.f32 %v7764_v58, %v17718_v35  ;;  %v17761_v28 = vpop.f32.mrf.mxu0  ;;  %v14491_v58 = vcombine.high %v7932_v47, %v7936_v45 }
 0x5f8   : > { %v7766_v33 = vpop.f32.mrf.mxu1 }
 0x5f9   : > { %v7767_v0 = vadd.f32 %v7766_v33, %v7726_v59  ;;  %v17765_v24 = vpop.f32.mrf.mxu0  ;;  %11206 = vmatpush2.bf16.msra.mxu0 %v14674_v22  ;;  %v7777_v61 = vmax.f32 %v7765_v38, 0.0  ;;  %v14372_v22 = vcombine.low %v7813_v14, %v7817_v48  ;;  %v7924_v59 = vld [vmem:[%s16214_s16 + $0x448] sm:$0xff]  ;;  %v14490_v33 = vcombine.low %v7932_v47, %v7936_v45 }
 0x5fa   : > { %v7768_v19 = vpop.f32.mrf.mxu1  ;;  %11207 = vmatprep.subr.bf16.mxu0 %v14667_v62  ;;  %v14365_v62 = vcombine.high %v7805_v31, %v7809_v7  ;;  %v7928_v38 = vld [vmem:[%s16214_s16 + $0x468] sm:$0xff] }
 0x5fb   : > { %v7778_v1 = vmax.f32 %v7767_v0, 0.0  ;;  %v10969_v35 = vpop.f32.mrf.mxu0  ;;  %v17773_v27 = vpack.c.bf16 %v7777_v61, %v7777_v61  ;;  %v14364_v0 = vcombine.low %v7805_v31, %v7809_v7  ;;  %v14357_v61 = vcombine.high %v7797_v21, %v7801_v17  ;;  %v7916_v19 = vld [vmem:[%s16214_s16 + $0x408] sm:$0xff] }
 0x5fc   : > { %v7769_v3 = vpop.f32.mrf.mxu1  ;;  %v7793_v35 = vld [vmem:[%s16214_s16 + $0x30] sm:$0xff]  ;;  %v14482_v16 = vcombine.low %v7924_v59, %v7928_v38  ;;  %v8012_v48 = vld [vmem:[%s16214_s16 + $0x708] sm:$0xff] }
 0x5fd   : > { %v17771_v34 = vpack.c.bf16 %v7778_v1, %v7778_v1  ;;  %v10970_v52 = vpop.f32.mrf.mxu0  ;;  %11208 = vmatpush2.bf16.msra.mxu0 %v14666_v54  ;;  %v14483_v54 = vcombine.high %v7924_v59, %v7928_v38  ;;  %v7789_v1 = vld [vmem:[%s16214_s16 + $0x10] sm:$0xff]  ;;  %v14356_v3 = vcombine.low %v7797_v21, %v7801_v17  ;;  %v8004_v7 = vld [vmem:[%s16214_s16 + $0x6c8] sm:$0xff] }
 0x5fe   : > { %11259 = vmatprep.subr.bf16.mxu0 %v14405_v46  ;;  %v7920_v46 = vld [vmem:[%s16214_s16 + $0x428] sm:$0xff]  ;;  %v14349_v26 = vcombine.high %v7789_v1, %v7793_v35 }
 0x5ff   : > { %11086 = vmatprep.mubr.bf16.mxu1 %v17771_v34  ;;  %v14475_v12 = vcombine.high %v7916_v19, %v7920_v46  ;;  %v8040_v52 = vld [vmem:[%s16214_s16 + $0x7e8] sm:$0xff] }
 0x600   : > { %11210 = vmatmul.mubr.bf16.vlgmr.msra.gmra.mxu0 %v17642_v36  ;;  %11087 = vmatmul.mubr.bf16.vlgmr.msra.gmra.mxu1 %v17773_v27  ;;  %v14595_v32 = vcombine.high %v8036_v11, %v8040_v52 }
 0x601   : > { %11137 = vmatpush1.bf16.msra.mxu1 %v14530_v18  ;;  %11260 = vmatpush1.bf16.msra.mxu0 %v14404_v25  ;;  %v14388_v18 = vcombine.low %v7829_v63, %v7833_v10  ;;  %v7909_v25 = vld [vmem:[%s16214_s16 + $0x3d0] sm:$0xff]  ;;  %v8028_v10 = vld [vmem:[%s16214_s16 + $0x788] sm:$0xff] }
 0x602   : > { %11291 = vmatprep.mubr.bf16.mxu0 %v17450_v23  ;;  %11168 = vmatprep.mubr.bf16.mxu1 %v17538_v15  ;;  %v14469_v63 = vcombine.high %v7909_v25, %v7913_v29  ;;  %v14468_v43 = vcombine.low %v7909_v25, %v7913_v29  ;;  %v7865_v25 = vld [vmem:[%s16214_s16 + $0x270] sm:$0xff] }
 0x603   : > { %11138 = vmatprep.subr.bf16.mxu1 %v14523_v57  ;;  %11261 = vmatprep.subr.bf16.mxu0 %v14397_v50  ;;  %v14474_v57 = vcombine.low %v7916_v19, %v7920_v46  ;;  %v14348_v50 = vcombine.low %v7789_v1, %v7793_v35  ;;  %v7873_v19 = vld [vmem:[%s16214_s16 + $0x2b0] sm:$0xff]  ;;  %v15397_v46 = vld [vmem:[%s16228_s14] sm:$0x77] }
 0x605   : > { %11139 = vmatpush1.bf16.msra.mxu1 %v14522_v4  ;;  %11262 = vmatpush1.bf16.msra.mxu0 %v14396_v5  ;;  %v8032_v4 = vld [vmem:[%s16214_s16 + $0x7a8] sm:$0xff]  ;;  %v7901_v5 = vld [vmem:[%s16214_s16 + $0x390] sm:$0xff] }
 0x606   : > { %11140 = vmatprep.subr.bf16.mxu1 %v14515_v37  ;;  %11263 = vmatprep.subr.bf16.mxu0 %v14389_v13  ;;  %v7905_v37 = vld [vmem:[%s16214_s16 + $0x3b0] sm:$0xff]  ;;  %v14594_v13 = vcombine.low %v8036_v11, %v8040_v52  ;;  %v14587_v44 = vcombine.high %v8028_v10, %v8032_v4  ;;  %v7992_v11 = vld [vmem:[%s16214_s16 + $0x668] sm:$0xff] }
 0x607   : > { %v14461_v60 = vcombine.high %v7901_v5, %v7905_v37  ;;  %v14460_v42 = vcombine.low %v7901_v5, %v7905_v37  ;;  %v7861_v52 = vld [vmem:[%s16214_s16 + $0x250] sm:$0xff]  ;;  %v7984_v5 = vld [vmem:[%s16214_s16 + $0x628] sm:$0xff] }
 0x608   : > { %v7853_v37 = vld [vmem:[%s16214_s16 + $0x210] sm:$0xff] }
 0x609   : > { %11141 = vmatpush1.bf16.msra.mxu1 %v14514_v55  ;;  %11264 = vmatpush1.bf16.msra.mxu0 %v14388_v18  ;;  %v8024_v55 = vld [vmem:[%s16214_s16 + $0x768] sm:$0xff]  ;;  %v7893_v18 = vld [vmem:[%s16214_s16 + $0x350] sm:$0xff] }
 0x60a   : > { %11142 = vmatprep.subr.bf16.mxu1 %v14507_v2  ;;  %11265 = vmatprep.subr.bf16.mxu0 %v14381_v49  ;;  %v7897_v2 = vld [vmem:[%s16214_s16 + $0x370] sm:$0xff]  ;;  %v14586_v49 = vcombine.low %v8028_v10, %v8032_v4  ;;  %v14579_v41 = vcombine.high %v8020_v20, %v8024_v55  ;;  %v7980_v10 = vld [vmem:[%s16214_s16 + $0x608] sm:$0xff] }
 0x60b   : > { %v14453_v14 = vcombine.high %v7893_v18, %v7897_v2  ;;  %v14452_v47 = vcombine.low %v7893_v18, %v7897_v2  ;;  %v8228_v2 = vld [vmem:[%s16214_s16 + $0xdc8] sm:$0xff] }
 0x60d   : > { %11143 = vmatpush1.bf16.msra.mxu1 %v14506_v30  ;;  %11266 = vmatpush1.bf16.msra.mxu0 %v14380_v53  ;;  %v8016_v30 = vld [vmem:[%s16214_s16 + $0x728] sm:$0xff]  ;;  %v7885_v53 = vld [vmem:[%s16214_s16 + $0x310] sm:$0xff] }
 0x60e   : > { %11144 = vmatprep.subr.bf16.mxu1 %v14499_v39  ;;  %11267 = vmatprep.subr.bf16.mxu0 %v14373_v6  ;;  %v7889_v39 = vld [vmem:[%s16214_s16 + $0x330] sm:$0xff]  ;;  %v14578_v6 = vcombine.low %v8020_v20, %v8024_v55  ;;  %v14571_v45 = vcombine.high %v8012_v48, %v8016_v30  ;;  %v14570_v59 = vcombine.low %v8012_v48, %v8016_v30 }
 0x60f   : > { %v14445_v31 = vcombine.high %v7885_v53, %v7889_v39  ;;  %v14444_v38 = vcombine.low %v7885_v53, %v7889_v39  ;;  %v14539_v55 = vcombine.high %v7980_v10, %v7984_v5  ;;  %v8105_v48 = vld [vmem:[%s16214_s16 + $0x9f0] sm:$0xff]  ;;  %v14538_v53 = vcombine.low %v7980_v10, %v7984_v5  ;;  %v8200_v5 = vld [vmem:[%s16214_s16 + $0xce8] sm:$0xff] }
 0x611   : > { %11145 = vmatpush1.bf16.msra.mxu1 %v14498_v56  ;;  %11268 = vmatpush1.bf16.msra.mxu0 %v14372_v22  ;;  %v8008_v56 = vld [vmem:[%s16214_s16 + $0x6e8] sm:$0xff]  ;;  %v7877_v22 = vld [vmem:[%s16214_s16 + $0x2d0] sm:$0xff] }
 0x612   : > { %11146 = vmatprep.subr.bf16.mxu1 %v14491_v58  ;;  %11269 = vmatprep.subr.bf16.mxu0 %v14365_v62  ;;  %v7881_v58 = vld [vmem:[%s16214_s16 + $0x2f0] sm:$0xff]  ;;  %v17828_v62 = vsub.s32 2, %v16813_v40  ;;  %v14563_v21 = vcombine.high %v8004_v7, %v8008_v56  ;;  %v14562_v35 = vcombine.low %v8004_v7, %v8008_v56  ;;  %v8224_v7 = vld [vmem:[%s16214_s16 + $0xda8] sm:$0xff] }
 0x613   : > { %v14437_v17 = vcombine.high %v7877_v22, %v7881_v58  ;;  %v8093_v56 = vld [vmem:[%s16214_s16 + $0x990] sm:$0xff] }
 0x614   : > { %v8302_v1 = vrot.slane %v15397_v46, %v17828_v62 }
 0x615   : > { %11147 = vmatpush1.bf16.msra.mxu1 %v14490_v33  ;;  %11270 = vmatpush1.bf16.msra.mxu0 %v14364_v0  ;;  %v7996_v33 = vld [vmem:[%s16214_s16 + $0x688] sm:$0xff]  ;;  %v17832_v0 = vsub.s32 6, %v16813_v40 }
 0x616   : > { %11148 = vmatprep.subr.bf16.mxu1 %v14483_v54  ;;  %11271 = vmatprep.subr.bf16.mxu0 %v14357_v61  ;;  %v8000_v54 = vld [vmem:[%s16214_s16 + $0x6a8] sm:$0xff]  ;;  %v7869_v61 = vld [vmem:[%s16214_s16 + $0x290] sm:$0xff]  ;;  %v8342_v29 = vrot.slane %v8302_v1, %v17828_v62 }
 0x617   : > { %v7988_v40 = vld [vmem:[%s16214_s16 + $0x648] sm:$0xff] }
 0x619   : > { %11149 = vmatpush1.bf16.msra.mxu1 %v14482_v16  ;;  %11272 = vmatpush1.bf16.msra.mxu0 %v14356_v3  ;;  %v14436_v16 = vcombine.low %v7877_v22, %v7881_v58  ;;  %v14555_v3 = vcombine.high %v7996_v33, %v8000_v54  ;;  %v8097_v22 = vld [vmem:[%s16214_s16 + $0x9b0] sm:$0xff] }
 0x61a   : > { %11150 = vmatprep.subr.bf16.mxu1 %v14475_v12  ;;  %11273 = vmatprep.subr.bf16.mxu0 %v14349_v26  ;;  %v14429_v12 = vcombine.high %v7869_v61, %v7873_v19  ;;  %v8306_v26 = vrot.slane %v15397_v46, %v17832_v0 }
 0x61c   : > { %v8346_v4 = vrot.slane %v8306_v26, %v17828_v62  ;;  %v8204_v26 = vld [vmem:[%s16214_s16 + $0xd08] sm:$0xff] }
 0x61d   : > { %11151 = vmatpush1.bf16.msra.mxu1 %v14474_v57  ;;  %11274 = vmatpush1.bf16.msra.mxu0 %v14348_v50  ;;  %v14554_v57 = vcombine.low %v7996_v33, %v8000_v54  ;;  %v14428_v50 = vcombine.low %v7869_v61, %v7873_v19  ;;  %v8216_v33 = vld [vmem:[%s16214_s16 + $0xd68] sm:$0xff]  ;;  %v8085_v61 = vld [vmem:[%s16214_s16 + $0x950] sm:$0xff] }
 0x61e   : > { %11152 = vmatprep.subr.bf16.mxu1 %v14595_v32  ;;  %11275 = vmatprep.subr.bf16.mxu0 %v14469_v63  ;;  %v14547_v32 = vcombine.high %v7988_v40, %v7992_v11  ;;  %v14421_v63 = vcombine.high %v7861_v52, %v7865_v25  ;;  %v8089_v19 = vld [vmem:[%s16214_s16 + $0x970] sm:$0xff] }
 0x621   : > { %11153 = vmatpush2.bf16.msra.mxu1 %v14594_v13  ;;  %11276 = vmatpush2.bf16.msra.mxu0 %v14468_v43  ;;  %v7857_v13 = vld [vmem:[%s16214_s16 + $0x230] sm:$0xff]  ;;  %v10966_v43 = vadd.f32 %v17761_v28, %v8342_v29 }
 0x622   : > { %11154 = vmatprep.subr.bf16.mxu1 %v14587_v44  ;;  %11277 = vmatprep.subr.bf16.mxu0 %v14461_v60  ;;  %v14546_v44 = vcombine.low %v7988_v40, %v7992_v11  ;;  %v14420_v60 = vcombine.low %v7861_v52, %v7865_v25  ;;  %v14413_v18 = vcombine.high %v7853_v37, %v7857_v13  ;;  %v8208_v11 = vld [vmem:[%s16214_s16 + $0xd28] sm:$0xff]  ;;  %v8077_v25 = vld [vmem:[%s16214_s16 + $0x910] sm:$0xff] }
 0x623   : > { %v14412_v39 = vcombine.low %v7853_v37, %v7857_v13  ;;  %v14645_v40 = vcombine.high %v8085_v61, %v8089_v19  ;;  %v8081_v29 = vld [vmem:[%s16214_s16 + $0x930] sm:$0xff] }
 0x624   : > { %v14637_v10 = vcombine.high %v8077_v25, %v8081_v29  ;;  %v8069_v37 = vld [vmem:[%s16214_s16 + $0x8d0] sm:$0xff] }
 0x625   : > { %11155 = vmatpush2.bf16.msra.mxu1 %v14586_v49  ;;  %11278 = vmatpush2.bf16.msra.mxu0 %v14460_v42  ;;  %v10968_v49 = vadd.f32 %v17765_v24, %v8346_v4  ;;  %v8196_v4 = vld [vmem:[%s16214_s16 + $0xcc8] sm:$0xff]  ;;  %v8073_v13 = vld [vmem:[%s16214_s16 + $0x8f0] sm:$0xff] }
 0x626   : > { %11156 = vmatprep.subr.bf16.mxu1 %v14579_v41  ;;  %11279 = vmatprep.subr.bf16.mxu0 %v14453_v14  ;;  %v8232_v41 = vld [vmem:[%s16214_s16 + $0xde8] sm:$0xff]  ;;  %v8101_v14 = vld [vmem:[%s16214_s16 + $0x9d0] sm:$0xff] }
 0x627   : > { %v14661_v24 = vcombine.high %v8101_v14, %v8105_v48  ;;  %v14786_v58 = vcombine.low %v8228_v2, %v8232_v41 }
 0x629   : > { %11157 = vmatpush2.bf16.msra.mxu1 %v14578_v6  ;;  %11280 = vmatpush2.bf16.msra.mxu0 %v14452_v47  ;;  %v14787_v47 = vcombine.high %v8228_v2, %v8232_v41  ;;  %v8061_v2 = vld [vmem:[%s16214_s16 + $0x890] sm:$0xff]  ;;  %v14628_v41 = vcombine.low %v8069_v37, %v8073_v13 }
 0x62a   : > { %11158 = vmatprep.subr.bf16.mxu1 %v14571_v45  ;;  %11281 = vmatprep.subr.bf16.mxu0 %v14445_v31  ;;  %v8220_v45 = vld [vmem:[%s16214_s16 + $0xd88] sm:$0xff] }
 0x62b   : > { %v14778_v1 = vcombine.low %v8220_v45, %v8224_v7 }
 0x62d   : > { %11159 = vmatpush2.bf16.msra.mxu1 %v14570_v59  ;;  %11282 = vmatpush2.bf16.msra.mxu0 %v14444_v38  ;;  %v14660_v59 = vcombine.low %v8101_v14, %v8105_v48  ;;  %v14779_v38 = vcombine.high %v8220_v45, %v8224_v7  ;;  %v8176_v7 = vld [vmem:[%s16214_s16 + $0xc28] sm:$0xff] }
 0x62e   : > { %11160 = vmatprep.subr.bf16.mxu1 %v14563_v21  ;;  %11283 = vmatprep.subr.bf16.mxu0 %v14437_v17  ;;  %v14653_v21 = vcombine.high %v8093_v56, %v8097_v22  ;;  %v8212_v17 = vld [vmem:[%s16214_s16 + $0xd48] sm:$0xff] }
 0x631   : > { %11161 = vmatpush2.bf16.msra.mxu1 %v14562_v35  ;;  %11284 = vmatpush2.bf16.msra.mxu0 %v14436_v16  ;;  %v14652_v16 = vcombine.low %v8093_v56, %v8097_v22  ;;  %v8045_v56 = vld [vmem:[%s16214_s16 + $0x810] sm:$0xff] }
 0x632   : > { %11162 = vmatprep.subr.bf16.mxu1 %v14555_v3  ;;  %11285 = vmatprep.subr.bf16.mxu0 %v14429_v12  ;;  %v14771_v3 = vcombine.high %v8212_v17, %v8216_v33  ;;  %v8049_v22 = vld [vmem:[%s16214_s16 + $0x830] sm:$0xff] }
 0x635   : > { %11163 = vmatpush2.bf16.msra.mxu1 %v14554_v57  ;;  %11286 = vmatpush2.bf16.msra.mxu0 %v14428_v50  ;;  %v14770_v57 = vcombine.low %v8212_v17, %v8216_v33  ;;  %v8292_v17 = vld [vmem:[%s16214_s16 + $0xfc8] sm:$0xff] }
 0x636   : > { %v11006_v20 = vpop.f32.mrf.mxu1  ;;  %11164 = vmatprep.subr.bf16.mxu1 %v14547_v32  ;;  %11287 = vmatprep.subr.bf16.mxu0 %v14421_v63  ;;  %v14644_v32 = vcombine.low %v8085_v61, %v8089_v19  ;;  %v14763_v63 = vcombine.high %v8204_v26, %v8208_v11  ;;  %v8296_v33 = vld [vmem:[%s16214_s16 + $0xfe8] sm:$0xff]  ;;  %v8169_v61 = vld [vmem:[%s16214_s16 + $0xbf0] sm:$0xff] }
 0x637   : > { %v11007_v42 = vadd.f32 %v11006_v20, %v10966_v43  ;;  %v14762_v43 = vcombine.low %v8204_v26, %v8208_v11  ;;  %v14629_v20 = vcombine.high %v8069_v37, %v8073_v13  ;;  %v8157_v26 = vld [vmem:[%s16214_s16 + $0xb90] sm:$0xff] }
 0x638   : > { %v11008_v28 = vpop.f32.mrf.mxu1  ;;  %v8161_v11 = vld [vmem:[%s16214_s16 + $0xbb0] sm:$0xff] }
 0x639   : > { %v11009_v30 = vadd.f32 %v11008_v28, %v10968_v49  ;;  %11165 = vmatpush2.bf16.msra.mxu1 %v14546_v44  ;;  %11288 = vmatpush2.bf16.msra.mxu0 %v14420_v60  ;;  %v14636_v44 = vcombine.low %v8077_v25, %v8081_v29  ;;  %v14755_v60 = vcombine.high %v8196_v4, %v8200_v5  ;;  %v8065_v49 = vld [vmem:[%s16214_s16 + $0x8b0] sm:$0xff]  ;;  %v8180_v28 = vld [vmem:[%s16214_s16 + $0xc48] sm:$0xff] }
 0x63a   : > { %v11010_v6 = vpop.f32.mrf.mxu1  ;;  %11166 = vmatprep.subr.bf16.mxu1 %v14539_v55  ;;  %11289 = vmatprep.subr.bf16.mxu0 %v14413_v18  ;;  %v8188_v55 = vld [vmem:[%s16214_s16 + $0xc88] sm:$0xff]  ;;  %v14621_v48 = vcombine.high %v8061_v2, %v8065_v49 }
 0x63b   : > { %v8192_v18 = vld [vmem:[%s16214_s16 + $0xca8] sm:$0xff] }
 0x63c   : > { %v11011_v31 = vpop.f32.mrf.mxu1  ;;  %v14747_v14 = vcombine.high %v8188_v55, %v8192_v18  ;;  %v14746_v6 = vcombine.low %v8188_v55, %v8192_v18 }
 0x63d   : > { %11167 = vmatpush2.bf16.msra.mxu1 %v14538_v53  ;;  %11290 = vmatpush2.bf16.msra.mxu0 %v14412_v39  ;;  %v8053_v53 = vld [vmem:[%s16214_s16 + $0x850] sm:$0xff]  ;;  %v8172_v31 = vld [vmem:[%s16214_s16 + $0xc08] sm:$0xff] }
 0x63e   : > { %11218 = vmatprep.subr.bf16.mxu1 %v14787_v47  ;;  %11341 = vmatprep.subr.bf16.mxu0 %v14661_v24  ;;  %v8057_v39 = vld [vmem:[%s16214_s16 + $0x870] sm:$0xff]  ;;  %v14620_v47 = vcombine.low %v8061_v2, %v8065_v49  ;;  %v14730_v19 = vcombine.low %v8172_v31, %v8176_v7 }
 0x63f   : > { %v14613_v45 = vcombine.high %v8053_v53, %v8057_v39 }
 0x640   : > { %11169 = vmatmul.mubr.bf16.vlgmr.msra.gmra.mxu1 %v17621_v51  ;;  %11292 = vmatmul.mubr.bf16.vlgmr.msra.gmra.mxu0 %v17533_v8  ;;  %v11047_v54 = vpop.f32.mrf.mxu0 }
 0x641   : > { %v17866_v46 = vadd.f32 %v11047_v54, %v11007_v42  ;;  %11219 = vmatpush1.bf16.msra.mxu1 %v14786_v58  ;;  %11250 = vmatprep.mubr.bf16.mxu1 %v17771_v34  ;;  %v14754_v42 = vcombine.low %v8196_v4, %v8200_v5  ;;  %v8165_v54 = vld [vmem:[%s16214_s16 + $0xbd0] sm:$0xff]  ;;  %v14716_v5 = vcombine.low %v8157_v26, %v8161_v11 }
 0x642   : > { %11342 = vmatpush1.bf16.msra.mxu0 %v14660_v59  ;;  %11373 = vmatprep.mubr.bf16.mxu0 %v17636_v9  ;;  %v11049_v35 = vpop.f32.mrf.mxu0  ;;  %v14612_v59 = vcombine.low %v8053_v53, %v8057_v39  ;;  %v14724_v25 = vcombine.low %v8165_v54, %v8169_v61 }
 0x643   : > { %v17870_v12 = vadd.f32 %v11049_v35, %v11009_v30  ;;  %11220 = vmatprep.subr.bf16.mxu1 %v14779_v38  ;;  %11343 = vmatprep.subr.bf16.mxu0 %v14653_v21  ;;  %v8184_v30 = vld [vmem:[%s16214_s16 + $0xc68] sm:$0xff]  ;;  %v14731_v38 = vcombine.high %v8172_v31, %v8176_v7  ;;  %v14605_v21 = vcombine.high %v8045_v56, %v8049_v22 }
 0x644   : > { %v11051_v52 = vpop.f32.mrf.mxu0  ;;  %v14739_v24 = vcombine.high %v8180_v28, %v8184_v30  ;;  %v14738_v58 = vcombine.low %v8180_v28, %v8184_v30  ;;  %v14851_v35 = vcombine.high %v8292_v17, %v8296_v33 }
 0x645   : > { %11221 = vmatpush1.bf16.msra.mxu1 %v14778_v1  ;;  %v14604_v1 = vcombine.low %v8045_v56, %v8049_v22  ;;  %v14850_v52 = vcombine.low %v8292_v17, %v8296_v33 }
 0x646   : > { %11344 = vmatpush1.bf16.msra.mxu0 %v14652_v16  ;;  %v11052_v50 = vpop.f32.mrf.mxu0  ;;  %11222 = vmatprep.subr.bf16.mxu1 %v14771_v3  ;;  %v14725_v16 = vcombine.high %v8165_v54, %v8169_v61  ;;  %v8284_v3 = vld [vmem:[%s16214_s16 + $0xf88] sm:$0xff] }
 0x647   : > { %11345 = vmatprep.subr.bf16.mxu0 %v14645_v40  ;;  %v8288_v40 = vld [vmem:[%s16214_s16 + $0xfa8] sm:$0xff] }
 0x648   : > { %v14843_v29 = vcombine.high %v8284_v3, %v8288_v40  ;;  %v8276_v50 = vld [vmem:[%s16214_s16 + $0xf48] sm:$0xff]  ;;  %v14842_v4 = vcombine.low %v8284_v3, %v8288_v40 }
 0x649   : > { %11223 = vmatpush1.bf16.msra.mxu1 %v14770_v57  ;;  %v14717_v57 = vcombine.high %v8157_v26, %v8161_v11 }
 0x64a   : > { %11346 = vmatpush1.bf16.msra.mxu0 %v14644_v32  ;;  %11224 = vmatprep.subr.bf16.mxu1 %v14763_v63  ;;  %v8280_v32 = vld [vmem:[%s16214_s16 + $0xf68] sm:$0xff]  ;;  %v8149_v63 = vld [vmem:[%s16214_s16 + $0xb50] sm:$0xff] }
 0x64b   : > { %11347 = vmatprep.subr.bf16.mxu0 %v14637_v10  ;;  %v8153_v10 = vld [vmem:[%s16214_s16 + $0xb70] sm:$0xff]  ;;  %v14835_v37 = vcombine.high %v8276_v50, %v8280_v32  ;;  %v14834_v55 = vcombine.low %v8276_v50, %v8280_v32 }
 0x64c   : > { %v14709_v13 = vcombine.high %v8149_v63, %v8153_v10  ;;  %v14708_v18 = vcombine.low %v8149_v63, %v8153_v10 }
 0x64d   : > { %11225 = vmatpush1.bf16.msra.mxu1 %v14762_v43  ;;  %v8268_v43 = vld [vmem:[%s16214_s16 + $0xf08] sm:$0xff] }
 0x64e   : > { %11348 = vmatpush1.bf16.msra.mxu0 %v14636_v44  ;;  %11226 = vmatprep.subr.bf16.mxu1 %v14755_v60  ;;  %v8272_v44 = vld [vmem:[%s16214_s16 + $0xf28] sm:$0xff]  ;;  %v8141_v60 = vld [vmem:[%s16214_s16 + $0xb10] sm:$0xff] }
 0x64f   : > { %11349 = vmatprep.subr.bf16.mxu0 %v14629_v20  ;;  %v8145_v20 = vld [vmem:[%s16214_s16 + $0xb30] sm:$0xff]  ;;  %v14827_v2 = vcombine.high %v8268_v43, %v8272_v44  ;;  %v14826_v28 = vcombine.low %v8268_v43, %v8272_v44  ;;  %v7842_v43 = vld [vmem:[%s16214_s16 + $0x1b8] sm:$0xff] }
 0x650   : > { %v14701_v49 = vcombine.high %v8141_v60, %v8145_v20  ;;  %v14700_v30 = vcombine.low %v8141_v60, %v8145_v20  ;;  %v7957_v20 = vld [vmem:[%s16214_s16 + $0x550] sm:$0xff] }
 0x651   : > { %11227 = vmatpush1.bf16.msra.mxu1 %v14754_v42  ;;  %v8260_v42 = vld [vmem:[%s16214_s16 + $0xec8] sm:$0xff] }
 0x652   : > { %11350 = vmatpush1.bf16.msra.mxu0 %v14628_v41  ;;  %11228 = vmatprep.subr.bf16.mxu1 %v14747_v14  ;;  %v8264_v41 = vld [vmem:[%s16214_s16 + $0xee8] sm:$0xff]  ;;  %v8133_v14 = vld [vmem:[%s16214_s16 + $0xad0] sm:$0xff] }
 0x653   : > { %11351 = vmatprep.subr.bf16.mxu0 %v14621_v48  ;;  %v8137_v48 = vld [vmem:[%s16214_s16 + $0xaf0] sm:$0xff]  ;;  %v14819_v53 = vcombine.high %v8260_v42, %v8264_v41  ;;  %v14818_v31 = vcombine.low %v8260_v42, %v8264_v41  ;;  %v7834_v42 = vld [vmem:[%s16214_s16 + $0x178] sm:$0xff] }
 0x654   : > { %v14693_v39 = vcombine.high %v8133_v14, %v8137_v48  ;;  %v14692_v7 = vcombine.low %v8133_v14, %v8137_v48 }
 0x655   : > { %11229 = vmatpush1.bf16.msra.mxu1 %v14746_v6  ;;  %v8252_v6 = vld [vmem:[%s16214_s16 + $0xe88] sm:$0xff] }
 0x656   : > { %11352 = vmatpush1.bf16.msra.mxu0 %v14620_v47  ;;  %11230 = vmatprep.subr.bf16.mxu1 %v14739_v24  ;;  %v8256_v47 = vld [vmem:[%s16214_s16 + $0xea8] sm:$0xff]  ;;  %v8125_v24 = vld [vmem:[%s16214_s16 + $0xa90] sm:$0xff] }
 0x657   : > { %11353 = vmatprep.subr.bf16.mxu0 %v14613_v45  ;;  %v8129_v45 = vld [vmem:[%s16214_s16 + $0xab0] sm:$0xff]  ;;  %v14811_v56 = vcombine.high %v8252_v6, %v8256_v47  ;;  %v14810_v17 = vcombine.low %v8252_v6, %v8256_v47  ;;  %v7822_v47 = vld [vmem:[%s16214_s16 + $0x118] sm:$0xff] }
 0x658   : > { %v14685_v22 = vcombine.high %v8125_v24, %v8129_v45  ;;  %v14684_v33 = vcombine.low %v8125_v24, %v8129_v45  ;;  %v7826_v24 = vld [vmem:[%s16214_s16 + $0x138] sm:$0xff] }
 0x659   : > { %11231 = vmatpush1.bf16.msra.mxu1 %v14738_v58  ;;  %v8244_v58 = vld [vmem:[%s16214_s16 + $0xe48] sm:$0xff] }
 0x65a   : > { %11354 = vmatpush1.bf16.msra.mxu0 %v14612_v59  ;;  %11232 = vmatprep.subr.bf16.mxu1 %v14731_v38  ;;  %v8248_v59 = vld [vmem:[%s16214_s16 + $0xe68] sm:$0xff]  ;;  %v8117_v38 = vld [vmem:[%s16214_s16 + $0xa50] sm:$0xff] }
 0x65b   : > { %11355 = vmatprep.subr.bf16.mxu0 %v14605_v21  ;;  %v8121_v21 = vld [vmem:[%s16214_s16 + $0xa70] sm:$0xff]  ;;  %v14803_v54 = vcombine.high %v8244_v58, %v8248_v59  ;;  %v14802_v3 = vcombine.low %v8244_v58, %v8248_v59  ;;  %v7814_v59 = vld [vmem:[%s16214_s16 + $0xd8] sm:$0xff] }
 0x65c   : > { %v14677_v61 = vcombine.high %v8117_v38, %v8121_v21  ;;  %v14676_v40 = vcombine.low %v8117_v38, %v8121_v21  ;;  %v7945_v58 = vld [vmem:[%s16214_s16 + $0x4f0] sm:$0xff]  ;;  %v7818_v38 = vld [vmem:[%s16214_s16 + $0xf8] sm:$0xff] }
 0x65d   : > { %11233 = vmatpush1.bf16.msra.mxu1 %v14730_v19  ;;  %v8236_v19 = vld [vmem:[%s16214_s16 + $0xe08] sm:$0xff] }
 0x65e   : > { %11356 = vmatpush1.bf16.msra.mxu0 %v14604_v1  ;;  %11234 = vmatprep.subr.bf16.mxu1 %v14851_v35  ;;  %v8240_v1 = vld [vmem:[%s16214_s16 + $0xe28] sm:$0xff]  ;;  %v8109_v35 = vld [vmem:[%s16214_s16 + $0xa10] sm:$0xff] }
 0x65f   : > { %11357 = vmatprep.subr.bf16.mxu0 %v14725_v16  ;;  %v8113_v16 = vld [vmem:[%s16214_s16 + $0xa30] sm:$0xff]  ;;  %v14795_v26 = vcombine.high %v8236_v19, %v8240_v1  ;;  %v14794_v50 = vcombine.low %v8236_v19, %v8240_v1  ;;  %v7806_v1 = vld [vmem:[%s16214_s16 + $0x98] sm:$0xff] }
 0x660   : > { %v14669_v11 = vcombine.high %v8109_v35, %v8113_v16  ;;  %v14668_v32 = vcombine.low %v8109_v35, %v8113_v16  ;;  %v7937_v19 = vld [vmem:[%s16214_s16 + $0x4b0] sm:$0xff]  ;;  %v7810_v35 = vld [vmem:[%s16214_s16 + $0xb8] sm:$0xff] }
 0x661   : > { %11235 = vmatpush2.bf16.msra.mxu1 %v14850_v52  ;;  %v7973_v52 = vld [vmem:[%s16214_s16 + $0x5d0] sm:$0xff] }
 0x662   : > { %11358 = vmatpush2.bf16.msra.mxu0 %v14724_v25  ;;  %11236 = vmatprep.subr.bf16.mxu1 %v14843_v29  ;;  %v7977_v25 = vld [vmem:[%s16214_s16 + $0x5f0] sm:$0xff]  ;;  %v7846_v29 = vld [vmem:[%s16214_s16 + $0x1d8] sm:$0xff] }
 0x663   : > { %11359 = vmatprep.subr.bf16.mxu0 %v14717_v57  ;;  %v7850_v57 = vld [vmem:[%s16214_s16 + $0x1f8] sm:$0xff]  ;;  %v14533_v63 = vcombine.high %v7973_v52, %v7977_v25 }
 0x664   : > { %v14407_v10 = vcombine.high %v7846_v29, %v7850_v57  ;;  %v14406_v44 = vcombine.low %v7846_v29, %v7850_v57  ;;  %v7802_v29 = vld [vmem:[%s16214_s16 + $0x78] sm:$0xff] }
 0x665   : > { %11237 = vmatpush2.bf16.msra.mxu1 %v14842_v4  ;;  %v7965_v4 = vld [vmem:[%s16214_s16 + $0x590] sm:$0xff] }
 0x666   : > { %11360 = vmatpush2.bf16.msra.mxu0 %v14716_v5  ;;  %11238 = vmatprep.subr.bf16.mxu1 %v14835_v37  ;;  %v7969_v5 = vld [vmem:[%s16214_s16 + $0x5b0] sm:$0xff]  ;;  %v14532_v37 = vcombine.low %v7973_v52, %v7977_v25  ;;  %v7798_v25 = vld [vmem:[%s16214_s16 + $0x58] sm:$0xff] }
 0x667   : > { %11361 = vmatprep.subr.bf16.mxu0 %v14709_v13  ;;  %v7838_v13 = vld [vmem:[%s16214_s16 + $0x198] sm:$0xff]  ;;  %v14525_v60 = vcombine.high %v7965_v4, %v7969_v5  ;;  %v14524_v41 = vcombine.low %v7965_v4, %v7969_v5  ;;  %v7929_v52 = vld [vmem:[%s16214_s16 + $0x470] sm:$0xff] }
 0x668   : > { %v14398_v48 = vcombine.low %v7838_v13, %v7842_v43  ;;  %v7921_v4 = vld [vmem:[%s16214_s16 + $0x430] sm:$0xff]  ;;  %v7790_v5 = vld [vmem:[%s16214_s16 + $0x18] sm:$0xff] }
 0x669   : > { %11239 = vmatpush2.bf16.msra.mxu1 %v14834_v55  ;;  %v7961_v55 = vld [vmem:[%s16214_s16 + $0x570] sm:$0xff] }
 0x66a   : > { %11362 = vmatpush2.bf16.msra.mxu0 %v14708_v18  ;;  %11240 = vmatprep.subr.bf16.mxu1 %v14827_v2  ;;  %v14399_v2 = vcombine.high %v7838_v13, %v7842_v43  ;;  %v14516_v45 = vcombine.low %v7957_v20, %v7961_v55  ;;  %v14358_v43 = vcombine.low %v7798_v25, %v7802_v29 }
 0x66b   : > { %11363 = vmatprep.subr.bf16.mxu0 %v14701_v49  ;;  %v7830_v49 = vld [vmem:[%s16214_s16 + $0x158] sm:$0xff] }
 0x66d   : > { %11241 = vmatpush2.bf16.msra.mxu1 %v14826_v28  ;;  %v14517_v28 = vcombine.high %v7957_v20, %v7961_v55  ;;  %v8037_v20 = vld [vmem:[%s16214_s16 + $0x7d0] sm:$0xff] }
 0x66e   : > { %11364 = vmatpush2.bf16.msra.mxu0 %v14700_v30  ;;  %11242 = vmatprep.subr.bf16.mxu1 %v14819_v53  ;;  %v14391_v30 = vcombine.high %v7830_v49, %v7834_v42  ;;  %v7949_v53 = vld [vmem:[%s16214_s16 + $0x510] sm:$0xff] }
 0x66f   : > { %11365 = vmatprep.subr.bf16.mxu0 %v14693_v39  ;;  %v7953_v39 = vld [vmem:[%s16214_s16 + $0x530] sm:$0xff] }
 0x670   : > { %v14508_v21 = vcombine.low %v7949_v53, %v7953_v39  ;;  %v8041_v55 = vld [vmem:[%s16214_s16 + $0x7f0] sm:$0xff] }
 0x671   : > { %11243 = vmatpush2.bf16.msra.mxu1 %v14818_v31 }
 0x672   : > { %11366 = vmatpush2.bf16.msra.mxu0 %v14692_v7  ;;  %11244 = vmatprep.subr.bf16.mxu1 %v14811_v56  ;;  %v14390_v7 = vcombine.low %v7830_v49, %v7834_v42  ;;  %v14383_v56 = vcombine.high %v7822_v47, %v7826_v24  ;;  %v7914_v49 = vld [vmem:[%s16214_s16 + $0x3f8] sm:$0xff] }
 0x673   : > { %11367 = vmatprep.subr.bf16.mxu0 %v14685_v22  ;;  %v7941_v22 = vld [vmem:[%s16214_s16 + $0x4d0] sm:$0xff] }
 0x674   : > { %v14500_v16 = vcombine.low %v7941_v22, %v7945_v58 }
 0x675   : > { %11245 = vmatpush2.bf16.msra.mxu1 %v14810_v17  ;;  %v14382_v17 = vcombine.low %v7822_v47, %v7826_v24  ;;  %v14596_v47 = vcombine.low %v8037_v20, %v8041_v55 }
 0x676   : > { %11368 = vmatpush2.bf16.msra.mxu0 %v14684_v33  ;;  %11246 = vmatprep.subr.bf16.mxu1 %v14803_v54  ;;  %v14501_v33 = vcombine.high %v7941_v22, %v7945_v58  ;;  %v14375_v54 = vcombine.high %v7814_v59, %v7818_v38  ;;  %v7898_v22 = vld [vmem:[%s16214_s16 + $0x378] sm:$0xff] }
 0x677   : > { %11369 = vmatprep.subr.bf16.mxu0 %v14677_v61  ;;  %v7933_v61 = vld [vmem:[%s16214_s16 + $0x490] sm:$0xff] }
 0x678   : > { %v14492_v57 = vcombine.low %v7933_v61, %v7937_v19 }
 0x679   : > { %11247 = vmatpush2.bf16.msra.mxu1 %v14802_v3  ;;  %v14374_v3 = vcombine.low %v7814_v59, %v7818_v38 }
 0x67a   : > { %11370 = vmatpush2.bf16.msra.mxu0 %v14676_v40  ;;  %11248 = vmatprep.subr.bf16.mxu1 %v14795_v26  ;;  %v14493_v40 = vcombine.high %v7933_v61, %v7937_v19  ;;  %v14367_v26 = vcombine.high %v7806_v1, %v7810_v35  ;;  %v7890_v61 = vld [vmem:[%s16214_s16 + $0x338] sm:$0xff] }
 0x67b   : > { %11371 = vmatprep.subr.bf16.mxu0 %v14669_v11  ;;  %v7925_v11 = vld [vmem:[%s16214_s16 + $0x450] sm:$0xff] }
 0x67c   : > { %v14484_v13 = vcombine.low %v7925_v11, %v7929_v52 }
 0x67d   : > { %11249 = vmatpush2.bf16.msra.mxu1 %v14794_v50  ;;  %v14366_v50 = vcombine.low %v7806_v1, %v7810_v35 }
 0x67e   : > { %11372 = vmatpush2.bf16.msra.mxu0 %v14668_v32  ;;  %11300 = vmatprep.subr.bf16.mxu1 %v14533_v63  ;;  %v14485_v32 = vcombine.high %v7925_v11, %v7929_v52  ;;  %v14359_v63 = vcombine.high %v7798_v25, %v7802_v29  ;;  %v7882_v11 = vld [vmem:[%s16214_s16 + $0x2f8] sm:$0xff] }
 0x67f   : > { %11423 = vmatprep.subr.bf16.mxu0 %v14407_v10  ;;  %v7917_v10 = vld [vmem:[%s16214_s16 + $0x410] sm:$0xff] }
 0x680   : > { %v17934_v18 = vpop.f32.mrf.mxu0  ;;  %11251 = vmatmul.mubr.bf16.vlgmr.msra.gmra.mxu1 %v17773_v27  ;;  %v14476_v42 = vcombine.low %v7917_v10, %v7921_v4 }
 0x681   : > { %11374 = vmatmul.mubr.bf16.vlgmr.msra.gmra.mxu0 %v17642_v36  ;;  %11301 = vmatpush1.bf16.msra.mxu1 %v14532_v37  ;;  %v7794_v37 = vld [vmem:[%s16214_s16 + $0x38] sm:$0xff] }
 0x682   : > { %11332 = vmatprep.mubr.bf16.mxu1 %v17538_v15  ;;  %11424 = vmatpush1.bf16.msra.mxu0 %v14406_v44  ;;  %v17941_v14 = vpop.f32.mrf.mxu0  ;;  %v14477_v44 = vcombine.high %v7917_v10, %v7921_v4  ;;  %v7874_v10 = vld [vmem:[%s16214_s16 + $0x2b8] sm:$0xff] }
 0x683   : > { %11455 = vmatprep.mubr.bf16.mxu0 %v17450_v23  ;;  %11302 = vmatprep.subr.bf16.mxu1 %v14525_v60  ;;  %v14509_v23 = vcombine.high %v7949_v53, %v7953_v39  ;;  %v14351_v60 = vcombine.high %v7790_v5, %v7794_v37  ;;  %v8033_v53 = vld [vmem:[%s16214_s16 + $0x7b0] sm:$0xff]  ;;  %v7902_v39 = vld [vmem:[%s16214_s16 + $0x398] sm:$0xff] }
 0x684   : > { %v11133_v6 = vpop.f32.mrf.mxu0  ;;  %11425 = vmatprep.subr.bf16.mxu0 %v14399_v2  ;;  %v7910_v2 = vld [vmem:[%s16214_s16 + $0x3d8] sm:$0xff] }
 0x685   : > { %11303 = vmatpush1.bf16.msra.mxu1 %v14524_v41  ;;  %v14350_v41 = vcombine.low %v7790_v5, %v7794_v37  ;;  %v7906_v6 = vld [vmem:[%s16214_s16 + $0x3b8] sm:$0xff]  ;;  %v14470_v24 = vcombine.low %v7910_v2, %v7914_v49 }
 0x686   : > { %11426 = vmatpush1.bf16.msra.mxu0 %v14398_v48  ;;  %v11134_v31 = vpop.f32.mrf.mxu0  ;;  %11304 = vmatprep.subr.bf16.mxu1 %v14517_v28  ;;  %v14597_v48 = vcombine.high %v8037_v20, %v8041_v55  ;;  %v14471_v28 = vcombine.high %v7910_v2, %v7914_v49  ;;  %v14462_v59 = vcombine.low %v7902_v39, %v7906_v6  ;;  %v7866_v20 = vld [vmem:[%s16214_s16 + $0x278] sm:$0xff] }
 0x687   : > { %11427 = vmatprep.subr.bf16.mxu0 %v14391_v30  ;;  %v8029_v30 = vld [vmem:[%s16214_s16 + $0x790] sm:$0xff]  ;;  %v14463_v31 = vcombine.high %v7902_v39, %v7906_v6 }
 0x688   : > { %v14588_v58 = vcombine.low %v8029_v30, %v8033_v53 }
 0x689   : > { %11305 = vmatpush1.bf16.msra.mxu1 %v14516_v45  ;;  %v14589_v45 = vcombine.high %v8029_v30, %v8033_v53  ;;  %v7858_v30 = vld [vmem:[%s16214_s16 + $0x238] sm:$0xff] }
 0x68a   : > { %11428 = vmatpush1.bf16.msra.mxu0 %v14390_v7  ;;  %11306 = vmatprep.subr.bf16.mxu1 %v14509_v23  ;;  %v8021_v7 = vld [vmem:[%s16214_s16 + $0x750] sm:$0xff] }
 0x68b   : > { %11429 = vmatprep.subr.bf16.mxu0 %v14383_v56  ;;  %v8025_v23 = vld [vmem:[%s16214_s16 + $0x770] sm:$0xff]  ;;  %v7894_v56 = vld [vmem:[%s16214_s16 + $0x358] sm:$0xff] }
 0x68c   : > { %v14581_v38 = vcombine.high %v8021_v7, %v8025_v23  ;;  %v14580_v19 = vcombine.low %v8021_v7, %v8025_v23  ;;  %v14454_v1 = vcombine.low %v7894_v56, %v7898_v22  ;;  %v8106_v7 = vld [vmem:[%s16214_s16 + $0x9f8] sm:$0xff] }
 0x68d   : > { %11307 = vmatpush1.bf16.msra.mxu1 %v14508_v21  ;;  %v14455_v21 = vcombine.high %v7894_v56, %v7898_v22 }
 0x68e   : > { %11430 = vmatpush1.bf16.msra.mxu0 %v14382_v17  ;;  %11308 = vmatprep.subr.bf16.mxu1 %v14501_v33  ;;  %v8013_v17 = vld [vmem:[%s16214_s16 + $0x710] sm:$0xff] }
 0x68f   : > { %11431 = vmatprep.subr.bf16.mxu0 %v14375_v54  ;;  %v8017_v33 = vld [vmem:[%s16214_s16 + $0x730] sm:$0xff]  ;;  %v7886_v54 = vld [vmem:[%s16214_s16 + $0x318] sm:$0xff] }
 0x690   : > { %v14573_v35 = vcombine.high %v8013_v17, %v8017_v33  ;;  %v14572_v52 = vcombine.low %v8013_v17, %v8017_v33  ;;  %v14446_v25 = vcombine.low %v7886_v54, %v7890_v61  ;;  %v8094_v17 = vld [vmem:[%s16214_s16 + $0x998] sm:$0xff] }
 0x691   : > { %11309 = vmatpush1.bf16.msra.mxu1 %v14500_v16  ;;  %v14447_v16 = vcombine.high %v7886_v54, %v7890_v61  ;;  %v8098_v33 = vld [vmem:[%s16214_s16 + $0x9b8] sm:$0xff] }
 0x692   : > { %11432 = vmatpush1.bf16.msra.mxu0 %v14374_v3  ;;  %11310 = vmatprep.subr.bf16.mxu1 %v14493_v40  ;;  %v8005_v3 = vld [vmem:[%s16214_s16 + $0x6d0] sm:$0xff] }
 0x693   : > { %11433 = vmatprep.subr.bf16.mxu0 %v14367_v26  ;;  %v8009_v40 = vld [vmem:[%s16214_s16 + $0x6f0] sm:$0xff]  ;;  %v7878_v26 = vld [vmem:[%s16214_s16 + $0x2d8] sm:$0xff] }
 0x694   : > { %v14565_v29 = vcombine.high %v8005_v3, %v8009_v40  ;;  %v14564_v4 = vcombine.low %v8005_v3, %v8009_v40  ;;  %v14438_v5 = vcombine.low %v7878_v26, %v7882_v11  ;;  %v14655_v3 = vcombine.high %v8094_v17, %v8098_v33  ;;  %v8086_v40 = vld [vmem:[%s16214_s16 + $0x958] sm:$0xff] }
 0x695   : > { %11311 = vmatpush1.bf16.msra.mxu1 %v14492_v57  ;;  %v14439_v57 = vcombine.high %v7878_v26, %v7882_v11  ;;  %v8090_v26 = vld [vmem:[%s16214_s16 + $0x978] sm:$0xff] }
 0x696   : > { %11434 = vmatpush1.bf16.msra.mxu0 %v14366_v50  ;;  %11312 = vmatprep.subr.bf16.mxu1 %v14485_v32  ;;  %v7997_v50 = vld [vmem:[%s16214_s16 + $0x690] sm:$0xff] }
 0x697   : > { %11435 = vmatprep.subr.bf16.mxu0 %v14359_v63  ;;  %v8001_v32 = vld [vmem:[%s16214_s16 + $0x6b0] sm:$0xff]  ;;  %v7870_v63 = vld [vmem:[%s16214_s16 + $0x298] sm:$0xff] }
 0x698   : > { %v14557_v37 = vcombine.high %v7997_v50, %v8001_v32  ;;  %v14556_v55 = vcombine.low %v7997_v50, %v8001_v32  ;;  %v14430_v2 = vcombine.low %v7870_v63, %v7874_v10  ;;  %v8205_v32 = vld [vmem:[%s16214_s16 + $0xd10] sm:$0xff] }
 0x699   : > { %11313 = vmatpush1.bf16.msra.mxu1 %v14484_v13  ;;  %v14431_v13 = vcombine.high %v7870_v63, %v7874_v10 }
 0x69a   : > { %11436 = vmatpush1.bf16.msra.mxu0 %v14358_v43  ;;  %11314 = vmatprep.subr.bf16.mxu1 %v14477_v44  ;;  %v7989_v43 = vld [vmem:[%s16214_s16 + $0x650] sm:$0xff] }
 0x69b   : > { %11437 = vmatprep.subr.bf16.mxu0 %v14351_v60  ;;  %v7993_v44 = vld [vmem:[%s16214_s16 + $0x670] sm:$0xff]  ;;  %v7862_v60 = vld [vmem:[%s16214_s16 + $0x258] sm:$0xff] }
 0x69c   : > { %v14549_v49 = vcombine.high %v7989_v43, %v7993_v44  ;;  %v14548_v53 = vcombine.low %v7989_v43, %v7993_v44  ;;  %v14422_v39 = vcombine.low %v7862_v60, %v7866_v20 }
 0x69d   : > { %11315 = vmatpush1.bf16.msra.mxu1 %v14476_v42  ;;  %v14423_v42 = vcombine.high %v7862_v60, %v7866_v20  ;;  %v8197_v20 = vld [vmem:[%s16214_s16 + $0xcd0] sm:$0xff] }
 0x69e   : > { %11438 = vmatpush1.bf16.msra.mxu0 %v14350_v41  ;;  %11316 = vmatprep.subr.bf16.mxu1 %v14597_v48  ;;  %v7981_v41 = vld [vmem:[%s16214_s16 + $0x610] sm:$0xff] }
 0x69f   : > { %11439 = vmatprep.subr.bf16.mxu0 %v14471_v28  ;;  %v7985_v48 = vld [vmem:[%s16214_s16 + $0x630] sm:$0xff]  ;;  %v7854_v28 = vld [vmem:[%s16214_s16 + $0x218] sm:$0xff] }
 0x6a0   : > { %v14541_v6 = vcombine.high %v7981_v41, %v7985_v48  ;;  %v14540_v23 = vcombine.low %v7981_v41, %v7985_v48  ;;  %v14414_v56 = vcombine.low %v7854_v28, %v7858_v30 }
 0x6a1   : > { %11317 = vmatpush2.bf16.msra.mxu1 %v14596_v47  ;;  %v14415_v47 = vcombine.high %v7854_v28, %v7858_v30  ;;  %v8189_v30 = vld [vmem:[%s16214_s16 + $0xc90] sm:$0xff] }
 0x6a2   : > { %11440 = vmatpush2.bf16.msra.mxu0 %v14470_v24  ;;  %11318 = vmatprep.subr.bf16.mxu1 %v14589_v45  ;;  %v8229_v24 = vld [vmem:[%s16214_s16 + $0xdd0] sm:$0xff] }
 0x6a3   : > { %11441 = vmatprep.subr.bf16.mxu0 %v14463_v31  ;;  %v8233_v45 = vld [vmem:[%s16214_s16 + $0xdf0] sm:$0xff]  ;;  %v8102_v31 = vld [vmem:[%s16214_s16 + $0x9d8] sm:$0xff] }
 0x6a4   : > { %v14789_v22 = vcombine.high %v8229_v24, %v8233_v45  ;;  %v14662_v54 = vcombine.low %v8102_v31, %v8106_v7 }
 0x6a5   : > { %11319 = vmatpush2.bf16.msra.mxu1 %v14588_v58  ;;  %v14663_v58 = vcombine.high %v8102_v31, %v8106_v7  ;;  %v8181_v7 = vld [vmem:[%s16214_s16 + $0xc50] sm:$0xff] }
 0x6a6   : > { %11442 = vmatpush2.bf16.msra.mxu0 %v14462_v59  ;;  %11320 = vmatprep.subr.bf16.mxu1 %v14581_v38  ;;  %v8221_v59 = vld [vmem:[%s16214_s16 + $0xd90] sm:$0xff] }
 0x6a7   : > { %11443 = vmatprep.subr.bf16.mxu0 %v14455_v21  ;;  %v8225_v38 = vld [vmem:[%s16214_s16 + $0xdb0] sm:$0xff]  ;;  %v14788_v21 = vcombine.low %v8229_v24, %v8233_v45 }
 0x6a8   : > { %v14781_v61 = vcombine.high %v8221_v59, %v8225_v38 }
 0x6a9   : > { %11321 = vmatpush2.bf16.msra.mxu1 %v14580_v19  ;;  %v8213_v19 = vld [vmem:[%s16214_s16 + $0xd50] sm:$0xff] }
 0x6aa   : > { %11444 = vmatpush2.bf16.msra.mxu0 %v14454_v1  ;;  %11322 = vmatprep.subr.bf16.mxu1 %v14573_v35  ;;  %v8217_v1 = vld [vmem:[%s16214_s16 + $0xd70] sm:$0xff] }
 0x6ab   : > { %11445 = vmatprep.subr.bf16.mxu0 %v14447_v16  ;;  %v14773_v50 = vcombine.high %v8213_v19, %v8217_v1 }
 0x6ad   : > { %11323 = vmatpush2.bf16.msra.mxu1 %v14572_v52  ;;  %v14780_v52 = vcombine.low %v8221_v59, %v8225_v38 }
 0x6ae   : > { %11446 = vmatpush2.bf16.msra.mxu0 %v14446_v25  ;;  %11324 = vmatprep.subr.bf16.mxu1 %v14565_v29 }
 0x6af   : > { %11447 = vmatprep.subr.bf16.mxu0 %v14439_v57  ;;  %v14654_v57 = vcombine.low %v8094_v17, %v8098_v33  ;;  %v8173_v17 = vld [vmem:[%s16214_s16 + $0xc10] sm:$0xff] }
 0x6b0   : > { %v8177_v33 = vld [vmem:[%s16214_s16 + $0xc30] sm:$0xff] }
 0x6b1   : > { %11325 = vmatpush2.bf16.msra.mxu1 %v14564_v4  ;;  %v8078_v4 = vld [vmem:[%s16214_s16 + $0x918] sm:$0xff] }
 0x6b2   : > { %11448 = vmatpush2.bf16.msra.mxu0 %v14438_v5  ;;  %11326 = vmatprep.subr.bf16.mxu1 %v14557_v37  ;;  %v8082_v5 = vld [vmem:[%s16214_s16 + $0x938] sm:$0xff]  ;;  %v14772_v37 = vcombine.low %v8213_v19, %v8217_v1 }
 0x6b3   : > { %11449 = vmatprep.subr.bf16.mxu0 %v14431_v13  ;;  %v14639_v60 = vcombine.high %v8078_v4, %v8082_v5  ;;  %v14638_v41 = vcombine.low %v8078_v4, %v8082_v5  ;;  %v8158_v4 = vld [vmem:[%s16214_s16 + $0xb98] sm:$0xff] }
 0x6b4   : > { %v8162_v5 = vld [vmem:[%s16214_s16 + $0xbb8] sm:$0xff] }
 0x6b5   : > { %11327 = vmatpush2.bf16.msra.mxu1 %v14556_v55  ;;  %v8201_v55 = vld [vmem:[%s16214_s16 + $0xcf0] sm:$0xff] }
 0x6b6   : > { %11450 = vmatpush2.bf16.msra.mxu0 %v14430_v2  ;;  %11328 = vmatprep.subr.bf16.mxu1 %v14549_v49  ;;  %v8070_v2 = vld [vmem:[%s16214_s16 + $0x8d8] sm:$0xff]  ;;  %v14757_v48 = vcombine.high %v8197_v20, %v8201_v55 }
 0x6b7   : > { %11451 = vmatprep.subr.bf16.mxu0 %v14423_v42  ;;  %v8074_v49 = vld [vmem:[%s16214_s16 + $0x8f8] sm:$0xff] }
 0x6b8   : > { %v14631_v28 = vcombine.high %v8070_v2, %v8074_v49  ;;  %v14630_v24 = vcombine.low %v8070_v2, %v8074_v49  ;;  %v14718_v49 = vcombine.low %v8158_v4, %v8162_v5 }
 0x6b9   : > { %11329 = vmatpush2.bf16.msra.mxu1 %v14548_v53  ;;  %v8193_v53 = vld [vmem:[%s16214_s16 + $0xcb0] sm:$0xff] }
 0x6ba   : > { %11452 = vmatpush2.bf16.msra.mxu0 %v14422_v39  ;;  %11330 = vmatprep.subr.bf16.mxu1 %v14541_v6  ;;  %v8062_v39 = vld [vmem:[%s16214_s16 + $0x898] sm:$0xff]  ;;  %v14749_v45 = vcombine.high %v8189_v30, %v8193_v53 }
 0x6bb   : > { %11453 = vmatprep.subr.bf16.mxu0 %v14415_v47  ;;  %v8066_v6 = vld [vmem:[%s16214_s16 + $0x8b8] sm:$0xff]  ;;  %v14756_v47 = vcombine.low %v8197_v20, %v8201_v55 }
 0x6bc   : > { %v14623_v31 = vcombine.high %v8062_v39, %v8066_v6  ;;  %v14622_v59 = vcombine.low %v8062_v39, %v8066_v6  ;;  %v8150_v20 = vld [vmem:[%s16214_s16 + $0xb58] sm:$0xff] }
 0x6bd   : > { %11331 = vmatpush2.bf16.msra.mxu1 %v14540_v23  ;;  %v8185_v23 = vld [vmem:[%s16214_s16 + $0xc70] sm:$0xff]  ;;  %v8154_v55 = vld [vmem:[%s16214_s16 + $0xb78] sm:$0xff] }
 0x6be   : > { %11454 = vmatpush2.bf16.msra.mxu0 %v14414_v56  ;;  %11382 = vmatprep.subr.bf16.mxu1 %v14789_v22  ;;  %v8054_v56 = vld [vmem:[%s16214_s16 + $0x858] sm:$0xff]  ;;  %v14741_v38 = vcombine.high %v8181_v7, %v8185_v23  ;;  %v14740_v19 = vcombine.low %v8181_v7, %v8185_v23  ;;  %v14710_v6 = vcombine.low %v8150_v20, %v8154_v55 }
 0x6bf   : > { %11505 = vmatprep.subr.bf16.mxu0 %v14663_v58  ;;  %v8058_v22 = vld [vmem:[%s16214_s16 + $0x878] sm:$0xff]  ;;  %v14748_v58 = vcombine.low %v8189_v30, %v8193_v53 }
 0x6c0   : > { %v18006_v35 = vpop.f32.mrf.mxu0  ;;  %11333 = vmatmul.mubr.bf16.vlgmr.msra.gmra.mxu1 %v17621_v51  ;;  %v11088_v16 = vpop.f32.mrf.mxu1  ;;  %v14614_v1 = vcombine.low %v8054_v56, %v8058_v22  ;;  %v8142_v30 = vld [vmem:[%s16214_s16 + $0xb18] sm:$0xff] }
 0x6c1   : > { %11456 = vmatmul.mubr.bf16.vlgmr.msra.gmra.mxu0 %v17533_v8  ;;  %v18013_v11 = vadd.f32 %v11088_v16, %v17866_v46  ;;  %11383 = vmatpush1.bf16.msra.mxu1 %v14788_v21  ;;  %v14647_v8 = vcombine.high %v8086_v40, %v8090_v26  ;;  %v8209_v46 = vld [vmem:[%s16214_s16 + $0xd30] sm:$0xff]  ;;  %v14615_v21 = vcombine.high %v8054_v56, %v8058_v22  ;;  %v8146_v53 = vld [vmem:[%s16214_s16 + $0xb38] sm:$0xff] }
 0x6c2   : > { %11414 = vmatprep.mubr.bf16.mxu1 %v17771_v34  ;;  %11506 = vmatpush1.bf16.msra.mxu0 %v14662_v54  ;;  %v18016_v25 = vpop.f32.mrf.mxu0  ;;  %v18018_v29 = vpop.f32.mrf.mxu1  ;;  %v14765_v44 = vcombine.high %v8205_v32, %v8209_v46  ;;  %v14764_v42 = vcombine.low %v8205_v32, %v8209_v46  ;;  %v8046_v54 = vld [vmem:[%s16214_s16 + $0x818] sm:$0xff]  ;;  %v14733_v16 = vcombine.high %v8173_v17, %v8177_v33 }
 0x6c3   : > { %11537 = vmatprep.mubr.bf16.mxu0 %v17636_v9  ;;  %11384 = vmatprep.subr.bf16.mxu1 %v14781_v61  ;;  %v14646_v9 = vcombine.low %v8086_v40, %v8090_v26  ;;  %v8050_v61 = vld [vmem:[%s16214_s16 + $0x838] sm:$0xff]  ;;  %v8293_v40 = vld [vmem:[%s16214_s16 + $0xfd0] sm:$0xff]  ;;  %v14702_v22 = vcombine.low %v8142_v30, %v8146_v53 }
 0x6c4   : > { %v11215_v63 = vpop.f32.mrf.mxu0  ;;  %11507 = vmatprep.subr.bf16.mxu0 %v14655_v3  ;;  %v11092_v10 = vpop.f32.mrf.mxu1  ;;  %v14607_v3 = vcombine.high %v8046_v54, %v8050_v61  ;;  %v8297_v26 = vld [vmem:[%s16214_s16 + $0xff0] sm:$0xff]  ;;  %v8134_v7 = vld [vmem:[%s16214_s16 + $0xad8] sm:$0xff] }
 0x6c5   : > { %11385 = vmatpush1.bf16.msra.mxu1 %v14780_v52  ;;  %v8166_v52 = vld [vmem:[%s16214_s16 + $0xbd8] sm:$0xff]  ;;  %v14853_v32 = vcombine.high %v8293_v40, %v8297_v26  ;;  %v8285_v63 = vld [vmem:[%s16214_s16 + $0xf90] sm:$0xff] }
 0x6c6   : > { %11508 = vmatpush1.bf16.msra.mxu0 %v14654_v57  ;;  %v11216_v13 = vpop.f32.mrf.mxu0  ;;  %v11093_v43 = vpop.f32.mrf.mxu1  ;;  %11386 = vmatprep.subr.bf16.mxu1 %v14773_v50  ;;  %v8170_v57 = vld [vmem:[%s16214_s16 + $0xbf8] sm:$0xff]  ;;  %v14732_v50 = vcombine.low %v8173_v17, %v8177_v33  ;;  %v8289_v10 = vld [vmem:[%s16214_s16 + $0xfb0] sm:$0xff] }
 0x6c7   : > { %11509 = vmatprep.subr.bf16.mxu0 %v14647_v8  ;;  %v14606_v8 = vcombine.low %v8046_v54, %v8050_v61  ;;  %v14727_v46 = vcombine.high %v8166_v52, %v8170_v57  ;;  %v14726_v13 = vcombine.low %v8166_v52, %v8170_v57  ;;  %v14845_v43 = vcombine.high %v8285_v63, %v8289_v10  ;;  %v8138_v23 = vld [vmem:[%s16214_s16 + $0xaf8] sm:$0xff] }
 0x6c8   : > { %v14844_v2 = vcombine.low %v8285_v63, %v8289_v10  ;;  %v8126_v17 = vld [vmem:[%s16214_s16 + $0xa98] sm:$0xff]  ;;  %v14694_v61 = vcombine.low %v8134_v7, %v8138_v23  ;;  %v11091_v52 = vadd.f32 %v18018_v29, %v17870_v12  ;;  %v8241_v63 = vld [vmem:[%s16214_s16 + $0xe30] sm:$0xff] }
 0x6c9   : > { %11387 = vmatpush1.bf16.msra.mxu1 %v14772_v37  ;;  %v14852_v37 = vcombine.low %v8293_v40, %v8297_v26  ;;  %v8130_v33 = vld [vmem:[%s16214_s16 + $0xab8] sm:$0xff] }
 0x6ca   : > { %11510 = vmatpush1.bf16.msra.mxu0 %v14646_v9  ;;  %11388 = vmatprep.subr.bf16.mxu1 %v14765_v44  ;;  %v14719_v9 = vcombine.high %v8158_v4, %v8162_v5  ;;  %v8277_v44 = vld [vmem:[%s16214_s16 + $0xf50] sm:$0xff]  ;;  %v8118_v40 = vld [vmem:[%s16214_s16 + $0xa58] sm:$0xff]  ;;  %15371 = vtanh.f32 %v11091_v52  ;;  %v11659_v52 = vld [vmem:[%s18081_s15 + $0x200] sm:$0xff] }
 0x6cb   : > { %11511 = vmatprep.subr.bf16.mxu0 %v14639_v60  ;;  %v8281_v60 = vld [vmem:[%s16214_s16 + $0xf70] sm:$0xff]  ;;  %v8122_v26 = vld [vmem:[%s16214_s16 + $0xa78] sm:$0xff]  ;;  %15373 = vtanh.f32 %v18013_v11 }
 0x6cc   : > { %v14836_v39 = vcombine.low %v8277_v44, %v8281_v60  ;;  %v8110_v10 = vld [vmem:[%s16214_s16 + $0xa18] sm:$0xff]  ;;  %v14678_v12 = vcombine.low %v8118_v40, %v8122_v26 }
 0x6cd   : > { %11389 = vmatpush1.bf16.msra.mxu1 %v14764_v42  ;;  %v14837_v42 = vcombine.high %v8277_v44, %v8281_v60  ;;  %v8114_v4 = vld [vmem:[%s16214_s16 + $0xa38] sm:$0xff] }
 0x6ce   : > { %11512 = vmatpush1.bf16.msra.mxu0 %v14638_v41  ;;  %11390 = vmatprep.subr.bf16.mxu1 %v14757_v48  ;;  %v14711_v41 = vcombine.high %v8150_v20, %v8154_v55  ;;  %v8269_v48 = vld [vmem:[%s16214_s16 + $0xf10] sm:$0xff]  ;;  %v14670_v44 = vcombine.low %v8110_v10, %v8114_v4  ;;  %v11701_v20 = vld [vmem:[%s18081_s15 + $0x350] sm:$0xff] }
 0x6cf   : > { %11513 = vmatprep.subr.bf16.mxu0 %v14631_v28  ;;  %v8273_v28 = vld [vmem:[%s16214_s16 + $0xf30] sm:$0xff]  ;;  %v11729_v11 = vld [vmem:[%s18081_s15 + $0x430] sm:$0xff] }
 0x6d0   : > { %v14828_v56 = vcombine.low %v8269_v48, %v8273_v28 }
 0x6d1   : > { %11391 = vmatpush1.bf16.msra.mxu1 %v14756_v47  ;;  %v14829_v47 = vcombine.high %v8269_v48, %v8273_v28  ;;  %v7962_v48 = vld [vmem:[%s16214_s16 + $0x578] sm:$0xff] }
 0x6d2   : > { %11514 = vmatpush1.bf16.msra.mxu0 %v14630_v24  ;;  %11392 = vmatprep.subr.bf16.mxu1 %v14749_v45  ;;  %v14703_v24 = vcombine.high %v8142_v30, %v8146_v53  ;;  %v8261_v45 = vld [vmem:[%s16214_s16 + $0xed0] sm:$0xff]  ;;  %v11694_v53 = vld [vmem:[%s18081_s15 + $0x318] sm:$0xff] }
 0x6d3   : > { %11515 = vmatprep.subr.bf16.mxu0 %v14623_v31  ;;  %v8265_v31 = vld [vmem:[%s16214_s16 + $0xef0] sm:$0xff] }
 0x6d4   : > { %v14820_v54 = vcombine.low %v8261_v45, %v8265_v31 }
 0x6d5   : > { %11393 = vmatpush1.bf16.msra.mxu1 %v14748_v58  ;;  %v14821_v58 = vcombine.high %v8261_v45, %v8265_v31 }
 0x6d6   : > { %11516 = vmatpush1.bf16.msra.mxu0 %v14622_v59  ;;  %11394 = vmatprep.subr.bf16.mxu1 %v14741_v38  ;;  %v14695_v59 = vcombine.high %v8134_v7, %v8138_v23  ;;  %v8253_v38 = vld [vmem:[%s16214_s16 + $0xe90] sm:$0xff]  ;;  %v11687_v7 = vld [vmem:[%s18081_s15 + $0x2e0] sm:$0xff] }
 0x6d7   : > { %11517 = vmatprep.subr.bf16.mxu0 %v14615_v21  ;;  %v8257_v21 = vld [vmem:[%s16214_s16 + $0xeb0] sm:$0xff] }
 0x6d8   : > { %v14812_v57 = vcombine.low %v8253_v38, %v8257_v21 }
 0x6d9   : > { %11395 = vmatpush1.bf16.msra.mxu1 %v14740_v19  ;;  %v14813_v19 = vcombine.high %v8253_v38, %v8257_v21  ;;  %v11679_v38 = vld [vmem:[%s18081_s15 + $0x2a0] sm:$0xff] }
 0x6da   : > { %11518 = vmatpush1.bf16.msra.mxu0 %v14614_v1  ;;  %11396 = vmatprep.subr.bf16.mxu1 %v14733_v16  ;;  %v14687_v1 = vcombine.high %v8126_v17, %v8130_v33  ;;  %v8245_v16 = vld [vmem:[%s16214_s16 + $0xe50] sm:$0xff] }
 0x6db   : > { %11519 = vmatprep.subr.bf16.mxu0 %v14607_v3  ;;  %v8249_v3 = vld [vmem:[%s16214_s16 + $0xe70] sm:$0xff] }
 0x6dc   : > { %v14804_v5 = vcombine.low %v8245_v16, %v8249_v3 }
 0x6dd   : > { %11397 = vmatpush1.bf16.msra.mxu1 %v14732_v50  ;;  %v14686_v50 = vcombine.low %v8126_v17, %v8130_v33 }
 0x6de   : > { %11520 = vmatpush1.bf16.msra.mxu0 %v14606_v8  ;;  %11398 = vmatprep.subr.bf16.mxu1 %v14853_v32  ;;  %v14805_v8 = vcombine.high %v8245_v16, %v8249_v3  ;;  %v14679_v32 = vcombine.high %v8118_v40, %v8122_v26  ;;  %v7946_v16 = vld [vmem:[%s16214_s16 + $0x4f8] sm:$0xff]  ;;  %v11666_v3 = vld [vmem:[%s18081_s15 + $0x238] sm:$0xff] }
 0x6df   : > { %11521 = vmatprep.subr.bf16.mxu0 %v14727_v46  ;;  %v8237_v46 = vld [vmem:[%s16214_s16 + $0xe10] sm:$0xff]  ;;  %v11665_v40 = vld [vmem:[%s18081_s15 + $0x230] sm:$0xff] }
 0x6e0   : > { %v14797_v29 = vcombine.high %v8237_v46, %v8241_v63 }
 0x6e1   : > { %11399 = vmatpush2.bf16.msra.mxu1 %v14852_v37  ;;  %v14671_v37 = vcombine.high %v8110_v10, %v8114_v4  ;;  %v11645_v4 = vld [vmem:[%s18081_s15 + $0x190] sm:$0xff] }
 0x6e2   : > { %11522 = vmatpush2.bf16.msra.mxu0 %v14726_v13  ;;  %11400 = vmatprep.subr.bf16.mxu1 %v14845_v43  ;;  %v7974_v13 = vld [vmem:[%s16214_s16 + $0x5d8] sm:$0xff] }
 0x6e3   : > { %11523 = vmatprep.subr.bf16.mxu0 %v14719_v9  ;;  %v7978_v43 = vld [vmem:[%s16214_s16 + $0x5f8] sm:$0xff]  ;;  %v14796_v9 = vcombine.low %v8237_v46, %v8241_v63  ;;  %v11652_v46 = vld [vmem:[%s18081_s15 + $0x1c8] sm:$0xff]  ;;  %v11651_v63 = vld [vmem:[%s18081_s15 + $0x1c0] sm:$0xff] }
 0x6e4   : > { %v14535_v60 = vcombine.high %v7974_v13, %v7978_v43  ;;  %v14534_v55 = vcombine.low %v7974_v13, %v7978_v43  ;;  %v11638_v13 = vld [vmem:[%s18081_s15 + $0x158] sm:$0xff]  ;;  %v11637_v43 = vld [vmem:[%s18081_s15 + $0x150] sm:$0xff] }
 0x6e5   : > { %11401 = vmatpush2.bf16.msra.mxu1 %v14844_v2  ;;  %v7966_v2 = vld [vmem:[%s16214_s16 + $0x598] sm:$0xff] }
 0x6e6   : > { %11524 = vmatpush2.bf16.msra.mxu0 %v14718_v49  ;;  %11402 = vmatprep.subr.bf16.mxu1 %v14837_v42  ;;  %v7970_v49 = vld [vmem:[%s16214_s16 + $0x5b8] sm:$0xff]  ;;  %v11700_v42 = vld [vmem:[%s18081_s15 + $0x348] sm:$0xff] }
 0x6e7   : > { %11525 = vmatprep.subr.bf16.mxu0 %v14711_v41  ;;  %v7958_v41 = vld [vmem:[%s16214_s16 + $0x558] sm:$0xff] }
 0x6e8   : > { %v14519_v23 = vcombine.high %v7958_v41, %v7962_v48  ;;  %v14518_v21 = vcombine.low %v7958_v41, %v7962_v48  ;;  %v11617_v48 = vld [vmem:[%s18081_s15 + $0xb0] sm:$0xff] }
 0x6e9   : > { %11403 = vmatpush2.bf16.msra.mxu1 %v14836_v39  ;;  %v14527_v39 = vcombine.high %v7966_v2, %v7970_v49 }
 0x6ea   : > { %11526 = vmatpush2.bf16.msra.mxu0 %v14710_v6  ;;  %11404 = vmatprep.subr.bf16.mxu1 %v14829_v47  ;;  %v11693_v6 = vld [vmem:[%s18081_s15 + $0x310] sm:$0xff]  ;;  %v14526_v47 = vcombine.low %v7966_v2, %v7970_v49  ;;  %v11624_v49 = vld [vmem:[%s18081_s15 + $0xe8] sm:$0xff] }
 0x6eb   : > { %11527 = vmatprep.subr.bf16.mxu0 %v14703_v24  ;;  %v18097_v24 = vpop.eup %15371  ;;  %v7922_v2 = vld [vmem:[%s16214_s16 + $0x438] sm:$0xff] }
 0x6ed   : > { %11405 = vmatpush2.bf16.msra.mxu1 %v14828_v56  ;;  %v7950_v56 = vld [vmem:[%s16214_s16 + $0x518] sm:$0xff] }
 0x6ee   : > { %11528 = vmatpush2.bf16.msra.mxu0 %v14702_v22  ;;  %11406 = vmatprep.subr.bf16.mxu1 %v14821_v58  ;;  %v7954_v22 = vld [vmem:[%s16214_s16 + $0x538] sm:$0xff] }
 0x6ef   : > { %11529 = vmatprep.subr.bf16.mxu0 %v14695_v59  ;;  %v11680_v59 = vld [vmem:[%s18081_s15 + $0x2a8] sm:$0xff]  ;;  %v14510_v26 = vcombine.low %v7950_v56, %v7954_v22 }
 0x6f1   : > { %11407 = vmatpush2.bf16.msra.mxu1 %v14820_v54  ;;  %v11673_v54 = vld [vmem:[%s18081_s15 + $0x270] sm:$0xff] }
 0x6f2   : > { %11530 = vmatpush2.bf16.msra.mxu0 %v14694_v61  ;;  %11408 = vmatprep.subr.bf16.mxu1 %v14813_v19  ;;  %v14511_v61 = vcombine.high %v7950_v56, %v7954_v22  ;;  %v11672_v19 = vld [vmem:[%s18081_s15 + $0x268] sm:$0xff]  ;;  %v11603_v56 = vld [vmem:[%s18081_s15 + $0x40] sm:$0xff] }
 0x6f3   : > { %11531 = vmatprep.subr.bf16.mxu0 %v14687_v1  ;;  %v7942_v1 = vld [vmem:[%s16214_s16 + $0x4d8] sm:$0xff] }
 0x6f4   : > { %v14502_v10 = vcombine.low %v7942_v1, %v7946_v16 }
 0x6f5   : > { %11409 = vmatpush2.bf16.msra.mxu1 %v14812_v57  ;;  %v14503_v57 = vcombine.high %v7942_v1, %v7946_v16  ;;  %v8026_v1 = vld [vmem:[%s16214_s16 + $0x778] sm:$0xff]  ;;  %v11806_v16 = vld [vmem:[%s18081_s15 + $0x698] sm:$0xff] }
 0x6f6   : > { %11532 = vmatpush2.bf16.msra.mxu0 %v14686_v50  ;;  %11410 = vmatprep.subr.bf16.mxu1 %v14805_v8  ;;  %v11658_v50 = vld [vmem:[%s18081_s15 + $0x1f8] sm:$0xff]  ;;  %v7934_v8 = vld [vmem:[%s16214_s16 + $0x498] sm:$0xff] }
 0x6f7   : > { %11533 = vmatprep.subr.bf16.mxu0 %v14679_v32  ;;  %v7938_v32 = vld [vmem:[%s16214_s16 + $0x4b8] sm:$0xff] }
 0x6f9   : > { %11411 = vmatpush2.bf16.msra.mxu1 %v14804_v5  ;;  %v14495_v5 = vcombine.high %v7934_v8, %v7938_v32 }
 0x6fa   : > { %11534 = vmatpush2.bf16.msra.mxu0 %v14678_v12  ;;  %11412 = vmatprep.subr.bf16.mxu1 %v14797_v29  ;;  %v11644_v12 = vld [vmem:[%s18081_s15 + $0x188] sm:$0xff]  ;;  %v7926_v29 = vld [vmem:[%s16214_s16 + $0x458] sm:$0xff] }
 0x6fb   : > { %11535 = vmatprep.subr.bf16.mxu0 %v14671_v37  ;;  %v7930_v37 = vld [vmem:[%s16214_s16 + $0x478] sm:$0xff] }
 0x6fc   : > { %v14486_v41 = vcombine.low %v7926_v29, %v7930_v37 }
 0x6fd   : > { %11413 = vmatpush2.bf16.msra.mxu1 %v14796_v9  ;;  %v14494_v9 = vcombine.low %v7934_v8, %v7938_v32  ;;  %v8018_v8 = vld [vmem:[%s16214_s16 + $0x738] sm:$0xff]  ;;  %v11792_v32 = vld [vmem:[%s18081_s15 + $0x628] sm:$0xff] }
 0x6fe   : > { %11536 = vmatpush2.bf16.msra.mxu0 %v14670_v44  ;;  %11464 = vmatprep.subr.bf16.mxu1 %v14535_v60  ;;  %v11631_v44 = vld [vmem:[%s18081_s15 + $0x120] sm:$0xff]  ;;  %v14487_v60 = vcombine.high %v7926_v29, %v7930_v37  ;;  %v8010_v29 = vld [vmem:[%s16214_s16 + $0x6f8] sm:$0xff]  ;;  %v11778_v37 = vld [vmem:[%s18081_s15 + $0x5b8] sm:$0xff] }
 0x6ff   : > { %12043 = vmatprep.subr.mxu0 %v11701_v20  ;;  %v11630_v20 = vld [vmem:[%s18081_s15 + $0x118] sm:$0xff] }
 0x700   : > { %v18089_v28 = vpop.f32.mrf.mxu1  ;;  %v18091_v30 = vpop.f32.mrf.mxu0  ;;  %11415 = vmatmul.mubr.bf16.vlgmr.msra.gmra.mxu1 %v17773_v27 }
 0x701   : > { %11538 = vmatmul.mubr.bf16.vlgmr.msra.gmra.mxu0 %v17642_v36  ;;  %11465 = vmatpush1.bf16.msra.mxu1 %v14534_v55  ;;  %v11686_v36 = vld [vmem:[%s18081_s15 + $0x2d8] sm:$0xff]  ;;  %v7918_v55 = vld [vmem:[%s16214_s16 + $0x418] sm:$0xff] }
 0x702   : > { %11496 = vmatprep.mubr.bf16.mxu1 %v17538_v15  ;;  %12044 = vmatpush1.msra.mxu0 %v11700_v42  ;;  %v18100_v45 = vpop.f32.mrf.mxu1  ;;  %v18102_v31 = vpop.f32.mrf.mxu0  ;;  %v11623_v42 = vld [vmem:[%s18081_s15 + $0xe0] sm:$0xff] }
 0x703   : > { %12107 = vmatprep.mubr.f32.mxu0 %v18097_v24  ;;  %12045 = vmatprep.subr.mxu0 %v11694_v53  ;;  %v14479_v53 = vcombine.high %v7918_v55, %v7922_v2 }
 0x704   : > { %12046 = vmatpush1.msra.mxu0 %v11693_v6  ;;  %v11174_v58 = vpop.f32.mrf.mxu1  ;;  %v11297_v15 = vpop.f32.mrf.mxu0  ;;  %11466 = vmatprep.subr.bf16.mxu1 %v14527_v39  ;;  %v11616_v39 = vld [vmem:[%s18081_s15 + $0xa8] sm:$0xff]  ;;  %v8038_v6 = vld [vmem:[%s16214_s16 + $0x7d8] sm:$0xff] }
 0x705   : > { %12047 = vmatprep.subr.mxu0 %v11687_v7  ;;  %11467 = vmatpush1.bf16.msra.mxu1 %v14526_v47  ;;  %v8042_v47 = vld [vmem:[%s16214_s16 + $0x7f8] sm:$0xff]  ;;  %v11610_v7 = vld [vmem:[%s18081_s15 + $0x78] sm:$0xff] }
 0x706   : > { %12048 = vmatpush1.msra.mxu0 %v11686_v36  ;;  %v11175_v17 = vpop.f32.mrf.mxu1  ;;  %v11298_v33 = vpop.f32.mrf.mxu0  ;;  %11468 = vmatprep.subr.bf16.mxu1 %v14519_v23  ;;  %v11609_v23 = vld [vmem:[%s18081_s15 + $0x70] sm:$0xff]  ;;  %v14478_v36 = vcombine.low %v7918_v55, %v7922_v2  ;;  %v14599_v22 = vcombine.high %v8038_v6, %v8042_v47  ;;  %v11602_v58 = vld [vmem:[%s18081_s15 + $0x38] sm:$0xff]  ;;  %v11764_v2 = vld [vmem:[%s18081_s15 + $0x548] sm:$0xff] }
 0x707   : > { %12049 = vmatprep.subr.mxu0 %v11680_v59  ;;  %v8030_v15 = vld [vmem:[%s16214_s16 + $0x798] sm:$0xff]  ;;  %v14598_v17 = vcombine.low %v8038_v6, %v8042_v47  ;;  %v11750_v47 = vld [vmem:[%s18081_s15 + $0x4d8] sm:$0xff] }
 0x708   : > { %12050 = vmatpush1.msra.mxu0 %v11679_v38  ;;  %v8034_v59 = vld [vmem:[%s16214_s16 + $0x7b8] sm:$0xff]  ;;  %v11596_v38 = vld [vmem:[%s18081_s15 + $0x8] sm:$0xff] }
 0x709   : > { %12051 = vmatprep.subr.mxu0 %v11673_v54  ;;  %11469 = vmatpush1.bf16.msra.mxu1 %v14518_v21  ;;  %v11595_v21 = vld [vmem:[%s18081_s15] sm:$0xff]  ;;  %v11813_v33 = vld [vmem:[%s18081_s15 + $0x6d0] sm:$0xff]  ;;  %v14591_v54 = vcombine.high %v8030_v15, %v8034_v59 }
 0x70a   : > { %12052 = vmatpush1.msra.mxu0 %v11672_v19  ;;  %11470 = vmatprep.subr.bf16.mxu1 %v14511_v61  ;;  %v11812_v61 = vld [vmem:[%s18081_s15 + $0x6c8] sm:$0xff]  ;;  %v8022_v19 = vld [vmem:[%s16214_s16 + $0x758] sm:$0xff] }
 0x70b   : > { %12053 = vmatprep.subr.mxu0 %v11666_v3  ;;  %v11805_v3 = vld [vmem:[%s18081_s15 + $0x690] sm:$0xff] }
 0x70c   : > { %12054 = vmatpush1.msra.mxu0 %v11665_v40  ;;  %v14590_v40 = vcombine.low %v8030_v15, %v8034_v59  ;;  %v8002_v55 = vld [vmem:[%s16214_s16 + $0x6b8] sm:$0xff]  ;;  %v11742_v59 = vld [vmem:[%s18081_s15 + $0x498] sm:$0xff] }
 0x70d   : > { %12055 = vmatprep.subr.mxu0 %v11659_v52  ;;  %11471 = vmatpush1.bf16.msra.mxu1 %v14510_v26  ;;  %v11799_v26 = vld [vmem:[%s18081_s15 + $0x660] sm:$0xff]  ;;  %v14583_v52 = vcombine.high %v8022_v19, %v8026_v1  ;;  %v7994_v6 = vld [vmem:[%s16214_s16 + $0x678] sm:$0xff] }
 0x70e   : > { %12056 = vmatpush1.msra.mxu0 %v11658_v50  ;;  %11472 = vmatprep.subr.bf16.mxu1 %v14503_v57  ;;  %v11798_v57 = vld [vmem:[%s18081_s15 + $0x658] sm:$0xff]  ;;  %v8014_v50 = vld [vmem:[%s16214_s16 + $0x718] sm:$0xff] }
 0x70f   : > { %12057 = vmatprep.subr.mxu0 %v11652_v46  ;;  %v11791_v46 = vld [vmem:[%s18081_s15 + $0x620] sm:$0xff] }
 0x710   : > { %12058 = vmatpush1.msra.mxu0 %v11651_v63  ;;  %v14582_v63 = vcombine.low %v8022_v19, %v8026_v1 }
 0x711   : > { %12059 = vmatprep.subr.mxu0 %v11645_v4  ;;  %11473 = vmatpush1.bf16.msra.mxu1 %v14502_v10  ;;  %v11785_v10 = vld [vmem:[%s18081_s15 + $0x5f0] sm:$0xff]  ;;  %v14575_v4 = vcombine.high %v8014_v50, %v8018_v8 }
 0x712   : > { %12060 = vmatpush1.msra.mxu0 %v11644_v12  ;;  %11474 = vmatprep.subr.bf16.mxu1 %v14495_v5  ;;  %v11784_v5 = vld [vmem:[%s18081_s15 + $0x5e8] sm:$0xff]  ;;  %v8006_v12 = vld [vmem:[%s16214_s16 + $0x6d8] sm:$0xff] }
 0x713   : > { %12061 = vmatprep.subr.mxu0 %v11638_v13  ;;  %v11777_v13 = vld [vmem:[%s18081_s15 + $0x5b0] sm:$0xff] }
 0x714   : > { %12062 = vmatpush1.msra.mxu0 %v11637_v43  ;;  %v14574_v43 = vcombine.low %v8014_v50, %v8018_v8  ;;  %v11715_v8 = vld [vmem:[%s18081_s15 + $0x3c0] sm:$0xff] }
 0x715   : > { %12063 = vmatprep.subr.mxu0 %v11631_v44  ;;  %11475 = vmatpush1.bf16.msra.mxu1 %v14494_v9  ;;  %v11771_v9 = vld [vmem:[%s18081_s15 + $0x580] sm:$0xff]  ;;  %v14567_v44 = vcombine.high %v8006_v12, %v8010_v29 }
 0x716   : > { %12064 = vmatpush1.msra.mxu0 %v11630_v20  ;;  %11476 = vmatprep.subr.bf16.mxu1 %v14487_v60  ;;  %v11770_v60 = vld [vmem:[%s18081_s15 + $0x578] sm:$0xff]  ;;  %v7998_v20 = vld [vmem:[%s16214_s16 + $0x698] sm:$0xff] }
 0x717   : > { %12065 = vmatprep.subr.mxu0 %v11624_v49  ;;  %v11763_v49 = vld [vmem:[%s18081_s15 + $0x540] sm:$0xff] }
 0x718   : > { %12066 = vmatpush1.msra.mxu0 %v11623_v42  ;;  %v14566_v42 = vcombine.low %v8006_v12, %v8010_v29  ;;  %v8222_v12 = vld [vmem:[%s16214_s16 + $0xd98] sm:$0xff] }
 0x719   : > { %12067 = vmatprep.subr.mxu0 %v11617_v48  ;;  %11477 = vmatpush1.bf16.msra.mxu1 %v14486_v41  ;;  %v11757_v41 = vld [vmem:[%s18081_s15 + $0x510] sm:$0xff]  ;;  %v14559_v48 = vcombine.high %v7998_v20, %v8002_v55 }
 0x71a   : > { %12068 = vmatpush1.msra.mxu0 %v11616_v39  ;;  %11478 = vmatprep.subr.bf16.mxu1 %v14479_v53  ;;  %v11756_v53 = vld [vmem:[%s18081_s15 + $0x508] sm:$0xff]  ;;  %v7990_v39 = vld [vmem:[%s16214_s16 + $0x658] sm:$0xff] }
 0x71b   : > { %12069 = vmatprep.subr.mxu0 %v11610_v7  ;;  %v15398_v7 = vld [vmem:[%s16228_s14 + $0x8] sm:$0x77]  ;;  %v8226_v29 = vld [vmem:[%s16214_s16 + $0xdb8] sm:$0xff] }
 0x71c   : > { %12070 = vmatpush1.msra.mxu0 %v11609_v23  ;;  %v8310_v23 = vrot.slane %v15398_v7, %v17828_v62  ;;  %v8314_v15 = vrot.slane %v15398_v7, %v17832_v0 }
 0x71d   : > { %12071 = vmatprep.subr.mxu0 %v11603_v56  ;;  %11479 = vmatpush1.bf16.msra.mxu1 %v14478_v36  ;;  %v11749_v36 = vld [vmem:[%s18081_s15 + $0x4d0] sm:$0xff]  ;;  %v14558_v56 = vcombine.low %v7998_v20, %v8002_v55 }
 0x71e   : > { %12072 = vmatpush1.msra.mxu0 %v11602_v58  ;;  %11480 = vmatprep.subr.bf16.mxu1 %v14599_v22  ;;  %v11743_v22 = vld [vmem:[%s18081_s15 + $0x4a0] sm:$0xff]  ;;  %v14551_v58 = vcombine.high %v7990_v39, %v7994_v6  ;;  %v8354_v1 = vrot.slane %v8314_v15, %v17828_v62 }
 0x71f   : > { %12073 = vmatprep.subr.mxu0 %v11596_v38  ;;  %v7982_v38 = vld [vmem:[%s16214_s16 + $0x618] sm:$0xff]  ;;  %v11675_v15 = vld [vmem:[%s18081_s15 + $0x280] sm:$0xff] }
 0x720   : > { %12074 = vmatpush1.msra.mxu0 %v11595_v21  ;;  %v7986_v21 = vld [vmem:[%s16214_s16 + $0x638] sm:$0xff] }
 0x721   : > { %12075 = vmatprep.subr.mxu0 %v11813_v33  ;;  %11481 = vmatpush2.bf16.msra.mxu1 %v14598_v17  ;;  %v11736_v17 = vld [vmem:[%s18081_s15 + $0x468] sm:$0xff]  ;;  %v8350_v33 = vrot.slane %v8310_v23, %v17828_v62  ;;  %v14543_v19 = vcombine.high %v7982_v38, %v7986_v21  ;;  %v14542_v50 = vcombine.low %v7982_v38, %v7986_v21  ;;  %v11682_v23 = vld [vmem:[%s18081_s15 + $0x2b8] sm:$0xff]  ;;  %v8198_v21 = vld [vmem:[%s16214_s16 + $0xcd8] sm:$0xff] }
 0x722   : > { %12076 = vmatpush2.msra.mxu0 %v11812_v61  ;;  %11482 = vmatprep.subr.bf16.mxu1 %v14591_v54  ;;  %v11735_v54 = vld [vmem:[%s18081_s15 + $0x460] sm:$0xff]  ;;  %v14550_v61 = vcombine.low %v7990_v39, %v7994_v6  ;;  %v8206_v6 = vld [vmem:[%s16214_s16 + $0xd18] sm:$0xff]  ;;  %v11674_v38 = vld [vmem:[%s18081_s15 + $0x278] sm:$0xff] }
 0x723   : > { %12077 = vmatprep.subr.mxu0 %v11806_v16  ;;  %v11728_v16 = vld [vmem:[%s18081_s15 + $0x428] sm:$0xff] }
 0x724   : > { %12078 = vmatpush2.msra.mxu0 %v11805_v3  ;;  %v8230_v3 = vld [vmem:[%s16214_s16 + $0xdd8] sm:$0xff] }
 0x725   : > { %12079 = vmatprep.subr.mxu0 %v11799_v26  ;;  %11483 = vmatpush2.bf16.msra.mxu1 %v14590_v40  ;;  %v8234_v40 = vld [vmem:[%s16214_s16 + $0xdf8] sm:$0xff]  ;;  %v11722_v26 = vld [vmem:[%s18081_s15 + $0x3f8] sm:$0xff] }
 0x726   : > { %12080 = vmatpush2.msra.mxu0 %v11798_v57  ;;  %11484 = vmatprep.subr.bf16.mxu1 %v14583_v52  ;;  %v11130_v52 = vadd.f32 %v17934_v18, %v8350_v33  ;;  %v11721_v57 = vld [vmem:[%s18081_s15 + $0x3f0] sm:$0xff]  ;;  %v11708_v18 = vld [vmem:[%s18081_s15 + $0x388] sm:$0xff] }
 0x727   : > { %12081 = vmatprep.subr.mxu0 %v11792_v32  ;;  %v14791_v32 = vcombine.high %v8230_v3, %v8234_v40  ;;  %v11668_v33 = vld [vmem:[%s18081_s15 + $0x248] sm:$0xff] }
 0x728   : > { %12082 = vmatpush2.msra.mxu0 %v11791_v46  ;;  %v11132_v46 = vadd.f32 %v17941_v14, %v8354_v1  ;;  %v11703_v14 = vld [vmem:[%s18081_s15 + $0x360] sm:$0xff]  ;;  %v11660_v1 = vld [vmem:[%s18081_s15 + $0x208] sm:$0xff] }
 0x729   : > { %12083 = vmatprep.subr.mxu0 %v11785_v10  ;;  %11485 = vmatpush2.bf16.msra.mxu1 %v14582_v63  ;;  %v11171_v63 = vadd.f32 %v18089_v28, %v11130_v52  ;;  %v11714_v10 = vld [vmem:[%s18081_s15 + $0x3b8] sm:$0xff] }
 0x72a   : > { %12084 = vmatpush2.msra.mxu0 %v11784_v5  ;;  %11486 = vmatprep.subr.bf16.mxu1 %v14575_v4  ;;  %v11173_v4 = vadd.f32 %v18100_v45, %v11132_v46  ;;  %v11707_v5 = vld [vmem:[%s18081_s15 + $0x380] sm:$0xff]  ;;  %v11646_v46 = vld [vmem:[%s18081_s15 + $0x198] sm:$0xff] }
 0x72b   : > { %12085 = vmatprep.subr.mxu0 %v11778_v37  ;;  %v14790_v37 = vcombine.low %v8230_v3, %v8234_v40  ;;  %v11212_v28 = vadd.f32 %v18006_v35, %v11171_v63  ;;  %v8194_v3 = vld [vmem:[%s16214_s16 + $0xcb8] sm:$0xff]  ;;  %v11654_v40 = vld [vmem:[%s18081_s15 + $0x1d8] sm:$0xff] }
 0x72c   : > { %12086 = vmatpush2.msra.mxu0 %v11777_v13  ;;  %v18207_v13 = vpop.eup %15373  ;;  %v11214_v35 = vadd.f32 %v18016_v25, %v11173_v4  ;;  %v11689_v25 = vld [vmem:[%s18081_s15 + $0x2f0] sm:$0xff] }
 0x72d   : > { %12087 = vmatprep.subr.mxu0 %v11771_v9  ;;  %11487 = vmatpush2.bf16.msra.mxu1 %v14574_v43  ;;  %v11702_v43 = vld [vmem:[%s18081_s15 + $0x358] sm:$0xff]  ;;  %v14783_v9 = vcombine.high %v8222_v12, %v8226_v29  ;;  %v8182_v63 = vld [vmem:[%s16214_s16 + $0xc58] sm:$0xff] }
 0x72e   : > { %12088 = vmatpush2.msra.mxu0 %v11770_v60  ;;  %11488 = vmatprep.subr.bf16.mxu1 %v14567_v44  ;;  %v8214_v44 = vld [vmem:[%s16214_s16 + $0xd58] sm:$0xff] }
 0x72f   : > { %12089 = vmatprep.subr.mxu0 %v11764_v2  ;;  %v8218_v60 = vld [vmem:[%s16214_s16 + $0xd78] sm:$0xff]  ;;  %v11696_v2 = vld [vmem:[%s18081_s15 + $0x328] sm:$0xff] }
 0x730   : > { %12090 = vmatpush2.msra.mxu0 %v11763_v49  ;;  %v11695_v49 = vld [vmem:[%s18081_s15 + $0x320] sm:$0xff] }
 0x731   : > { %12091 = vmatprep.subr.mxu0 %v11757_v41  ;;  %11489 = vmatpush2.bf16.msra.mxu1 %v14566_v42  ;;  %v14782_v42 = vcombine.low %v8222_v12, %v8226_v29  ;;  %v11639_v12 = vld [vmem:[%s18081_s15 + $0x160] sm:$0xff] }
 0x732   : > { %12092 = vmatpush2.msra.mxu0 %v11756_v53  ;;  %11490 = vmatprep.subr.bf16.mxu1 %v14559_v48  ;;  %v14775_v53 = vcombine.high %v8214_v44, %v8218_v60 }
 0x733   : > { %12093 = vmatprep.subr.mxu0 %v11750_v47  ;;  %v8210_v47 = vld [vmem:[%s16214_s16 + $0xd38] sm:$0xff] }
 0x734   : > { %12094 = vmatpush2.msra.mxu0 %v11749_v36 }
 0x735   : > { %12095 = vmatprep.subr.mxu0 %v11743_v22  ;;  %11491 = vmatpush2.bf16.msra.mxu1 %v14558_v56  ;;  %v11681_v56 = vld [vmem:[%s18081_s15 + $0x2b0] sm:$0xff]  ;;  %v14774_v22 = vcombine.low %v8214_v44, %v8218_v60  ;;  %v11626_v44 = vld [vmem:[%s18081_s15 + $0xf8] sm:$0xff] }
 0x736   : > { %12096 = vmatpush2.msra.mxu0 %v11742_v59  ;;  %11492 = vmatprep.subr.bf16.mxu1 %v14551_v58  ;;  %v14767_v59 = vcombine.high %v8206_v6, %v8210_v47  ;;  %v11625_v60 = vld [vmem:[%s18081_s15 + $0xf0] sm:$0xff] }
 0x737   : > { %12097 = vmatprep.subr.mxu0 %v11736_v17  ;;  %v8202_v17 = vld [vmem:[%s16214_s16 + $0xcf8] sm:$0xff] }
 0x738   : > { %12098 = vmatpush2.msra.mxu0 %v11735_v54  ;;  %v11667_v54 = vld [vmem:[%s18081_s15 + $0x240] sm:$0xff]  ;;  %v14758_v52 = vcombine.low %v8198_v21, %v8202_v17 }
 0x739   : > { %12099 = vmatprep.subr.mxu0 %v11729_v11  ;;  %11493 = vmatpush2.bf16.msra.mxu1 %v14550_v61  ;;  %v14766_v61 = vcombine.low %v8206_v6, %v8210_v47  ;;  %v11661_v11 = vld [vmem:[%s18081_s15 + $0x210] sm:$0xff]  ;;  %v11604_v6 = vld [vmem:[%s18081_s15 + $0x48] sm:$0xff] }
 0x73a   : > { %12100 = vmatpush2.msra.mxu0 %v11728_v16  ;;  %11494 = vmatprep.subr.bf16.mxu1 %v14543_v19  ;;  %v14759_v19 = vcombine.high %v8198_v21, %v8202_v17  ;;  %v8190_v16 = vld [vmem:[%s16214_s16 + $0xc98] sm:$0xff]  ;;  %v11808_v21 = vld [vmem:[%s18081_s15 + $0x6a8] sm:$0xff]  ;;  %v11807_v17 = vld [vmem:[%s18081_s15 + $0x6a0] sm:$0xff] }
 0x73b   : > { %12101 = vmatprep.subr.mxu0 %v11722_v26  ;;  %v11653_v26 = vld [vmem:[%s18081_s15 + $0x1d0] sm:$0xff]  ;;  %v14750_v29 = vcombine.low %v8190_v16, %v8194_v3 }
 0x73c   : > { %12102 = vmatpush2.msra.mxu0 %v11721_v57  ;;  %v11647_v57 = vld [vmem:[%s18081_s15 + $0x1a0] sm:$0xff]  ;;  %v8286_v47 = vld [vmem:[%s16214_s16 + $0xf98] sm:$0xff] }
 0x73d   : > { %12103 = vmatprep.subr.mxu0 %v11715_v8  ;;  %11495 = vmatpush2.bf16.msra.mxu1 %v14542_v50  ;;  %v14751_v50 = vcombine.high %v8190_v16, %v8194_v3  ;;  %v13211_v8 = vadd.f32 %v18207_v13, %v18097_v24  ;;  %v11794_v16 = vld [vmem:[%s18081_s15 + $0x638] sm:$0xff]  ;;  %v11793_v3 = vld [vmem:[%s18081_s15 + $0x630] sm:$0xff] }
 0x73e   : > { %12104 = vmatpush2.msra.mxu0 %v11714_v10  ;;  %11546 = vmatprep.subr.bf16.mxu1 %v14791_v32  ;;  %v8186_v10 = vld [vmem:[%s16214_s16 + $0xc78] sm:$0xff] }
 0x73f   : > { %12105 = vmatprep.subr.mxu0 %v11708_v18  ;;  %v11640_v18 = vld [vmem:[%s18081_s15 + $0x168] sm:$0xff] }
 0x740   : > { %12106 = vmatpush2.msra.mxu0 %v11707_v5  ;;  %v11252_v45 = vpop.f32.mrf.mxu1  ;;  %11497 = vmatmul.mubr.bf16.vlgmr.msra.gmra.mxu1 %v17621_v51 }
 0x741   : > { %v11253_v20 = vadd.f32 %v11252_v45, %v11212_v28  ;;  %v18213_v55 = vpop.f32.mrf.mxu0  ;;  %12108 = vmatmul.mubr.f32.vlgmr.msra.gmra.mxu0 %v18207_v13  ;;  %12185 = vmatprep.subr.mxu0 %v11703_v14  ;;  %v14743_v28 = vcombine.high %v8182_v63, %v8186_v10  ;;  %v11632_v45 = vld [vmem:[%s18081_s15 + $0x128] sm:$0xff] }
 0x742   : > { %11547 = vmatpush1.bf16.msra.mxu1 %v14790_v37  ;;  %11578 = vmatprep.mubr.bf16.mxu1 %v17771_v34  ;;  %v11254_v51 = vpop.f32.mrf.mxu1  ;;  %v11688_v34 = vld [vmem:[%s18081_s15 + $0x2e8] sm:$0xff]  ;;  %v11633_v37 = vld [vmem:[%s18081_s15 + $0x130] sm:$0xff] }
 0x743   : > { %15375 = vtanh.f32 %v11253_v20  ;;  %12186 = vmatpush1.msra.mxu0 %v11702_v43  ;;  %12249 = vmatprep.mubr.f32.mxu0 %v18097_v24  ;;  %v11255_v41 = vadd.f32 %v11254_v51, %v11214_v35  ;;  %v18221_v48 = vpop.f32.mrf.mxu0  ;;  %v8174_v43 = vld [vmem:[%s16214_s16 + $0xc18] sm:$0xff]  ;;  %v14742_v20 = vcombine.low %v8182_v63, %v8186_v10  ;;  %v11619_v35 = vld [vmem:[%s18081_s15 + $0xc0] sm:$0xff]  ;;  %v11618_v51 = vld [vmem:[%s18081_s15 + $0xb8] sm:$0xff] }
 0x744   : > { %12187 = vmatprep.subr.mxu0 %v11696_v2  ;;  %v11256_v39 = vpop.f32.mrf.mxu1  ;;  %11548 = vmatprep.subr.bf16.mxu1 %v14783_v9  ;;  %v8178_v9 = vld [vmem:[%s16214_s16 + $0xc38] sm:$0xff]  ;;  %v11779_v63 = vld [vmem:[%s18081_s15 + $0x5c0] sm:$0xff] }
 0x745   : > { %15377 = vtanh.f32 %v11255_v41  ;;  %12188 = vmatpush1.msra.mxu0 %v11695_v49  ;;  %v11379_v7 = vpop.f32.mrf.mxu0  ;;  %v14735_v2 = vcombine.high %v8174_v43, %v8178_v9  ;;  %v8294_v49 = vld [vmem:[%s16214_s16 + $0xfd8] sm:$0xff]  ;;  %v11612_v41 = vld [vmem:[%s18081_s15 + $0x88] sm:$0xff] }
 0x746   : > { %12189 = vmatprep.subr.mxu0 %v11689_v25  ;;  %11549 = vmatpush1.bf16.msra.mxu1 %v14782_v42  ;;  %v11257_v36 = vpop.f32.mrf.mxu1  ;;  %v8298_v42 = vld [vmem:[%s16214_s16 + $0xff8] sm:$0xff]  ;;  %v11611_v25 = vld [vmem:[%s18081_s15 + $0x80] sm:$0xff] }
 0x747   : > { %12190 = vmatpush1.msra.mxu0 %v11688_v34  ;;  %v11380_v58 = vpop.f32.mrf.mxu0  ;;  %11550 = vmatprep.subr.bf16.mxu1 %v14775_v53  ;;  %v14734_v53 = vcombine.low %v8174_v43, %v8178_v9  ;;  %v11605_v39 = vld [vmem:[%s18081_s15 + $0x50] sm:$0xff]  ;;  %v14855_v34 = vcombine.high %v8294_v49, %v8298_v42  ;;  %v11759_v43 = vld [vmem:[%s18081_s15 + $0x520] sm:$0xff] }
 0x748   : > { %12191 = vmatprep.subr.mxu0 %v11682_v23  ;;  %v8290_v7 = vld [vmem:[%s16214_s16 + $0xfb8] sm:$0xff]  ;;  %v11598_v23 = vld [vmem:[%s18081_s15 + $0x18] sm:$0xff] }
 0x749   : > { %12192 = vmatpush1.msra.mxu0 %v11681_v56  ;;  %v11597_v36 = vld [vmem:[%s18081_s15 + $0x10] sm:$0xff]  ;;  %v14854_v56 = vcombine.low %v8294_v49, %v8298_v42  ;;  %v14847_v58 = vcombine.high %v8286_v47, %v8290_v7 }
 0x74a   : > { %12193 = vmatprep.subr.mxu0 %v11675_v15  ;;  %11551 = vmatpush1.bf16.msra.mxu1 %v14774_v22  ;;  %v11815_v22 = vld [vmem:[%s18081_s15 + $0x6e0] sm:$0xff]  ;;  %v11814_v15 = vld [vmem:[%s18081_s15 + $0x6d8] sm:$0xff]  ;;  %v11745_v49 = vld [vmem:[%s18081_s15 + $0x4b0] sm:$0xff] }
 0x74b   : > { %12194 = vmatpush1.msra.mxu0 %v11674_v38  ;;  %11552 = vmatprep.subr.bf16.mxu1 %v14767_v59  ;;  %v8278_v59 = vld [vmem:[%s16214_s16 + $0xf58] sm:$0xff] }
 0x74c   : > { %12195 = vmatprep.subr.mxu0 %v11668_v33  ;;  %v8282_v38 = vld [vmem:[%s16214_s16 + $0xf78] sm:$0xff]  ;;  %v14846_v33 = vcombine.low %v8286_v47, %v8290_v7 }
 0x74d   : > { %12196 = vmatpush1.msra.mxu0 %v11667_v54  ;;  %v11801_v54 = vld [vmem:[%s18081_s15 + $0x670] sm:$0xff] }
 0x74e   : > { %12197 = vmatprep.subr.mxu0 %v11661_v11  ;;  %11553 = vmatpush1.bf16.msra.mxu1 %v14766_v61  ;;  %v14839_v61 = vcombine.high %v8278_v59, %v8282_v38  ;;  %v11800_v11 = vld [vmem:[%s18081_s15 + $0x668] sm:$0xff]  ;;  %v15399_v47 = vld [vmem:[%s16228_s14 + $0x10] sm:$0x77] }
 0x74f   : > { %12198 = vmatpush1.msra.mxu0 %v11660_v1  ;;  %11554 = vmatprep.subr.bf16.mxu1 %v14759_v19  ;;  %v8270_v19 = vld [vmem:[%s16214_s16 + $0xf18] sm:$0xff]  ;;  %v8318_v7 = vrot.slane %v15399_v47, %v17828_v62 }
 0x750   : > { %v18244_v32 = vpop.eup %15375  ;;  %12199 = vmatprep.subr.mxu0 %v11654_v40  ;;  %v8274_v1 = vld [vmem:[%s16214_s16 + $0xf38] sm:$0xff]  ;;  %v14838_v40 = vcombine.low %v8278_v59, %v8282_v38 }
 0x751   : > { %12200 = vmatpush1.msra.mxu0 %v11653_v26  ;;  %v13212_v4 = vadd.f32 %v18244_v32, %v13211_v8  ;;  %v11787_v26 = vld [vmem:[%s18081_s15 + $0x600] sm:$0xff]  ;;  %v8266_v8 = vld [vmem:[%s16214_s16 + $0xef8] sm:$0xff]  ;;  %v14830_v10 = vcombine.low %v8270_v19, %v8274_v1  ;;  %v8358_v38 = vrot.slane %v8318_v7, %v17828_v62 }
 0x752   : > { %v18251_v5 = vpop.eup %15377  ;;  %12201 = vmatprep.subr.mxu0 %v11647_v57  ;;  %11555 = vmatpush1.bf16.msra.mxu1 %v14758_v52  ;;  %v14831_v52 = vcombine.high %v8270_v19, %v8274_v1  ;;  %v11786_v57 = vld [vmem:[%s18081_s15 + $0x5f8] sm:$0xff]  ;;  %v11705_v1 = vld [vmem:[%s18081_s15 + $0x370] sm:$0xff]  ;;  %v11875_v7 = vld [vmem:[%s18081_s15 + $0x8c0] sm:$0xff] }
 0x753   : > { %12202 = vmatpush1.msra.mxu0 %v11646_v46  ;;  %11556 = vmatprep.subr.bf16.mxu1 %v14751_v50  ;;  %v13213_v14 = vadd.f32 %v18251_v5, %v13212_v4  ;;  %v8262_v50 = vld [vmem:[%s16214_s16 + $0xed8] sm:$0xff]  ;;  %v11780_v46 = vld [vmem:[%s18081_s15 + $0x5c8] sm:$0xff]  ;;  %v11294_v19 = vadd.f32 %v18091_v30, %v8358_v38 }
 0x754   : > { %12203 = vmatprep.subr.mxu0 %v11640_v18  ;;  %v11773_v18 = vld [vmem:[%s18081_s15 + $0x590] sm:$0xff]  ;;  %v14823_v4 = vcombine.high %v8262_v50, %v8266_v8 }
 0x755   : > { %12204 = vmatpush1.msra.mxu0 %v11639_v12  ;;  %13214 = vadd.xlane.f32.xlu0 %v13213_v14  ;;  %v11772_v12 = vld [vmem:[%s18081_s15 + $0x588] sm:$0xff]  ;;  %v11766_v14 = vld [vmem:[%s18081_s15 + $0x558] sm:$0xff]  ;;  %v11861_v38 = vld [vmem:[%s18081_s15 + $0x850] sm:$0xff] }
 0x756   : > { %12205 = vmatprep.subr.mxu0 %v11633_v37  ;;  %11557 = vmatpush1.bf16.msra.mxu1 %v14750_v29  ;;  %v8254_v29 = vld [vmem:[%s16214_s16 + $0xe98] sm:$0xff] }
 0x757   : > { %12206 = vmatpush1.msra.mxu0 %v11632_v45  ;;  %11558 = vmatprep.subr.bf16.mxu1 %v14743_v28  ;;  %v8258_v37 = vld [vmem:[%s16214_s16 + $0xeb8] sm:$0xff]  ;;  %v14822_v45 = vcombine.low %v8262_v50, %v8266_v8  ;;  %v11918_v50 = vld [vmem:[%s18081_s15 + $0xa18] sm:$0xff] }
 0x758   : > { %12207 = vmatprep.subr.mxu0 %v11626_v44  ;;  %v11765_v28 = vld [vmem:[%s18081_s15 + $0x550] sm:$0xff]  ;;  %v14815_v9 = vcombine.high %v8254_v29, %v8258_v37  ;;  %v11758_v44 = vld [vmem:[%s18081_s15 + $0x518] sm:$0xff] }
 0x759   : > { %12208 = vmatpush1.msra.mxu0 %v11625_v60  ;;  %v8246_v60 = vld [vmem:[%s16214_s16 + $0xe58] sm:$0xff]  ;;  %v11698_v8 = vld [vmem:[%s18081_s15 + $0x338] sm:$0xff] }
 0x75a   : > { %12209 = vmatprep.subr.mxu0 %v11619_v35  ;;  %11559 = vmatpush1.bf16.msra.mxu1 %v14742_v20  ;;  %v8250_v20 = vld [vmem:[%s16214_s16 + $0xe78] sm:$0xff]  ;;  %v11752_v35 = vld [vmem:[%s18081_s15 + $0x4e8] sm:$0xff] }
 0x75b   : > { %12210 = vmatpush1.msra.mxu0 %v11618_v51  ;;  %11560 = vmatprep.subr.bf16.mxu1 %v14735_v2  ;;  %v11751_v2 = vld [vmem:[%s18081_s15 + $0x4e0] sm:$0xff]  ;;  %v14814_v51 = vcombine.low %v8254_v29, %v8258_v37  ;;  %v14807_v42 = vcombine.high %v8246_v60, %v8250_v20  ;;  %v11910_v37 = vld [vmem:[%s18081_s15 + $0x9d8] sm:$0xff] }
 0x75c   : > { %12211 = vmatprep.subr.mxu0 %v11612_v41  ;;  %v11744_v41 = vld [vmem:[%s18081_s15 + $0x4a8] sm:$0xff] }
 0x75d   : > { %12212 = vmatpush1.msra.mxu0 %v11611_v25  ;;  %v8238_v25 = vld [vmem:[%s16214_s16 + $0xe18] sm:$0xff] }
 0x75e   : > { %12213 = vmatprep.subr.mxu0 %v11605_v39  ;;  %11561 = vmatpush1.bf16.msra.mxu1 %v14734_v53  ;;  %v8242_v53 = vld [vmem:[%s16214_s16 + $0xe38] sm:$0xff]  ;;  %v11738_v39 = vld [vmem:[%s18081_s15 + $0x478] sm:$0xff] }
 0x75f   : > { %12214 = vmatpush1.msra.mxu0 %v11604_v6  ;;  %11562 = vmatprep.subr.bf16.mxu1 %v14855_v34  ;;  %v11737_v34 = vld [vmem:[%s18081_s15 + $0x470] sm:$0xff]  ;;  %v14806_v6 = vcombine.low %v8246_v60, %v8250_v20  ;;  %v14798_v59 = vcombine.low %v8238_v25, %v8242_v53  ;;  %v11683_v60 = vld [vmem:[%s18081_s15 + $0x2c0] sm:$0xff] }
 0x760   : > { %12215 = vmatprep.subr.mxu0 %v11598_v23  ;;  %v11731_v23 = vld [vmem:[%s18081_s15 + $0x440] sm:$0xff]  ;;  %v11677_v20 = vld [vmem:[%s18081_s15 + $0x290] sm:$0xff] }
 0x761   : > { %12216 = vmatpush1.msra.mxu0 %v11597_v36  ;;  %v14799_v36 = vcombine.high %v8238_v25, %v8242_v53  ;;  %v11883_v25 = vld [vmem:[%s18081_s15 + $0x900] sm:$0xff] }
 0x762   : > { %12217 = vmatprep.subr.mxu0 %v11815_v22  ;;  %11563 = vmatpush2.bf16.msra.mxu1 %v14854_v56  ;;  %v11730_v56 = vld [vmem:[%s18081_s15 + $0x438] sm:$0xff]  ;;  %v8322_v22 = vrot.slane %v15399_v47, %v17832_v0  ;;  %v11663_v53 = vld [vmem:[%s18081_s15 + $0x220] sm:$0xff]  ;;  %v11656_v47 = vld [vmem:[%s18081_s15 + $0x1e8] sm:$0xff] }
 0x763   : > { %12218 = vmatpush2.msra.mxu0 %v11814_v15  ;;  %11564 = vmatprep.subr.bf16.mxu1 %v14847_v58  ;;  %v11724_v58 = vld [vmem:[%s18081_s15 + $0x408] sm:$0xff]  ;;  %v11723_v15 = vld [vmem:[%s18081_s15 + $0x400] sm:$0xff] }
 0x764   : > { %12219 = vmatprep.subr.mxu0 %v11808_v21  ;;  %v11717_v21 = vld [vmem:[%s18081_s15 + $0x3d0] sm:$0xff] }
 0x765   : > { %12220 = vmatpush2.msra.mxu0 %v11807_v17  ;;  %v11716_v17 = vld [vmem:[%s18081_s15 + $0x3c8] sm:$0xff] }
 0x766   : > { %12221 = vmatprep.subr.mxu0 %v11801_v54  ;;  %11565 = vmatpush2.bf16.msra.mxu1 %v14846_v33  ;;  %v11925_v33 = vld [vmem:[%s18081_s15 + $0xa50] sm:$0xff]  ;;  %v8362_v54 = vrot.slane %v8322_v22, %v17828_v62  ;;  %v11868_v22 = vld [vmem:[%s18081_s15 + $0x888] sm:$0xff] }
 0x767   : > { %12222 = vmatpush2.msra.mxu0 %v11800_v11  ;;  %11566 = vmatprep.subr.bf16.mxu1 %v14839_v61  ;;  %v11710_v61 = vld [vmem:[%s18081_s15 + $0x398] sm:$0xff]  ;;  %v11709_v11 = vld [vmem:[%s18081_s15 + $0x390] sm:$0xff] }
 0x768   : > { %12223 = vmatprep.subr.mxu0 %v11794_v16 }
 0x769   : > { %12224 = vmatpush2.msra.mxu0 %v11793_v3  ;;  %v11924_v3 = vld [vmem:[%s18081_s15 + $0xa48] sm:$0xff] }
 0x76a   : > { %12225 = vmatprep.subr.mxu0 %v11787_v26  ;;  %11567 = vmatpush2.bf16.msra.mxu1 %v14838_v40  ;;  %v11296_v40 = vadd.f32 %v18102_v31, %v8362_v54  ;;  %v11854_v54 = vld [vmem:[%s18081_s15 + $0x818] sm:$0xff] }
 0x76b   : > { %12226 = vmatpush2.msra.mxu0 %v11786_v57  ;;  %11568 = vmatprep.subr.bf16.mxu1 %v14831_v52  ;;  %v11704_v57 = vld [vmem:[%s18081_s15 + $0x368] sm:$0xff] }
 0x76c   : > { %12227 = vmatprep.subr.mxu0 %v11780_v46 }
 0x76d   : > { %12228 = vmatpush2.msra.mxu0 %v11779_v63  ;;  %v11917_v63 = vld [vmem:[%s18081_s15 + $0xa10] sm:$0xff] }
 0x76e   : > { %12229 = vmatprep.subr.mxu0 %v11773_v18  ;;  %11569 = vmatpush2.bf16.msra.mxu1 %v14830_v10  ;;  %v11697_v10 = vld [vmem:[%s18081_s15 + $0x330] sm:$0xff] }
 0x76f   : > { %12230 = vmatpush2.msra.mxu0 %v11772_v12  ;;  %11570 = vmatprep.subr.bf16.mxu1 %v14823_v4  ;;  %v11911_v4 = vld [vmem:[%s18081_s15 + $0x9e0] sm:$0xff] }
 0x770   : > { %12231 = vmatprep.subr.mxu0 %v11766_v14  ;;  %v11691_v12 = vld [vmem:[%s18081_s15 + $0x300] sm:$0xff]  ;;  %v11690_v14 = vld [vmem:[%s18081_s15 + $0x2f8] sm:$0xff] }
 0x771   : > { %12232 = vmatpush2.msra.mxu0 %v11765_v28 }
 0x772   : > { %12233 = vmatprep.subr.mxu0 %v11759_v43  ;;  %11571 = vmatpush2.bf16.msra.mxu1 %v14822_v45  ;;  %v11904_v45 = vld [vmem:[%s18081_s15 + $0x9a8] sm:$0xff] }
 0x773   : > { %12234 = vmatpush2.msra.mxu0 %v11758_v44  ;;  %11572 = vmatprep.subr.bf16.mxu1 %v14815_v9  ;;  %v11684_v43 = vld [vmem:[%s18081_s15 + $0x2c8] sm:$0xff]  ;;  %v11903_v44 = vld [vmem:[%s18081_s15 + $0x9a0] sm:$0xff] }
 0x774   : > { %12235 = vmatprep.subr.mxu0 %v11752_v35  ;;  %v11896_v35 = vld [vmem:[%s18081_s15 + $0x968] sm:$0xff] }
 0x775   : > { %12236 = vmatpush2.msra.mxu0 %v11751_v2  ;;  %v11676_v2 = vld [vmem:[%s18081_s15 + $0x288] sm:$0xff] }
 0x776   : > { %12237 = vmatprep.subr.mxu0 %v11745_v49  ;;  %11573 = vmatpush2.bf16.msra.mxu1 %v14814_v51  ;;  %v11890_v51 = vld [vmem:[%s18081_s15 + $0x938] sm:$0xff] }
 0x777   : > { %12238 = vmatpush2.msra.mxu0 %v11744_v41  ;;  %11574 = vmatprep.subr.bf16.mxu1 %v14807_v42  ;;  %v11670_v49 = vld [vmem:[%s18081_s15 + $0x258] sm:$0xff]  ;;  %v11889_v42 = vld [vmem:[%s18081_s15 + $0x930] sm:$0xff] }
 0x778   : > { %12239 = vmatprep.subr.mxu0 %v11738_v39  ;;  %v11669_v41 = vld [vmem:[%s18081_s15 + $0x250] sm:$0xff]  ;;  %v11882_v39 = vld [vmem:[%s18081_s15 + $0x8f8] sm:$0xff] }
 0x779   : > { %12240 = vmatpush2.msra.mxu0 %v11737_v34  ;;  %v11662_v34 = vld [vmem:[%s18081_s15 + $0x218] sm:$0xff] }
 0x77a   : > { %12241 = vmatprep.subr.mxu0 %v11731_v23  ;;  %11575 = vmatpush2.bf16.msra.mxu1 %v14806_v6  ;;  %v11876_v6 = vld [vmem:[%s18081_s15 + $0x8c8] sm:$0xff]  ;;  %v11655_v23 = vld [vmem:[%s18081_s15 + $0x1e0] sm:$0xff] }
 0x77b   : > { %12242 = vmatpush2.msra.mxu0 %v11730_v56  ;;  %11576 = vmatprep.subr.bf16.mxu1 %v14799_v36  ;;  %v11869_v36 = vld [vmem:[%s18081_s15 + $0x890] sm:$0xff] }
 0x77c   : > { %12243 = vmatprep.subr.mxu0 %v11724_v58  ;;  %v11649_v56 = vld [vmem:[%s18081_s15 + $0x1b0] sm:$0xff]  ;;  %v11648_v58 = vld [vmem:[%s18081_s15 + $0x1a8] sm:$0xff] }
 0x77d   : > { %12244 = vmatpush2.msra.mxu0 %v11723_v15  ;;  %v11862_v15 = vld [vmem:[%s18081_s15 + $0x858] sm:$0xff] }
 0x77e   : > { %12245 = vmatprep.subr.mxu0 %v11717_v21  ;;  %11577 = vmatpush2.bf16.msra.mxu1 %v14798_v59  ;;  %v11642_v59 = vld [vmem:[%s18081_s15 + $0x178] sm:$0xff]  ;;  %v11641_v21 = vld [vmem:[%s18081_s15 + $0x170] sm:$0xff] }
 0x77f   : > { %12246 = vmatpush2.msra.mxu0 %v11716_v17  ;;  %12114 = vmatprep.subr.mxu1 %v11925_v33  ;;  %v11855_v17 = vld [vmem:[%s18081_s15 + $0x820] sm:$0xff] }
 0x780   : > { %12247 = vmatprep.subr.mxu0 %v11710_v61  ;;  %v11334_v16 = vpop.f32.mrf.mxu1  ;;  %v11635_v33 = vld [vmem:[%s18081_s15 + $0x140] sm:$0xff]  ;;  %v11634_v61 = vld [vmem:[%s18081_s15 + $0x138] sm:$0xff] }
 0x781   : > { %12248 = vmatpush2.msra.mxu0 %v11709_v11  ;;  %v11335_v26 = vadd.f32 %v11334_v16, %v11294_v19  ;;  %v18327_v52 = vpop.f32.mrf.mxu0  ;;  %11579 = vmatmul.mubr.bf16.vlgmr.msra.gmra.mxu1 %v17773_v27  ;;  %v11848_v11 = vld [vmem:[%s18081_s15 + $0x7e8] sm:$0xff]  ;;  %v11627_v16 = vld [vmem:[%s18081_s15 + $0x100] sm:$0xff] }
 0x782   : > { %12250 = vmatmul.mubr.f32.vlgmr.msra.gmra.mxu0 %v18207_v13  ;;  %12327 = vmatprep.subr.mxu0 %v11705_v1  ;;  %v11336_v30 = vpop.f32.mrf.mxu1  ;;  %v11628_v19 = vld [vmem:[%s18081_s15 + $0x108] sm:$0xff]  ;;  %v11847_v1 = vld [vmem:[%s18081_s15 + $0x7e0] sm:$0xff] }
 0x783   : > { %12115 = vmatpush1.msra.mxu1 %v11924_v3  ;;  %12178 = vmatprep.mubr.f32.mxu1 %v18251_v5  ;;  %v11337_v31 = vadd.f32 %v11336_v30, %v11296_v40  ;;  %v18335_v46 = vpop.f32.mrf.mxu0  ;;  %v18340_v27 = vadd.f32 %v18213_v55, %v11335_v26  ;;  %v11841_v3 = vld [vmem:[%s18081_s15 + $0x7b0] sm:$0xff]  ;;  %v11840_v26 = vld [vmem:[%s18081_s15 + $0x7a8] sm:$0xff]  ;;  %v11834_v30 = vld [vmem:[%s18081_s15 + $0x778] sm:$0xff] }
 0x784   : > { %12328 = vmatpush1.msra.mxu0 %v11704_v57  ;;  %12391 = vmatprep.mubr.f32.mxu0 %v18097_v24  ;;  %v11338_v18 = vpop.f32.mrf.mxu1  ;;  %v11621_v40 = vld [vmem:[%s18081_s15 + $0xd0] sm:$0xff]  ;;  %v11620_v57 = vld [vmem:[%s18081_s15 + $0xc8] sm:$0xff] }
 0x785   : > { %12116 = vmatprep.subr.mxu1 %v11918_v50  ;;  %12329 = vmatprep.subr.mxu0 %v11698_v8  ;;  %v11461_v29 = vpop.f32.mrf.mxu0  ;;  %v18348_v28 = vadd.f32 %v18221_v48, %v11337_v31  ;;  %v11897_v48 = vld [vmem:[%s18081_s15 + $0x970] sm:$0xff]  ;;  %v11614_v50 = vld [vmem:[%s18081_s15 + $0x98] sm:$0xff] }
 0x786   : > { %12117 = vmatpush1.msra.mxu1 %v11917_v63  ;;  %12330 = vmatpush1.msra.mxu0 %v11697_v10  ;;  %v11339_v55 = vpop.f32.mrf.mxu1  ;;  %v11833_v8 = vld [vmem:[%s18081_s15 + $0x770] sm:$0xff]  ;;  %v11827_v63 = vld [vmem:[%s18081_s15 + $0x740] sm:$0xff]  ;;  %v11826_v18 = vld [vmem:[%s18081_s15 + $0x738] sm:$0xff] }
 0x787   : > { %12118 = vmatprep.subr.mxu1 %v11911_v4  ;;  %12331 = vmatprep.subr.mxu0 %v11691_v12  ;;  %v11462_v9 = vpop.f32.mrf.mxu0  ;;  %v11613_v31 = vld [vmem:[%s18081_s15 + $0x90] sm:$0xff]  ;;  %v11607_v10 = vld [vmem:[%s18081_s15 + $0x60] sm:$0xff]  ;;  %v11606_v4 = vld [vmem:[%s18081_s15 + $0x58] sm:$0xff] }
 0x788   : > { %12119 = vmatpush1.msra.mxu1 %v11910_v37  ;;  %12332 = vmatpush1.msra.mxu0 %v11690_v14  ;;  %v11820_v12 = vld [vmem:[%s18081_s15 + $0x708] sm:$0xff]  ;;  %v11819_v37 = vld [vmem:[%s18081_s15 + $0x700] sm:$0xff]  ;;  %v12037_v55 = vld [vmem:[%s18081_s15 + $0xdd0] sm:$0xff] }
 0x789   : > { %12120 = vmatprep.subr.mxu1 %v11904_v45  ;;  %12333 = vmatprep.subr.mxu0 %v11684_v43  ;;  %v11600_v29 = vld [vmem:[%s18081_s15 + $0x28] sm:$0xff]  ;;  %v11599_v14 = vld [vmem:[%s18081_s15 + $0x20] sm:$0xff]  ;;  %v11817_v45 = vld [vmem:[%s18081_s15 + $0x6f0] sm:$0xff] }
 0x78a   : > { %12121 = vmatpush1.msra.mxu1 %v11903_v44  ;;  %12334 = vmatpush1.msra.mxu0 %v11683_v60  ;;  %v12036_v43 = vld [vmem:[%s18081_s15 + $0xdc8] sm:$0xff]  ;;  %v12030_v44 = vld [vmem:[%s18081_s15 + $0xd98] sm:$0xff] }
 0x78b   : > { %12122 = vmatprep.subr.mxu1 %v11897_v48  ;;  %12335 = vmatprep.subr.mxu0 %v11677_v20  ;;  %v11816_v9 = vld [vmem:[%s18081_s15 + $0x6e8] sm:$0xff]  ;;  %v11810_v60 = vld [vmem:[%s18081_s15 + $0x6b8] sm:$0xff]  ;;  %v12029_v48 = vld [vmem:[%s18081_s15 + $0xd90] sm:$0xff] }
 0x78c   : > { %12123 = vmatpush1.msra.mxu1 %v11896_v35  ;;  %12336 = vmatpush1.msra.mxu0 %v11676_v2  ;;  %v11809_v20 = vld [vmem:[%s18081_s15 + $0x6b0] sm:$0xff]  ;;  %v12023_v35 = vld [vmem:[%s18081_s15 + $0xd60] sm:$0xff] }
 0x78d   : > { %12124 = vmatprep.subr.mxu1 %v11890_v51  ;;  %12337 = vmatprep.subr.mxu0 %v11670_v49  ;;  %v11803_v2 = vld [vmem:[%s18081_s15 + $0x680] sm:$0xff]  ;;  %v12022_v51 = vld [vmem:[%s18081_s15 + $0xd58] sm:$0xff] }
 0x78e   : > { %12125 = vmatpush1.msra.mxu1 %v11889_v42  ;;  %12338 = vmatpush1.msra.mxu0 %v11669_v41  ;;  %v11802_v49 = vld [vmem:[%s18081_s15 + $0x678] sm:$0xff]  ;;  %v12016_v42 = vld [vmem:[%s18081_s15 + $0xd28] sm:$0xff] }
 0x78f   : > { %12126 = vmatprep.subr.mxu1 %v11883_v25  ;;  %12339 = vmatprep.subr.mxu0 %v11663_v53  ;;  %v11796_v41 = vld [vmem:[%s18081_s15 + $0x648] sm:$0xff]  ;;  %v12015_v25 = vld [vmem:[%s18081_s15 + $0xd20] sm:$0xff] }
 0x790   : > { %12127 = vmatpush1.msra.mxu1 %v11882_v39  ;;  %12340 = vmatpush1.msra.mxu0 %v11662_v34  ;;  %v11795_v53 = vld [vmem:[%s18081_s15 + $0x640] sm:$0xff]  ;;  %v12009_v39 = vld [vmem:[%s18081_s15 + $0xcf0] sm:$0xff] }
 0x791   : > { %12128 = vmatprep.subr.mxu1 %v11876_v6  ;;  %12341 = vmatprep.subr.mxu0 %v11656_v47  ;;  %v11789_v34 = vld [vmem:[%s18081_s15 + $0x610] sm:$0xff]  ;;  %v12008_v6 = vld [vmem:[%s18081_s15 + $0xce8] sm:$0xff] }
 0x792   : > { %12129 = vmatpush1.msra.mxu1 %v11875_v7  ;;  %12342 = vmatpush1.msra.mxu0 %v11655_v23  ;;  %v11788_v47 = vld [vmem:[%s18081_s15 + $0x608] sm:$0xff]  ;;  %v12002_v7 = vld [vmem:[%s18081_s15 + $0xcb8] sm:$0xff] }
 0x793   : > { %12130 = vmatprep.subr.mxu1 %v11869_v36  ;;  %12343 = vmatprep.subr.mxu0 %v11649_v56  ;;  %v11782_v23 = vld [vmem:[%s18081_s15 + $0x5d8] sm:$0xff]  ;;  %v12001_v36 = vld [vmem:[%s18081_s15 + $0xcb0] sm:$0xff] }
 0x794   : > { %12131 = vmatpush1.msra.mxu1 %v11868_v22  ;;  %12344 = vmatpush1.msra.mxu0 %v11648_v58  ;;  %v11781_v56 = vld [vmem:[%s18081_s15 + $0x5d0] sm:$0xff]  ;;  %v11995_v22 = vld [vmem:[%s18081_s15 + $0xc80] sm:$0xff] }
 0x795   : > { %12132 = vmatprep.subr.mxu1 %v11862_v15  ;;  %12345 = vmatprep.subr.mxu0 %v11642_v59  ;;  %v11775_v58 = vld [vmem:[%s18081_s15 + $0x5a0] sm:$0xff]  ;;  %v11994_v15 = vld [vmem:[%s18081_s15 + $0xc78] sm:$0xff] }
 0x796   : > { %12133 = vmatpush1.msra.mxu1 %v11861_v38  ;;  %12346 = vmatpush1.msra.mxu0 %v11641_v21  ;;  %v11774_v59 = vld [vmem:[%s18081_s15 + $0x598] sm:$0xff]  ;;  %v11988_v38 = vld [vmem:[%s18081_s15 + $0xc48] sm:$0xff] }
 0x797   : > { %12134 = vmatprep.subr.mxu1 %v11855_v17  ;;  %12347 = vmatprep.subr.mxu0 %v11635_v33  ;;  %v11768_v21 = vld [vmem:[%s18081_s15 + $0x568] sm:$0xff]  ;;  %v11987_v17 = vld [vmem:[%s18081_s15 + $0xc40] sm:$0xff] }
 0x798   : > { %12135 = vmatpush1.msra.mxu1 %v11854_v54  ;;  %12348 = vmatpush1.msra.mxu0 %v11634_v61  ;;  %v11767_v33 = vld [vmem:[%s18081_s15 + $0x560] sm:$0xff]  ;;  %v11981_v54 = vld [vmem:[%s18081_s15 + $0xc10] sm:$0xff] }
 0x799   : > { %12136 = vmatprep.subr.mxu1 %v11848_v11  ;;  %12349 = vmatprep.subr.mxu0 %v11628_v19  ;;  %v11761_v61 = vld [vmem:[%s18081_s15 + $0x530] sm:$0xff]  ;;  %v11980_v11 = vld [vmem:[%s18081_s15 + $0xc08] sm:$0xff] }
 0x79a   : > { %12137 = vmatpush1.msra.mxu1 %v11847_v1  ;;  %12350 = vmatpush1.msra.mxu0 %v11627_v16  ;;  %v11760_v19 = vld [vmem:[%s18081_s15 + $0x528] sm:$0xff]  ;;  %v11974_v1 = vld [vmem:[%s18081_s15 + $0xbd8] sm:$0xff] }
 0x79b   : > { %12138 = vmatprep.subr.mxu1 %v11841_v3  ;;  %12351 = vmatprep.subr.mxu0 %v11621_v40  ;;  %v11754_v16 = vld [vmem:[%s18081_s15 + $0x4f8] sm:$0xff]  ;;  %v11973_v3 = vld [vmem:[%s18081_s15 + $0xbd0] sm:$0xff] }
 0x79c   : > { %12139 = vmatpush1.msra.mxu1 %v11840_v26  ;;  %12352 = vmatpush1.msra.mxu0 %v11620_v57  ;;  %v11753_v40 = vld [vmem:[%s18081_s15 + $0x4f0] sm:$0xff]  ;;  %v11967_v26 = vld [vmem:[%s18081_s15 + $0xba0] sm:$0xff] }
 0x79d   : > { %12140 = vmatprep.subr.mxu1 %v11834_v30  ;;  %12353 = vmatprep.subr.mxu0 %v11614_v50  ;;  %v11747_v57 = vld [vmem:[%s18081_s15 + $0x4c0] sm:$0xff]  ;;  %v11966_v30 = vld [vmem:[%s18081_s15 + $0xb98] sm:$0xff] }
 0x79e   : > { %12141 = vmatpush1.msra.mxu1 %v11833_v8  ;;  %12354 = vmatpush1.msra.mxu0 %v11613_v31  ;;  %v11746_v50 = vld [vmem:[%s18081_s15 + $0x4b8] sm:$0xff]  ;;  %v11960_v8 = vld [vmem:[%s18081_s15 + $0xb68] sm:$0xff] }
 0x79f   : > { %12142 = vmatprep.subr.mxu1 %v11827_v63  ;;  %12355 = vmatprep.subr.mxu0 %v11607_v10  ;;  %v11740_v31 = vld [vmem:[%s18081_s15 + $0x488] sm:$0xff]  ;;  %v11959_v63 = vld [vmem:[%s18081_s15 + $0xb60] sm:$0xff] }
 0x7a0   : > { %12143 = vmatpush1.msra.mxu1 %v11826_v18  ;;  %12356 = vmatpush1.msra.mxu0 %v11606_v4  ;;  %v11739_v10 = vld [vmem:[%s18081_s15 + $0x480] sm:$0xff]  ;;  %v11953_v18 = vld [vmem:[%s18081_s15 + $0xb30] sm:$0xff] }
 0x7a1   : > { %12144 = vmatprep.subr.mxu1 %v11820_v12  ;;  %12357 = vmatprep.subr.mxu0 %v11600_v29  ;;  %v11733_v4 = vld [vmem:[%s18081_s15 + $0x450] sm:$0xff]  ;;  %v11952_v12 = vld [vmem:[%s18081_s15 + $0xb28] sm:$0xff] }
 0x7a2   : > { %12145 = vmatpush1.msra.mxu1 %v11819_v37  ;;  %12358 = vmatpush1.msra.mxu0 %v11599_v14  ;;  %v11732_v29 = vld [vmem:[%s18081_s15 + $0x448] sm:$0xff]  ;;  %v11946_v37 = vld [vmem:[%s18081_s15 + $0xaf8] sm:$0xff] }
 0x7a3   : > { %12146 = vmatprep.subr.mxu1 %v12037_v55  ;;  %12359 = vmatprep.subr.mxu0 %v11817_v45  ;;  %v11726_v14 = vld [vmem:[%s18081_s15 + $0x418] sm:$0xff]  ;;  %v11945_v55 = vld [vmem:[%s18081_s15 + $0xaf0] sm:$0xff] }
 0x7a4   : > { %12147 = vmatpush2.msra.mxu1 %v12036_v43  ;;  %12360 = vmatpush2.msra.mxu0 %v11816_v9  ;;  %v11725_v45 = vld [vmem:[%s18081_s15 + $0x410] sm:$0xff]  ;;  %v11939_v43 = vld [vmem:[%s18081_s15 + $0xac0] sm:$0xff] }
 0x7a5   : > { %12148 = vmatprep.subr.mxu1 %v12030_v44  ;;  %12361 = vmatprep.subr.mxu0 %v11810_v60  ;;  %v11719_v9 = vld [vmem:[%s18081_s15 + $0x3e0] sm:$0xff]  ;;  %v11938_v44 = vld [vmem:[%s18081_s15 + $0xab8] sm:$0xff] }
 0x7a6   : > { %12149 = vmatpush2.msra.mxu1 %v12029_v48  ;;  %12362 = vmatpush2.msra.mxu0 %v11809_v20  ;;  %v11718_v60 = vld [vmem:[%s18081_s15 + $0x3d8] sm:$0xff]  ;;  %v11932_v48 = vld [vmem:[%s18081_s15 + $0xa88] sm:$0xff] }
 0x7a7   : > { %12150 = vmatprep.subr.mxu1 %v12023_v35  ;;  %12363 = vmatprep.subr.mxu0 %v11803_v2  ;;  %v11712_v20 = vld [vmem:[%s18081_s15 + $0x3a8] sm:$0xff]  ;;  %v11931_v35 = vld [vmem:[%s18081_s15 + $0xa80] sm:$0xff] }
 0x7a8   : > { %12151 = vmatpush2.msra.mxu1 %v12022_v51  ;;  %12364 = vmatpush2.msra.mxu0 %v11802_v49  ;;  %v11711_v2 = vld [vmem:[%s18081_s15 + $0x3a0] sm:$0xff] }
 0x7a9   : > { %12152 = vmatprep.subr.mxu1 %v12016_v42  ;;  %12365 = vmatprep.subr.mxu0 %v11796_v41  ;;  %v11927_v49 = vld [vmem:[%s18081_s15 + $0xa60] sm:$0xff] }
 0x7aa   : > { %12153 = vmatpush2.msra.mxu1 %v12015_v25  ;;  %12366 = vmatpush2.msra.mxu0 %v11795_v53  ;;  %v11818_v25 = vld [vmem:[%s18081_s15 + $0x6f8] sm:$0xff] }
 0x7ab   : > { %12154 = vmatprep.subr.mxu1 %v12009_v39  ;;  %12367 = vmatprep.subr.mxu0 %v11789_v34  ;;  %v11926_v53 = vld [vmem:[%s18081_s15 + $0xa58] sm:$0xff] }
 0x7ac   : > { %12155 = vmatpush2.msra.mxu1 %v12008_v6  ;;  %12368 = vmatpush2.msra.mxu0 %v11788_v47  ;;  %v11706_v34 = vld [vmem:[%s18081_s15 + $0x378] sm:$0xff]  ;;  %v11811_v47 = vld [vmem:[%s18081_s15 + $0x6c0] sm:$0xff] }
 0x7ad   : > { %12156 = vmatprep.subr.mxu1 %v12002_v7  ;;  %12369 = vmatprep.subr.mxu0 %v11782_v23  ;;  %v11919_v23 = vld [vmem:[%s18081_s15 + $0xa20] sm:$0xff] }
 0x7ae   : > { %12157 = vmatpush2.msra.mxu1 %v12001_v36  ;;  %12370 = vmatpush2.msra.mxu0 %v11781_v56  ;;  %v11699_v36 = vld [vmem:[%s18081_s15 + $0x340] sm:$0xff] }
 0x7af   : > { %12158 = vmatprep.subr.mxu1 %v11995_v22  ;;  %12371 = vmatprep.subr.mxu0 %v11775_v58  ;;  %v11913_v22 = vld [vmem:[%s18081_s15 + $0x9f0] sm:$0xff]  ;;  %v11804_v58 = vld [vmem:[%s18081_s15 + $0x688] sm:$0xff] }
 0x7b0   : > { %12159 = vmatpush2.msra.mxu1 %v11994_v15  ;;  %12372 = vmatpush2.msra.mxu0 %v11774_v59  ;;  %v11912_v59 = vld [vmem:[%s18081_s15 + $0x9e8] sm:$0xff] }
 0x7b1   : > { %12160 = vmatprep.subr.mxu1 %v11988_v38  ;;  %12373 = vmatprep.subr.mxu0 %v11768_v21  ;;  %v11692_v38 = vld [vmem:[%s18081_s15 + $0x308] sm:$0xff] }
 0x7b2   : > { %12161 = vmatpush2.msra.mxu1 %v11987_v17  ;;  %12374 = vmatpush2.msra.mxu0 %v11767_v33  ;;  %v11906_v17 = vld [vmem:[%s18081_s15 + $0x9b8] sm:$0xff]  ;;  %v11797_v33 = vld [vmem:[%s18081_s15 + $0x650] sm:$0xff] }
 0x7b3   : > { %12162 = vmatprep.subr.mxu1 %v11981_v54  ;;  %12375 = vmatprep.subr.mxu0 %v11761_v61  ;;  %v11685_v54 = vld [vmem:[%s18081_s15 + $0x2d0] sm:$0xff]  ;;  %v11899_v61 = vld [vmem:[%s18081_s15 + $0x980] sm:$0xff] }
 0x7b4   : > { %12163 = vmatpush2.msra.mxu1 %v11980_v11  ;;  %12376 = vmatpush2.msra.mxu0 %v11760_v19  ;;  %v11790_v11 = vld [vmem:[%s18081_s15 + $0x618] sm:$0xff] }
 0x7b5   : > { %12164 = vmatprep.subr.mxu1 %v11974_v1  ;;  %12377 = vmatprep.subr.mxu0 %v11754_v16  ;;  %v11898_v19 = vld [vmem:[%s18081_s15 + $0x978] sm:$0xff]  ;;  %v11892_v16 = vld [vmem:[%s18081_s15 + $0x948] sm:$0xff] }
 0x7b6   : > { %12165 = vmatpush2.msra.mxu1 %v11973_v3  ;;  %12378 = vmatpush2.msra.mxu0 %v11753_v40  ;;  %v11678_v1 = vld [vmem:[%s18081_s15 + $0x298] sm:$0xff]  ;;  %v11783_v3 = vld [vmem:[%s18081_s15 + $0x5e0] sm:$0xff] }
 0x7b7   : > { %12166 = vmatprep.subr.mxu1 %v11967_v26  ;;  %12379 = vmatprep.subr.mxu0 %v11747_v57  ;;  %v11891_v40 = vld [vmem:[%s18081_s15 + $0x940] sm:$0xff]  ;;  %v11885_v57 = vld [vmem:[%s18081_s15 + $0x910] sm:$0xff] }
 0x7b8   : > { %12167 = vmatpush2.msra.mxu1 %v11966_v30  ;;  %12380 = vmatpush2.msra.mxu0 %v11746_v50  ;;  %v11671_v26 = vld [vmem:[%s18081_s15 + $0x260] sm:$0xff]  ;;  %v11776_v30 = vld [vmem:[%s18081_s15 + $0x5a8] sm:$0xff] }
 0x7b9   : > { %12168 = vmatprep.subr.mxu1 %v11960_v8  ;;  %12381 = vmatprep.subr.mxu0 %v11740_v31  ;;  %v11884_v50 = vld [vmem:[%s18081_s15 + $0x908] sm:$0xff]  ;;  %v11878_v31 = vld [vmem:[%s18081_s15 + $0x8d8] sm:$0xff] }
 0x7ba   : > { %12169 = vmatpush2.msra.mxu1 %v11959_v63  ;;  %12382 = vmatpush2.msra.mxu0 %v11739_v10  ;;  %v11664_v8 = vld [vmem:[%s18081_s15 + $0x228] sm:$0xff]  ;;  %v11769_v63 = vld [vmem:[%s18081_s15 + $0x570] sm:$0xff] }
 0x7bb   : > { %12170 = vmatprep.subr.mxu1 %v11953_v18  ;;  %12383 = vmatprep.subr.mxu0 %v11733_v4  ;;  %v11877_v10 = vld [vmem:[%s18081_s15 + $0x8d0] sm:$0xff]  ;;  %v11871_v4 = vld [vmem:[%s18081_s15 + $0x8a0] sm:$0xff] }
 0x7bc   : > { %12171 = vmatpush2.msra.mxu1 %v11952_v12  ;;  %12384 = vmatpush2.msra.mxu0 %v11732_v29  ;;  %v11657_v18 = vld [vmem:[%s18081_s15 + $0x1f0] sm:$0xff]  ;;  %v11762_v12 = vld [vmem:[%s18081_s15 + $0x538] sm:$0xff] }
 0x7bd   : > { %12172 = vmatprep.subr.mxu1 %v11946_v37  ;;  %12385 = vmatprep.subr.mxu0 %v11726_v14  ;;  %v11870_v29 = vld [vmem:[%s18081_s15 + $0x898] sm:$0xff]  ;;  %v11864_v14 = vld [vmem:[%s18081_s15 + $0x868] sm:$0xff] }
 0x7be   : > { %12173 = vmatpush2.msra.mxu1 %v11945_v55  ;;  %12386 = vmatpush2.msra.mxu0 %v11725_v45  ;;  %v11650_v37 = vld [vmem:[%s18081_s15 + $0x1b8] sm:$0xff]  ;;  %v11755_v55 = vld [vmem:[%s18081_s15 + $0x500] sm:$0xff] }
 0x7bf   : > { %12174 = vmatprep.subr.mxu1 %v11939_v43  ;;  %12387 = vmatprep.subr.mxu0 %v11719_v9  ;;  %v11863_v45 = vld [vmem:[%s18081_s15 + $0x860] sm:$0xff]  ;;  %v11857_v9 = vld [vmem:[%s18081_s15 + $0x830] sm:$0xff] }
 0x7c0   : > { %12175 = vmatpush2.msra.mxu1 %v11938_v44  ;;  %12388 = vmatpush2.msra.mxu0 %v11718_v60  ;;  %v11416_v51 = vpop.f32.mrf.mxu1  ;;  %v11643_v43 = vld [vmem:[%s18081_s15 + $0x180] sm:$0xff]  ;;  %v11748_v44 = vld [vmem:[%s18081_s15 + $0x4c8] sm:$0xff] }
 0x7c1   : > { %12176 = vmatprep.subr.mxu1 %v11932_v48  ;;  %12389 = vmatprep.subr.mxu0 %v11712_v20  ;;  %v18468_v42 = vadd.f32 %v11416_v51, %v18340_v27  ;;  %v18470_v41 = vpop.f32.mrf.mxu0  ;;  %v11920_v27 = vld [vmem:[%s18081_s15 + $0xa28] sm:$0xff]  ;;  %v11850_v20 = vld [vmem:[%s18081_s15 + $0x7f8] sm:$0xff]  ;;  %v11629_v51 = vld [vmem:[%s18081_s15 + $0x110] sm:$0xff] }
 0x7c2   : > { %12177 = vmatpush2.msra.mxu1 %v11931_v35  ;;  %12390 = vmatpush2.msra.mxu0 %v11711_v2  ;;  %v18474_v39 = vpop.f32.mrf.mxu1  ;;  %v11856_v60 = vld [vmem:[%s18081_s15 + $0x828] sm:$0xff]  ;;  %v11741_v35 = vld [vmem:[%s18081_s15 + $0x490] sm:$0xff] }
 0x7c3   : > { %12179 = vmatmul.mubr.f32.vlgmr.msra.gmra.mxu1 %v18244_v32  ;;  %12256 = vmatprep.subr.mxu1 %v11927_v49  ;;  %v18478_v6 = vpop.f32.mrf.mxu0  ;;  %v11636_v48 = vld [vmem:[%s18081_s15 + $0x148] sm:$0xff]  ;;  %v11849_v2 = vld [vmem:[%s18081_s15 + $0x7f0] sm:$0xff]  ;;  %v11843_v49 = vld [vmem:[%s18081_s15 + $0x7c0] sm:$0xff] }
 0x7c4   : > { %12392 = vmatmul.mubr.f32.vlgmr.msra.gmra.mxu0 %v18207_v13  ;;  %14867 = vmatprep.subr.mxu0 %v11818_v25  ;;  %v11420_v7 = vpop.f32.mrf.mxu1  ;;  %v11734_v25 = vld [vmem:[%s18081_s15 + $0x458] sm:$0xff] }
 0x7c5   : > { %12257 = vmatpush1.msra.mxu1 %v11926_v53  ;;  %12320 = vmatprep.mubr.f32.mxu1 %v18251_v5  ;;  %v11543_v56 = vpop.f32.mrf.mxu0  ;;  %v11842_v53 = vld [vmem:[%s18081_s15 + $0x7b8] sm:$0xff]  ;;  %v13210_v7 = vld [vmem:[%s19484_s9] sm:$0xff] }
 0x7c6   : > { %14868 = vmatpush3.msra.mxu0 %v11706_v34  ;;  %12533 = vmatprep.mubr.f32.mxu0 %v18097_v24  ;;  %v11421_v15 = vpop.f32.mrf.mxu1  ;;  %v11905_v24 = vld [vmem:[%s18081_s15 + $0x9b0] sm:$0xff]  ;;  %v11622_v34 = vld [vmem:[%s18081_s15 + $0xd8] sm:$0xff] }
 0x7c7   : > { %12258 = vmatprep.subr.mxu1 %v11920_v27  ;;  %14869 = vmatprep.subr.mxu0 %v11811_v47  ;;  %v11544_v21 = vpop.f32.mrf.mxu0  ;;  %v11836_v27 = vld [vmem:[%s18081_s15 + $0x788] sm:$0xff]  ;;  %v11727_v47 = vld [vmem:[%s18081_s15 + $0x420] sm:$0xff]  ;;  %v11829_v56 = vld [vmem:[%s18081_s15 + $0x750] sm:$0xff] }
 0x7c8   : > { %12259 = vmatpush1.msra.mxu1 %v11919_v23  ;;  %14870 = vmatpush3.msra.mxu0 %v11699_v36  ;;  %v11835_v23 = vld [vmem:[%s18081_s15 + $0x780] sm:$0xff]  ;;  %v11828_v15 = vld [vmem:[%s18081_s15 + $0x748] sm:$0xff]  ;;  %v11822_v21 = vld [vmem:[%s18081_s15 + $0x718] sm:$0xff] }
 0x7c9   : > { %12260 = vmatprep.subr.mxu1 %v11913_v22  ;;  %14871 = vmatprep.subr.mxu0 %v11804_v58  ;;  %v11615_v36 = vld [vmem:[%s18081_s15 + $0xa0] sm:$0xff]  ;;  %v11720_v22 = vld [vmem:[%s18081_s15 + $0x3e8] sm:$0xff] }
 0x7ca   : > { %12261 = vmatpush1.msra.mxu1 %v11912_v59  ;;  %14872 = vmatpush3.msra.mxu0 %v11692_v38  ;;  %v11608_v59 = vld [vmem:[%s18081_s15 + $0x68] sm:$0xff] }
 0x7cb   : > { %12262 = vmatprep.subr.mxu1 %v11906_v17  ;;  %14873 = vmatprep.subr.mxu0 %v11797_v33  ;;  %v11713_v17 = vld [vmem:[%s18081_s15 + $0x3b0] sm:$0xff] }
 0x7cc   : > { %12263 = vmatpush1.msra.mxu1 %v11905_v24  ;;  %14874 = vmatpush3.msra.mxu0 %v11685_v54  ;;  %v11821_v33 = vld [vmem:[%s18081_s15 + $0x710] sm:$0xff]  ;;  %v12039_v54 = vld [vmem:[%s18081_s15 + $0xde0] sm:$0xff] }
 0x7cd   : > { %12264 = vmatprep.subr.mxu1 %v11899_v61  ;;  %14875 = vmatprep.subr.mxu0 %v11790_v11  ;;  %v11601_v24 = vld [vmem:[%s18081_s15 + $0x30] sm:$0xff]  ;;  %v12038_v61 = vld [vmem:[%s18081_s15 + $0xdd8] sm:$0xff]  ;;  %v18553_v11 = vadd.f32 %v18474_v39, %v18348_v28 }
 0x7ce   : > { %12265 = vmatpush1.msra.mxu1 %v11898_v19  ;;  %14876 = vmatpush3.msra.mxu0 %v11678_v1  ;;  %v12032_v19 = vld [vmem:[%s18081_s15 + $0xda8] sm:$0xff]  ;;  %v15400_v1 = vld [vmem:[%s18081_s15 + $0x350] sm:$0xff]  ;;  %v15402_v28 = vld [vmem:[%s18081_s15 + $0x318] sm:$0xff] }
 0x7cf   : > { %12266 = vmatprep.subr.mxu1 %v11892_v16  ;;  %14877 = vmatprep.subr.mxu0 %v11783_v3  ;;  %v12031_v16 = vld [vmem:[%s18081_s15 + $0xda0] sm:$0xff]  ;;  %v15401_v3 = vld [vmem:[%s18081_s15 + $0x348] sm:$0xff]  ;;  %v15403_v39 = vld [vmem:[%s18081_s15 + $0x310] sm:$0xff] }
 0x7d0   : > { %12267 = vmatpush1.msra.mxu1 %v11891_v40  ;;  %14878 = vmatpush3.msra.mxu0 %v11671_v26  ;;  %v12025_v40 = vld [vmem:[%s18081_s15 + $0xd70] sm:$0xff]  ;;  %v12018_v26 = vld [vmem:[%s18081_s15 + $0xd38] sm:$0xff] }
 0x7d1   : > { %12268 = vmatprep.subr.mxu1 %v11885_v57  ;;  %14879 = vmatprep.subr.mxu0 %v11776_v30  ;;  %v15404_v57 = vld [vmem:[%s18081_s15 + $0x2e0] sm:$0xff]  ;;  %v12017_v30 = vld [vmem:[%s18081_s15 + $0xd30] sm:$0xff] }
 0x7d2   : > { %12269 = vmatpush1.msra.mxu1 %v11884_v50  ;;  %14880 = vmatpush3.msra.mxu0 %v11664_v8  ;;  %v15405_v50 = vld [vmem:[%s18081_s15 + $0x2d8] sm:$0xff]  ;;  %v12011_v8 = vld [vmem:[%s18081_s15 + $0xd00] sm:$0xff] }
 0x7d3   : > { %12270 = vmatprep.subr.mxu1 %v11878_v31  ;;  %14881 = vmatprep.subr.mxu0 %v11769_v63  ;;  %v15406_v31 = vld [vmem:[%s18081_s15 + $0x2a8] sm:$0xff]  ;;  %v12010_v63 = vld [vmem:[%s18081_s15 + $0xcf8] sm:$0xff] }
 0x7d4   : > { %12271 = vmatpush1.msra.mxu1 %v11877_v10  ;;  %14882 = vmatpush3.msra.mxu0 %v11657_v18  ;;  %v15407_v10 = vld [vmem:[%s18081_s15 + $0x2a0] sm:$0xff]  ;;  %v12004_v18 = vld [vmem:[%s18081_s15 + $0xcc8] sm:$0xff] }
 0x7d5   : > { %12272 = vmatprep.subr.mxu1 %v11871_v4  ;;  %14883 = vmatprep.subr.mxu0 %v11762_v12  ;;  %v15408_v4 = vld [vmem:[%s18081_s15 + $0x270] sm:$0xff]  ;;  %v12003_v12 = vld [vmem:[%s18081_s15 + $0xcc0] sm:$0xff] }
 0x7d6   : > { %12273 = vmatpush1.msra.mxu1 %v11870_v29  ;;  %14884 = vmatpush3.msra.mxu0 %v11650_v37  ;;  %v15409_v29 = vld [vmem:[%s18081_s15 + $0x268] sm:$0xff]  ;;  %v11997_v37 = vld [vmem:[%s18081_s15 + $0xc90] sm:$0xff] }
 0x7d7   : > { %12274 = vmatprep.subr.mxu1 %v11864_v14  ;;  %14885 = vmatprep.subr.mxu0 %v11755_v55  ;;  %v15410_v14 = vld [vmem:[%s18081_s15 + $0x238] sm:$0xff]  ;;  %v11996_v55 = vld [vmem:[%s18081_s15 + $0xc88] sm:$0xff] }
 0x7d8   : > { %12275 = vmatpush1.msra.mxu1 %v11863_v45  ;;  %14886 = vmatpush3.msra.mxu0 %v11643_v43  ;;  %v15411_v45 = vld [vmem:[%s18081_s15 + $0x230] sm:$0xff]  ;;  %v11990_v43 = vld [vmem:[%s18081_s15 + $0xc58] sm:$0xff] }
 0x7d9   : > { %12276 = vmatprep.subr.mxu1 %v11857_v9  ;;  %14887 = vmatprep.subr.mxu0 %v11748_v44  ;;  %v15412_v9 = vld [vmem:[%s18081_s15 + $0x200] sm:$0xff]  ;;  %v11989_v44 = vld [vmem:[%s18081_s15 + $0xc50] sm:$0xff] }
 0x7da   : > { %12277 = vmatpush1.msra.mxu1 %v11856_v60  ;;  %14888 = vmatpush3.msra.mxu0 %v11636_v48  ;;  %v15413_v60 = vld [vmem:[%s18081_s15 + $0x1f8] sm:$0xff]  ;;  %v11983_v48 = vld [vmem:[%s18081_s15 + $0xc20] sm:$0xff] }
 0x7db   : > { %12278 = vmatprep.subr.mxu1 %v11850_v20  ;;  %14889 = vmatprep.subr.mxu0 %v11741_v35  ;;  %v15414_v20 = vld [vmem:[%s18081_s15 + $0x1c8] sm:$0xff]  ;;  %v11982_v35 = vld [vmem:[%s18081_s15 + $0xc18] sm:$0xff] }
 0x7dc   : > { %12279 = vmatpush1.msra.mxu1 %v11849_v2  ;;  %14890 = vmatpush3.msra.mxu0 %v11629_v51  ;;  %v15415_v2 = vld [vmem:[%s18081_s15 + $0x1c0] sm:$0xff]  ;;  %v11976_v51 = vld [vmem:[%s18081_s15 + $0xbe8] sm:$0xff] }
 0x7dd   : > { %12280 = vmatprep.subr.mxu1 %v11843_v49  ;;  %14891 = vmatprep.subr.mxu0 %v11734_v25  ;;  %v15416_v49 = vld [vmem:[%s18081_s15 + $0x190] sm:$0xff]  ;;  %v11975_v25 = vld [vmem:[%s18081_s15 + $0xbe0] sm:$0xff] }
 0x7de   : > { %12281 = vmatpush1.msra.mxu1 %v11842_v53  ;;  %14892 = vmatpush3.msra.mxu0 %v11622_v34  ;;  %v13215_v58 = vpop.xlane.xlu0 %13214  ;;  %v15417_v53 = vld [vmem:[%s16228_s14 + $0x18] sm:$0x77]  ;;  %s15967_s14 = smov [#allocation10]  }
 0x7df   : > { %12282 = vmatprep.subr.mxu1 %v11836_v27  ;;  %14893 = vmatprep.subr.mxu0 %v11727_v47  ;;  %v13216_v38 = vadd.f32 %v13215_v58, %v13210_v7  ;;  %v8326_v34 = vrot.slane %v15417_v53, %v17828_v62  ;;  %v15418_v27 = vld [vmem:[%s18081_s15 + $0x188] sm:$0xff]  ;;  %v11969_v47 = vld [vmem:[%s18081_s15 + $0xbb0] sm:$0xff]  ;;  %v15419_v7 = vld [vmem:[%s18081_s15 + $0x158] sm:$0xff]  ;;  %s13226_s23 = sshll.u32 %s15967_s14, 4  ;;  %s13227_s23 = int_to_ptr.vmem [resolvable:$true] %s13226_s23 }
 0x7e0   : > { %12283 = vmatpush1.msra.mxu1 %v11835_v23  ;;  %14894 = vmatpush3.msra.mxu0 %v11615_v36  ;;  %v11968_v23 = vld [vmem:[%s18081_s15 + $0xba8] sm:$0xff]  ;;  %v8330_v36 = vrot.slane %v15417_v53, %v17832_v0  ;;  %v15421_v58 = vld [vmem:[%s18081_s15 + $0x120] sm:$0xff]  ;;  %v11894_v53 = vld [vmem:[%s18081_s15 + $0x958] sm:$0xff]  ;;  %s15888_s20 = scalar_lea.vmem %s13227_s23, 896  ;;  %p15895_p1 = scmp.lt.s32.totalorder %s13227_s23, %s13227_s23 }
 0x7e1   : > { %12284 = vmatprep.subr.mxu1 %v11829_v56  ;;  %14895 = vmatprep.subr.mxu0 %v11720_v22  ;;  %13218 = vst.msk [vmem:[%s19484_s9] sm:$0xff] %vm13217_vm3, %v13216_v38  ;;  %v15420_v56 = vld [vmem:[%s18081_s15 + $0x150] sm:$0xff]  ;;  %v11962_v22 = vld [vmem:[%s18081_s15 + $0xb78] sm:$0xff]  ;;  %v15423_v0 = vld [vmem:[%s18081_s15 + $0xe8] sm:$0xff]  ;;  %p15889_p11 = scmp.ne.s32.totalorder %s13227_s23, %s15888_s20  ;;  %p15896_p13 = scmp.lt.s32.totalorder %s15888_s20, %s15888_s20 }
 0x7e2   : > { %12285 = vmatpush1.msra.mxu1 %v11828_v15  ;;  %14896 = vmatpush3.msra.mxu0 %v11608_v59  ;;  %v11961_v15 = vld [vmem:[%s18081_s15 + $0xb70] sm:$0xff]  ;;  %v8366_v59 = vrot.slane %v8326_v34, %v17828_v62  ;;  %v15422_v38 = vld [vmem:[%s18081_s15 + $0x118] sm:$0xff] }
 0x7e3   : > { %12286 = vmatprep.subr.mxu1 %v11822_v21  ;;  %14897 = vmatprep.subr.mxu0 %v11713_v17  ;;  %v11955_v21 = vld [vmem:[%s18081_s15 + $0xb40] sm:$0xff]  ;;  %v11954_v17 = vld [vmem:[%s18081_s15 + $0xb38] sm:$0xff]  ;;  %v15441_v34 = vld [vmem:[%s18081_s15 + $0x5f0] sm:$0xff]  ;;  %p15890_p12 = pnand %p15889_p11, %p15038_p10  ;;  %p15897_p7 = por %p15896_p13, %p15895_p1 }
 0x7e4   : > { %12287 = vmatpush1.msra.mxu1 %v11821_v33  ;;  %14898 = vmatpush3.msra.mxu0 %v11601_v24  ;;  %v8370_v33 = vrot.slane %v8330_v36, %v17828_v62  ;;  %v15424_v24 = vld [vmem:[%s18081_s15 + $0xe0] sm:$0xff]  ;;  %v15427_v62 = vld [vmem:[%s18081_s15 + $0x78] sm:$0xff] }
 0x7e5   : > { %12288 = vmatprep.subr.mxu1 %v12039_v54  ;;  %12534 = vmatmul.mubr.f32.vlgmr.msra.gmra.mxu0 %v18207_v13  ;;  %v12024_v13 = vld [vmem:[%s18081_s15 + $0xd68] sm:$0xff]  ;;  %v11886_v36 = vld [vmem:[%s18081_s15 + $0x918] sm:$0xff]  ;;  %p15891_p2 = pneg %p15890_p12 }
 0x7e6   : > { %12609 = vmatprep.subr.mxu0 %v15400_v1  ;;  %12289 = vmatpush2.msra.mxu1 %v12038_v61  ;;  %v11948_v54 = vld [vmem:[%s18081_s15 + $0xb08] sm:$0xff]  ;;  %v15425_v61 = vld [vmem:[%s18081_s15 + $0xb0] sm:$0xff]  ;;  %v11458_v1 = vadd.f32 %v18327_v52, %v8366_v59  ;;  %v11934_v52 = vld [vmem:[%s18081_s15 + $0xa98] sm:$0xff] }
 0x7e7   : > { %12610 = vmatpush1.msra.mxu0 %v15401_v3  ;;  %12673 = vmatprep.mubr.f32.mxu0 %v18553_v11  ;;  %v11941_v3 = vld [vmem:[%s18081_s15 + $0xad0] sm:$0xff]  ;;  %v15446_v59 = vld [vmem:[%s18081_s15 + $0x578] sm:$0xff]  ;;  %p15898_p0 = pnand %p15897_p7, %p15891_p2 }
 0x7e8   : > { %12290 = vmatprep.subr.mxu1 %v12032_v19  ;;  %12611 = vmatprep.subr.mxu0 %v15402_v28  ;;  %v11947_v19 = vld [vmem:[%s18081_s15 + $0xb00] sm:$0xff] }
 0x7e9   : > { %12291 = vmatpush2.msra.mxu1 %v12031_v16  ;;  %12612 = vmatpush1.msra.mxu0 %v15403_v39  ;;  %v15426_v16 = vld [vmem:[%s18081_s15 + $0xa8] sm:$0xff]  ;;  %v15428_v39 = vld [vmem:[%s18081_s15 + $0x70] sm:$0xff] }
 0x7ea   : > { %12292 = vmatprep.subr.mxu1 %v12025_v40  ;;  %12613 = vmatprep.subr.mxu0 %v15404_v57  ;;  %v11940_v40 = vld [vmem:[%s18081_s15 + $0xac8] sm:$0xff]  ;;  %v15429_v57 = vld [vmem:[%s18081_s15 + $0x40] sm:$0xff] }
 0x7eb   : > { %12293 = vmatpush2.msra.mxu1 %v12024_v13  ;;  %12614 = vmatpush1.msra.mxu0 %v15405_v50  ;;  %v11460_v13 = vadd.f32 %v18335_v46, %v8370_v33  ;;  %v18669_v33 = vld [vmem:[%s18081_s15 + $0x878] sm:$0xff] }
 0x7ec   : > { %12294 = vmatprep.subr.mxu1 %v12018_v26  ;;  %12615 = vmatprep.subr.mxu0 %v15406_v31  ;;  %v11929_v31 = vld [vmem:[%s18081_s15 + $0xa70] sm:$0xff] }
 0x7ed   : > { %12295 = vmatpush2.msra.mxu1 %v12017_v30  ;;  %12616 = vmatpush1.msra.mxu0 %v15407_v10  ;;  %v11933_v30 = vld [vmem:[%s18081_s15 + $0xa90] sm:$0xff]  ;;  %v15431_v10 = vld [vmem:[%s18081_s15 + $0x8] sm:$0xff] }
 0x7ee   : > { %12296 = vmatprep.subr.mxu1 %v12011_v8  ;;  %12617 = vmatprep.subr.mxu0 %v15408_v4  ;;  %v15430_v8 = vld [vmem:[%s18081_s15 + $0x38] sm:$0xff] }
 0x7ef   : > { %12297 = vmatpush2.msra.mxu1 %v12010_v63  ;;  %12618 = vmatpush1.msra.mxu0 %v15409_v29 }
 0x7f0   : > { %12298 = vmatprep.subr.mxu1 %v12004_v18  ;;  %12619 = vmatprep.subr.mxu0 %v15410_v14  ;;  %v11928_v18 = vld [vmem:[%s18081_s15 + $0xa68] sm:$0xff]  ;;  %v15433_v14 = vld [vmem:[%s18081_s15 + $0x6d0] sm:$0xff] }
 0x7f1   : > { %12299 = vmatpush2.msra.mxu1 %v12003_v12  ;;  %12620 = vmatpush1.msra.mxu0 %v15411_v45  ;;  %v15432_v12 = vld [vmem:[%s18081_s15] sm:$0xff]  ;;  %v15434_v45 = vld [vmem:[%s18081_s15 + $0x6c8] sm:$0xff] }
 0x7f2   : > { %12300 = vmatprep.subr.mxu1 %v11997_v37  ;;  %12621 = vmatprep.subr.mxu0 %v15412_v9  ;;  %v11914_v9 = vld [vmem:[%s18081_s15 + $0x9f8] sm:$0xff] }
 0x7f3   : > { %12301 = vmatpush2.msra.mxu1 %v11996_v55  ;;  %12622 = vmatpush1.msra.mxu0 %v15413_v60  ;;  %v11921_v55 = vld [vmem:[%s18081_s15 + $0xa30] sm:$0xff]  ;;  %v11908_v60 = vld [vmem:[%s18081_s15 + $0x9c8] sm:$0xff] }
 0x7f4   : > { %12302 = vmatprep.subr.mxu1 %v11990_v43  ;;  %12623 = vmatprep.subr.mxu0 %v15414_v20  ;;  %v15435_v43 = vld [vmem:[%s18081_s15 + $0x698] sm:$0xff]  ;;  %v11907_v20 = vld [vmem:[%s18081_s15 + $0x9c0] sm:$0xff] }
 0x7f5   : > { %12303 = vmatpush2.msra.mxu1 %v11989_v44  ;;  %12624 = vmatpush1.msra.mxu0 %v15415_v2  ;;  %v15436_v44 = vld [vmem:[%s18081_s15 + $0x690] sm:$0xff] }
 0x7f6   : > { %12304 = vmatprep.subr.mxu1 %v11983_v48  ;;  %12625 = vmatprep.subr.mxu0 %v15416_v49  ;;  %v15437_v48 = vld [vmem:[%s18081_s15 + $0x660] sm:$0xff]  ;;  %v11901_v2 = vld [vmem:[%s18081_s15 + $0x990] sm:$0xff]  ;;  %v11900_v49 = vld [vmem:[%s18081_s15 + $0x988] sm:$0xff] }
 0x7f7   : > { %12305 = vmatpush2.msra.mxu1 %v11982_v35  ;;  %12626 = vmatpush1.msra.mxu0 %v15418_v27  ;;  %v15438_v35 = vld [vmem:[%s18081_s15 + $0x658] sm:$0xff]  ;;  %v11893_v27 = vld [vmem:[%s18081_s15 + $0x950] sm:$0xff] }
 0x7f8   : > { %12306 = vmatprep.subr.mxu1 %v11976_v51  ;;  %12627 = vmatprep.subr.mxu0 %v15419_v7  ;;  %v15439_v51 = vld [vmem:[%s18081_s15 + $0x628] sm:$0xff]  ;;  %v11887_v7 = vld [vmem:[%s18081_s15 + $0x920] sm:$0xff] }
 0x7f9   : > { %12307 = vmatpush2.msra.mxu1 %v11975_v25  ;;  %12628 = vmatpush1.msra.mxu0 %v15420_v56  ;;  %v15440_v25 = vld [vmem:[%s18081_s15 + $0x620] sm:$0xff]  ;;  %v15444_v56 = vld [vmem:[%s18081_s15 + $0x5b0] sm:$0xff] }
 0x7fa   : > { %12308 = vmatprep.subr.mxu1 %v11969_v47  ;;  %12629 = vmatprep.subr.mxu0 %v15421_v58  ;;  %v15442_v47 = vld [vmem:[%s18081_s15 + $0x5e8] sm:$0xff]  ;;  %v15445_v58 = vld [vmem:[%s18081_s15 + $0x580] sm:$0xff] }
 0x7fb   : > { %12309 = vmatpush2.msra.mxu1 %v11968_v23  ;;  %12630 = vmatpush1.msra.mxu0 %v15422_v38  ;;  %v15443_v23 = vld [vmem:[%s18081_s15 + $0x5b8] sm:$0xff]  ;;  %v11873_v38 = vld [vmem:[%s18081_s15 + $0x8b0] sm:$0xff] }
 0x7fc   : > { %12310 = vmatprep.subr.mxu1 %v11962_v22  ;;  %12631 = vmatprep.subr.mxu0 %v15423_v0  ;;  %v11880_v22 = vld [vmem:[%s18081_s15 + $0x8e8] sm:$0xff] }
 0x7fd   : > { %12311 = vmatpush2.msra.mxu1 %v11961_v15  ;;  %12632 = vmatpush1.msra.mxu0 %v15424_v24  ;;  %v11879_v15 = vld [vmem:[%s18081_s15 + $0x8e0] sm:$0xff]  ;;  %v11872_v0 = vld [vmem:[%s18081_s15 + $0x8a8] sm:$0xff]  ;;  %v15449_v24 = vld [vmem:[%s18081_s15 + $0x510] sm:$0xff] }
 0x7fe   : > { %12312 = vmatprep.subr.mxu1 %v11955_v21  ;;  %12633 = vmatprep.subr.mxu0 %v15425_v61  ;;  %v15447_v21 = vld [vmem:[%s18081_s15 + $0x548] sm:$0xff] }
 0x7ff   : > { %12313 = vmatpush2.msra.mxu1 %v11954_v17  ;;  %12634 = vmatpush1.msra.mxu0 %v15426_v16  ;;  %v15448_v17 = vld [vmem:[%s18081_s15 + $0x540] sm:$0xff]  ;;  %v15450_v61 = vld [vmem:[%s18081_s15 + $0x508] sm:$0xff]  ;;  %v18682_v16 = vld [vmem:[%s18081_s15 + $0x838] sm:$0xff] }
 0x800   : > { %12314 = vmatprep.subr.mxu1 %v11948_v54  ;;  %12635 = vmatprep.subr.mxu0 %v15427_v62  ;;  %v11498_v28 = vpop.f32.mrf.mxu1  ;;  %v18673_v54 = vld [vmem:[%s18081_s15 + $0x870] sm:$0xff]  ;;  %v18687_v62 = vld [vmem:[%s18081_s15 + $0x808] sm:$0xff] }
 0x801   : > { %12315 = vmatpush2.msra.mxu1 %v11947_v19  ;;  %12636 = vmatpush1.msra.mxu0 %v15428_v39  ;;  %v11499_v26 = vadd.f32 %v11498_v28, %v11458_v1  ;;  %v18677_v19 = vld [vmem:[%s18081_s15 + $0x840] sm:$0xff]  ;;  %v15451_v1 = vld [vmem:[%s18081_s15 + $0x4d8] sm:$0xff]  ;;  %v18697_v39 = vld [vmem:[%s18081_s15 + $0x7d0] sm:$0xff] }
 0x802   : > { %12316 = vmatprep.subr.mxu1 %v11941_v3  ;;  %12637 = vmatprep.subr.mxu0 %v15429_v57  ;;  %v11500_v50 = vpop.f32.mrf.mxu1  ;;  %v15452_v3 = vld [vmem:[%s18081_s15 + $0x4d0] sm:$0xff]  ;;  %v18692_v28 = vld [vmem:[%s18081_s15 + $0x800] sm:$0xff] }
 0x803   : > { %12317 = vmatpush2.msra.mxu1 %v11940_v40  ;;  %12638 = vmatpush1.msra.mxu0 %v15430_v8  ;;  %v11501_v46 = vadd.f32 %v11500_v50, %v11460_v13  ;;  %v18626_v63 = vadd.f32 %v18470_v41, %v11499_v26  ;;  %v11922_v41 = vld [vmem:[%s18081_s15 + $0xa38] sm:$0xff]  ;;  %v15453_v40 = vld [vmem:[%s18081_s15 + $0x4a0] sm:$0xff]  ;;  %v18702_v26 = vld [vmem:[%s18081_s15 + $0x7c8] sm:$0xff] }
 0x804   : > { %12318 = vmatprep.subr.mxu1 %v11934_v52  ;;  %12639 = vmatprep.subr.mxu0 %v15431_v10  ;;  %v11502_v4 = vpop.f32.mrf.mxu1  ;;  %v15454_v13 = vld [vmem:[%s18081_s15 + $0x498] sm:$0xff]  ;;  %v15455_v52 = vld [vmem:[%s18081_s15 + $0x468] sm:$0xff]  ;;  %v15456_v57 = vld [vmem:[%s18081_s15 + $0x460] sm:$0xff] }
 0x805   : > { %12319 = vmatpush2.msra.mxu1 %v11933_v30  ;;  %12640 = vmatpush1.msra.mxu0 %v15432_v12  ;;  %v18632_v29 = vadd.f32 %v18478_v6, %v11501_v46  ;;  %v11915_v6 = vld [vmem:[%s18081_s15 + $0xa00] sm:$0xff]  ;;  %v18707_v30 = vld [vmem:[%s18081_s15 + $0x798] sm:$0xff]  ;;  %v15457_v50 = vld [vmem:[%s18081_s15 + $0x430] sm:$0xff] }
 0x806   : > { %12321 = vmatmul.mubr.f32.vlgmr.msra.gmra.mxu1 %v18244_v32  ;;  %12398 = vmatprep.subr.mxu1 %v11929_v31  ;;  %v11503_v37 = vpop.f32.mrf.mxu1  ;;  %v18712_v8 = vld [vmem:[%s18081_s15 + $0x790] sm:$0xff]  ;;  %v15458_v31 = vld [vmem:[%s18081_s15 + $0x428] sm:$0xff]  ;;  %v18717_v46 = vld [vmem:[%s18081_s15 + $0x760] sm:$0xff] }
 0x807   : > { %12641 = vmatprep.subr.mxu0 %v15433_v14  ;;  %12399 = vmatpush1.msra.mxu1 %v11928_v18  ;;  %v15459_v10 = vld [vmem:[%s18081_s15 + $0x3f8] sm:$0xff]  ;;  %v15460_v4 = vld [vmem:[%s18081_s15 + $0x3f0] sm:$0xff]  ;;  %v18727_v12 = vld [vmem:[%s18081_s15 + $0x728] sm:$0xff] }
 0x808   : > { %12462 = vmatprep.mubr.f32.mxu1 %v18251_v5  ;;  %12642 = vmatpush2.msra.mxu0 %v15434_v45  ;;  %v18722_v18 = vld [vmem:[%s18081_s15 + $0x758] sm:$0xff]  ;;  %v18732_v37 = vld [vmem:[%s18081_s15 + $0x720] sm:$0xff]  ;;  %v15463_v45 = vld [vmem:[%s18081_s15 + $0x388] sm:$0xff] }
 0x809   : > { %12400 = vmatprep.subr.mxu1 %v11922_v41  ;;  %12643 = vmatprep.subr.mxu0 %v15435_v43  ;;  %v15461_v41 = vld [vmem:[%s18081_s15 + $0x3c0] sm:$0xff]  ;;  %v15462_v14 = vld [vmem:[%s18081_s15 + $0x3b8] sm:$0xff] }
 0x80a   : > { %12401 = vmatpush1.msra.mxu1 %v11921_v55  ;;  %12644 = vmatpush2.msra.mxu0 %v15436_v44  ;;  %v18737_v55 = vld [vmem:[%s18081_s15 + $0xdf0] sm:$0xff]  ;;  %v15464_v43 = vld [vmem:[%s18081_s15 + $0x380] sm:$0xff] }
 0x80b   : > { %12402 = vmatprep.subr.mxu1 %v11915_v6  ;;  %12645 = vmatprep.subr.mxu0 %v15437_v48  ;;  %v18742_v6 = vld [vmem:[%s18081_s15 + $0xde8] sm:$0xff]  ;;  %v15465_v44 = vld [vmem:[%s18081_s15 + $0x360] sm:$0xff]  ;;  %v15466_v48 = vld [vmem:[%s18081_s15 + $0x358] sm:$0xff] }
 0x80c   : > { %12403 = vmatpush1.msra.mxu1 %v11914_v9  ;;  %12646 = vmatpush2.msra.mxu0 %v15438_v35  ;;  %v18749_v9 = vld [vmem:[%s18081_s15 + $0xdb8] sm:$0xff]  ;;  %v15467_v35 = vld [vmem:[%s18081_s15 + $0x328] sm:$0xff] }
 0x80d   : > { %12404 = vmatprep.subr.mxu1 %v11908_v60  ;;  %12647 = vmatprep.subr.mxu0 %v15439_v51  ;;  %v18754_v60 = vld [vmem:[%s18081_s15 + $0xdb0] sm:$0xff]  ;;  %v15468_v51 = vld [vmem:[%s18081_s15 + $0x320] sm:$0xff] }
 0x80e   : > { %12405 = vmatpush1.msra.mxu1 %v11907_v20  ;;  %12648 = vmatpush2.msra.mxu0 %v15440_v25  ;;  %v18759_v20 = vld [vmem:[%s18081_s15 + $0xd80] sm:$0xff]  ;;  %v15469_v25 = vld [vmem:[%s18081_s15 + $0x2f0] sm:$0xff] }
 0x80f   : > { %12406 = vmatprep.subr.mxu1 %v11901_v2  ;;  %12649 = vmatprep.subr.mxu0 %v15441_v34  ;;  %v18764_v2 = vld [vmem:[%s18081_s15 + $0xd78] sm:$0xff]  ;;  %v15470_v34 = vld [vmem:[%s18081_s15 + $0x2e8] sm:$0xff] }
 0x810   : > { %12407 = vmatpush1.msra.mxu1 %v11900_v49  ;;  %12650 = vmatpush2.msra.mxu0 %v15442_v47  ;;  %v18769_v49 = vld [vmem:[%s18081_s15 + $0xd48] sm:$0xff]  ;;  %v15471_v47 = vld [vmem:[%s18081_s15 + $0x2b8] sm:$0xff] }
 0x811   : > { %12408 = vmatprep.subr.mxu1 %v11894_v53  ;;  %12651 = vmatprep.subr.mxu0 %v15443_v23  ;;  %v18774_v53 = vld [vmem:[%s18081_s15 + $0xd40] sm:$0xff]  ;;  %v15472_v23 = vld [vmem:[%s18081_s15 + $0x2b0] sm:$0xff] }
 0x812   : > { %12409 = vmatpush1.msra.mxu1 %v11893_v27  ;;  %12652 = vmatpush2.msra.mxu0 %v15444_v56  ;;  %v18779_v27 = vld [vmem:[%s18081_s15 + $0xd10] sm:$0xff]  ;;  %v15473_v56 = vld [vmem:[%s18081_s15 + $0x280] sm:$0xff] }
 0x813   : > { %12410 = vmatprep.subr.mxu1 %v11887_v7  ;;  %12653 = vmatprep.subr.mxu0 %v15445_v58  ;;  %v18784_v7 = vld [vmem:[%s18081_s15 + $0xd08] sm:$0xff]  ;;  %v15474_v58 = vld [vmem:[%s18081_s15 + $0x278] sm:$0xff] }
 0x814   : > { %12411 = vmatpush1.msra.mxu1 %v11886_v36  ;;  %12654 = vmatpush2.msra.mxu0 %v15446_v59  ;;  %v18789_v36 = vld [vmem:[%s18081_s15 + $0xcd8] sm:$0xff]  ;;  %v15475_v59 = vld [vmem:[%s18081_s15 + $0x248] sm:$0xff] }
 0x815   : > { %12412 = vmatprep.subr.mxu1 %v11880_v22  ;;  %12655 = vmatprep.subr.mxu0 %v15447_v21  ;;  %v18794_v22 = vld [vmem:[%s18081_s15 + $0xcd0] sm:$0xff]  ;;  %v15476_v21 = vld [vmem:[%s18081_s15 + $0x240] sm:$0xff] }
 0x816   : > { %12413 = vmatpush1.msra.mxu1 %v11879_v15  ;;  %12656 = vmatpush2.msra.mxu0 %v15448_v17  ;;  %v18799_v15 = vld [vmem:[%s18081_s15 + $0xca0] sm:$0xff]  ;;  %v15477_v17 = vld [vmem:[%s18081_s15 + $0x210] sm:$0xff] }
 0x817   : > { %12414 = vmatprep.subr.mxu1 %v11873_v38  ;;  %12657 = vmatprep.subr.mxu0 %v15449_v24  ;;  %v18804_v38 = vld [vmem:[%s18081_s15 + $0xc98] sm:$0xff]  ;;  %v18814_v24 = vld [vmem:[%s18081_s15 + $0xc60] sm:$0xff] }
 0x818   : > { %12415 = vmatpush1.msra.mxu1 %v11872_v0  ;;  %12658 = vmatpush2.msra.mxu0 %v15450_v61  ;;  %v18809_v0 = vld [vmem:[%s18081_s15 + $0xc68] sm:$0xff] }
 0x819   : > { %12416 = vmatprep.subr.mxu1 %v18669_v33  ;;  %12659 = vmatprep.subr.mxu0 %v15451_v1  ;;  %v15478_v61 = vld [vmem:[%s18081_s15 + $0x208] sm:$0xff]  ;;  %v18819_v1 = vld [vmem:[%s18081_s15 + $0xc30] sm:$0xff] }
 0x81a   : > { %12417 = vmatpush1.msra.mxu1 %v18673_v54  ;;  %12660 = vmatpush2.msra.mxu0 %v15452_v3  ;;  %v15479_v3 = vld [vmem:[%s18081_s15 + $0x1d8] sm:$0xff] }
 0x81b   : > { %12418 = vmatprep.subr.mxu1 %v18677_v19  ;;  %12661 = vmatprep.subr.mxu0 %v15453_v40  ;;  %v18824_v40 = vld [vmem:[%s18081_s15 + $0xc28] sm:$0xff] }
 0x81c   : > { %12419 = vmatpush1.msra.mxu1 %v18682_v16  ;;  %12662 = vmatpush2.msra.mxu0 %v15454_v13  ;;  %v15480_v13 = vld [vmem:[%s18081_s15 + $0x1d0] sm:$0xff] }
 0x81d   : > { %12420 = vmatprep.subr.mxu1 %v18687_v62  ;;  %12663 = vmatprep.subr.mxu0 %v15455_v52  ;;  %v18829_v52 = vld [vmem:[%s18081_s15 + $0xbf8] sm:$0xff] }
 0x81e   : > { %12421 = vmatpush1.msra.mxu1 %v18692_v28  ;;  %12664 = vmatpush2.msra.mxu0 %v15456_v57  ;;  %v15481_v57 = vld [vmem:[%s18081_s15 + $0x1a0] sm:$0xff] }
 0x81f   : > { %12422 = vmatprep.subr.mxu1 %v18697_v39  ;;  %12665 = vmatprep.subr.mxu0 %v15457_v50  ;;  %v18834_v50 = vld [vmem:[%s18081_s15 + $0xbf0] sm:$0xff] }
 0x820   : > { %12423 = vmatpush1.msra.mxu1 %v18702_v26  ;;  %12666 = vmatpush2.msra.mxu0 %v15458_v31  ;;  %v15482_v31 = vld [vmem:[%s18081_s15 + $0x198] sm:$0xff] }
 0x821   : > { %12424 = vmatprep.subr.mxu1 %v18707_v30  ;;  %12667 = vmatprep.subr.mxu0 %v15459_v10  ;;  %v18839_v10 = vld [vmem:[%s18081_s15 + $0xbc0] sm:$0xff] }
 0x822   : > { %12425 = vmatpush1.msra.mxu1 %v18712_v8  ;;  %12668 = vmatpush2.msra.mxu0 %v15460_v4  ;;  %v15483_v4 = vld [vmem:[%s18081_s15 + $0x168] sm:$0xff] }
 0x823   : > { %12426 = vmatprep.subr.mxu1 %v18717_v46  ;;  %12669 = vmatprep.subr.mxu0 %v15461_v41  ;;  %v18844_v41 = vld [vmem:[%s18081_s15 + $0xbb8] sm:$0xff] }
 0x824   : > { %12427 = vmatpush1.msra.mxu1 %v18722_v18  ;;  %12670 = vmatpush2.msra.mxu0 %v15462_v14  ;;  %v15484_v14 = vld [vmem:[%s18081_s15 + $0x160] sm:$0xff] }
 0x825   : > { %12428 = vmatprep.subr.mxu1 %v18727_v12  ;;  %12671 = vmatprep.subr.mxu0 %v15463_v45  ;;  %v18849_v45 = vld [vmem:[%s18081_s15 + $0xb88] sm:$0xff] }
 0x826   : > { %12429 = vmatpush1.msra.mxu1 %v18732_v37  ;;  %12672 = vmatpush2.msra.mxu0 %v15464_v43  ;;  %v15485_v43 = vld [vmem:[%s18081_s15 + $0x130] sm:$0xff] }
 0x827   : > { %12430 = vmatprep.subr.mxu1 %v18737_v55  ;;  %12674 = vmatmul.mubr.f32.vlgmr.msra.gmra.mxu0 %v18468_v42 }
 0x828   : > { %12751 = vmatprep.subr.mxu0 %v15465_v44  ;;  %12431 = vmatpush2.msra.mxu1 %v18742_v6  ;;  %v18854_v44 = vld [vmem:[%s18081_s15 + $0xb80] sm:$0xff] }
 0x829   : > { %12752 = vmatpush1.msra.mxu0 %v15466_v48  ;;  %12815 = vmatprep.mubr.f32.mxu0 %v18553_v11  ;;  %v15486_v48 = vld [vmem:[%s18081_s15 + $0x128] sm:$0xff] }
 0x82a   : > { %12432 = vmatprep.subr.mxu1 %v18749_v9  ;;  %12753 = vmatprep.subr.mxu0 %v15467_v35  ;;  %v18859_v35 = vld [vmem:[%s18081_s15 + $0xb50] sm:$0xff] }
 0x82b   : > { %12433 = vmatpush2.msra.mxu1 %v18754_v60  ;;  %12754 = vmatpush1.msra.mxu0 %v15468_v51  ;;  %v15487_v51 = vld [vmem:[%s18081_s15 + $0xf8] sm:$0xff] }
 0x82c   : > { %12434 = vmatprep.subr.mxu1 %v18759_v20  ;;  %12755 = vmatprep.subr.mxu0 %v15469_v25  ;;  %v18864_v25 = vld [vmem:[%s18081_s15 + $0xb48] sm:$0xff] }
 0x82d   : > { %12435 = vmatpush2.msra.mxu1 %v18764_v2  ;;  %12756 = vmatpush1.msra.mxu0 %v15470_v34  ;;  %v15488_v34 = vld [vmem:[%s18081_s15 + $0xf0] sm:$0xff] }
 0x82e   : > { %12436 = vmatprep.subr.mxu1 %v18769_v49  ;;  %12757 = vmatprep.subr.mxu0 %v15471_v47  ;;  %v18869_v47 = vld [vmem:[%s18081_s15 + $0xb18] sm:$0xff] }
 0x82f   : > { %12437 = vmatpush2.msra.mxu1 %v18774_v53  ;;  %12758 = vmatpush1.msra.mxu0 %v15472_v23  ;;  %v15489_v23 = vld [vmem:[%s18081_s15 + $0xc0] sm:$0xff] }
 0x830   : > { %12438 = vmatprep.subr.mxu1 %v18779_v27  ;;  %12759 = vmatprep.subr.mxu0 %v15473_v56  ;;  %v18874_v56 = vld [vmem:[%s18081_s15 + $0xb10] sm:$0xff] }
 0x831   : > { %12439 = vmatpush2.msra.mxu1 %v18784_v7  ;;  %12760 = vmatpush1.msra.mxu0 %v15474_v58  ;;  %v15490_v58 = vld [vmem:[%s18081_s15 + $0xb8] sm:$0xff] }
 0x832   : > { %12440 = vmatprep.subr.mxu1 %v18789_v36  ;;  %12761 = vmatprep.subr.mxu0 %v15475_v59  ;;  %v18879_v59 = vld [vmem:[%s18081_s15 + $0xae0] sm:$0xff] }
 0x833   : > { %12441 = vmatpush2.msra.mxu1 %v18794_v22  ;;  %12762 = vmatpush1.msra.mxu0 %v15476_v21 }
 0x834   : > { %12442 = vmatprep.subr.mxu1 %v18799_v15  ;;  %12763 = vmatprep.subr.mxu0 %v15477_v17  ;;  %v15491_v17 = vld [vmem:[%s18081_s15 + $0x88] sm:$0xff] }
 0x835   : > { %12443 = vmatpush2.msra.mxu1 %v18804_v38  ;;  %12764 = vmatpush1.msra.mxu0 %v15478_v61  ;;  %v18884_v61 = vld [vmem:[%s18081_s15 + $0xad8] sm:$0xff] }
 0x836   : > { %12444 = vmatprep.subr.mxu1 %v18809_v0  ;;  %12765 = vmatprep.subr.mxu0 %v15479_v3 }
 0x837   : > { %12445 = vmatpush2.msra.mxu1 %v18814_v24  ;;  %12766 = vmatpush1.msra.mxu0 %v15480_v13  ;;  %v15492_v13 = vld [vmem:[%s18081_s15 + $0x80] sm:$0xff] }
 0x838   : > { %12446 = vmatprep.subr.mxu1 %v18819_v1  ;;  %12767 = vmatprep.subr.mxu0 %v15481_v57  ;;  %v18892_v57 = vld [vmem:[%s18081_s15 + $0xaa8] sm:$0xff] }
 0x839   : > { %12447 = vmatpush2.msra.mxu1 %v18824_v40  ;;  %12768 = vmatpush1.msra.mxu0 %v15482_v31 }
 0x83a   : > { %12448 = vmatprep.subr.mxu1 %v18829_v52  ;;  %12769 = vmatprep.subr.mxu0 %v15483_v4  ;;  %v15493_v4 = vld [vmem:[%s18081_s15 + $0x50] sm:$0xff] }
 0x83b   : > { %12449 = vmatpush2.msra.mxu1 %v18834_v50  ;;  %12770 = vmatpush1.msra.mxu0 %v15484_v14  ;;  %v18899_v14 = vld [vmem:[%s18081_s15 + $0xaa0] sm:$0xff] }
 0x83c   : > { %12450 = vmatprep.subr.mxu1 %v18839_v10  ;;  %12771 = vmatprep.subr.mxu0 %v15485_v43  ;;  %v18904_v43 = vld [vmem:[%s18081_s15 + $0xdf8] sm:$0xff] }
 0x83d   : > { %12451 = vmatpush2.msra.mxu1 %v18844_v41  ;;  %12772 = vmatpush1.msra.mxu0 %v15486_v48 }
 0x83e   : > { %12452 = vmatprep.subr.mxu1 %v18849_v45  ;;  %12773 = vmatprep.subr.mxu0 %v15487_v51  ;;  %v15495_v51 = vld [vmem:[%s18081_s15 + $0x18] sm:$0xff] }
 0x83f   : > { %12453 = vmatpush2.msra.mxu1 %v18854_v44  ;;  %12774 = vmatpush1.msra.mxu0 %v15488_v34  ;;  %v18909_v34 = vld [vmem:[%s18081_s15 + $0xa78] sm:$0xff] }
 0x840   : > { %12454 = vmatprep.subr.mxu1 %v18859_v35  ;;  %12775 = vmatprep.subr.mxu0 %v15489_v23  ;;  %v15496_v23 = vld [vmem:[%s18081_s15 + $0x10] sm:$0xff] }
 0x841   : > { %12455 = vmatpush2.msra.mxu1 %v18864_v25  ;;  %12776 = vmatpush1.msra.mxu0 %v15490_v58  ;;  %v11580_v21 = vpop.f32.mrf.mxu1 }
 0x842   : > { %12456 = vmatprep.subr.mxu1 %v18869_v47  ;;  %12777 = vmatprep.subr.mxu0 %v15491_v17  ;;  %v18887_v3 = vadd.f32 %v11580_v21, %v18626_v63  ;;  %v15494_v63 = vld [vmem:[%s18081_s15 + $0x48] sm:$0xff]  ;;  %v18916_v21 = vld [vmem:[%s18081_s15 + $0xdc0] sm:$0xff] }
 0x843   : > { %12457 = vmatpush2.msra.mxu1 %v18874_v56  ;;  %12778 = vmatpush1.msra.mxu0 %v15492_v13  ;;  %v18894_v31 = vpop.f32.mrf.mxu1  ;;  %v15497_v17 = vld [vmem:[%s18081_s15 + $0x6e0] sm:$0xff] }
 0x844   : > { %12458 = vmatprep.subr.mxu1 %v18879_v59  ;;  %12779 = vmatprep.subr.mxu0 %v15493_v4  ;;  %v18921_v13 = vld [vmem:[%s18081_s15 + $0xa40] sm:$0xff]  ;;  %v15498_v4 = vld [vmem:[%s18081_s15 + $0x6d8] sm:$0xff] }
 0x845   : > { %12459 = vmatpush2.msra.mxu1 %v18884_v61  ;;  %12780 = vmatpush1.msra.mxu0 %v15494_v63  ;;  %v11584_v48 = vpop.f32.mrf.mxu1  ;;  %19542 = vst [vmem:[#allocation16_spill] sm:$0xff] %v18921_v13  ;;  %v18926_v63 = vld [vmem:[%s18081_s15 + $0xd88] sm:$0xff] }
 0x846   : > { %12460 = vmatprep.subr.mxu1 %v18892_v57  ;;  %12781 = vmatprep.subr.mxu0 %v15495_v51  ;;  %19543 = vst [vmem:[#allocation17_spill] sm:$0xff] %v18926_v63  ;;  %v15499_v48 = vld [vmem:[%s18081_s15 + $0x6a8] sm:$0xff] }
 0x847   : > { %12461 = vmatpush2.msra.mxu1 %v18899_v14  ;;  %12782 = vmatpush1.msra.mxu0 %v15496_v23  ;;  %v11585_v58 = vpop.f32.mrf.mxu1  ;;  %v18931_v51 = vld [vmem:[%s18081_s15 + $0xa08] sm:$0xff]  ;;  %v15500_v23 = vld [vmem:[%s18081_s15 + $0x6a0] sm:$0xff] }
 0x848   : > { %12463 = vmatmul.mubr.f32.vlgmr.msra.gmra.mxu1 %v18244_v32  ;;  %14902 = vmatprep.subr.mxu1 %v18904_v43  ;;  %19544 = vst [vmem:[#allocation18_spill] sm:$0xff] %v18931_v51  ;;  %v15501_v58 = vld [vmem:[%s18081_s15 + $0x670] sm:$0xff] }
 0x849   : > { %12783 = vmatprep.subr.mxu0 %v15497_v17  ;;  %14903 = vmatpush3.msra.mxu1 %v18909_v34  ;;  %v18941_v17 = vld [vmem:[%s18081_s15 + $0x9d0] sm:$0xff] }
 0x84a   : > { %12603 = vmatprep.mubr.f32.mxu1 %v18251_v5  ;;  %12784 = vmatpush2.msra.mxu0 %v15498_v4  ;;  %v18936_v5 = vld [vmem:[%s18081_s15 + $0xd50] sm:$0xff]  ;;  %19546 = vst [vmem:[#allocation20_spill] sm:$0xff] %v18941_v17  ;;  %v15502_v4 = vld [vmem:[%s18081_s15 + $0x668] sm:$0xff] }
 0x84b   : > { %14904 = vmatprep.subr.mxu1 %v18916_v21  ;;  %12785 = vmatprep.subr.mxu0 %v15499_v48  ;;  %19545 = vst [vmem:[#allocation19_spill] sm:$0xff] %v18936_v5  ;;  %v18946_v48 = vld [vmem:[%s18081_s15 + $0xd18] sm:$0xff] }
 0x84c   : > { %14905 = vmatpush3.msra.mxu1 %v18921_v13  ;;  %12786 = vmatpush2.msra.mxu0 %v15500_v23  ;;  %19547 = vst [vmem:[#allocation21_spill] sm:$0xff] %v18946_v48  ;;  %v15503_v23 = vld [vmem:[%s18081_s15 + $0x638] sm:$0xff]  ;;  %v19051_v13 = vld [vmem:[%s18081_s15 + $0x768] sm:$0xff] }
 0x84d   : > { %14906 = vmatprep.subr.mxu1 %v18926_v63  ;;  %12787 = vmatprep.subr.mxu0 %v15501_v58  ;;  %v18951_v63 = vld [vmem:[%s18081_s15 + $0x998] sm:$0xff]  ;;  %v15504_v58 = vld [vmem:[%s18081_s15 + $0x630] sm:$0xff]  ;;  %19567 = vst [vmem:[#allocation41_spill] sm:$0xff] %v19051_v13 }
 0x84e   : > { %14907 = vmatpush3.msra.mxu1 %v18931_v51  ;;  %12788 = vmatpush2.msra.mxu0 %v15502_v4  ;;  %19548 = vst [vmem:[#allocation22_spill] sm:$0xff] %v18951_v63  ;;  %v18956_v51 = vld [vmem:[%s18081_s15 + $0xce0] sm:$0xff] }
 0x84f   : > { %14908 = vmatprep.subr.mxu1 %v18936_v5  ;;  %12789 = vmatprep.subr.mxu0 %v15503_v23  ;;  %19549 = vst [vmem:[#allocation23_spill] sm:$0xff] %v18956_v51  ;;  %v15505_v4 = vld [vmem:[%s18081_s15 + $0x600] sm:$0xff]  ;;  %v15506_v23 = vld [vmem:[%s18081_s15 + $0x5f8] sm:$0xff] }
 0x850   : > { %14909 = vmatpush3.msra.mxu1 %v18941_v17  ;;  %12790 = vmatpush2.msra.mxu0 %v15504_v58  ;;  %v18961_v5 = vld [vmem:[%s18081_s15 + $0x960] sm:$0xff]  ;;  %v18966_v17 = vld [vmem:[%s18081_s15 + $0xca8] sm:$0xff] }
 0x851   : > { %14910 = vmatprep.subr.mxu1 %v18946_v48  ;;  %12791 = vmatprep.subr.mxu0 %v15505_v4  ;;  %19550 = vst [vmem:[#allocation24_spill] sm:$0xff] %v18961_v5  ;;  %19551 = vst [vmem:[#allocation25_spill] sm:$0xff] %v18966_v17  ;;  %v15507_v58 = vld [vmem:[%s18081_s15 + $0x5c8] sm:$0xff]  ;;  %v15508_v4 = vld [vmem:[%s18081_s15 + $0x5c0] sm:$0xff] }
 0x852   : > { %14911 = vmatpush3.msra.mxu1 %v18951_v63  ;;  %12792 = vmatpush2.msra.mxu0 %v15506_v23  ;;  %v18971_v48 = vld [vmem:[%s18081_s15 + $0x928] sm:$0xff]  ;;  %v18976_v63 = vld [vmem:[%s18081_s15 + $0xc70] sm:$0xff] }
 0x853   : > { %14912 = vmatprep.subr.mxu1 %v18956_v51  ;;  %12793 = vmatprep.subr.mxu0 %v15507_v58  ;;  %19552 = vst [vmem:[#allocation26_spill] sm:$0xff] %v18971_v48  ;;  %19553 = vst [vmem:[#allocation27_spill] sm:$0xff] %v18976_v63  ;;  %v15509_v23 = vld [vmem:[%s18081_s15 + $0x590] sm:$0xff]  ;;  %v15510_v58 = vld [vmem:[%s18081_s15 + $0x588] sm:$0xff] }
 0x854   : > { %14913 = vmatpush3.msra.mxu1 %v18961_v5  ;;  %12794 = vmatpush2.msra.mxu0 %v15508_v4  ;;  %v18981_v51 = vld [vmem:[%s18081_s15 + $0x8f0] sm:$0xff]  ;;  %v18986_v5 = vld [vmem:[%s18081_s15 + $0xc38] sm:$0xff] }
 0x855   : > { %14914 = vmatprep.subr.mxu1 %v18966_v17  ;;  %12795 = vmatprep.subr.mxu0 %v15509_v23  ;;  %19554 = vst [vmem:[#allocation28_spill] sm:$0xff] %v18981_v51  ;;  %19555 = vst [vmem:[#allocation29_spill] sm:$0xff] %v18986_v5  ;;  %v15511_v4 = vld [vmem:[%s18081_s15 + $0x558] sm:$0xff]  ;;  %v15512_v23 = vld [vmem:[%s18081_s15 + $0x550] sm:$0xff] }
 0x856   : > { %14915 = vmatpush3.msra.mxu1 %v18971_v48  ;;  %12796 = vmatpush2.msra.mxu0 %v15510_v58  ;;  %v18991_v17 = vld [vmem:[%s18081_s15 + $0x8b8] sm:$0xff]  ;;  %v18996_v48 = vld [vmem:[%s18081_s15 + $0xc00] sm:$0xff] }
 0x857   : > { %14916 = vmatprep.subr.mxu1 %v18976_v63  ;;  %12797 = vmatprep.subr.mxu0 %v15511_v4  ;;  %19556 = vst [vmem:[#allocation30_spill] sm:$0xff] %v18991_v17  ;;  %19557 = vst [vmem:[#allocation31_spill] sm:$0xff] %v18996_v48  ;;  %v15513_v58 = vld [vmem:[%s18081_s15 + $0x520] sm:$0xff]  ;;  %v15514_v4 = vld [vmem:[%s18081_s15 + $0x518] sm:$0xff] }
 0x858   : > { %14917 = vmatpush3.msra.mxu1 %v18981_v51  ;;  %12798 = vmatpush2.msra.mxu0 %v15512_v23  ;;  %v19001_v63 = vld [vmem:[%s18081_s15 + $0x880] sm:$0xff]  ;;  %v19006_v51 = vld [vmem:[%s18081_s15 + $0xbc8] sm:$0xff] }
 0x859   : > { %14918 = vmatprep.subr.mxu1 %v18986_v5  ;;  %12799 = vmatprep.subr.mxu0 %v15513_v58  ;;  %19558 = vst [vmem:[#allocation32_spill] sm:$0xff] %v19001_v63  ;;  %19559 = vst [vmem:[#allocation33_spill] sm:$0xff] %v19006_v51  ;;  %v15515_v23 = vld [vmem:[%s18081_s15 + $0x4e8] sm:$0xff]  ;;  %v15516_v58 = vld [vmem:[%s18081_s15 + $0x4e0] sm:$0xff] }
 0x85a   : > { %14919 = vmatpush3.msra.mxu1 %v18991_v17  ;;  %12800 = vmatpush2.msra.mxu0 %v15514_v4  ;;  %v19011_v5 = vld [vmem:[%s18081_s15 + $0x848] sm:$0xff]  ;;  %v19016_v17 = vld [vmem:[%s18081_s15 + $0xb90] sm:$0xff] }
 0x85b   : > { %14920 = vmatprep.subr.mxu1 %v18996_v48  ;;  %12801 = vmatprep.subr.mxu0 %v15515_v23  ;;  %19560 = vst [vmem:[#allocation34_spill] sm:$0xff] %v19011_v5  ;;  %19561 = vst [vmem:[#allocation35_spill] sm:$0xff] %v19016_v17  ;;  %v15517_v4 = vld [vmem:[%s18081_s15 + $0x4b0] sm:$0xff]  ;;  %v15518_v23 = vld [vmem:[%s18081_s15 + $0x4a8] sm:$0xff] }
 0x85c   : > { %14921 = vmatpush3.msra.mxu1 %v19001_v63  ;;  %12802 = vmatpush2.msra.mxu0 %v15516_v58  ;;  %v19021_v48 = vld [vmem:[%s18081_s15 + $0x810] sm:$0xff]  ;;  %v19026_v63 = vld [vmem:[%s18081_s15 + $0xb58] sm:$0xff] }
 0x85d   : > { %14922 = vmatprep.subr.mxu1 %v19006_v51  ;;  %12803 = vmatprep.subr.mxu0 %v15517_v4  ;;  %19562 = vst [vmem:[#allocation36_spill] sm:$0xff] %v19021_v48  ;;  %19563 = vst [vmem:[#allocation37_spill] sm:$0xff] %v19026_v63  ;;  %v15519_v58 = vld [vmem:[%s18081_s15 + $0x478] sm:$0xff]  ;;  %v15520_v4 = vld [vmem:[%s18081_s15 + $0x470] sm:$0xff] }
 0x85e   : > { %14923 = vmatpush3.msra.mxu1 %v19011_v5  ;;  %12804 = vmatpush2.msra.mxu0 %v15518_v23  ;;  %v19031_v51 = vld [vmem:[%s18081_s15 + $0x7d8] sm:$0xff]  ;;  %v19036_v5 = vld [vmem:[%s18081_s15 + $0xb20] sm:$0xff] }
 0x85f   : > { %14924 = vmatprep.subr.mxu1 %v19016_v17  ;;  %12805 = vmatprep.subr.mxu0 %v15519_v58  ;;  %19564 = vst [vmem:[#allocation38_spill] sm:$0xff] %v19031_v51  ;;  %v15521_v23 = vld [vmem:[%s18081_s15 + $0x440] sm:$0xff]  ;;  %v15522_v58 = vld [vmem:[%s18081_s15 + $0x438] sm:$0xff] }
 0x860   : > { %14925 = vmatpush3.msra.mxu1 %v19021_v48  ;;  %12806 = vmatpush2.msra.mxu0 %v15520_v4  ;;  %v19041_v17 = vld [vmem:[%s18081_s15 + $0x7a0] sm:$0xff]  ;;  %v19046_v48 = vld [vmem:[%s18081_s15 + $0xae8] sm:$0xff] }
 0x861   : > { %14926 = vmatprep.subr.mxu1 %v19026_v63  ;;  %12807 = vmatprep.subr.mxu0 %v15521_v23  ;;  %19565 = vst [vmem:[#allocation39_spill] sm:$0xff] %v19041_v17  ;;  %19566 = vst [vmem:[#allocation40_spill] sm:$0xff] %v19046_v48  ;;  %v15523_v4 = vld [vmem:[%s18081_s15 + $0x408] sm:$0xff]  ;;  %v15524_v23 = vld [vmem:[%s18081_s15 + $0x400] sm:$0xff] }
 0x862   : > { %14927 = vmatpush3.msra.mxu1 %v19031_v51  ;;  %12808 = vmatpush2.msra.mxu0 %v15522_v58  ;;  %v19056_v63 = vld [vmem:[%s18081_s15 + $0xab0] sm:$0xff] }
 0x863   : > { %14928 = vmatprep.subr.mxu1 %v19036_v5  ;;  %12809 = vmatprep.subr.mxu0 %v15523_v4  ;;  %19568 = vst [vmem:[#allocation42_spill] sm:$0xff] %v19056_v63  ;;  %v15525_v58 = vld [vmem:[%s18081_s15 + $0x3d0] sm:$0xff]  ;;  %v15526_v4 = vld [vmem:[%s18081_s15 + $0x3c8] sm:$0xff] }
 0x864   : > { %14929 = vmatpush3.msra.mxu1 %v19041_v17  ;;  %12810 = vmatpush2.msra.mxu0 %v15524_v23  ;;  %v19061_v51 = vld [vmem:[%s18081_s15 + $0x730] sm:$0xff]  ;;  %v15527_v17 = vld [vmem:[%s18081_s15 + $0x398] sm:$0xff] }
 0x865   : > { %14930 = vmatprep.subr.mxu1 %v19046_v48  ;;  %12811 = vmatprep.subr.mxu0 %v15525_v58  ;;  %19569 = vst [vmem:[#allocation43_spill] sm:$0xff] %v19061_v51  ;;  %v15528_v23 = vld [vmem:[%s18081_s15 + $0x390] sm:$0xff]  ;;  %v19071_v58 = vadd.f32 %v18894_v31, %v18632_v29  ;;  %v15534_v29 = vld [vmem:[%s18081_s15 + $0x338] sm:$0xff]  ;;  %v15653_v48 = vld [vmem:[%s18081_s15 + $0xa88] sm:$0xff] }
 0x866   : > { %14931 = vmatpush3.msra.mxu1 %v19051_v13  ;;  %12812 = vmatpush2.msra.mxu0 %v15526_v4  ;;  %v15529_v13 = vld [vmem:[%s18081_s15 + $0xa50] sm:$0xff] }
 0x867   : > { %14932 = vmatprep.subr.mxu1 %v19056_v63  ;;  %12813 = vmatprep.subr.mxu0 %v15527_v17  ;;  %v15530_v4 = vld [vmem:[%s18081_s15 + $0x370] sm:$0xff]  ;;  %v15531_v17 = vld [vmem:[%s18081_s15 + $0xa48] sm:$0xff]  ;;  %v15651_v63 = vld [vmem:[%s18081_s15 + $0xab8] sm:$0xff] }
 0x868   : > { %14933 = vmatpush3.msra.mxu1 %v19061_v51  ;;  %12814 = vmatpush2.msra.mxu0 %v15528_v23  ;;  %v15532_v23 = vld [vmem:[%s18081_s15 + $0x368] sm:$0xff]  ;;  %v15535_v31 = vld [vmem:[%s18081_s15 + $0xa10] sm:$0xff]  ;;  %v15540_v51 = vld [vmem:[%s18081_s15 + $0x2f8] sm:$0xff] }
 0x869   : > { %12604 = vmatmul.mubr.f32.vlgmr.msra.gmra.mxu1 %v18244_v32  ;;  %12680 = vmatprep.subr.mxu1 %v15529_v13  ;;  %v15533_v32 = vld [vmem:[%s18081_s15 + $0xa18] sm:$0xff]  ;;  %v15536_v13 = vld [vmem:[%s18081_s15 + $0x330] sm:$0xff] }
 0x86a   : > { %12816 = vmatmul.mubr.f32.vlgmr.msra.gmra.mxu0 %v18468_v42  ;;  %12893 = vmatprep.subr.mxu0 %v15530_v4  ;;  %v15537_v4 = vld [vmem:[%s18081_s15 + $0x9e0] sm:$0xff] }
 0x86b   : > { %12681 = vmatpush1.msra.mxu1 %v15531_v17  ;;  %12744 = vmatprep.mubr.f32.mxu1 %v19071_v58  ;;  %v15538_v17 = vld [vmem:[%s18081_s15 + $0x300] sm:$0xff] }
 0x86c   : > { %12894 = vmatpush1.msra.mxu0 %v15532_v23  ;;  %12957 = vmatprep.mubr.f32.mxu0 %v18553_v11  ;;  %v15539_v23 = vld [vmem:[%s18081_s15 + $0x9d8] sm:$0xff] }
 0x86d   : > { %12682 = vmatprep.subr.mxu1 %v15533_v32  ;;  %12895 = vmatprep.subr.mxu0 %v15534_v29  ;;  %v15541_v32 = vld [vmem:[%s18081_s15 + $0x9a8] sm:$0xff] }
 0x86e   : > { %12683 = vmatpush1.msra.mxu1 %v15535_v31  ;;  %12896 = vmatpush1.msra.mxu0 %v15536_v13  ;;  %v15542_v29 = vld [vmem:[%s18081_s15 + $0x2c8] sm:$0xff]  ;;  %v15543_v31 = vld [vmem:[%s18081_s15 + $0x9a0] sm:$0xff] }
 0x86f   : > { %12684 = vmatprep.subr.mxu1 %v15537_v4  ;;  %12897 = vmatprep.subr.mxu0 %v15538_v17  ;;  %v15544_v13 = vld [vmem:[%s18081_s15 + $0x2c0] sm:$0xff]  ;;  %v15545_v4 = vld [vmem:[%s18081_s15 + $0x970] sm:$0xff] }
 0x870   : > { %12685 = vmatpush1.msra.mxu1 %v15539_v23  ;;  %12898 = vmatpush1.msra.mxu0 %v15540_v51  ;;  %v15546_v17 = vld [vmem:[%s18081_s15 + $0x290] sm:$0xff]  ;;  %v15547_v23 = vld [vmem:[%s18081_s15 + $0x968] sm:$0xff] }
 0x871   : > { %12686 = vmatprep.subr.mxu1 %v15541_v32  ;;  %12899 = vmatprep.subr.mxu0 %v15542_v29  ;;  %v15548_v51 = vld [vmem:[%s18081_s15 + $0x288] sm:$0xff]  ;;  %v15549_v32 = vld [vmem:[%s18081_s15 + $0x938] sm:$0xff] }
 0x872   : > { %12687 = vmatpush1.msra.mxu1 %v15543_v31  ;;  %12900 = vmatpush1.msra.mxu0 %v15544_v13  ;;  %v15550_v29 = vld [vmem:[%s18081_s15 + $0x258] sm:$0xff]  ;;  %v15551_v31 = vld [vmem:[%s18081_s15 + $0x930] sm:$0xff] }
 0x873   : > { %12688 = vmatprep.subr.mxu1 %v15545_v4  ;;  %12901 = vmatprep.subr.mxu0 %v15546_v17  ;;  %v15552_v13 = vld [vmem:[%s18081_s15 + $0x250] sm:$0xff]  ;;  %v15553_v4 = vld [vmem:[%s18081_s15 + $0x900] sm:$0xff] }
 0x874   : > { %12689 = vmatpush1.msra.mxu1 %v15547_v23  ;;  %12902 = vmatpush1.msra.mxu0 %v15548_v51  ;;  %v15554_v17 = vld [vmem:[%s18081_s15 + $0x220] sm:$0xff]  ;;  %v15555_v23 = vld [vmem:[%s18081_s15 + $0x8f8] sm:$0xff] }
 0x875   : > { %12690 = vmatprep.subr.mxu1 %v15549_v32  ;;  %12903 = vmatprep.subr.mxu0 %v15550_v29  ;;  %v15556_v51 = vld [vmem:[%s18081_s15 + $0x218] sm:$0xff]  ;;  %v15557_v32 = vld [vmem:[%s18081_s15 + $0x8c8] sm:$0xff] }
 0x876   : > { %12691 = vmatpush1.msra.mxu1 %v15551_v31  ;;  %12904 = vmatpush1.msra.mxu0 %v15552_v13  ;;  %v15558_v29 = vld [vmem:[%s18081_s15 + $0x1e8] sm:$0xff]  ;;  %v15559_v31 = vld [vmem:[%s18081_s15 + $0x8c0] sm:$0xff] }
 0x877   : > { %12692 = vmatprep.subr.mxu1 %v15553_v4  ;;  %12905 = vmatprep.subr.mxu0 %v15554_v17  ;;  %v15560_v13 = vld [vmem:[%s18081_s15 + $0x1e0] sm:$0xff]  ;;  %v15561_v4 = vld [vmem:[%s18081_s15 + $0x890] sm:$0xff] }
 0x878   : > { %12693 = vmatpush1.msra.mxu1 %v15555_v23  ;;  %12906 = vmatpush1.msra.mxu0 %v15556_v51  ;;  %v15562_v17 = vld [vmem:[%s18081_s15 + $0x1b0] sm:$0xff]  ;;  %v15563_v23 = vld [vmem:[%s18081_s15 + $0x888] sm:$0xff] }
 0x879   : > { %12694 = vmatprep.subr.mxu1 %v15557_v32  ;;  %12907 = vmatprep.subr.mxu0 %v15558_v29  ;;  %v15564_v51 = vld [vmem:[%s18081_s15 + $0x1a8] sm:$0xff]  ;;  %v15565_v32 = vld [vmem:[%s18081_s15 + $0x858] sm:$0xff] }
 0x87a   : > { %12695 = vmatpush1.msra.mxu1 %v15559_v31  ;;  %12908 = vmatpush1.msra.mxu0 %v15560_v13  ;;  %v15566_v29 = vld [vmem:[%s18081_s15 + $0x178] sm:$0xff]  ;;  %v15567_v31 = vld [vmem:[%s18081_s15 + $0x850] sm:$0xff] }
 0x87b   : > { %12696 = vmatprep.subr.mxu1 %v15561_v4  ;;  %12909 = vmatprep.subr.mxu0 %v15562_v17  ;;  %v15568_v13 = vld [vmem:[%s18081_s15 + $0x170] sm:$0xff]  ;;  %v15569_v4 = vld [vmem:[%s18081_s15 + $0x820] sm:$0xff] }
 0x87c   : > { %12697 = vmatpush1.msra.mxu1 %v15563_v23  ;;  %12910 = vmatpush1.msra.mxu0 %v15564_v51  ;;  %v15570_v17 = vld [vmem:[%s18081_s15 + $0x140] sm:$0xff]  ;;  %v15571_v23 = vld [vmem:[%s18081_s15 + $0x818] sm:$0xff] }
 0x87d   : > { %12698 = vmatprep.subr.mxu1 %v15565_v32  ;;  %12911 = vmatprep.subr.mxu0 %v15566_v29  ;;  %v15572_v51 = vld [vmem:[%s18081_s15 + $0x138] sm:$0xff]  ;;  %v15573_v32 = vld [vmem:[%s18081_s15 + $0x7e8] sm:$0xff] }
 0x87e   : > { %12699 = vmatpush1.msra.mxu1 %v15567_v31  ;;  %12912 = vmatpush1.msra.mxu0 %v15568_v13  ;;  %v15574_v29 = vld [vmem:[%s18081_s15 + $0x108] sm:$0xff]  ;;  %v15575_v31 = vld [vmem:[%s18081_s15 + $0x7e0] sm:$0xff] }
 0x87f   : > { %12700 = vmatprep.subr.mxu1 %v15569_v4  ;;  %12913 = vmatprep.subr.mxu0 %v15570_v17  ;;  %v15576_v13 = vld [vmem:[%s18081_s15 + $0x100] sm:$0xff]  ;;  %v15577_v4 = vld [vmem:[%s18081_s15 + $0x7b0] sm:$0xff] }
 0x880   : > { %12701 = vmatpush1.msra.mxu1 %v15571_v23  ;;  %12914 = vmatpush1.msra.mxu0 %v15572_v51  ;;  %v15578_v17 = vld [vmem:[%s18081_s15 + $0xd0] sm:$0xff]  ;;  %v15579_v23 = vld [vmem:[%s18081_s15 + $0x7a8] sm:$0xff] }
 0x881   : > { %12702 = vmatprep.subr.mxu1 %v15573_v32  ;;  %12915 = vmatprep.subr.mxu0 %v15574_v29  ;;  %v15580_v51 = vld [vmem:[%s18081_s15 + $0xc8] sm:$0xff]  ;;  %v15581_v32 = vld [vmem:[%s18081_s15 + $0x778] sm:$0xff] }
 0x882   : > { %12703 = vmatpush1.msra.mxu1 %v15575_v31  ;;  %12916 = vmatpush1.msra.mxu0 %v15576_v13  ;;  %v15582_v29 = vld [vmem:[%s18081_s15 + $0x98] sm:$0xff]  ;;  %v15583_v31 = vld [vmem:[%s18081_s15 + $0x770] sm:$0xff] }
 0x883   : > { %12704 = vmatprep.subr.mxu1 %v15577_v4  ;;  %12917 = vmatprep.subr.mxu0 %v15578_v17  ;;  %v15584_v13 = vld [vmem:[%s18081_s15 + $0x90] sm:$0xff]  ;;  %v15585_v4 = vld [vmem:[%s18081_s15 + $0x740] sm:$0xff] }
 0x884   : > { %12705 = vmatpush1.msra.mxu1 %v15579_v23  ;;  %12918 = vmatpush1.msra.mxu0 %v15580_v51  ;;  %v15586_v17 = vld [vmem:[%s18081_s15 + $0x60] sm:$0xff]  ;;  %v15587_v23 = vld [vmem:[%s18081_s15 + $0x738] sm:$0xff] }
 0x885   : > { %12706 = vmatprep.subr.mxu1 %v15581_v32  ;;  %12919 = vmatprep.subr.mxu0 %v15582_v29  ;;  %v15588_v51 = vld [vmem:[%s18081_s15 + $0x58] sm:$0xff]  ;;  %v15589_v32 = vld [vmem:[%s18081_s15 + $0x708] sm:$0xff] }
 0x886   : > { %12707 = vmatpush1.msra.mxu1 %v15583_v31  ;;  %12920 = vmatpush1.msra.mxu0 %v15584_v13  ;;  %v15590_v29 = vld [vmem:[%s18081_s15 + $0x28] sm:$0xff]  ;;  %v15591_v31 = vld [vmem:[%s18081_s15 + $0x700] sm:$0xff] }
 0x887   : > { %12708 = vmatprep.subr.mxu1 %v15585_v4  ;;  %12921 = vmatprep.subr.mxu0 %v15586_v17  ;;  %v15592_v13 = vld [vmem:[%s18081_s15 + $0x20] sm:$0xff]  ;;  %v15593_v4 = vld [vmem:[%s18081_s15 + $0xdd0] sm:$0xff] }
 0x888   : > { %12709 = vmatpush1.msra.mxu1 %v15587_v23  ;;  %12922 = vmatpush1.msra.mxu0 %v15588_v51  ;;  %v15594_v17 = vld [vmem:[%s18081_s15 + $0x6f0] sm:$0xff]  ;;  %v15595_v23 = vld [vmem:[%s18081_s15 + $0xdc8] sm:$0xff] }
 0x889   : > { %12710 = vmatprep.subr.mxu1 %v15589_v32  ;;  %12923 = vmatprep.subr.mxu0 %v15590_v29  ;;  %v15596_v51 = vld [vmem:[%s18081_s15 + $0x6e8] sm:$0xff]  ;;  %v15597_v32 = vld [vmem:[%s18081_s15 + $0xd98] sm:$0xff] }
 0x88a   : > { %12711 = vmatpush1.msra.mxu1 %v15591_v31  ;;  %12924 = vmatpush1.msra.mxu0 %v15592_v13  ;;  %v15598_v29 = vld [vmem:[%s18081_s15 + $0x6b8] sm:$0xff]  ;;  %v15599_v31 = vld [vmem:[%s18081_s15 + $0xd90] sm:$0xff] }
 0x88b   : > { %12712 = vmatprep.subr.mxu1 %v15593_v4  ;;  %12925 = vmatprep.subr.mxu0 %v15594_v17  ;;  %v15600_v13 = vld [vmem:[%s18081_s15 + $0x6b0] sm:$0xff]  ;;  %v15601_v4 = vld [vmem:[%s18081_s15 + $0xd60] sm:$0xff] }
 0x88c   : > { %12713 = vmatpush2.msra.mxu1 %v15595_v23  ;;  %12926 = vmatpush2.msra.mxu0 %v15596_v51  ;;  %v15602_v17 = vld [vmem:[%s18081_s15 + $0x680] sm:$0xff]  ;;  %v15603_v23 = vld [vmem:[%s18081_s15 + $0xd58] sm:$0xff] }
 0x88d   : > { %12714 = vmatprep.subr.mxu1 %v15597_v32  ;;  %12927 = vmatprep.subr.mxu0 %v15598_v29  ;;  %v15604_v51 = vld [vmem:[%s18081_s15 + $0x678] sm:$0xff]  ;;  %v15605_v32 = vld [vmem:[%s18081_s15 + $0xd28] sm:$0xff] }
 0x88e   : > { %12715 = vmatpush2.msra.mxu1 %v15599_v31  ;;  %12928 = vmatpush2.msra.mxu0 %v15600_v13  ;;  %v15606_v29 = vld [vmem:[%s18081_s15 + $0x648] sm:$0xff]  ;;  %v15607_v31 = vld [vmem:[%s18081_s15 + $0xd20] sm:$0xff] }
 0x88f   : > { %12716 = vmatprep.subr.mxu1 %v15601_v4  ;;  %12929 = vmatprep.subr.mxu0 %v15602_v17  ;;  %v15608_v13 = vld [vmem:[%s18081_s15 + $0x640] sm:$0xff]  ;;  %v19157_v4 = vpop.f32.mrf.mxu0  ;;  %v15609_v17 = vld [vmem:[%s18081_s15 + $0xcf0] sm:$0xff] }
 0x890   : > { %12717 = vmatpush2.msra.mxu1 %v15603_v23  ;;  %12930 = vmatpush2.msra.mxu0 %v15604_v51  ;;  %19570 = vst [vmem:[#allocation44_spill] sm:$0xff] %v19157_v4  ;;  %v15610_v23 = vld [vmem:[%s18081_s15 + $0x610] sm:$0xff]  ;;  %v15611_v51 = vld [vmem:[%s18081_s15 + $0xce8] sm:$0xff] }
 0x891   : > { %12718 = vmatprep.subr.mxu1 %v15605_v32  ;;  %12931 = vmatprep.subr.mxu0 %v15606_v29  ;;  %v15612_v32 = vld [vmem:[%s18081_s15 + $0x608] sm:$0xff]  ;;  %v15613_v29 = vld [vmem:[%s18081_s15 + $0xcb8] sm:$0xff]  ;;  %v15616_v4 = vld [vmem:[%s18081_s15 + $0x5d0] sm:$0xff] }
 0x892   : > { %12719 = vmatpush2.msra.mxu1 %v15607_v31  ;;  %12932 = vmatpush2.msra.mxu0 %v15608_v13  ;;  %v15614_v31 = vld [vmem:[%s18081_s15 + $0x5d8] sm:$0xff]  ;;  %v15615_v13 = vld [vmem:[%s18081_s15 + $0xcb0] sm:$0xff] }
 0x893   : > { %12720 = vmatprep.subr.mxu1 %v15609_v17  ;;  %12933 = vmatprep.subr.mxu0 %v15610_v23  ;;  %v19167_v17 = vpop.f32.mrf.mxu0  ;;  %v15617_v23 = vld [vmem:[%s18081_s15 + $0xc80] sm:$0xff] }
 0x894   : > { %12721 = vmatpush2.msra.mxu1 %v15611_v51  ;;  %12934 = vmatpush2.msra.mxu0 %v15612_v32  ;;  %19571 = vst [vmem:[#allocation45_spill] sm:$0xff] %v19167_v17  ;;  %v15618_v51 = vld [vmem:[%s18081_s15 + $0x5a0] sm:$0xff]  ;;  %v15619_v32 = vld [vmem:[%s18081_s15 + $0xc78] sm:$0xff] }
 0x895   : > { %12722 = vmatprep.subr.mxu1 %v15613_v29  ;;  %12935 = vmatprep.subr.mxu0 %v15614_v31  ;;  %v15620_v29 = vld [vmem:[%s18081_s15 + $0x598] sm:$0xff]  ;;  %v19173_v31 = vpop.f32.mrf.mxu0  ;;  %v15623_v17 = vld [vmem:[%s18081_s15 + $0xc40] sm:$0xff] }
 0x896   : > { %12723 = vmatpush2.msra.mxu1 %v15615_v13  ;;  %12936 = vmatpush2.msra.mxu0 %v15616_v4  ;;  %19572 = vst [vmem:[#allocation46_spill] sm:$0xff] %v19173_v31  ;;  %v15621_v13 = vld [vmem:[%s18081_s15 + $0xc48] sm:$0xff] }
 0x897   : > { %12724 = vmatprep.subr.mxu1 %v15617_v23  ;;  %12937 = vmatprep.subr.mxu0 %v15618_v51  ;;  %v15622_v4 = vld [vmem:[%s18081_s15 + $0x568] sm:$0xff]  ;;  %v15624_v23 = vld [vmem:[%s18081_s15 + $0x560] sm:$0xff]  ;;  %v15625_v51 = vld [vmem:[%s18081_s15 + $0xc10] sm:$0xff] }
 0x898   : > { %12725 = vmatpush2.msra.mxu1 %v15619_v32  ;;  %12938 = vmatpush2.msra.mxu0 %v15620_v29  ;;  %v15626_v32 = vld [vmem:[%s18081_s15 + $0x530] sm:$0xff]  ;;  %v15627_v29 = vld [vmem:[%s18081_s15 + $0xc08] sm:$0xff] }
 0x899   : > { %12726 = vmatprep.subr.mxu1 %v15621_v13  ;;  %12939 = vmatprep.subr.mxu0 %v15622_v4  ;;  %v15628_v31 = vld [vmem:[%s18081_s15 + $0x528] sm:$0xff]  ;;  %v19183_v13 = vpop.f32.mrf.mxu0  ;;  %v15629_v4 = vld [vmem:[%s18081_s15 + $0xbd8] sm:$0xff] }
 0x89a   : > { %12727 = vmatpush2.msra.mxu1 %v15623_v17  ;;  %12940 = vmatpush2.msra.mxu0 %v15624_v23  ;;  %19573 = vst [vmem:[#allocation47_spill] sm:$0xff] %v19183_v13  ;;  %v15630_v17 = vld [vmem:[%s18081_s15 + $0x4f8] sm:$0xff]  ;;  %v15631_v23 = vld [vmem:[%s18081_s15 + $0xbd0] sm:$0xff] }
 0x89b   : > { %12728 = vmatprep.subr.mxu1 %v15625_v51  ;;  %12941 = vmatprep.subr.mxu0 %v15626_v32  ;;  %v15632_v51 = vld [vmem:[%s18081_s15 + $0x4f0] sm:$0xff]  ;;  %v19189_v32 = vpop.f32.mrf.mxu0  ;;  %v15635_v13 = vld [vmem:[%s18081_s15 + $0xb98] sm:$0xff] }
 0x89c   : > { %12729 = vmatpush2.msra.mxu1 %v15627_v29  ;;  %12942 = vmatpush2.msra.mxu0 %v15628_v31  ;;  %19574 = vst [vmem:[#allocation48_spill] sm:$0xff] %v19189_v32  ;;  %v15633_v29 = vld [vmem:[%s18081_s15 + $0xba0] sm:$0xff] }
 0x89d   : > { %12730 = vmatprep.subr.mxu1 %v15629_v4  ;;  %12943 = vmatprep.subr.mxu0 %v15630_v17  ;;  %v15634_v31 = vld [vmem:[%s18081_s15 + $0x4c0] sm:$0xff]  ;;  %v15636_v4 = vld [vmem:[%s18081_s15 + $0x4b8] sm:$0xff]  ;;  %v15637_v17 = vld [vmem:[%s18081_s15 + $0xb68] sm:$0xff] }
 0x89e   : > { %12731 = vmatpush2.msra.mxu1 %v15631_v23  ;;  %12944 = vmatpush2.msra.mxu0 %v15632_v51  ;;  %v15638_v23 = vld [vmem:[%s18081_s15 + $0x488] sm:$0xff]  ;;  %v15639_v51 = vld [vmem:[%s18081_s15 + $0xb60] sm:$0xff] }
 0x89f   : > { %12732 = vmatprep.subr.mxu1 %v15633_v29  ;;  %12945 = vmatprep.subr.mxu0 %v15634_v31  ;;  %v15640_v32 = vld [vmem:[%s18081_s15 + $0x480] sm:$0xff]  ;;  %v19199_v29 = vpop.f32.mrf.mxu0  ;;  %v15641_v31 = vld [vmem:[%s18081_s15 + $0xb30] sm:$0xff] }
 0x8a0   : > { %12733 = vmatpush2.msra.mxu1 %v15635_v13  ;;  %12946 = vmatpush2.msra.mxu0 %v15636_v4  ;;  %19575 = vst [vmem:[#allocation49_spill] sm:$0xff] %v19199_v29  ;;  %v15642_v13 = vld [vmem:[%s18081_s15 + $0x450] sm:$0xff]  ;;  %v15643_v4 = vld [vmem:[%s18081_s15 + $0xb28] sm:$0xff] }
 0x8a1   : > { %12734 = vmatprep.subr.mxu1 %v15637_v17  ;;  %12947 = vmatprep.subr.mxu0 %v15638_v23  ;;  %v15644_v17 = vld [vmem:[%s18081_s15 + $0x448] sm:$0xff]  ;;  %v15645_v23 = vld [vmem:[%s18081_s15 + $0xaf8] sm:$0xff]  ;;  %v15647_v29 = vld [vmem:[%s18081_s15 + $0xaf0] sm:$0xff] }
 0x8a2   : > { %12735 = vmatpush2.msra.mxu1 %v15639_v51  ;;  %12948 = vmatpush2.msra.mxu0 %v15640_v32  ;;  %v15646_v51 = vld [vmem:[%s18081_s15 + $0x418] sm:$0xff] }
 0x8a3   : > { %12736 = vmatprep.subr.mxu1 %v15641_v31  ;;  %12949 = vmatprep.subr.mxu0 %v15642_v13  ;;  %v15648_v31 = vld [vmem:[%s18081_s15 + $0x410] sm:$0xff]  ;;  %v15649_v13 = vld [vmem:[%s18081_s15 + $0xac0] sm:$0xff] }
 0x8a4   : > { %12737 = vmatpush2.msra.mxu1 %v15643_v4  ;;  %12950 = vmatpush2.msra.mxu0 %v15644_v17  ;;  %v15650_v4 = vld [vmem:[%s18081_s15 + $0x3e0] sm:$0xff] }
 0x8a5   : > { %12738 = vmatprep.subr.mxu1 %v15645_v23  ;;  %12951 = vmatprep.subr.mxu0 %v15646_v51  ;;  %v14899_v32 = vpop.f32.mrf.mxu0  ;;  %v15652_v23 = vld [vmem:[%s18081_s15 + $0x3d8] sm:$0xff] }
 0x8a6   : > { %12739 = vmatpush2.msra.mxu1 %v15647_v29  ;;  %12952 = vmatpush2.msra.mxu0 %v15648_v31  ;;  %v15654_v29 = vld [vmem:[%s18081_s15 + $0x3a8] sm:$0xff]  ;;  %v15655_v31 = vld [vmem:[%s18081_s15 + $0xa80] sm:$0xff] }
 0x8a7   : > { %12740 = vmatprep.subr.mxu1 %v15649_v13  ;;  %12953 = vmatprep.subr.mxu0 %v15650_v4  ;;  %v14900_v17 = vpop.f32.mrf.mxu0  ;;  %v15656_v13 = vld [vmem:[%s18081_s15 + $0x3a0] sm:$0xff]  ;;  %v15660_v4 = vld [vmem:[%s18081_s15 + $0x378] sm:$0xff] }
 0x8a8   : > { %12741 = vmatpush2.msra.mxu1 %v15651_v63  ;;  %12954 = vmatpush2.msra.mxu0 %v15652_v23  ;;  %v19213_v51 = vadd.f32 %v14900_v17, %v14899_v32  ;;  %v15657_v63 = vld [vmem:[%s18081_s15 + $0xa60] sm:$0xff]  ;;  %v15658_v32 = vld [vmem:[%s18081_s15 + $0x6f8] sm:$0xff]  ;;  %v15661_v17 = vld [vmem:[%s18081_s15 + $0xa28] sm:$0xff] }
 0x8a9   : > { %12742 = vmatprep.subr.mxu1 %v15653_v48  ;;  %12955 = vmatprep.subr.mxu0 %v15654_v29  ;;  %v15659_v48 = vld [vmem:[%s18081_s15 + $0xa58] sm:$0xff]  ;;  %v15662_v23 = vld [vmem:[%s18081_s15 + $0x6c0] sm:$0xff] }
 0x8aa   : > { %12743 = vmatpush2.msra.mxu1 %v15655_v31  ;;  %12956 = vmatpush2.msra.mxu0 %v15656_v13  ;;  %v15663_v29 = vld [vmem:[%s18081_s15 + $0xa20] sm:$0xff]  ;;  %v15665_v13 = vld [vmem:[%s18081_s15 + $0x9f0] sm:$0xff] }
 0x8ab   : > { %12745 = vmatmul.mubr.f32.vlgmr.msra.gmra.mxu1 %v18887_v3  ;;  %12822 = vmatprep.subr.mxu1 %v15657_v63  ;;  %v15664_v31 = vld [vmem:[%s18081_s15 + $0x340] sm:$0xff]  ;;  %v15666_v63 = vld [vmem:[%s18081_s15 + $0x688] sm:$0xff] }
 0x8ac   : > { %12958 = vmatmul.mubr.f32.vlgmr.msra.gmra.mxu0 %v18468_v42  ;;  %14937 = vmatprep.subr.mxu0 %v15658_v32  ;;  %v15667_v32 = vld [vmem:[%s18081_s15 + $0x9e8] sm:$0xff] }
 0x8ad   : > { %12823 = vmatpush1.msra.mxu1 %v15659_v48  ;;  %12886 = vmatprep.mubr.f32.mxu1 %v19071_v58  ;;  %v15669_v48 = vld [vmem:[%s18081_s15 + $0x9b8] sm:$0xff] }
 0x8ae   : > { %14938 = vmatpush3.msra.mxu0 %v15660_v4  ;;  %13099 = vmatprep.mubr.f32.mxu0 %v18553_v11  ;;  %v15668_v11 = vld [vmem:[%s18081_s15 + $0x308] sm:$0xff]  ;;  %v15670_v4 = vld [vmem:[%s18081_s15 + $0x650] sm:$0xff] }
 0x8af   : > { %12824 = vmatprep.subr.mxu1 %v15661_v17  ;;  %14939 = vmatprep.subr.mxu0 %v15662_v23  ;;  %v15671_v17 = vld [vmem:[%s18081_s15 + $0x9b0] sm:$0xff] }
 0x8b0   : > { %12825 = vmatpush1.msra.mxu1 %v15663_v29  ;;  %14940 = vmatpush3.msra.mxu0 %v15664_v31  ;;  %v15672_v23 = vld [vmem:[%s18081_s15 + $0x2d0] sm:$0xff]  ;;  %v15673_v29 = vld [vmem:[%s18081_s15 + $0x980] sm:$0xff]  ;;  %v15674_v31 = vld [vmem:[%s18081_s15 + $0x618] sm:$0xff] }
 0x8b1   : > { %12826 = vmatprep.subr.mxu1 %v15665_v13  ;;  %14941 = vmatprep.subr.mxu0 %v15666_v63  ;;  %v15675_v13 = vld [vmem:[%s18081_s15 + $0x978] sm:$0xff] }
 0x8b2   : > { %12827 = vmatpush1.msra.mxu1 %v15667_v32  ;;  %14942 = vmatpush3.msra.mxu0 %v15668_v11  ;;  %v15676_v63 = vld [vmem:[%s18081_s15 + $0x298] sm:$0xff]  ;;  %v15677_v32 = vld [vmem:[%s18081_s15 + $0x948] sm:$0xff]  ;;  %v15678_v11 = vld [vmem:[%s18081_s15 + $0x5e0] sm:$0xff] }
 0x8b3   : > { %12828 = vmatprep.subr.mxu1 %v15669_v48  ;;  %14943 = vmatprep.subr.mxu0 %v15670_v4  ;;  %v15679_v48 = vld [vmem:[%s18081_s15 + $0x940] sm:$0xff] }
 0x8b4   : > { %12829 = vmatpush1.msra.mxu1 %v15671_v17  ;;  %14944 = vmatpush3.msra.mxu0 %v15672_v23  ;;  %v15680_v4 = vld [vmem:[%s18081_s15 + $0x260] sm:$0xff]  ;;  %v15681_v17 = vld [vmem:[%s18081_s15 + $0x910] sm:$0xff]  ;;  %v15682_v23 = vld [vmem:[%s18081_s15 + $0x5a8] sm:$0xff] }
 0x8b5   : > { %12830 = vmatprep.subr.mxu1 %v15673_v29  ;;  %14945 = vmatprep.subr.mxu0 %v15674_v31  ;;  %v15683_v29 = vld [vmem:[%s18081_s15 + $0x908] sm:$0xff] }
 0x8b6   : > { %12831 = vmatpush1.msra.mxu1 %v15675_v13  ;;  %14946 = vmatpush3.msra.mxu0 %v15676_v63  ;;  %v15684_v31 = vld [vmem:[%s18081_s15 + $0x228] sm:$0xff]  ;;  %v15685_v13 = vld [vmem:[%s18081_s15 + $0x8d8] sm:$0xff]  ;;  %v15686_v63 = vld [vmem:[%s18081_s15 + $0x570] sm:$0xff] }
 0x8b7   : > { %12832 = vmatprep.subr.mxu1 %v15677_v32  ;;  %14947 = vmatprep.subr.mxu0 %v15678_v11  ;;  %v15687_v32 = vld [vmem:[%s18081_s15 + $0x8d0] sm:$0xff] }
 0x8b8   : > { %12833 = vmatpush1.msra.mxu1 %v15679_v48  ;;  %14948 = vmatpush3.msra.mxu0 %v15680_v4  ;;  %v15688_v11 = vld [vmem:[%s18081_s15 + $0x1f0] sm:$0xff]  ;;  %v15689_v48 = vld [vmem:[%s18081_s15 + $0x8a0] sm:$0xff]  ;;  %v15690_v4 = vld [vmem:[%s18081_s15 + $0x538] sm:$0xff] }
 0x8b9   : > { %12834 = vmatprep.subr.mxu1 %v15681_v17  ;;  %14949 = vmatprep.subr.mxu0 %v15682_v23  ;;  %v15691_v17 = vld [vmem:[%s18081_s15 + $0x898] sm:$0xff] }
 0x8ba   : > { %12835 = vmatpush1.msra.mxu1 %v15683_v29  ;;  %14950 = vmatpush3.msra.mxu0 %v15684_v31  ;;  %v15692_v23 = vld [vmem:[%s18081_s15 + $0x1b8] sm:$0xff]  ;;  %v15693_v29 = vld [vmem:[%s18081_s15 + $0x868] sm:$0xff]  ;;  %v15694_v31 = vld [vmem:[%s18081_s15 + $0x500] sm:$0xff] }
 0x8bb   : > { %12836 = vmatprep.subr.mxu1 %v15685_v13  ;;  %14951 = vmatprep.subr.mxu0 %v15686_v63  ;;  %v15695_v13 = vld [vmem:[%s18081_s15 + $0x860] sm:$0xff] }
 0x8bc   : > { %12837 = vmatpush1.msra.mxu1 %v15687_v32  ;;  %14952 = vmatpush3.msra.mxu0 %v15688_v11  ;;  %v15696_v63 = vld [vmem:[%s18081_s15 + $0x180] sm:$0xff]  ;;  %v15697_v32 = vld [vmem:[%s18081_s15 + $0x830] sm:$0xff]  ;;  %v15698_v11 = vld [vmem:[%s18081_s15 + $0x4c8] sm:$0xff] }
 0x8bd   : > { %12838 = vmatprep.subr.mxu1 %v15689_v48  ;;  %14953 = vmatprep.subr.mxu0 %v15690_v4  ;;  %v15699_v48 = vld [vmem:[%s18081_s15 + $0x828] sm:$0xff] }
 0x8be   : > { %12839 = vmatpush1.msra.mxu1 %v15691_v17  ;;  %14954 = vmatpush3.msra.mxu0 %v15692_v23  ;;  %v15700_v4 = vld [vmem:[%s18081_s15 + $0x148] sm:$0xff]  ;;  %v15701_v17 = vld [vmem:[%s18081_s15 + $0x7f8] sm:$0xff]  ;;  %v15702_v23 = vld [vmem:[%s18081_s15 + $0x490] sm:$0xff] }
 0x8bf   : > { %12840 = vmatprep.subr.mxu1 %v15693_v29  ;;  %14955 = vmatprep.subr.mxu0 %v15694_v31  ;;  %v15703_v29 = vld [vmem:[%s18081_s15 + $0x7f0] sm:$0xff] }
 0x8c0   : > { %12841 = vmatpush1.msra.mxu1 %v15695_v13  ;;  %14956 = vmatpush3.msra.mxu0 %v15696_v63  ;;  %v15704_v31 = vld [vmem:[%s18081_s15 + $0x110] sm:$0xff]  ;;  %v15705_v13 = vld [vmem:[%s18081_s15 + $0x7c0] sm:$0xff]  ;;  %v15706_v63 = vld [vmem:[%s18081_s15 + $0x458] sm:$0xff] }
 0x8c1   : > { %12842 = vmatprep.subr.mxu1 %v15697_v32  ;;  %14957 = vmatprep.subr.mxu0 %v15698_v11  ;;  %v15707_v32 = vld [vmem:[%s18081_s15 + $0x7b8] sm:$0xff] }
 0x8c2   : > { %12843 = vmatpush1.msra.mxu1 %v15699_v48  ;;  %14958 = vmatpush3.msra.mxu0 %v15700_v4  ;;  %v15708_v11 = vld [vmem:[%s18081_s15 + $0xd8] sm:$0xff]  ;;  %v15709_v48 = vld [vmem:[%s18081_s15 + $0x788] sm:$0xff]  ;;  %v15710_v4 = vld [vmem:[%s18081_s15 + $0x420] sm:$0xff] }
 0x8c3   : > { %12844 = vmatprep.subr.mxu1 %v15701_v17  ;;  %14959 = vmatprep.subr.mxu0 %v15702_v23  ;;  %v15711_v17 = vld [vmem:[%s18081_s15 + $0x780] sm:$0xff] }
 0x8c4   : > { %12845 = vmatpush1.msra.mxu1 %v15703_v29  ;;  %14960 = vmatpush3.msra.mxu0 %v15704_v31  ;;  %v15712_v23 = vld [vmem:[%s18081_s15 + $0xa0] sm:$0xff]  ;;  %v15713_v29 = vld [vmem:[%s18081_s15 + $0x750] sm:$0xff]  ;;  %v15714_v31 = vld [vmem:[%s18081_s15 + $0x3e8] sm:$0xff] }
 0x8c5   : > { %12846 = vmatprep.subr.mxu1 %v15705_v13  ;;  %14961 = vmatprep.subr.mxu0 %v15706_v63  ;;  %v15715_v13 = vld [vmem:[%s18081_s15 + $0x748] sm:$0xff] }
 0x8c6   : > { %12847 = vmatpush1.msra.mxu1 %v15707_v32  ;;  %14962 = vmatpush3.msra.mxu0 %v15708_v11  ;;  %v15716_v63 = vld [vmem:[%s18081_s15 + $0x68] sm:$0xff]  ;;  %v15717_v32 = vld [vmem:[%s18081_s15 + $0x718] sm:$0xff]  ;;  %v15718_v11 = vld [vmem:[%s18081_s15 + $0x3b0] sm:$0xff] }
 0x8c7   : > { %12848 = vmatprep.subr.mxu1 %v15709_v48  ;;  %14963 = vmatprep.subr.mxu0 %v15710_v4  ;;  %v15719_v48 = vld [vmem:[%s18081_s15 + $0x710] sm:$0xff] }
 0x8c8   : > { %12849 = vmatpush1.msra.mxu1 %v15711_v17  ;;  %14964 = vmatpush3.msra.mxu0 %v15712_v23  ;;  %v15720_v4 = vld [vmem:[%s18081_s15 + $0x30] sm:$0xff]  ;;  %v15721_v17 = vld [vmem:[%s18081_s15 + $0xde0] sm:$0xff]  ;;  %v15722_v23 = vld [vmem:[%s18081_s15 + $0xdd8] sm:$0xff] }
 0x8c9   : > { %12850 = vmatprep.subr.mxu1 %v15713_v29  ;;  %14965 = vmatprep.subr.mxu0 %v15714_v31  ;;  %v15723_v29 = vld [vmem:[%s18081_s15 + $0xda8] sm:$0xff]  ;;  %v15724_v31 = vld [vmem:[%s18081_s15 + $0xda0] sm:$0xff] }
 0x8ca   : > { %12851 = vmatpush1.msra.mxu1 %v15715_v13  ;;  %14966 = vmatpush3.msra.mxu0 %v15716_v63  ;;  %v15725_v13 = vld [vmem:[%s18081_s15 + $0xd70] sm:$0xff]  ;;  %v15726_v63 = vld [vmem:[%s18081_s15 + $0xd68] sm:$0xff] }
 0x8cb   : > { %12852 = vmatprep.subr.mxu1 %v15717_v32  ;;  %14967 = vmatprep.subr.mxu0 %v15718_v11  ;;  %v15727_v32 = vld [vmem:[%s18081_s15 + $0xd38] sm:$0xff]  ;;  %v15728_v11 = vld [vmem:[%s18081_s15 + $0xd30] sm:$0xff] }
 0x8cc   : > { %12853 = vmatpush1.msra.mxu1 %v15719_v48  ;;  %14968 = vmatpush3.msra.mxu0 %v15720_v4  ;;  %v15730_v48 = vld [vmem:[%s18081_s15 + $0xcf8] sm:$0xff]  ;;  %v15731_v4 = vld [vmem:[%s18081_s15 + $0xcc8] sm:$0xff] }
 0x8cd   : > { %12854 = vmatprep.subr.mxu1 %v15721_v17  ;;  %13100 = vmatmul.mubr.f32.vlgmr.msra.gmra.mxu0 %v18468_v42  ;;  %v15729_v42 = vld [vmem:[%s18081_s15 + $0xd00] sm:$0xff] }
 0x8ce   : > { %12855 = vmatpush2.msra.mxu1 %v15722_v23  ;;  %v15732_v17 = vld [vmem:[%s18081_s15 + $0xcc0] sm:$0xff]  ;;  %v15733_v23 = vld [vmem:[%s18081_s15 + $0xc90] sm:$0xff] }
 0x8cf   : > { %12856 = vmatprep.subr.mxu1 %v15723_v29  ;;  %v15734_v29 = vld [vmem:[%s18081_s15 + $0xc88] sm:$0xff] }
 0x8d0   : > { %12857 = vmatpush2.msra.mxu1 %v15724_v31  ;;  %v15735_v31 = vld [vmem:[%s18081_s15 + $0xc58] sm:$0xff] }
 0x8d1   : > { %12858 = vmatprep.subr.mxu1 %v15725_v13  ;;  %v15736_v13 = vld [vmem:[%s18081_s15 + $0xc50] sm:$0xff] }
 0x8d2   : > { %12859 = vmatpush2.msra.mxu1 %v15726_v63  ;;  %v15737_v63 = vld [vmem:[%s18081_s15 + $0xc20] sm:$0xff] }
 0x8d3   : > { %12860 = vmatprep.subr.mxu1 %v15727_v32  ;;  %v15738_v32 = vld [vmem:[%s18081_s15 + $0xc18] sm:$0xff] }
 0x8d4   : > { %12861 = vmatpush2.msra.mxu1 %v15728_v11  ;;  %v15739_v11 = vld [vmem:[%s18081_s15 + $0xbe8] sm:$0xff] }
 0x8d5   : > { %12862 = vmatprep.subr.mxu1 %v15729_v42  ;;  %v15740_v42 = vld [vmem:[%s18081_s15 + $0xbe0] sm:$0xff] }
 0x8d6   : > { %12863 = vmatpush2.msra.mxu1 %v15730_v48  ;;  %v15741_v48 = vld [vmem:[%s18081_s15 + $0xbb0] sm:$0xff] }
 0x8d7   : > { %12864 = vmatprep.subr.mxu1 %v15731_v4  ;;  %v15742_v4 = vld [vmem:[%s18081_s15 + $0xba8] sm:$0xff] }
 0x8d8   : > { %12865 = vmatpush2.msra.mxu1 %v15732_v17  ;;  %v15743_v17 = vld [vmem:[%s18081_s15 + $0xb78] sm:$0xff] }
 0x8d9   : > { %12866 = vmatprep.subr.mxu1 %v15733_v23  ;;  %v15744_v23 = vld [vmem:[%s18081_s15 + $0xb70] sm:$0xff] }
 0x8da   : > { %12867 = vmatpush2.msra.mxu1 %v15734_v29  ;;  %v15745_v29 = vld [vmem:[%s18081_s15 + $0xb40] sm:$0xff] }
 0x8db   : > { %12868 = vmatprep.subr.mxu1 %v15735_v31  ;;  %v15746_v31 = vld [vmem:[%s18081_s15 + $0xb38] sm:$0xff] }
 0x8dc   : > { %12869 = vmatpush2.msra.mxu1 %v15736_v13  ;;  %v15747_v13 = vld [vmem:[%s18081_s15 + $0xb08] sm:$0xff] }
 0x8dd   : > { %12870 = vmatprep.subr.mxu1 %v15737_v63  ;;  %v15748_v63 = vld [vmem:[%s18081_s15 + $0xb00] sm:$0xff] }
 0x8de   : > { %12871 = vmatpush2.msra.mxu1 %v15738_v32  ;;  %v15749_v32 = vld [vmem:[%s18081_s15 + $0xad0] sm:$0xff] }
 0x8df   : > { %12872 = vmatprep.subr.mxu1 %v15739_v11  ;;  %v15750_v11 = vld [vmem:[%s18081_s15 + $0xac8] sm:$0xff] }
 0x8e0   : > { %12873 = vmatpush2.msra.mxu1 %v15740_v42  ;;  %v15751_v42 = vld [vmem:[%s18081_s15 + $0xa98] sm:$0xff] }
 0x8e1   : > { %12874 = vmatprep.subr.mxu1 %v15741_v48  ;;  %v15752_v48 = vld [vmem:[%s18081_s15 + $0xa90] sm:$0xff] }
 0x8e2   : > { %12875 = vmatpush2.msra.mxu1 %v15742_v4  ;;  %v15753_v4 = vld [vmem:[%s18081_s15 + $0xa70] sm:$0xff] }
 0x8e3   : > { %12876 = vmatprep.subr.mxu1 %v15743_v17  ;;  %v15754_v17 = vld [vmem:[%s18081_s15 + $0xa68] sm:$0xff] }
 0x8e4   : > { %12877 = vmatpush2.msra.mxu1 %v15744_v23  ;;  %v15755_v23 = vld [vmem:[%s18081_s15 + $0xa38] sm:$0xff] }
 0x8e5   : > { %12878 = vmatprep.subr.mxu1 %v15745_v29  ;;  %v15756_v29 = vld [vmem:[%s18081_s15 + $0xa30] sm:$0xff] }
 0x8e6   : > { %12879 = vmatpush2.msra.mxu1 %v15746_v31  ;;  %v15757_v31 = vld [vmem:[%s18081_s15 + $0xa00] sm:$0xff] }
 0x8e7   : > { %12880 = vmatprep.subr.mxu1 %v15747_v13  ;;  %v15758_v13 = vld [vmem:[%s18081_s15 + $0x9f8] sm:$0xff] }
 0x8e8   : > { %12881 = vmatpush2.msra.mxu1 %v15748_v63  ;;  %v15759_v63 = vld [vmem:[%s18081_s15 + $0x9c8] sm:$0xff] }
 0x8e9   : > { %12882 = vmatprep.subr.mxu1 %v15749_v32  ;;  %v15760_v32 = vld [vmem:[%s18081_s15 + $0x9c0] sm:$0xff] }
 0x8ea   : > { %12883 = vmatpush2.msra.mxu1 %v15750_v11  ;;  %v15761_v11 = vld [vmem:[%s18081_s15 + $0x990] sm:$0xff] }
 0x8eb   : > { %12884 = vmatprep.subr.mxu1 %v15751_v42  ;;  %v15762_v42 = vld [vmem:[%s18081_s15 + $0x988] sm:$0xff] }
 0x8ec   : > { %12885 = vmatpush2.msra.mxu1 %v15752_v48  ;;  %v15763_v48 = vld [vmem:[%s18081_s15 + $0x958] sm:$0xff] }
 0x8ed   : > { %12887 = vmatmul.mubr.f32.vlgmr.msra.gmra.mxu1 %v18887_v3  ;;  %12964 = vmatprep.subr.mxu1 %v15753_v4  ;;  %v15764_v4 = vld [vmem:[%s18081_s15 + $0x950] sm:$0xff] }
 0x8ee   : > { %12965 = vmatpush1.msra.mxu1 %v15754_v17  ;;  %13028 = vmatprep.mubr.f32.mxu1 %v19071_v58  ;;  %v15765_v17 = vld [vmem:[%s18081_s15 + $0x920] sm:$0xff] }
 0x8ef   : > { %12966 = vmatprep.subr.mxu1 %v15755_v23  ;;  %v15766_v23 = vld [vmem:[%s18081_s15 + $0x918] sm:$0xff] }
 0x8f0   : > { %12967 = vmatpush1.msra.mxu1 %v15756_v29  ;;  %v15767_v29 = vld [vmem:[%s18081_s15 + $0x8e8] sm:$0xff] }
 0x8f1   : > { %12968 = vmatprep.subr.mxu1 %v15757_v31  ;;  %v15768_v31 = vld [vmem:[%s18081_s15 + $0x8e0] sm:$0xff] }
 0x8f2   : > { %12969 = vmatpush1.msra.mxu1 %v15758_v13  ;;  %v15769_v13 = vld [vmem:[%s18081_s15 + $0x8b0] sm:$0xff] }
 0x8f3   : > { %12970 = vmatprep.subr.mxu1 %v15759_v63  ;;  %v15770_v63 = vld [vmem:[%s18081_s15 + $0x8a8] sm:$0xff] }
 0x8f4   : > { %12971 = vmatpush1.msra.mxu1 %v15760_v32 }
 0x8f5   : > { %12972 = vmatprep.subr.mxu1 %v15761_v11 }
 0x8f6   : > { %12973 = vmatpush1.msra.mxu1 %v15762_v42  ;;  %v15772_v42 = vld [vmem:[#allocation10 + $0x8] sm:$0xff] }
 0x8f7   : > { %12974 = vmatprep.subr.mxu1 %v15763_v48 }
 0x8f8   : > { %12975 = vmatpush1.msra.mxu1 %v15764_v4 }
 0x8f9   : > { %12976 = vmatprep.subr.mxu1 %v15765_v17  ;;  %v19606_v17 = vld [vmem:[#allocation46_spill] sm:$0xff] }
 0x8fa   : > { %12977 = vmatpush1.msra.mxu1 %v15766_v23 }
 0x8fb   : > { %12978 = vmatprep.subr.mxu1 %v15767_v29  ;;  %v19607_v29 = vld [vmem:[#allocation47_spill] sm:$0xff] }
 0x8fc   : > { %12979 = vmatpush1.msra.mxu1 %v15768_v31 }
 0x8fd   : > { %12980 = vmatprep.subr.mxu1 %v15769_v13 }
 0x8fe   : > { %12981 = vmatpush1.msra.mxu1 %v15770_v63 }
 0x8ff   : > { %12982 = vmatprep.subr.mxu1 %v18669_v33  ;;  %v19364_v33 = vpop.f32.mrf.mxu1 }
 0x900   : > { %12983 = vmatpush1.msra.mxu1 %v18673_v54 }
 0x901   : > { %12984 = vmatprep.subr.mxu1 %v18677_v19  ;;  %v19370_v54 = vpop.f32.mrf.mxu1 }
 0x902   : > { %12985 = vmatpush1.msra.mxu1 %v18682_v16 }
 0x903   : > { %12986 = vmatprep.subr.mxu1 %v18687_v62  ;;  %v19374_v19 = vpop.f32.mrf.mxu1 }
 0x904   : > { %12987 = vmatpush1.msra.mxu1 %v18692_v28  ;;  %v12323_v23 = vadd.f32 %v19374_v19, %v19606_v17 }
 0x905   : > { %12988 = vmatprep.subr.mxu1 %v18697_v39  ;;  %v19380_v16 = vpop.f32.mrf.mxu1 }
 0x906   : > { %12989 = vmatpush1.msra.mxu1 %v18702_v26  ;;  %v12325_v31 = vadd.f32 %v19380_v16, %v19607_v29  ;;  %v13179_v13 = vmul.f32 1.442695, %v12323_v23  ;;  %v19608_v16 = vld [vmem:[#allocation48_spill] sm:$0xff] }
 0x907   : > { %12990 = vmatprep.subr.mxu1 %v18707_v30 }
 0x908   : > { %12991 = vmatpush1.msra.mxu1 %v18712_v8  ;;  %v19384_v62 = vpop.f32.mrf.mxu1  ;;  %v13181_v63 = vmul.f32 1.442695, %v12325_v31 }
 0x909   : > { %12992 = vmatprep.subr.mxu1 %v18717_v46  ;;  %v19576_v46 = vld [vmem:[#allocation16_spill] sm:$0xff] }
 0x90a   : > { %12993 = vmatpush1.msra.mxu1 %v18722_v18  ;;  %v19390_v28 = vpop.f32.mrf.mxu1  ;;  %v19577_v18 = vld [vmem:[#allocation17_spill] sm:$0xff] }
 0x90b   : > { %12994 = vmatprep.subr.mxu1 %v18727_v12  ;;  %v19578_v12 = vld [vmem:[#allocation18_spill] sm:$0xff] }
 0x90c   : > { %12995 = vmatpush1.msra.mxu1 %v18732_v37  ;;  %v19579_v37 = vld [vmem:[#allocation19_spill] sm:$0xff] }
 0x90d   : > { %12996 = vmatprep.subr.mxu1 %v18737_v55  ;;  %v19580_v55 = vld [vmem:[#allocation20_spill] sm:$0xff] }
 0x90e   : > { %12997 = vmatpush2.msra.mxu1 %v18742_v6  ;;  %v19581_v6 = vld [vmem:[#allocation21_spill] sm:$0xff] }
 0x90f   : > { %12998 = vmatprep.subr.mxu1 %v18749_v9  ;;  %v19582_v9 = vld [vmem:[#allocation22_spill] sm:$0xff] }
 0x910   : > { %12999 = vmatpush2.msra.mxu1 %v18754_v60  ;;  %v19583_v60 = vld [vmem:[#allocation23_spill] sm:$0xff] }
 0x911   : > { %13000 = vmatprep.subr.mxu1 %v18759_v20  ;;  %v19584_v20 = vld [vmem:[#allocation24_spill] sm:$0xff] }
 0x912   : > { %13001 = vmatpush2.msra.mxu1 %v18764_v2  ;;  %v19585_v2 = vld [vmem:[#allocation25_spill] sm:$0xff] }
 0x913   : > { %13002 = vmatprep.subr.mxu1 %v18769_v49  ;;  %v19586_v49 = vld [vmem:[#allocation26_spill] sm:$0xff] }
 0x914   : > { %13003 = vmatpush2.msra.mxu1 %v18774_v53  ;;  %v19587_v53 = vld [vmem:[#allocation27_spill] sm:$0xff] }
 0x915   : > { %13004 = vmatprep.subr.mxu1 %v18779_v27  ;;  %v19588_v27 = vld [vmem:[#allocation28_spill] sm:$0xff] }
 0x916   : > { %13005 = vmatpush2.msra.mxu1 %v18784_v7  ;;  %v19589_v7 = vld [vmem:[#allocation29_spill] sm:$0xff] }
 0x917   : > { %13006 = vmatprep.subr.mxu1 %v18789_v36  ;;  %v19590_v36 = vld [vmem:[#allocation30_spill] sm:$0xff] }
 0x918   : > { %13007 = vmatpush2.msra.mxu1 %v18794_v22  ;;  %v19591_v22 = vld [vmem:[#allocation31_spill] sm:$0xff] }
 0x919   : > { %13008 = vmatprep.subr.mxu1 %v18799_v15  ;;  %v19592_v15 = vld [vmem:[#allocation32_spill] sm:$0xff] }
 0x91a   : > { %13009 = vmatpush2.msra.mxu1 %v18804_v38  ;;  %v19593_v38 = vld [vmem:[#allocation33_spill] sm:$0xff] }
 0x91b   : > { %13010 = vmatprep.subr.mxu1 %v18809_v0  ;;  %v19594_v0 = vld [vmem:[#allocation34_spill] sm:$0xff] }
 0x91c   : > { %13011 = vmatpush2.msra.mxu1 %v18814_v24  ;;  %v19595_v24 = vld [vmem:[#allocation35_spill] sm:$0xff] }
 0x91d   : > { %13012 = vmatprep.subr.mxu1 %v18819_v1  ;;  %v19596_v1 = vld [vmem:[#allocation36_spill] sm:$0xff] }
 0x91e   : > { %13013 = vmatpush2.msra.mxu1 %v18824_v40  ;;  %v19597_v40 = vld [vmem:[#allocation37_spill] sm:$0xff] }
 0x91f   : > { %13014 = vmatprep.subr.mxu1 %v18829_v52  ;;  %v19598_v52 = vld [vmem:[#allocation38_spill] sm:$0xff] }
 0x920   : > { %13015 = vmatpush2.msra.mxu1 %v18834_v50  ;;  %v19599_v50 = vld [vmem:[#allocation39_spill] sm:$0xff] }
 0x921   : > { %13016 = vmatprep.subr.mxu1 %v18839_v10  ;;  %v19600_v10 = vld [vmem:[#allocation40_spill] sm:$0xff] }
 0x922   : > { %13017 = vmatpush2.msra.mxu1 %v18844_v41  ;;  %v19601_v41 = vld [vmem:[#allocation41_spill] sm:$0xff] }
 0x923   : > { %13018 = vmatprep.subr.mxu1 %v18849_v45  ;;  %v19602_v45 = vld [vmem:[#allocation42_spill] sm:$0xff] }
 0x924   : > { %13019 = vmatpush2.msra.mxu1 %v18854_v44  ;;  %v19603_v44 = vld [vmem:[#allocation43_spill] sm:$0xff] }
 0x925   : > { %13020 = vmatprep.subr.mxu1 %v18859_v35  ;;  %v19604_v35 = vld [vmem:[#allocation44_spill] sm:$0xff] }
 0x926   : > { %13021 = vmatpush2.msra.mxu1 %v18864_v25  ;;  %v12181_v25 = vadd.f32 %v19364_v33, %v19604_v35 }
 0x927   : > { %13022 = vmatprep.subr.mxu1 %v18869_v47  ;;  %v19605_v47 = vld [vmem:[#allocation45_spill] sm:$0xff] }
 0x928   : > { %13023 = vmatpush2.msra.mxu1 %v18874_v56  ;;  %v12183_v56 = vadd.f32 %v19370_v54, %v19605_v47 }
 0x929   : > { %13024 = vmatprep.subr.mxu1 %v18879_v59  ;;  %v14934_v39 = vpop.f32.mrf.mxu1  ;;  %v13175_v59 = vmul.f32 1.442695, %v12181_v25 }
 0x92a   : > { %13025 = vmatpush2.msra.mxu1 %v18884_v61  ;;  %v13177_v61 = vmul.f32 1.442695, %v12183_v56 }
 0x92b   : > { %13026 = vmatprep.subr.mxu1 %v18892_v57  ;;  %v14935_v26 = vpop.f32.mrf.mxu1  ;;  %15379 = vpow2.f32 %v13175_v59 }
 0x92c   : > { %13027 = vmatpush2.msra.mxu1 %v18899_v14  ;;  %v14936_v30 = vadd.f32 %v14935_v26, %v14934_v39  ;;  %15381 = vpow2.f32 %v13177_v61  ;;  %v12675_v14 = vpop.f32.mrf.mxu0 }
 0x92d   : > { %13029 = vmatmul.mubr.f32.vlgmr.msra.gmra.mxu1 %v18887_v3  ;;  %14972 = vmatprep.subr.mxu1 %v18904_v43  ;;  %15383 = vpow2.f32 %v13179_v13 }
 0x92e   : > { %14973 = vmatpush3.msra.mxu1 %v18909_v34  ;;  %13169 = vmatprep.mubr.f32.mxu1 %v19071_v58  ;;  %v19403_v8 = vadd.f32 %v14936_v30, %v19213_v51  ;;  %v12677_v51 = vpop.f32.mrf.mxu0  ;;  %15385 = vpow2.f32 %v13181_v63 }
 0x92f   : > { %14974 = vmatprep.subr.mxu1 %v18916_v21 }
 0x930   : > { %14975 = vmatpush3.msra.mxu1 %v19576_v46  ;;  %v12817_v54 = vpop.f32.mrf.mxu0  ;;  %v15773_v46 = vld [vmem:[#allocation10 + $0x10] sm:$0xff] }
 0x931   : > { %14976 = vmatprep.subr.mxu1 %v19577_v18 }
 0x932   : > { %14977 = vmatpush3.msra.mxu1 %v19578_v12  ;;  %v12819_v12 = vpop.f32.mrf.mxu0 }
 0x933   : > { %14978 = vmatprep.subr.mxu1 %v19579_v37 }
 0x934   : > { %14979 = vmatpush3.msra.mxu1 %v19580_v55 }
 0x935   : > { %14980 = vmatprep.subr.mxu1 %v19581_v6 }
 0x936   : > { %14981 = vmatpush3.msra.mxu1 %v19582_v9  ;;  %v15774_v9 = vld [vmem:[#allocation10 + $0x18] sm:$0xff] }
 0x937   : > { %14982 = vmatprep.subr.mxu1 %v19583_v60 }
 0x938   : > { %14983 = vmatpush3.msra.mxu1 %v19584_v20  ;;  %v15380_v57 = vpop.eup %15379  ;;  %v12465_v20 = vadd.f32 %v19384_v62, %v19608_v16 }
 0x939   : > { %14984 = vmatprep.subr.mxu1 %v19585_v2  ;;  %v15382_v43 = vpop.eup %15381  ;;  %v19609_v2 = vld [vmem:[#allocation49_spill] sm:$0xff] }
 0x93a   : > { %14985 = vmatpush3.msra.mxu1 %v19586_v49  ;;  %v13190_v48 = vmul.f32 %v15772_v42, %v15382_v43  ;;  %v15384_v33 = vpop.eup %15383  ;;  %v12467_v49 = vadd.f32 %v19390_v28, %v19609_v2  ;;  %v13187_v28 = vmul.f32 1.442695, %v19403_v8 }
 0x93b   : > { %14986 = vmatprep.subr.mxu1 %v19587_v53  ;;  %v15386_v39 = vpop.eup %15385  ;;  %v13191_v18 = vmul.f32 %v15773_v46, %v15384_v33  ;;  %v13183_v53 = vmul.f32 1.442695, %v12465_v20 }
 0x93c   : > { %14987 = vmatpush3.msra.mxu1 %v19588_v27  ;;  %v13192_v19 = vmul.f32 %v15774_v9, %v15386_v39  ;;  %v13185_v27 = vmul.f32 1.442695, %v12467_v49 }
 0x93d   : > { %14988 = vmatprep.subr.mxu1 %v19589_v7  ;;  %15387 = vpow2.f32 %v13183_v53 }
 0x93e   : > { %14989 = vmatpush3.msra.mxu1 %v19590_v36  ;;  %15389 = vpow2.f32 %v13185_v27 }
 0x93f   : > { %14990 = vmatprep.subr.mxu1 %v19591_v22  ;;  %15391 = vpow2.f32 %v13187_v28 }
 0x940   : > { %14991 = vmatpush3.msra.mxu1 %v19592_v15 }
 0x941   : > { %14992 = vmatprep.subr.mxu1 %v19593_v38 }
 0x942   : > { %14993 = vmatpush3.msra.mxu1 %v19594_v0  ;;  %v15775_v0 = vld [vmem:[#allocation10 + $0x20] sm:$0xff] }
 0x943   : > { %14994 = vmatprep.subr.mxu1 %v19595_v24 }
 0x944   : > { %14995 = vmatpush3.msra.mxu1 %v19596_v1 }
 0x945   : > { %14996 = vmatprep.subr.mxu1 %v19597_v40 }
 0x946   : > { %14997 = vmatpush3.msra.mxu1 %v19598_v52 }
 0x947   : > { %14998 = vmatprep.subr.mxu1 %v19036_v5  ;;  %v15771_v5 = vld [vmem:[#allocation10] sm:$0xff] }
 0x948   : > { %14999 = vmatpush3.msra.mxu1 %v19599_v50  ;;  %v13189_v58 = vmul.f32 %v15771_v5, %v15380_v57  ;;  %v15777_v57 = vld [vmem:[#allocation10 + $0x30] sm:$0xff] }
 0x949   : > { %15000 = vmatprep.subr.mxu1 %v19600_v10  ;;  %v15776_v10 = vld [vmem:[#allocation10 + $0x28] sm:$0xff] }
 0x94a   : > { %15001 = vmatpush3.msra.mxu1 %v19601_v41  ;;  %v15388_v7 = vpop.eup %15387 }
 0x94b   : > { %15002 = vmatprep.subr.mxu1 %v19602_v45  ;;  %v15390_v22 = vpop.eup %15389  ;;  %v13193_v24 = vmul.f32 %v15775_v0, %v15388_v7 }
 0x94c   : > { %15003 = vmatpush3.msra.mxu1 %v19603_v44  ;;  %v13194_v62 = vmul.f32 %v15776_v10, %v15390_v22  ;;  %v15392_v25 = vpop.eup %15391 }
 0x94d   : > { %13170 = vmatmul.mubr.f32.vlgmr.msra.gmra.mxu1 %v18887_v3 }
 0x96b   : > { %v12746_v34 = vpop.f32.mrf.mxu1 }
 0x96c   : > { %v12747_v21 = vadd.f32 %v12746_v34, %v12675_v14  ;;  %v12959_v36 = vpop.f32.mrf.mxu0  ;;  %v13195_v14 = vmul.f32 %v15777_v57, %v15392_v25 }
 0x96d   : > { %v12748_v32 = vpop.f32.mrf.mxu1 }
 0x96e   : > { %v13196_v3 = vadd.f32 %v13189_v58, %v12747_v21  ;;  %v12749_v11 = vadd.f32 %v12748_v32, %v12677_v51  ;;  %v12961_v1 = vpop.f32.mrf.mxu0 }
 0x970   : > { %13203 = vst [vmem:[#allocation10] sm:$0xff] %v13196_v3  ;;  %v13197_v4 = vadd.f32 %v13190_v48, %v12749_v11 }
 0x972   : > { %13204 = vst [vmem:[#allocation10 + $0x8] sm:$0xff] %v13197_v4 }
 0x98d   : > { %v14969_v45 = vpop.f32.mrf.mxu0 }
 0x98f   : > { %v14970_v44 = vpop.f32.mrf.mxu0 }
 0x990   : > { %v14971_v56 = vadd.f32 %v14970_v44, %v14969_v45 }
 0x9ad   : > { %v12888_v26 = vpop.f32.mrf.mxu1 }
 0x9ae   : > { %v12889_v30 = vadd.f32 %v12888_v26, %v12817_v54 }
 0x9af   : > { %v12890_v37 = vpop.f32.mrf.mxu1 }
 0x9b0   : > { %v13198_v55 = vadd.f32 %v13191_v18, %v12889_v30  ;;  %v12891_v6 = vadd.f32 %v12890_v37, %v12819_v12 }
 0x9b2   : > { %13205 = vst [vmem:[#allocation10 + $0x10] sm:$0xff] %v13198_v55  ;;  %v13199_v60 = vadd.f32 %v13192_v19, %v12891_v6 }
 0x9b4   : > { %13206 = vst [vmem:[#allocation10 + $0x18] sm:$0xff] %v13199_v60 }
 0x9ed   : > { %v13030_v15 = vpop.f32.mrf.mxu1 }
 0x9ee   : > { %v13031_v38 = vadd.f32 %v13030_v15, %v12959_v36 }
 0x9ef   : > { %v13032_v40 = vpop.f32.mrf.mxu1 }
 0x9f0   : > { %v13200_v52 = vadd.f32 %v13193_v24, %v13031_v38  ;;  %v13033_v50 = vadd.f32 %v13032_v40, %v12961_v1 }
 0x9f2   : > { %13207 = vst [vmem:[#allocation10 + $0x20] sm:$0xff] %v13200_v52  ;;  %v13201_v41 = vadd.f32 %v13194_v62, %v13033_v50 }
 0x9f4   : > { %13208 = vst [vmem:[#allocation10 + $0x28] sm:$0xff] %v13201_v41 }
 0xa0d   : > { %v15004_v35 = vpop.f32.mrf.mxu1 }
 0xa0f   : > { %v15005_v47 = vpop.f32.mrf.mxu1 }
 0xa10   : > { %v15006_v59 = vadd.f32 %v15005_v47, %v15004_v35 }
 0xa12   : > { %v13172_v61 = vadd.f32 %v15006_v59, %v14971_v56 }
 0xa14   : > { %v13202_v43 = vadd.f32 %v13195_v14, %v13172_v61 }
 0xa16   : > { %13209 = vst.msk [vmem:[#allocation10 + $0x30] sm:$0xff] %vm1675_vm2, %v13202_v43 }
 0xa17   : > { %15901 = shalt.err (!%p15898_p0)
}
 0xa18   : > { %15018 = dma.vmem_to_hbm [thread:$0]  (%p15038_p10), %s13227_s23, 896, %s19483_s8, [#allocation4]  }
 0xa19   : > { %15941 = dma.done.wait (%p15038_p10), [#allocation4], 896  }
 0xa1a   : > { %15943 = vsyncadd (%p15038_p10), [#allocation4], 4294966400 }
 0xa1b PF: > { %s19610_s26 = sld [smem:[#allocation15_spill]]  ;;  %p25_p4 = scmp.ge.s32.totalorder %s16039_s13, 10  }
 0xa1c   : > { %s19611_s30 = smov %s15950_s10  ;;  %s19612_s10 = smov %s15954_s11 }
 0xa1d   : > { %s19614_s12 = smov %s16039_s13  ;;  %27 = sbr.rel (!%p25_p4) target bundleno = 11 (0xb), region = 135 }
 0xa21   : > { %s19613_s11 = smov %s19610_s26 }
 0xa22   :  { %13245 = vsyncpa [#allocation3], 1 }
 0xa23   :  { %13247 = vsyncpa [#allocation3 + $0x1], 1 }
 0xa24   :  { %13248 = vsyncpa [#allocation6], 1 }
 0xa25   :  { %13250 = vsyncpa [#allocation6 + $0x1], 1 }
 0xa26   :  { %13251 = vsyncpa [#allocation9], 1 }
 0xa27   :  { %13253 = vsyncpa [#allocation9 + $0x1], 1 }
 0xa28   :  { %13254 = vsyncpa [#allocation4], 1 }
 0xa29   :  { %13256 = vsyncpa [#allocation4 + $0x1], 1 }

</bundles_post_ra>
